<compile_context>
chip_gen: v7x
topology: tpu7x:2x2x1
jax: 0.10.0
libtpu: 0.0.40
codegen_flags: <defaults>
</compile_context>

<pallas_src>
import numpy as np
import jax
import jax.numpy as jnp
from jax.experimental import pallas as pl
from jax.experimental.pallas import tpu as pltpu

BN_EPS = 1e-5
PATCH_SIZE = 4
PATCH_SIZE2 = 2
VMEM_LIMIT = 32 * 1024 * 1024   # far above what these tiles need; safe on v5e/v6e/v7x


# ---------------------------- stage kernel ----------------------------

def _make_stage_kernel(depth, H, W, use_roll):
    HW = H * W
    offs = [dy * W + dx for dy in (-1, 0, 1) for dx in (-1, 0, 1)]

    def kernel(p_ref, win_ref, bin_ref, op_ref, s2_ref, b2_ref, *rest):
        out_ref, outn_ref = rest[-2], rest[-1]

        # Input projection (patch-embed / patch-merge); BN scale is folded into
        # the weight columns, so only a bias add remains.
        x = jnp.dot(p_ref[0], win_ref[...],
                    preferred_element_type=jnp.float32) + bin_ref[...]

        # Hoist the tap operators (masks or tiny shift matrices) once per stage.
        ops = [op_ref[t] for t in range(9)]

        for bi in range(depth):
            wt_ref, b1_ref, w2_ref = rest[3 * bi], rest[3 * bi + 1], rest[3 * bi + 2]
            xb = x.astype(jnp.bfloat16)
            # Centre tap also carries the untouched-channel path x[:,Cp:]@W1[Cp:].
            acc = jnp.dot(xb, wt_ref[4], preferred_element_type=jnp.float32)
            for t in range(9):
                if t == 4:
                    continue
                if use_roll:
                    shift = (-offs[t]) % HW
                    tap = pltpu.roll(x, shift=shift, axis=0) * ops[t]
                else:
                    # shift+zero-pad folded into a tiny 0/1 matrix (MXU matmul)
                    tap = jnp.dot(ops[t], x, preferred_element_type=jnp.float32)
                acc = acc + jnp.dot(tap.astype(jnp.bfloat16), wt_ref[t],
                                    preferred_element_type=jnp.float32)
            h = jnp.maximum(acc + b1_ref[...], 0.0)
            x = x + jnp.dot(h.astype(jnp.bfloat16), w2_ref[...],
                            preferred_element_type=jnp.float32)

        out_ref[0] = x.astype(jnp.bfloat16)                 # carry to next stage
        outn_ref[0] = x * s2_ref[...] + b2_ref[...]          # fused out_indices BN

    return kernel


def _run_stage(p, w_in, b_in, tap_op, use_roll, s2, b2, blocks, H, W):
    N, HW, Kin = p.shape
    C = w_in.shape[1]
    Ch = blocks[0]['b1'].shape[1]
    depth = len(blocks)
    kernel = _make_stage_kernel(depth, H, W, use_roll)

    act = lambda n: (n, 0, 0)
    c2 = lambda n: (0, 0)
    c3 = lambda n: (0, 0, 0)

    in_specs = [
        pl.BlockSpec((1, HW, Kin), act),                       # per-image activation slab
        pl.BlockSpec((Kin, C), c2),                            # folded embed/merge weight
        pl.BlockSpec((1, C), c2),                              # its BN bias
        pl.BlockSpec(tuple(tap_op.shape), c3),                 # tap masks / shift matrices
        pl.BlockSpec((1, C), c2),                              # stage out-norm scale
        pl.BlockSpec((1, C), c2),                              # stage out-norm bias
    ]
    args = [p, w_in, b_in, tap_op, s2, b2]
    for blk in blocks:
        in_specs += [pl.BlockSpec((9, C, Ch), c3),             # fused per-tap W1 (BN folded)
                     pl.BlockSpec((1, Ch), c2),                # BN bias
                     pl.BlockSpec((Ch, C), c2)]                # W2
        args += [blk['wt'], blk['b1'], blk['w2']]

    out, outn = pl.pallas_call(
        kernel,
        out_shape=(jax.ShapeDtypeStruct((N, HW, C), jnp.bfloat16),
                   jax.ShapeDtypeStruct((N, HW, C), jnp.float32)),
        grid=(N,),
        in_specs=in_specs,
        out_specs=(pl.BlockSpec((1, HW, C), act),
                   pl.BlockSpec((1, HW, C), act)),
        compiler_params=pltpu.CompilerParams(
            dimension_semantics=("parallel",),
            vmem_limit_bytes=VMEM_LIMIT),
    )(*args)
    return out, outn


def _conv3x3_taps(H, W):
    # Per-tap operator for the in-kernel 3x3 partial conv.
    #  - sublane-aligned HW: (9, HW, 1) 0/1 validity masks, used with pltpu.roll
    #  - tiny / unaligned HW: (9, HW, HW) 0/1 shift-and-mask matrices (MXU path)
    HW = H * W
    hh, ww = np.meshgrid(np.arange(H), np.arange(W), indexing="ij")
    hh, ww = hh.reshape(-1), ww.reshape(-1)
    use_roll = (HW % 8 == 0)
    op = np.zeros((9, HW, 1) if use_roll else (9, HW, HW), np.float32)
    t = 0
    for dy in (-1, 0, 1):
        for dx in (-1, 0, 1):
            valid = (hh + dy >= 0) & (hh + dy < H) & (ww + dx >= 0) & (ww + dx < W)
            if use_roll:
                op[t, :, 0] = valid
            else:
                src = (hh + dy) * W + (ww + dx)
                rows = np.nonzero(valid)[0]
                op[t, rows, src[rows]] = 1.0
            t += 1
    return jnp.asarray(op), use_roll


# ---------------------------- parameter init ----------------------------

def _fold_bn(key, c):
    k1, k2, k3, k4 = jax.random.split(key, 4)
    gamma = 1.0 + 0.1 * jax.random.normal(k1, (c,), jnp.float32)
    beta = 0.1 * jax.random.normal(k2, (c,), jnp.float32)
    mean = 0.1 * jax.random.normal(k3, (c,), jnp.float32)
    var = 0.5 + jnp.abs(jax.random.normal(k4, (c,), jnp.float32))
    scale = gamma / jnp.sqrt(var + BN_EPS)
    bias = beta - mean * scale
    return scale, bias


def _conv_w(key, fan_in, fan_out):
    # (kh*kw*cin, cout), rows flattened in (kh, kw, cin) order.
    return (jax.random.normal(key, (fan_in, fan_out), jnp.float32)
            / jnp.sqrt(jnp.float32(fan_in)))


def init_fasternet(key, in_chans=3, embed_dim=16, depths=(1, 2, 2, 1),
                   mlp_ratio=2.0, n_div=4,
                   patch_size=PATCH_SIZE, patch_size2=PATCH_SIZE2):
    keys = iter(jax.random.split(key, 4 * sum(depths) + 4 * len(depths) + 8))

    stage_in, stages, out_norms = [], [], []

    # PatchEmbedding: conv k4/s4 (no bias) + BN -> scale folded into weight columns.
    w = _conv_w(next(keys), patch_size * patch_size * in_chans, embed_dim)
    s, b = _fold_bn(next(keys), embed_dim)
    stage_in.append({'w': (w * s[None, :]).astype(jnp.bfloat16),
                     'b': b.reshape(1, embed_dim)})

    for i_stage, depth in enumerate(depths):
        dim = int(embed_dim * 2 ** i_stage)
        cp = dim // n_div
        ch = int(dim * mlp_ratio)
        blocks = []
        for _ in range(depth):
            wp = _conv_w(next(keys), 9 * cp, cp)     # 3x3 partial conv, (dy,dx,cin) rows
            w1 = _conv_w(next(keys), dim, ch)        # MLP 1x1 conv #1
            s1, b1 = _fold_bn(next(keys), ch)        # BN after it
            w2 = _conv_w(next(keys), ch, dim)        # MLP 1x1 conv #2
            # Fuse wp @ W1[:Cp] per tap; untouched channels ride on the centre tap.
            w1c = w1[:cp]
            wt = jnp.zeros((9, dim, ch), jnp.float32)
            for t in range(9):
                wt = wt.at[t, :cp, :].set(wp[t * cp:(t + 1) * cp] @ w1c)
            wt = wt.at[4, cp:, :].set(w1[cp:])
            wt = wt * s1[None, None, :]              # fold BN scale (f32, pre-cast)
            blocks.append({'wt': wt.astype(jnp.bfloat16),
                           'b1': b1.reshape(1, ch),
                           'w2': w2.astype(jnp.bfloat16)})
        stages.append(blocks)

        s2, b2 = _fold_bn(next(keys), dim)           # out_indices norm for this stage
        out_norms.append({'s': s2.reshape(1, dim), 'b': b2.reshape(1, dim)})

        if i_stage < len(depths) - 1:
            # PatchMerging: conv k2/s2 (no bias) + BN -> scale folded.
            wm = _conv_w(next(keys), patch_size2 * patch_size2 * dim, 2 * dim)
            sm, bm = _fold_bn(next(keys), 2 * dim)
            stage_in.append({'w': (wm * sm[None, :]).astype(jnp.bfloat16),
                             'b': bm.reshape(1, 2 * dim)})

    return {'stage_in': stage_in, 'stages': stages, 'out_norms': out_norms}


# ---------------------------- forward pass ----------------------------

def _space_to_depth(x, pz):
    # Exact non-overlapping conv (kernel == stride): (N,H,W,C) -> (N, Ho*Wo, pz*pz*C)
    N, H, W, C = x.shape
    Ho, Wo = H // pz, W // pz
    x = x.reshape(N, Ho, pz, Wo, pz, C).transpose(0, 1, 3, 2, 4, 5)
    return x.reshape(N, Ho * Wo, pz * pz * C), Ho, Wo


@jax.jit
def fasternet_forward(x_nchw, params):
    # NCHW -> NHWC; activations cross HBM in bf16 (kernels compute in f32).
    x = jnp.transpose(x_nchw, (0, 2, 3, 1)).astype(jnp.bfloat16)
    N = x.shape[0]
    # TODO(synk): the between-stage space-to-depth (and the final NCHW transposes)
    # stay as host-side XLA reshapes; a halo/strided out BlockSpec could absorb them.
    p, H, W = _space_to_depth(x, PATCH_SIZE)

    outs = []
    n_stages = len(params['stages'])
    for i in range(n_stages):
        tap_op, use_roll = _conv3x3_taps(H, W)
        carry, outn = _run_stage(p,
                                 params['stage_in'][i]['w'],
                                 params['stage_in'][i]['b'],
                                 tap_op, use_roll,
                                 params['out_norms'][i]['s'],
                                 params['out_norms'][i]['b'],
                                 params['stages'][i], H, W)
        C = carry.shape[-1]
        outs.append(jnp.transpose(outn.reshape(N, H, W, C), (0, 3, 1, 2)))
        if i < n_stages - 1:
            p, H, W = _space_to_depth(carry.reshape(N, H, W, C), PATCH_SIZE2)
    return outs


if __name__ == "__main__":
    key = jax.random.PRNGKey(0)
    kp, kx = jax.random.split(key)
    params = init_fasternet(kp, in_chans=3, embed_dim=16, depths=(1, 2, 2, 1),
                            mlp_ratio=2.0, n_div=4)
    x = jax.random.normal(kx, (2, 3, 64, 64), jnp.float32)  # NCHW like PyTorch
    outs = fasternet_forward(x, params)
    outs = jax.block_until_ready(outs)
    expected = [(2, 16, 16, 16), (2, 32, 8, 8), (2, 64, 4, 4), (2, 128, 2, 2)]
    assert [tuple(o.shape) for o in outs] == expected, [o.shape for o in outs]
    assert all(bool(jnp.all(jnp.isfinite(o))) for o in outs)
    print("KERNEL_OK")
</pallas_src>

<mosaic_0001>
module attributes {stable_mosaic.version = 11 : i64} {
  func.func @kernel(%arg0: i32, %arg1: memref<1x256x48xbf16, #tpu.memory_space<vmem>>, %arg2: memref<48x16xbf16, #tpu.memory_space<vmem>>, %arg3: memref<1x16xf32, #tpu.memory_space<vmem>>, %arg4: memref<9x256x1xf32, #tpu.memory_space<vmem>>, %arg5: memref<1x16xf32, #tpu.memory_space<vmem>>, %arg6: memref<1x16xf32, #tpu.memory_space<vmem>>, %arg7: memref<9x16x32xbf16, #tpu.memory_space<vmem>>, %arg8: memref<1x32xf32, #tpu.memory_space<vmem>>, %arg9: memref<32x16xbf16, #tpu.memory_space<vmem>>, %arg10: memref<1x256x16xbf16, #tpu.memory_space<vmem>>, %arg11: memref<1x256x16xf32, #tpu.memory_space<vmem>>) attributes {dimension_semantics = [#tpu.dimension_semantics<parallel>], iteration_bounds = array<i64: 2>, scalar_prefetch = 0 : i64, scratch_operands = 0 : i64, tpu.core_type = #tpu.core_type<tc>, window_params = [{transform_indices = @transform_0, window_bounds = array<i64: 1, 256, 48>}, {pipeline_mode = #tpu.pipeline_mode<synchronous>, transform_indices = @transform_1, window_bounds = array<i64: 48, 16>}, {pipeline_mode = #tpu.pipeline_mode<synchronous>, transform_indices = @transform_2, window_bounds = array<i64: 1, 16>}, {pipeline_mode = #tpu.pipeline_mode<synchronous>, transform_indices = @transform_3, window_bounds = array<i64: 9, 256, 1>}, {pipeline_mode = #tpu.pipeline_mode<synchronous>, transform_indices = @transform_4, window_bounds = array<i64: 1, 16>}, {pipeline_mode = #tpu.pipeline_mode<synchronous>, transform_indices = @transform_5, window_bounds = array<i64: 1, 16>}, {pipeline_mode = #tpu.pipeline_mode<synchronous>, transform_indices = @transform_6, window_bounds = array<i64: 9, 16, 32>}, {pipeline_mode = #tpu.pipeline_mode<synchronous>, transform_indices = @transform_7, window_bounds = array<i64: 1, 32>}, {pipeline_mode = #tpu.pipeline_mode<synchronous>, transform_indices = @transform_8, window_bounds = array<i64: 32, 16>}, {transform_indices = @transform_9, window_bounds = array<i64: 1, 256, 16>}, {transform_indices = @transform_10, window_bounds = array<i64: 1, 256, 16>}]} {
    %c0 = arith.constant 0 : index
    %c0_0 = arith.constant 0 : index
    %c0_1 = arith.constant 0 : index
    %0 = vector.load %arg1[%c0, %c0_0, %c0_1] : memref<1x256x48xbf16, #tpu.memory_space<vmem>>, vector<1x256x48xbf16>
    %1 = vector.shape_cast %0 : vector<1x256x48xbf16> to vector<256x48xbf16>
    %c0_2 = arith.constant 0 : index
    %c0_3 = arith.constant 0 : index
    %2 = vector.load %arg2[%c0_2, %c0_3] : memref<48x16xbf16, #tpu.memory_space<vmem>>, vector<48x16xbf16>
    %cst = arith.constant dense<0.000000e+00> : vector<256x16xf32>
    %3 = tpu.matmul %1, %2, %cst {dimension_numbers = #tpu.dot_dimension_numbers<[1], [0], [0], [1], [0, 0, 1, 1], [], []>} : vector<256x48xbf16>, vector<48x16xbf16>, vector<256x16xf32> -> vector<256x16xf32>
    %c0_4 = arith.constant 0 : index
    %c0_5 = arith.constant 0 : index
    %4 = vector.load %arg3[%c0_4, %c0_5] : memref<1x16xf32, #tpu.memory_space<vmem>>, vector<1x16xf32>
    %5 = vector.broadcast %4 : vector<1x16xf32> to vector<256x16xf32>
    %6 = arith.addf %3, %5 : vector<256x16xf32>
    %c0_6 = arith.constant 0 : index
    %c0_7 = arith.constant 0 : index
    %c0_8 = arith.constant 0 : index
    %7 = vector.load %arg4[%c0_6, %c0_7, %c0_8] : memref<9x256x1xf32, #tpu.memory_space<vmem>>, vector<1x256x1xf32>
    %8 = vector.shape_cast %7 : vector<1x256x1xf32> to vector<256x1xf32>
    %c1 = arith.constant 1 : index
    %c0_9 = arith.constant 0 : index
    %c0_10 = arith.constant 0 : index
    %9 = vector.load %arg4[%c1, %c0_9, %c0_10] : memref<9x256x1xf32, #tpu.memory_space<vmem>>, vector<1x256x1xf32>
    %10 = vector.shape_cast %9 : vector<1x256x1xf32> to vector<256x1xf32>
    %c2 = arith.constant 2 : index
    %c0_11 = arith.constant 0 : index
    %c0_12 = arith.constant 0 : index
    %11 = vector.load %arg4[%c2, %c0_11, %c0_12] : memref<9x256x1xf32, #tpu.memory_space<vmem>>, vector<1x256x1xf32>
    %12 = vector.shape_cast %11 : vector<1x256x1xf32> to vector<256x1xf32>
    %c3 = arith.constant 3 : index
    %c0_13 = arith.constant 0 : index
    %c0_14 = arith.constant 0 : index
    %13 = vector.load %arg4[%c3, %c0_13, %c0_14] : memref<9x256x1xf32, #tpu.memory_space<vmem>>, vector<1x256x1xf32>
    %14 = vector.shape_cast %13 : vector<1x256x1xf32> to vector<256x1xf32>
    %c5 = arith.constant 5 : index
    %c0_15 = arith.constant 0 : index
    %c0_16 = arith.constant 0 : index
    %15 = vector.load %arg4[%c5, %c0_15, %c0_16] : memref<9x256x1xf32, #tpu.memory_space<vmem>>, vector<1x256x1xf32>
    %16 = vector.shape_cast %15 : vector<1x256x1xf32> to vector<256x1xf32>
    %c6 = arith.constant 6 : index
    %c0_17 = arith.constant 0 : index
    %c0_18 = arith.constant 0 : index
    %17 = vector.load %arg4[%c6, %c0_17, %c0_18] : memref<9x256x1xf32, #tpu.memory_space<vmem>>, vector<1x256x1xf32>
    %18 = vector.shape_cast %17 : vector<1x256x1xf32> to vector<256x1xf32>
    %c7 = arith.constant 7 : index
    %c0_19 = arith.constant 0 : index
    %c0_20 = arith.constant 0 : index
    %19 = vector.load %arg4[%c7, %c0_19, %c0_20] : memref<9x256x1xf32, #tpu.memory_space<vmem>>, vector<1x256x1xf32>
    %20 = vector.shape_cast %19 : vector<1x256x1xf32> to vector<256x1xf32>
    %c8 = arith.constant 8 : index
    %c0_21 = arith.constant 0 : index
    %c0_22 = arith.constant 0 : index
    %21 = vector.load %arg4[%c8, %c0_21, %c0_22] : memref<9x256x1xf32, #tpu.memory_space<vmem>>, vector<1x256x1xf32>
    %22 = vector.shape_cast %21 : vector<1x256x1xf32> to vector<256x1xf32>
    %23 = arith.truncf %6 : vector<256x16xf32> to vector<256x16xbf16>
    %c4 = arith.constant 4 : index
    %c0_23 = arith.constant 0 : index
    %c0_24 = arith.constant 0 : index
    %24 = vector.load %arg7[%c4, %c0_23, %c0_24] : memref<9x16x32xbf16, #tpu.memory_space<vmem>>, vector<1x16x32xbf16>
    %25 = vector.shape_cast %24 : vector<1x16x32xbf16> to vector<16x32xbf16>
    %cst_25 = arith.constant dense<0.000000e+00> : vector<256x32xf32>
    %26 = tpu.matmul %23, %25, %cst_25 {dimension_numbers = #tpu.dot_dimension_numbers<[1], [0], [0], [1], [0, 0, 1, 1], [], []>} : vector<256x16xbf16>, vector<16x32xbf16>, vector<256x32xf32> -> vector<256x32xf32>
    %c17_i32 = arith.constant 17 : i32
    %27 = tpu.dynamic_rotate %6 by %c17_i32 dim 0 : vector<256x16xf32>, i32 -> vector<256x16xf32>
    %28 = vector.broadcast %8 : vector<256x1xf32> to vector<256x16xf32>
    %29 = arith.mulf %27, %28 : vector<256x16xf32>
    %30 = arith.truncf %29 : vector<256x16xf32> to vector<256x16xbf16>
    %c0_26 = arith.constant 0 : index
    %c0_27 = arith.constant 0 : index
    %c0_28 = arith.constant 0 : index
    %31 = vector.load %arg7[%c0_26, %c0_27, %c0_28] : memref<9x16x32xbf16, #tpu.memory_space<vmem>>, vector<1x16x32xbf16>
    %32 = vector.shape_cast %31 : vector<1x16x32xbf16> to vector<16x32xbf16>
    %cst_29 = arith.constant dense<0.000000e+00> : vector<256x32xf32>
    %33 = tpu.matmul %30, %32, %cst_29 {dimension_numbers = #tpu.dot_dimension_numbers<[1], [0], [0], [1], [0, 0, 1, 1], [], []>} : vector<256x16xbf16>, vector<16x32xbf16>, vector<256x32xf32> -> vector<256x32xf32>
    %34 = arith.addf %26, %33 : vector<256x32xf32>
    %c16_i32 = arith.constant 16 : i32
    %35 = tpu.dynamic_rotate %6 by %c16_i32 dim 0 : vector<256x16xf32>, i32 -> vector<256x16xf32>
    %36 = vector.broadcast %10 : vector<256x1xf32> to vector<256x16xf32>
    %37 = arith.mulf %35, %36 : vector<256x16xf32>
    %38 = arith.truncf %37 : vector<256x16xf32> to vector<256x16xbf16>
    %c1_30 = arith.constant 1 : index
    %c0_31 = arith.constant 0 : index
    %c0_32 = arith.constant 0 : index
    %39 = vector.load %arg7[%c1_30, %c0_31, %c0_32] : memref<9x16x32xbf16, #tpu.memory_space<vmem>>, vector<1x16x32xbf16>
    %40 = vector.shape_cast %39 : vector<1x16x32xbf16> to vector<16x32xbf16>
    %cst_33 = arith.constant dense<0.000000e+00> : vector<256x32xf32>
    %41 = tpu.matmul %38, %40, %cst_33 {dimension_numbers = #tpu.dot_dimension_numbers<[1], [0], [0], [1], [0, 0, 1, 1], [], []>} : vector<256x16xbf16>, vector<16x32xbf16>, vector<256x32xf32> -> vector<256x32xf32>
    %42 = arith.addf %34, %41 : vector<256x32xf32>
    %c15_i32 = arith.constant 15 : i32
    %43 = tpu.dynamic_rotate %6 by %c15_i32 dim 0 : vector<256x16xf32>, i32 -> vector<256x16xf32>
    %44 = vector.broadcast %12 : vector<256x1xf32> to vector<256x16xf32>
    %45 = arith.mulf %43, %44 : vector<256x16xf32>
    %46 = arith.truncf %45 : vector<256x16xf32> to vector<256x16xbf16>
    %c2_34 = arith.constant 2 : index
    %c0_35 = arith.constant 0 : index
    %c0_36 = arith.constant 0 : index
    %47 = vector.load %arg7[%c2_34, %c0_35, %c0_36] : memref<9x16x32xbf16, #tpu.memory_space<vmem>>, vector<1x16x32xbf16>
    %48 = vector.shape_cast %47 : vector<1x16x32xbf16> to vector<16x32xbf16>
    %cst_37 = arith.constant dense<0.000000e+00> : vector<256x32xf32>
    %49 = tpu.matmul %46, %48, %cst_37 {dimension_numbers = #tpu.dot_dimension_numbers<[1], [0], [0], [1], [0, 0, 1, 1], [], []>} : vector<256x16xbf16>, vector<16x32xbf16>, vector<256x32xf32> -> vector<256x32xf32>
    %50 = arith.addf %42, %49 : vector<256x32xf32>
    %c1_i32 = arith.constant 1 : i32
    %51 = tpu.dynamic_rotate %6 by %c1_i32 dim 0 : vector<256x16xf32>, i32 -> vector<256x16xf32>
    %52 = vector.broadcast %14 : vector<256x1xf32> to vector<256x16xf32>
    %53 = arith.mulf %51, %52 : vector<256x16xf32>
    %54 = arith.truncf %53 : vector<256x16xf32> to vector<256x16xbf16>
    %c3_38 = arith.constant 3 : index
    %c0_39 = arith.constant 0 : index
    %c0_40 = arith.constant 0 : index
    %55 = vector.load %arg7[%c3_38, %c0_39, %c0_40] : memref<9x16x32xbf16, #tpu.memory_space<vmem>>, vector<1x16x32xbf16>
    %56 = vector.shape_cast %55 : vector<1x16x32xbf16> to vector<16x32xbf16>
    %cst_41 = arith.constant dense<0.000000e+00> : vector<256x32xf32>
    %57 = tpu.matmul %54, %56, %cst_41 {dimension_numbers = #tpu.dot_dimension_numbers<[1], [0], [0], [1], [0, 0, 1, 1], [], []>} : vector<256x16xbf16>, vector<16x32xbf16>, vector<256x32xf32> -> vector<256x32xf32>
    %58 = arith.addf %50, %57 : vector<256x32xf32>
    %c255_i32 = arith.constant 255 : i32
    %59 = tpu.dynamic_rotate %6 by %c255_i32 dim 0 : vector<256x16xf32>, i32 -> vector<256x16xf32>
    %60 = vector.broadcast %16 : vector<256x1xf32> to vector<256x16xf32>
    %61 = arith.mulf %59, %60 : vector<256x16xf32>
    %62 = arith.truncf %61 : vector<256x16xf32> to vector<256x16xbf16>
    %c5_42 = arith.constant 5 : index
    %c0_43 = arith.constant 0 : index
    %c0_44 = arith.constant 0 : index
    %63 = vector.load %arg7[%c5_42, %c0_43, %c0_44] : memref<9x16x32xbf16, #tpu.memory_space<vmem>>, vector<1x16x32xbf16>
    %64 = vector.shape_cast %63 : vector<1x16x32xbf16> to vector<16x32xbf16>
    %cst_45 = arith.constant dense<0.000000e+00> : vector<256x32xf32>
    %65 = tpu.matmul %62, %64, %cst_45 {dimension_numbers = #tpu.dot_dimension_numbers<[1], [0], [0], [1], [0, 0, 1, 1], [], []>} : vector<256x16xbf16>, vector<16x32xbf16>, vector<256x32xf32> -> vector<256x32xf32>
    %66 = arith.addf %58, %65 : vector<256x32xf32>
    %c241_i32 = arith.constant 241 : i32
    %67 = tpu.dynamic_rotate %6 by %c241_i32 dim 0 : vector<256x16xf32>, i32 -> vector<256x16xf32>
    %68 = vector.broadcast %18 : vector<256x1xf32> to vector<256x16xf32>
    %69 = arith.mulf %67, %68 : vector<256x16xf32>
    %70 = arith.truncf %69 : vector<256x16xf32> to vector<256x16xbf16>
    %c6_46 = arith.constant 6 : index
    %c0_47 = arith.constant 0 : index
    %c0_48 = arith.constant 0 : index
    %71 = vector.load %arg7[%c6_46, %c0_47, %c0_48] : memref<9x16x32xbf16, #tpu.memory_space<vmem>>, vector<1x16x32xbf16>
    %72 = vector.shape_cast %71 : vector<1x16x32xbf16> to vector<16x32xbf16>
    %cst_49 = arith.constant dense<0.000000e+00> : vector<256x32xf32>
    %73 = tpu.matmul %70, %72, %cst_49 {dimension_numbers = #tpu.dot_dimension_numbers<[1], [0], [0], [1], [0, 0, 1, 1], [], []>} : vector<256x16xbf16>, vector<16x32xbf16>, vector<256x32xf32> -> vector<256x32xf32>
    %74 = arith.addf %66, %73 : vector<256x32xf32>
    %c240_i32 = arith.constant 240 : i32
    %75 = tpu.dynamic_rotate %6 by %c240_i32 dim 0 : vector<256x16xf32>, i32 -> vector<256x16xf32>
    %76 = vector.broadcast %20 : vector<256x1xf32> to vector<256x16xf32>
    %77 = arith.mulf %75, %76 : vector<256x16xf32>
    %78 = arith.truncf %77 : vector<256x16xf32> to vector<256x16xbf16>
    %c7_50 = arith.constant 7 : index
    %c0_51 = arith.constant 0 : index
    %c0_52 = arith.constant 0 : index
    %79 = vector.load %arg7[%c7_50, %c0_51, %c0_52] : memref<9x16x32xbf16, #tpu.memory_space<vmem>>, vector<1x16x32xbf16>
    %80 = vector.shape_cast %79 : vector<1x16x32xbf16> to vector<16x32xbf16>
    %cst_53 = arith.constant dense<0.000000e+00> : vector<256x32xf32>
    %81 = tpu.matmul %78, %80, %cst_53 {dimension_numbers = #tpu.dot_dimension_numbers<[1], [0], [0], [1], [0, 0, 1, 1], [], []>} : vector<256x16xbf16>, vector<16x32xbf16>, vector<256x32xf32> -> vector<256x32xf32>
    %82 = arith.addf %74, %81 : vector<256x32xf32>
    %c239_i32 = arith.constant 239 : i32
    %83 = tpu.dynamic_rotate %6 by %c239_i32 dim 0 : vector<256x16xf32>, i32 -> vector<256x16xf32>
    %84 = vector.broadcast %22 : vector<256x1xf32> to vector<256x16xf32>
    %85 = arith.mulf %83, %84 : vector<256x16xf32>
    %86 = arith.truncf %85 : vector<256x16xf32> to vector<256x16xbf16>
    %c8_54 = arith.constant 8 : index
    %c0_55 = arith.constant 0 : index
    %c0_56 = arith.constant 0 : index
    %87 = vector.load %arg7[%c8_54, %c0_55, %c0_56] : memref<9x16x32xbf16, #tpu.memory_space<vmem>>, vector<1x16x32xbf16>
    %88 = vector.shape_cast %87 : vector<1x16x32xbf16> to vector<16x32xbf16>
    %cst_57 = arith.constant dense<0.000000e+00> : vector<256x32xf32>
    %89 = tpu.matmul %86, %88, %cst_57 {dimension_numbers = #tpu.dot_dimension_numbers<[1], [0], [0], [1], [0, 0, 1, 1], [], []>} : vector<256x16xbf16>, vector<16x32xbf16>, vector<256x32xf32> -> vector<256x32xf32>
    %90 = arith.addf %82, %89 : vector<256x32xf32>
    %c0_58 = arith.constant 0 : index
    %c0_59 = arith.constant 0 : index
    %91 = vector.load %arg8[%c0_58, %c0_59] : memref<1x32xf32, #tpu.memory_space<vmem>>, vector<1x32xf32>
    %92 = vector.broadcast %91 : vector<1x32xf32> to vector<256x32xf32>
    %93 = arith.addf %90, %92 : vector<256x32xf32>
    %cst_60 = arith.constant 0.000000e+00 : f32
    %94 = vector.broadcast %cst_60 : f32 to vector<256x32xf32>
    %95 = arith.maximumf %93, %94 : vector<256x32xf32>
    %96 = arith.truncf %95 : vector<256x32xf32> to vector<256x32xbf16>
    %c0_61 = arith.constant 0 : index
    %c0_62 = arith.constant 0 : index
    %97 = vector.load %arg9[%c0_61, %c0_62] : memref<32x16xbf16, #tpu.memory_space<vmem>>, vector<32x16xbf16>
    %cst_63 = arith.constant dense<0.000000e+00> : vector<256x16xf32>
    %98 = tpu.matmul %96, %97, %cst_63 {dimension_numbers = #tpu.dot_dimension_numbers<[1], [0], [0], [1], [0, 0, 1, 1], [], []>} : vector<256x32xbf16>, vector<32x16xbf16>, vector<256x16xf32> -> vector<256x16xf32>
    %99 = arith.addf %6, %98 : vector<256x16xf32>
    %100 = arith.truncf %99 : vector<256x16xf32> to vector<256x16xbf16>
    %c0_64 = arith.constant 0 : index
    %c0_65 = arith.constant 0 : index
    %c0_66 = arith.constant 0 : index
    %101 = vector.load %arg10[%c0_64, %c0_65, %c0_66] : memref<1x256x16xbf16, #tpu.memory_space<vmem>>, vector<1x256x16xbf16>
    %102 = vector.shape_cast %101 : vector<1x256x16xbf16> to vector<256x16xbf16>
    %103 = vector.shape_cast %100 : vector<256x16xbf16> to vector<1x256x16xbf16>
    tpu.vector_store %arg10[%c0_64, %c0_65, %c0_66], %103 {strides = array<i32>} : memref<1x256x16xbf16, #tpu.memory_space<vmem>>, vector<1x256x16xbf16>,
    %c0_67 = arith.constant 0 : index
    %c0_68 = arith.constant 0 : index
    %104 = vector.load %arg5[%c0_67, %c0_68] : memref<1x16xf32, #tpu.memory_space<vmem>>, vector<1x16xf32>
    %105 = vector.broadcast %104 : vector<1x16xf32> to vector<256x16xf32>
    %106 = arith.mulf %99, %105 : vector<256x16xf32>
    %c0_69 = arith.constant 0 : index
    %c0_70 = arith.constant 0 : index
    %107 = vector.load %arg6[%c0_69, %c0_70] : memref<1x16xf32, #tpu.memory_space<vmem>>, vector<1x16xf32>
    %108 = vector.broadcast %107 : vector<1x16xf32> to vector<256x16xf32>
    %109 = arith.addf %106, %108 : vector<256x16xf32>
    %c0_71 = arith.constant 0 : index
    %c0_72 = arith.constant 0 : index
    %c0_73 = arith.constant 0 : index
    %110 = vector.load %arg11[%c0_71, %c0_72, %c0_73] : memref<1x256x16xf32, #tpu.memory_space<vmem>>, vector<1x256x16xf32>
    %111 = vector.shape_cast %110 : vector<1x256x16xf32> to vector<256x16xf32>
    %112 = vector.shape_cast %109 : vector<256x16xf32> to vector<1x256x16xf32>
    tpu.vector_store %arg11[%c0_71, %c0_72, %c0_73], %112 {strides = array<i32>} : memref<1x256x16xf32, #tpu.memory_space<vmem>>, vector<1x256x16xf32>,
    return
  }
  func.func @transform_0(%arg0: i32) -> (i32, i32, i32) {
    %c0_i32 = arith.constant 0 : i32
    %c0_i32_0 = arith.constant 0 : i32
    %c0_i32_1 = arith.constant 0 : i32
    return %arg0, %c0_i32, %c0_i32_0 : i32, i32, i32
  }
  func.func @transform_1(%arg0: i32) -> (i32, i32) {
    %c0_i32 = arith.constant 0 : i32
    %c0_i32_0 = arith.constant 0 : i32
    %c0_i32_1 = arith.constant 0 : i32
    return %c0_i32, %c0_i32_0 : i32, i32
  }
  func.func @transform_2(%arg0: i32) -> (i32, i32) {
    %c0_i32 = arith.constant 0 : i32
    %c0_i32_0 = arith.constant 0 : i32
    %c0_i32_1 = arith.constant 0 : i32
    return %c0_i32, %c0_i32_0 : i32, i32
  }
  func.func @transform_3(%arg0: i32) -> (i32, i32, i32) {
    %c0_i32 = arith.constant 0 : i32
    %c0_i32_0 = arith.constant 0 : i32
    %c0_i32_1 = arith.constant 0 : i32
    %c0_i32_2 = arith.constant 0 : i32
    return %c0_i32, %c0_i32_0, %c0_i32_1 : i32, i32, i32
  }
  func.func @transform_4(%arg0: i32) -> (i32, i32) {
    %c0_i32 = arith.constant 0 : i32
    %c0_i32_0 = arith.constant 0 : i32
    %c0_i32_1 = arith.constant 0 : i32
    return %c0_i32, %c0_i32_0 : i32, i32
  }
  func.func @transform_5(%arg0: i32) -> (i32, i32) {
    %c0_i32 = arith.constant 0 : i32
    %c0_i32_0 = arith.constant 0 : i32
    %c0_i32_1 = arith.constant 0 : i32
    return %c0_i32, %c0_i32_0 : i32, i32
  }
  func.func @transform_6(%arg0: i32) -> (i32, i32, i32) {
    %c0_i32 = arith.constant 0 : i32
    %c0_i32_0 = arith.constant 0 : i32
    %c0_i32_1 = arith.constant 0 : i32
    %c0_i32_2 = arith.constant 0 : i32
    return %c0_i32, %c0_i32_0, %c0_i32_1 : i32, i32, i32
  }
  func.func @transform_7(%arg0: i32) -> (i32, i32) {
    %c0_i32 = arith.constant 0 : i32
    %c0_i32_0 = arith.constant 0 : i32
    %c0_i32_1 = arith.constant 0 : i32
    return %c0_i32, %c0_i32_0 : i32, i32
  }
  func.func @transform_8(%arg0: i32) -> (i32, i32) {
    %c0_i32 = arith.constant 0 : i32
    %c0_i32_0 = arith.constant 0 : i32
    %c0_i32_1 = arith.constant 0 : i32
    return %c0_i32, %c0_i32_0 : i32, i32
  }
  func.func @transform_9(%arg0: i32) -> (i32, i32, i32) {
    %c0_i32 = arith.constant 0 : i32
    %c0_i32_0 = arith.constant 0 : i32
    %c0_i32_1 = arith.constant 0 : i32
    return %arg0, %c0_i32, %c0_i32_0 : i32, i32, i32
  }
  func.func @transform_10(%arg0: i32) -> (i32, i32, i32) {
    %c0_i32 = arith.constant 0 : i32
    %c0_i32_0 = arith.constant 0 : i32
    %c0_i32_1 = arith.constant 0 : i32
    return %arg0, %c0_i32, %c0_i32_0 : i32, i32, i32
  }
}

module attributes {stable_mosaic.version = 11 : i64} {
  func.func @kernel(%arg0: i32, %arg1: memref<1x64x64xbf16, #tpu.memory_space<vmem>>, %arg2: memref<64x32xbf16, #tpu.memory_space<vmem>>, %arg3: memref<1x32xf32, #tpu.memory_space<vmem>>, %arg4: memref<9x64x1xf32, #tpu.memory_space<vmem>>, %arg5: memref<1x32xf32, #tpu.memory_space<vmem>>, %arg6: memref<1x32xf32, #tpu.memory_space<vmem>>, %arg7: memref<9x32x64xbf16, #tpu.memory_space<vmem>>, %arg8: memref<1x64xf32, #tpu.memory_space<vmem>>, %arg9: memref<64x32xbf16, #tpu.memory_space<vmem>>, %arg10: memref<9x32x64xbf16, #tpu.memory_space<vmem>>, %arg11: memref<1x64xf32, #tpu.memory_space<vmem>>, %arg12: memref<64x32xbf16, #tpu.memory_space<vmem>>, %arg13: memref<1x64x32xbf16, #tpu.memory_space<vmem>>, %arg14: memref<1x64x32xf32, #tpu.memory_space<vmem>>) attributes {dimension_semantics = [#tpu.dimension_semantics<parallel>], iteration_bounds = array<i64: 2>, scalar_prefetch = 0 : i64, scratch_operands = 0 : i64, tpu.core_type = #tpu.core_type<tc>, window_params = [{transform_indices = @transform_0, window_bounds = array<i64: 1, 64, 64>}, {pipeline_mode = #tpu.pipeline_mode<synchronous>, transform_indices = @transform_1, window_bounds = array<i64: 64, 32>}, {pipeline_mode = #tpu.pipeline_mode<synchronous>, transform_indices = @transform_2, window_bounds = array<i64: 1, 32>}, {pipeline_mode = #tpu.pipeline_mode<synchronous>, transform_indices = @transform_3, window_bounds = array<i64: 9, 64, 1>}, {pipeline_mode = #tpu.pipeline_mode<synchronous>, transform_indices = @transform_4, window_bounds = array<i64: 1, 32>}, {pipeline_mode = #tpu.pipeline_mode<synchronous>, transform_indices = @transform_5, window_bounds = array<i64: 1, 32>}, {pipeline_mode = #tpu.pipeline_mode<synchronous>, transform_indices = @transform_6, window_bounds = array<i64: 9, 32, 64>}, {pipeline_mode = #tpu.pipeline_mode<synchronous>, transform_indices = @transform_7, window_bounds = array<i64: 1, 64>}, {pipeline_mode = #tpu.pipeline_mode<synchronous>, transform_indices = @transform_8, window_bounds = array<i64: 64, 32>}, {pipeline_mode = #tpu.pipeline_mode<synchronous>, transform_indices = @transform_9, window_bounds = array<i64: 9, 32, 64>}, {pipeline_mode = #tpu.pipeline_mode<synchronous>, transform_indices = @transform_10, window_bounds = array<i64: 1, 64>}, {pipeline_mode = #tpu.pipeline_mode<synchronous>, transform_indices = @transform_11, window_bounds = array<i64: 64, 32>}, {transform_indices = @transform_12, window_bounds = array<i64: 1, 64, 32>}, {transform_indices = @transform_13, window_bounds = array<i64: 1, 64, 32>}]} {
    %c0 = arith.constant 0 : index
    %c0_0 = arith.constant 0 : index
    %c0_1 = arith.constant 0 : index
    %0 = vector.load %arg1[%c0, %c0_0, %c0_1] : memref<1x64x64xbf16, #tpu.memory_space<vmem>>, vector<1x64x64xbf16>
    %1 = vector.shape_cast %0 : vector<1x64x64xbf16> to vector<64x64xbf16>
    %c0_2 = arith.constant 0 : index
    %c0_3 = arith.constant 0 : index
    %2 = vector.load %arg2[%c0_2, %c0_3] : memref<64x32xbf16, #tpu.memory_space<vmem>>, vector<64x32xbf16>
    %cst = arith.constant dense<0.000000e+00> : vector<64x32xf32>
    %3 = tpu.matmul %1, %2, %cst {dimension_numbers = #tpu.dot_dimension_numbers<[1], [0], [0], [1], [0, 0, 1, 1], [], []>} : vector<64x64xbf16>, vector<64x32xbf16>, vector<64x32xf32> -> vector<64x32xf32>
    %c0_4 = arith.constant 0 : index
    %c0_5 = arith.constant 0 : index
    %4 = vector.load %arg3[%c0_4, %c0_5] : memref<1x32xf32, #tpu.memory_space<vmem>>, vector<1x32xf32>
    %5 = vector.broadcast %4 : vector<1x32xf32> to vector<64x32xf32>
    %6 = arith.addf %3, %5 : vector<64x32xf32>
    %c0_6 = arith.constant 0 : index
    %c0_7 = arith.constant 0 : index
    %c0_8 = arith.constant 0 : index
    %7 = vector.load %arg4[%c0_6, %c0_7, %c0_8] : memref<9x64x1xf32, #tpu.memory_space<vmem>>, vector<1x64x1xf32>
    %8 = vector.shape_cast %7 : vector<1x64x1xf32> to vector<64x1xf32>
    %c1 = arith.constant 1 : index
    %c0_9 = arith.constant 0 : index
    %c0_10 = arith.constant 0 : index
    %9 = vector.load %arg4[%c1, %c0_9, %c0_10] : memref<9x64x1xf32, #tpu.memory_space<vmem>>, vector<1x64x1xf32>
    %10 = vector.shape_cast %9 : vector<1x64x1xf32> to vector<64x1xf32>
    %c2 = arith.constant 2 : index
    %c0_11 = arith.constant 0 : index
    %c0_12 = arith.constant 0 : index
    %11 = vector.load %arg4[%c2, %c0_11, %c0_12] : memref<9x64x1xf32, #tpu.memory_space<vmem>>, vector<1x64x1xf32>
    %12 = vector.shape_cast %11 : vector<1x64x1xf32> to vector<64x1xf32>
    %c3 = arith.constant 3 : index
    %c0_13 = arith.constant 0 : index
    %c0_14 = arith.constant 0 : index
    %13 = vector.load %arg4[%c3, %c0_13, %c0_14] : memref<9x64x1xf32, #tpu.memory_space<vmem>>, vector<1x64x1xf32>
    %14 = vector.shape_cast %13 : vector<1x64x1xf32> to vector<64x1xf32>
    %c5 = arith.constant 5 : index
    %c0_15 = arith.constant 0 : index
    %c0_16 = arith.constant 0 : index
    %15 = vector.load %arg4[%c5, %c0_15, %c0_16] : memref<9x64x1xf32, #tpu.memory_space<vmem>>, vector<1x64x1xf32>
    %16 = vector.shape_cast %15 : vector<1x64x1xf32> to vector<64x1xf32>
    %c6 = arith.constant 6 : index
    %c0_17 = arith.constant 0 : index
    %c0_18 = arith.constant 0 : index
    %17 = vector.load %arg4[%c6, %c0_17, %c0_18] : memref<9x64x1xf32, #tpu.memory_space<vmem>>, vector<1x64x1xf32>
    %18 = vector.shape_cast %17 : vector<1x64x1xf32> to vector<64x1xf32>
    %c7 = arith.constant 7 : index
    %c0_19 = arith.constant 0 : index
    %c0_20 = arith.constant 0 : index
    %19 = vector.load %arg4[%c7, %c0_19, %c0_20] : memref<9x64x1xf32, #tpu.memory_space<vmem>>, vector<1x64x1xf32>
    %20 = vector.shape_cast %19 : vector<1x64x1xf32> to vector<64x1xf32>
    %c8 = arith.constant 8 : index
    %c0_21 = arith.constant 0 : index
    %c0_22 = arith.constant 0 : index
    %21 = vector.load %arg4[%c8, %c0_21, %c0_22] : memref<9x64x1xf32, #tpu.memory_space<vmem>>, vector<1x64x1xf32>
    %22 = vector.shape_cast %21 : vector<1x64x1xf32> to vector<64x1xf32>
    %23 = arith.truncf %6 : vector<64x32xf32> to vector<64x32xbf16>
    %c4 = arith.constant 4 : index
    %c0_23 = arith.constant 0 : index
    %c0_24 = arith.constant 0 : index
    %24 = vector.load %arg7[%c4, %c0_23, %c0_24] : memref<9x32x64xbf16, #tpu.memory_space<vmem>>, vector<1x32x64xbf16>
    %25 = vector.shape_cast %24 : vector<1x32x64xbf16> to vector<32x64xbf16>
    %cst_25 = arith.constant dense<0.000000e+00> : vector<64x64xf32>
    %26 = tpu.matmul %23, %25, %cst_25 {dimension_numbers = #tpu.dot_dimension_numbers<[1], [0], [0], [1], [0, 0, 1, 1], [], []>} : vector<64x32xbf16>, vector<32x64xbf16>, vector<64x64xf32> -> vector<64x64xf32>
    %c9_i32 = arith.constant 9 : i32
    %27 = tpu.dynamic_rotate %6 by %c9_i32 dim 0 : vector<64x32xf32>, i32 -> vector<64x32xf32>
    %28 = vector.broadcast %8 : vector<64x1xf32> to vector<64x32xf32>
    %29 = arith.mulf %27, %28 : vector<64x32xf32>
    %30 = arith.truncf %29 : vector<64x32xf32> to vector<64x32xbf16>
    %c0_26 = arith.constant 0 : index
    %c0_27 = arith.constant 0 : index
    %c0_28 = arith.constant 0 : index
    %31 = vector.load %arg7[%c0_26, %c0_27, %c0_28] : memref<9x32x64xbf16, #tpu.memory_space<vmem>>, vector<1x32x64xbf16>
    %32 = vector.shape_cast %31 : vector<1x32x64xbf16> to vector<32x64xbf16>
    %cst_29 = arith.constant dense<0.000000e+00> : vector<64x64xf32>
    %33 = tpu.matmul %30, %32, %cst_29 {dimension_numbers = #tpu.dot_dimension_numbers<[1], [0], [0], [1], [0, 0, 1, 1], [], []>} : vector<64x32xbf16>, vector<32x64xbf16>, vector<64x64xf32> -> vector<64x64xf32>
    %34 = arith.addf %26, %33 : vector<64x64xf32>
    %c8_i32 = arith.constant 8 : i32
    %35 = tpu.dynamic_rotate %6 by %c8_i32 dim 0 : vector<64x32xf32>, i32 -> vector<64x32xf32>
    %36 = vector.broadcast %10 : vector<64x1xf32> to vector<64x32xf32>
    %37 = arith.mulf %35, %36 : vector<64x32xf32>
    %38 = arith.truncf %37 : vector<64x32xf32> to vector<64x32xbf16>
    %c1_30 = arith.constant 1 : index
    %c0_31 = arith.constant 0 : index
    %c0_32 = arith.constant 0 : index
    %39 = vector.load %arg7[%c1_30, %c0_31, %c0_32] : memref<9x32x64xbf16, #tpu.memory_space<vmem>>, vector<1x32x64xbf16>
    %40 = vector.shape_cast %39 : vector<1x32x64xbf16> to vector<32x64xbf16>
    %cst_33 = arith.constant dense<0.000000e+00> : vector<64x64xf32>
    %41 = tpu.matmul %38, %40, %cst_33 {dimension_numbers = #tpu.dot_dimension_numbers<[1], [0], [0], [1], [0, 0, 1, 1], [], []>} : vector<64x32xbf16>, vector<32x64xbf16>, vector<64x64xf32> -> vector<64x64xf32>
    %42 = arith.addf %34, %41 : vector<64x64xf32>
    %c7_i32 = arith.constant 7 : i32
    %43 = tpu.dynamic_rotate %6 by %c7_i32 dim 0 : vector<64x32xf32>, i32 -> vector<64x32xf32>
    %44 = vector.broadcast %12 : vector<64x1xf32> to vector<64x32xf32>
    %45 = arith.mulf %43, %44 : vector<64x32xf32>
    %46 = arith.truncf %45 : vector<64x32xf32> to vector<64x32xbf16>
    %c2_34 = arith.constant 2 : index
    %c0_35 = arith.constant 0 : index
    %c0_36 = arith.constant 0 : index
    %47 = vector.load %arg7[%c2_34, %c0_35, %c0_36] : memref<9x32x64xbf16, #tpu.memory_space<vmem>>, vector<1x32x64xbf16>
    %48 = vector.shape_cast %47 : vector<1x32x64xbf16> to vector<32x64xbf16>
    %cst_37 = arith.constant dense<0.000000e+00> : vector<64x64xf32>
    %49 = tpu.matmul %46, %48, %cst_37 {dimension_numbers = #tpu.dot_dimension_numbers<[1], [0], [0], [1], [0, 0, 1, 1], [], []>} : vector<64x32xbf16>, vector<32x64xbf16>, vector<64x64xf32> -> vector<64x64xf32>
    %50 = arith.addf %42, %49 : vector<64x64xf32>
    %c1_i32 = arith.constant 1 : i32
    %51 = tpu.dynamic_rotate %6 by %c1_i32 dim 0 : vector<64x32xf32>, i32 -> vector<64x32xf32>
    %52 = vector.broadcast %14 : vector<64x1xf32> to vector<64x32xf32>
    %53 = arith.mulf %51, %52 : vector<64x32xf32>
    %54 = arith.truncf %53 : vector<64x32xf32> to vector<64x32xbf16>
    %c3_38 = arith.constant 3 : index
    %c0_39 = arith.constant 0 : index
    %c0_40 = arith.constant 0 : index
    %55 = vector.load %arg7[%c3_38, %c0_39, %c0_40] : memref<9x32x64xbf16, #tpu.memory_space<vmem>>, vector<1x32x64xbf16>
    %56 = vector.shape_cast %55 : vector<1x32x64xbf16> to vector<32x64xbf16>
    %cst_41 = arith.constant dense<0.000000e+00> : vector<64x64xf32>
    %57 = tpu.matmul %54, %56, %cst_41 {dimension_numbers = #tpu.dot_dimension_numbers<[1], [0], [0], [1], [0, 0, 1, 1], [], []>} : vector<64x32xbf16>, vector<32x64xbf16>, vector<64x64xf32> -> vector<64x64xf32>
    %58 = arith.addf %50, %57 : vector<64x64xf32>
    %c63_i32 = arith.constant 63 : i32
    %59 = tpu.dynamic_rotate %6 by %c63_i32 dim 0 : vector<64x32xf32>, i32 -> vector<64x32xf32>
    %60 = vector.broadcast %16 : vector<64x1xf32> to vector<64x32xf32>
    %61 = arith.mulf %59, %60 : vector<64x32xf32>
    %62 = arith.truncf %61 : vector<64x32xf32> to vector<64x32xbf16>
    %c5_42 = arith.constant 5 : index
    %c0_43 = arith.constant 0 : index
    %c0_44 = arith.constant 0 : index
    %63 = vector.load %arg7[%c5_42, %c0_43, %c0_44] : memref<9x32x64xbf16, #tpu.memory_space<vmem>>, vector<1x32x64xbf16>
    %64 = vector.shape_cast %63 : vector<1x32x64xbf16> to vector<32x64xbf16>
    %cst_45 = arith.constant dense<0.000000e+00> : vector<64x64xf32>
    %65 = tpu.matmul %62, %64, %cst_45 {dimension_numbers = #tpu.dot_dimension_numbers<[1], [0], [0], [1], [0, 0, 1, 1], [], []>} : vector<64x32xbf16>, vector<32x64xbf16>, vector<64x64xf32> -> vector<64x64xf32>
    %66 = arith.addf %58, %65 : vector<64x64xf32>
    %c57_i32 = arith.constant 57 : i32
    %67 = tpu.dynamic_rotate %6 by %c57_i32 dim 0 : vector<64x32xf32>, i32 -> vector<64x32xf32>
    %68 = vector.broadcast %18 : vector<64x1xf32> to vector<64x32xf32>
    %69 = arith.mulf %67, %68 : vector<64x32xf32>
    %70 = arith.truncf %69 : vector<64x32xf32> to vector<64x32xbf16>
    %c6_46 = arith.constant 6 : index
    %c0_47 = arith.constant 0 : index
    %c0_48 = arith.constant 0 : index
    %71 = vector.load %arg7[%c6_46, %c0_47, %c0_48] : memref<9x32x64xbf16, #tpu.memory_space<vmem>>, vector<1x32x64xbf16>
    %72 = vector.shape_cast %71 : vector<1x32x64xbf16> to vector<32x64xbf16>
    %cst_49 = arith.constant dense<0.000000e+00> : vector<64x64xf32>
    %73 = tpu.matmul %70, %72, %cst_49 {dimension_numbers = #tpu.dot_dimension_numbers<[1], [0], [0], [1], [0, 0, 1, 1], [], []>} : vector<64x32xbf16>, vector<32x64xbf16>, vector<64x64xf32> -> vector<64x64xf32>
    %74 = arith.addf %66, %73 : vector<64x64xf32>
    %c56_i32 = arith.constant 56 : i32
    %75 = tpu.dynamic_rotate %6 by %c56_i32 dim 0 : vector<64x32xf32>, i32 -> vector<64x32xf32>
    %76 = vector.broadcast %20 : vector<64x1xf32> to vector<64x32xf32>
    %77 = arith.mulf %75, %76 : vector<64x32xf32>
    %78 = arith.truncf %77 : vector<64x32xf32> to vector<64x32xbf16>
    %c7_50 = arith.constant 7 : index
    %c0_51 = arith.constant 0 : index
    %c0_52 = arith.constant 0 : index
    %79 = vector.load %arg7[%c7_50, %c0_51, %c0_52] : memref<9x32x64xbf16, #tpu.memory_space<vmem>>, vector<1x32x64xbf16>
    %80 = vector.shape_cast %79 : vector<1x32x64xbf16> to vector<32x64xbf16>
    %cst_53 = arith.constant dense<0.000000e+00> : vector<64x64xf32>
    %81 = tpu.matmul %78, %80, %cst_53 {dimension_numbers = #tpu.dot_dimension_numbers<[1], [0], [0], [1], [0, 0, 1, 1], [], []>} : vector<64x32xbf16>, vector<32x64xbf16>, vector<64x64xf32> -> vector<64x64xf32>
    %82 = arith.addf %74, %81 : vector<64x64xf32>
    %c55_i32 = arith.constant 55 : i32
    %83 = tpu.dynamic_rotate %6 by %c55_i32 dim 0 : vector<64x32xf32>, i32 -> vector<64x32xf32>
    %84 = vector.broadcast %22 : vector<64x1xf32> to vector<64x32xf32>
    %85 = arith.mulf %83, %84 : vector<64x32xf32>
    %86 = arith.truncf %85 : vector<64x32xf32> to vector<64x32xbf16>
    %c8_54 = arith.constant 8 : index
    %c0_55 = arith.constant 0 : index
    %c0_56 = arith.constant 0 : index
    %87 = vector.load %arg7[%c8_54, %c0_55, %c0_56] : memref<9x32x64xbf16, #tpu.memory_space<vmem>>, vector<1x32x64xbf16>
    %88 = vector.shape_cast %87 : vector<1x32x64xbf16> to vector<32x64xbf16>
    %cst_57 = arith.constant dense<0.000000e+00> : vector<64x64xf32>
    %89 = tpu.matmul %86, %88, %cst_57 {dimension_numbers = #tpu.dot_dimension_numbers<[1], [0], [0], [1], [0, 0, 1, 1], [], []>} : vector<64x32xbf16>, vector<32x64xbf16>, vector<64x64xf32> -> vector<64x64xf32>
    %90 = arith.addf %82, %89 : vector<64x64xf32>
    %c0_58 = arith.constant 0 : index
    %c0_59 = arith.constant 0 : index
    %91 = vector.load %arg8[%c0_58, %c0_59] : memref<1x64xf32, #tpu.memory_space<vmem>>, vector<1x64xf32>
    %92 = vector.broadcast %91 : vector<1x64xf32> to vector<64x64xf32>
    %93 = arith.addf %90, %92 : vector<64x64xf32>
    %cst_60 = arith.constant 0.000000e+00 : f32
    %94 = vector.broadcast %cst_60 : f32 to vector<64x64xf32>
    %95 = arith.maximumf %93, %94 : vector<64x64xf32>
    %96 = arith.truncf %95 : vector<64x64xf32> to vector<64x64xbf16>
    %c0_61 = arith.constant 0 : index
    %c0_62 = arith.constant 0 : index
    %97 = vector.load %arg9[%c0_61, %c0_62] : memref<64x32xbf16, #tpu.memory_space<vmem>>, vector<64x32xbf16>
    %cst_63 = arith.constant dense<0.000000e+00> : vector<64x32xf32>
    %98 = tpu.matmul %96, %97, %cst_63 {dimension_numbers = #tpu.dot_dimension_numbers<[1], [0], [0], [1], [0, 0, 1, 1], [], []>} : vector<64x64xbf16>, vector<64x32xbf16>, vector<64x32xf32> -> vector<64x32xf32>
    %99 = arith.addf %6, %98 : vector<64x32xf32>
    %100 = arith.truncf %99 : vector<64x32xf32> to vector<64x32xbf16>
    %c4_64 = arith.constant 4 : index
    %c0_65 = arith.constant 0 : index
    %c0_66 = arith.constant 0 : index
    %101 = vector.load %arg10[%c4_64, %c0_65, %c0_66] : memref<9x32x64xbf16, #tpu.memory_space<vmem>>, vector<1x32x64xbf16>
    %102 = vector.shape_cast %101 : vector<1x32x64xbf16> to vector<32x64xbf16>
    %cst_67 = arith.constant dense<0.000000e+00> : vector<64x64xf32>
    %103 = tpu.matmul %100, %102, %cst_67 {dimension_numbers = #tpu.dot_dimension_numbers<[1], [0], [0], [1], [0, 0, 1, 1], [], []>} : vector<64x32xbf16>, vector<32x64xbf16>, vector<64x64xf32> -> vector<64x64xf32>
    %c9_i32_68 = arith.constant 9 : i32
    %104 = tpu.dynamic_rotate %99 by %c9_i32_68 dim 0 : vector<64x32xf32>, i32 -> vector<64x32xf32>
    %105 = vector.broadcast %8 : vector<64x1xf32> to vector<64x32xf32>
    %106 = arith.mulf %104, %105 : vector<64x32xf32>
    %107 = arith.truncf %106 : vector<64x32xf32> to vector<64x32xbf16>
    %c0_69 = arith.constant 0 : index
    %c0_70 = arith.constant 0 : index
    %c0_71 = arith.constant 0 : index
    %108 = vector.load %arg10[%c0_69, %c0_70, %c0_71] : memref<9x32x64xbf16, #tpu.memory_space<vmem>>, vector<1x32x64xbf16>
    %109 = vector.shape_cast %108 : vector<1x32x64xbf16> to vector<32x64xbf16>
    %cst_72 = arith.constant dense<0.000000e+00> : vector<64x64xf32>
    %110 = tpu.matmul %107, %109, %cst_72 {dimension_numbers = #tpu.dot_dimension_numbers<[1], [0], [0], [1], [0, 0, 1, 1], [], []>} : vector<64x32xbf16>, vector<32x64xbf16>, vector<64x64xf32> -> vector<64x64xf32>
    %111 = arith.addf %103, %110 : vector<64x64xf32>
    %c8_i32_73 = arith.constant 8 : i32
    %112 = tpu.dynamic_rotate %99 by %c8_i32_73 dim 0 : vector<64x32xf32>, i32 -> vector<64x32xf32>
    %113 = vector.broadcast %10 : vector<64x1xf32> to vector<64x32xf32>
    %114 = arith.mulf %112, %113 : vector<64x32xf32>
    %115 = arith.truncf %114 : vector<64x32xf32> to vector<64x32xbf16>
    %c1_74 = arith.constant 1 : index
    %c0_75 = arith.constant 0 : index
    %c0_76 = arith.constant 0 : index
    %116 = vector.load %arg10[%c1_74, %c0_75, %c0_76] : memref<9x32x64xbf16, #tpu.memory_space<vmem>>, vector<1x32x64xbf16>
    %117 = vector.shape_cast %116 : vector<1x32x64xbf16> to vector<32x64xbf16>
    %cst_77 = arith.constant dense<0.000000e+00> : vector<64x64xf32>
    %118 = tpu.matmul %115, %117, %cst_77 {dimension_numbers = #tpu.dot_dimension_numbers<[1], [0], [0], [1], [0, 0, 1, 1], [], []>} : vector<64x32xbf16>, vector<32x64xbf16>, vector<64x64xf32> -> vector<64x64xf32>
    %119 = arith.addf %111, %118 : vector<64x64xf32>
    %c7_i32_78 = arith.constant 7 : i32
    %120 = tpu.dynamic_rotate %99 by %c7_i32_78 dim 0 : vector<64x32xf32>, i32 -> vector<64x32xf32>
    %121 = vector.broadcast %12 : vector<64x1xf32> to vector<64x32xf32>
    %122 = arith.mulf %120, %121 : vector<64x32xf32>
    %123 = arith.truncf %122 : vector<64x32xf32> to vector<64x32xbf16>
    %c2_79 = arith.constant 2 : index
    %c0_80 = arith.constant 0 : index
    %c0_81 = arith.constant 0 : index
    %124 = vector.load %arg10[%c2_79, %c0_80, %c0_81] : memref<9x32x64xbf16, #tpu.memory_space<vmem>>, vector<1x32x64xbf16>
    %125 = vector.shape_cast %124 : vector<1x32x64xbf16> to vector<32x64xbf16>
    %cst_82 = arith.constant dense<0.000000e+00> : vector<64x64xf32>
    %126 = tpu.matmul %123, %125, %cst_82 {dimension_numbers = #tpu.dot_dimension_numbers<[1], [0], [0], [1], [0, 0, 1, 1], [], []>} : vector<64x32xbf16>, vector<32x64xbf16>, vector<64x64xf32> -> vector<64x64xf32>
    %127 = arith.addf %119, %126 : vector<64x64xf32>
    %c1_i32_83 = arith.constant 1 : i32
    %128 = tpu.dynamic_rotate %99 by %c1_i32_83 dim 0 : vector<64x32xf32>, i32 -> vector<64x32xf32>
    %129 = vector.broadcast %14 : vector<64x1xf32> to vector<64x32xf32>
    %130 = arith.mulf %128, %129 : vector<64x32xf32>
    %131 = arith.truncf %130 : vector<64x32xf32> to vector<64x32xbf16>
    %c3_84 = arith.constant 3 : index
    %c0_85 = arith.constant 0 : index
    %c0_86 = arith.constant 0 : index
    %132 = vector.load %arg10[%c3_84, %c0_85, %c0_86] : memref<9x32x64xbf16, #tpu.memory_space<vmem>>, vector<1x32x64xbf16>
    %133 = vector.shape_cast %132 : vector<1x32x64xbf16> to vector<32x64xbf16>
    %cst_87 = arith.constant dense<0.000000e+00> : vector<64x64xf32>
    %134 = tpu.matmul %131, %133, %cst_87 {dimension_numbers = #tpu.dot_dimension_numbers<[1], [0], [0], [1], [0, 0, 1, 1], [], []>} : vector<64x32xbf16>, vector<32x64xbf16>, vector<64x64xf32> -> vector<64x64xf32>
    %135 = arith.addf %127, %134 : vector<64x64xf32>
    %c63_i32_88 = arith.constant 63 : i32
    %136 = tpu.dynamic_rotate %99 by %c63_i32_88 dim 0 : vector<64x32xf32>, i32 -> vector<64x32xf32>
    %137 = vector.broadcast %16 : vector<64x1xf32> to vector<64x32xf32>
    %138 = arith.mulf %136, %137 : vector<64x32xf32>
    %139 = arith.truncf %138 : vector<64x32xf32> to vector<64x32xbf16>
    %c5_89 = arith.constant 5 : index
    %c0_90 = arith.constant 0 : index
    %c0_91 = arith.constant 0 : index
    %140 = vector.load %arg10[%c5_89, %c0_90, %c0_91] : memref<9x32x64xbf16, #tpu.memory_space<vmem>>, vector<1x32x64xbf16>
    %141 = vector.shape_cast %140 : vector<1x32x64xbf16> to vector<32x64xbf16>
    %cst_92 = arith.constant dense<0.000000e+00> : vector<64x64xf32>
    %142 = tpu.matmul %139, %141, %cst_92 {dimension_numbers = #tpu.dot_dimension_numbers<[1], [0], [0], [1], [0, 0, 1, 1], [], []>} : vector<64x32xbf16>, vector<32x64xbf16>, vector<64x64xf32> -> vector<64x64xf32>
    %143 = arith.addf %135, %142 : vector<64x64xf32>
    %c57_i32_93 = arith.constant 57 : i32
    %144 = tpu.dynamic_rotate %99 by %c57_i32_93 dim 0 : vector<64x32xf32>, i32 -> vector<64x32xf32>
    %145 = vector.broadcast %18 : vector<64x1xf32> to vector<64x32xf32>
    %146 = arith.mulf %144, %145 : vector<64x32xf32>
    %147 = arith.truncf %146 : vector<64x32xf32> to vector<64x32xbf16>
    %c6_94 = arith.constant 6 : index
    %c0_95 = arith.constant 0 : index
    %c0_96 = arith.constant 0 : index
    %148 = vector.load %arg10[%c6_94, %c0_95, %c0_96] : memref<9x32x64xbf16, #tpu.memory_space<vmem>>, vector<1x32x64xbf16>
    %149 = vector.shape_cast %148 : vector<1x32x64xbf16> to vector<32x64xbf16>
    %cst_97 = arith.constant dense<0.000000e+00> : vector<64x64xf32>
    %150 = tpu.matmul %147, %149, %cst_97 {dimension_numbers = #tpu.dot_dimension_numbers<[1], [0], [0], [1], [0, 0, 1, 1], [], []>} : vector<64x32xbf16>, vector<32x64xbf16>, vector<64x64xf32> -> vector<64x64xf32>
    %151 = arith.addf %143, %150 : vector<64x64xf32>
    %c56_i32_98 = arith.constant 56 : i32
    %152 = tpu.dynamic_rotate %99 by %c56_i32_98 dim 0 : vector<64x32xf32>, i32 -> vector<64x32xf32>
    %153 = vector.broadcast %20 : vector<64x1xf32> to vector<64x32xf32>
    %154 = arith.mulf %152, %153 : vector<64x32xf32>
    %155 = arith.truncf %154 : vector<64x32xf32> to vector<64x32xbf16>
    %c7_99 = arith.constant 7 : index
    %c0_100 = arith.constant 0 : index
    %c0_101 = arith.constant 0 : index
    %156 = vector.load %arg10[%c7_99, %c0_100, %c0_101] : memref<9x32x64xbf16, #tpu.memory_space<vmem>>, vector<1x32x64xbf16>
    %157 = vector.shape_cast %156 : vector<1x32x64xbf16> to vector<32x64xbf16>
    %cst_102 = arith.constant dense<0.000000e+00> : vector<64x64xf32>
    %158 = tpu.matmul %155, %157, %cst_102 {dimension_numbers = #tpu.dot_dimension_numbers<[1], [0], [0], [1], [0, 0, 1, 1], [], []>} : vector<64x32xbf16>, vector<32x64xbf16>, vector<64x64xf32> -> vector<64x64xf32>
    %159 = arith.addf %151, %158 : vector<64x64xf32>
    %c55_i32_103 = arith.constant 55 : i32
    %160 = tpu.dynamic_rotate %99 by %c55_i32_103 dim 0 : vector<64x32xf32>, i32 -> vector<64x32xf32>
    %161 = vector.broadcast %22 : vector<64x1xf32> to vector<64x32xf32>
    %162 = arith.mulf %160, %161 : vector<64x32xf32>
    %163 = arith.truncf %162 : vector<64x32xf32> to vector<64x32xbf16>
    %c8_104 = arith.constant 8 : index
    %c0_105 = arith.constant 0 : index
    %c0_106 = arith.constant 0 : index
    %164 = vector.load %arg10[%c8_104, %c0_105, %c0_106] : memref<9x32x64xbf16, #tpu.memory_space<vmem>>, vector<1x32x64xbf16>
    %165 = vector.shape_cast %164 : vector<1x32x64xbf16> to vector<32x64xbf16>
    %cst_107 = arith.constant dense<0.000000e+00> : vector<64x64xf32>
    %166 = tpu.matmul %163, %165, %cst_107 {dimension_numbers = #tpu.dot_dimension_numbers<[1], [0], [0], [1], [0, 0, 1, 1], [], []>} : vector<64x32xbf16>, vector<32x64xbf16>, vector<64x64xf32> -> vector<64x64xf32>
    %167 = arith.addf %159, %166 : vector<64x64xf32>
    %c0_108 = arith.constant 0 : index
    %c0_109 = arith.constant 0 : index
    %168 = vector.load %arg11[%c0_108, %c0_109] : memref<1x64xf32, #tpu.memory_space<vmem>>, vector<1x64xf32>
    %169 = vector.broadcast %168 : vector<1x64xf32> to vector<64x64xf32>
    %170 = arith.addf %167, %169 : vector<64x64xf32>
    %cst_110 = arith.constant 0.000000e+00 : f32
    %171 = vector.broadcast %cst_110 : f32 to vector<64x64xf32>
    %172 = arith.maximumf %170, %171 : vector<64x64xf32>
    %173 = arith.truncf %172 : vector<64x64xf32> to vector<64x64xbf16>
    %c0_111 = arith.constant 0 : index
    %c0_112 = arith.constant 0 : index
    %174 = vector.load %arg12[%c0_111, %c0_112] : memref<64x32xbf16, #tpu.memory_space<vmem>>, vector<64x32xbf16>
    %cst_113 = arith.constant dense<0.000000e+00> : vector<64x32xf32>
    %175 = tpu.matmul %173, %174, %cst_113 {dimension_numbers = #tpu.dot_dimension_numbers<[1], [0], [0], [1], [0, 0, 1, 1], [], []>} : vector<64x64xbf16>, vector<64x32xbf16>, vector<64x32xf32> -> vector<64x32xf32>
    %176 = arith.addf %99, %175 : vector<64x32xf32>
    %177 = arith.truncf %176 : vector<64x32xf32> to vector<64x32xbf16>
    %c0_114 = arith.constant 0 : index
    %c0_115 = arith.constant 0 : index
    %c0_116 = arith.constant 0 : index
    %178 = vector.load %arg13[%c0_114, %c0_115, %c0_116] : memref<1x64x32xbf16, #tpu.memory_space<vmem>>, vector<1x64x32xbf16>
    %179 = vector.shape_cast %178 : vector<1x64x32xbf16> to vector<64x32xbf16>
    %180 = vector.shape_cast %177 : vector<64x32xbf16> to vector<1x64x32xbf16>
    tpu.vector_store %arg13[%c0_114, %c0_115, %c0_116], %180 {strides = array<i32>} : memref<1x64x32xbf16, #tpu.memory_space<vmem>>, vector<1x64x32xbf16>,
    %c0_117 = arith.constant 0 : index
    %c0_118 = arith.constant 0 : index
    %181 = vector.load %arg5[%c0_117, %c0_118] : memref<1x32xf32, #tpu.memory_space<vmem>>, vector<1x32xf32>
    %182 = vector.broadcast %181 : vector<1x32xf32> to vector<64x32xf32>
    %183 = arith.mulf %176, %182 : vector<64x32xf32>
    %c0_119 = arith.constant 0 : index
    %c0_120 = arith.constant 0 : index
    %184 = vector.load %arg6[%c0_119, %c0_120] : memref<1x32xf32, #tpu.memory_space<vmem>>, vector<1x32xf32>
    %185 = vector.broadcast %184 : vector<1x32xf32> to vector<64x32xf32>
    %186 = arith.addf %183, %185 : vector<64x32xf32>
    %c0_121 = arith.constant 0 : index
    %c0_122 = arith.constant 0 : index
    %c0_123 = arith.constant 0 : index
    %187 = vector.load %arg14[%c0_121, %c0_122, %c0_123] : memref<1x64x32xf32, #tpu.memory_space<vmem>>, vector<1x64x32xf32>
    %188 = vector.shape_cast %187 : vector<1x64x32xf32> to vector<64x32xf32>
    %189 = vector.shape_cast %186 : vector<64x32xf32> to vector<1x64x32xf32>
    tpu.vector_store %arg14[%c0_121, %c0_122, %c0_123], %189 {strides = array<i32>} : memref<1x64x32xf32, #tpu.memory_space<vmem>>, vector<1x64x32xf32>,
    return
  }
  func.func @transform_0(%arg0: i32) -> (i32, i32, i32) {
    %c0_i32 = arith.constant 0 : i32
    %c0_i32_0 = arith.constant 0 : i32
    %c0_i32_1 = arith.constant 0 : i32
    return %arg0, %c0_i32, %c0_i32_0 : i32, i32, i32
  }
  func.func @transform_1(%arg0: i32) -> (i32, i32) {
    %c0_i32 = arith.constant 0 : i32
    %c0_i32_0 = arith.constant 0 : i32
    %c0_i32_1 = arith.constant 0 : i32
    return %c0_i32, %c0_i32_0 : i32, i32
  }
  func.func @transform_2(%arg0: i32) -> (i32, i32) {
    %c0_i32 = arith.constant 0 : i32
    %c0_i32_0 = arith.constant 0 : i32
    %c0_i32_1 = arith.constant 0 : i32
    return %c0_i32, %c0_i32_0 : i32, i32
  }
  func.func @transform_3(%arg0: i32) -> (i32, i32, i32) {
    %c0_i32 = arith.constant 0 : i32
    %c0_i32_0 = arith.constant 0 : i32
    %c0_i32_1 = arith.constant 0 : i32
    %c0_i32_2 = arith.constant 0 : i32
    return %c0_i32, %c0_i32_0, %c0_i32_1 : i32, i32, i32
  }
  func.func @transform_4(%arg0: i32) -> (i32, i32) {
    %c0_i32 = arith.constant 0 : i32
    %c0_i32_0 = arith.constant 0 : i32
    %c0_i32_1 = arith.constant 0 : i32
    return %c0_i32, %c0_i32_0 : i32, i32
  }
  func.func @transform_5(%arg0: i32) -> (i32, i32) {
    %c0_i32 = arith.constant 0 : i32
    %c0_i32_0 = arith.constant 0 : i32
    %c0_i32_1 = arith.constant 0 : i32
    return %c0_i32, %c0_i32_0 : i32, i32
  }
  func.func @transform_6(%arg0: i32) -> (i32, i32, i32) {
    %c0_i32 = arith.constant 0 : i32
    %c0_i32_0 = arith.constant 0 : i32
    %c0_i32_1 = arith.constant 0 : i32
    %c0_i32_2 = arith.constant 0 : i32
    return %c0_i32, %c0_i32_0, %c0_i32_1 : i32, i32, i32
  }
  func.func @transform_7(%arg0: i32) -> (i32, i32) {
    %c0_i32 = arith.constant 0 : i32
    %c0_i32_0 = arith.constant 0 : i32
    %c0_i32_1 = arith.constant 0 : i32
    return %c0_i32, %c0_i32_0 : i32, i32
  }
  func.func @transform_8(%arg0: i32) -> (i32, i32) {
    %c0_i32 = arith.constant 0 : i32
    %c0_i32_0 = arith.constant 0 : i32
    %c0_i32_1 = arith.constant 0 : i32
    return %c0_i32, %c0_i32_0 : i32, i32
  }
  func.func @transform_9(%arg0: i32) -> (i32, i32, i32) {
    %c0_i32 = arith.constant 0 : i32
    %c0_i32_0 = arith.constant 0 : i32
    %c0_i32_1 = arith.constant 0 : i32
    %c0_i32_2 = arith.constant 0 : i32
    return %c0_i32, %c0_i32_0, %c0_i32_1 : i32, i32, i32
  }
  func.func @transform_10(%arg0: i32) -> (i32, i32) {
    %c0_i32 = arith.constant 0 : i32
    %c0_i32_0 = arith.constant 0 : i32
    %c0_i32_1 = arith.constant 0 : i32
    return %c0_i32, %c0_i32_0 : i32, i32
  }
  func.func @transform_11(%arg0: i32) -> (i32, i32) {
    %c0_i32 = arith.constant 0 : i32
    %c0_i32_0 = arith.constant 0 : i32
    %c0_i32_1 = arith.constant 0 : i32
    return %c0_i32, %c0_i32_0 : i32, i32
  }
  func.func @transform_12(%arg0: i32) -> (i32, i32, i32) {
    %c0_i32 = arith.constant 0 : i32
    %c0_i32_0 = arith.constant 0 : i32
    %c0_i32_1 = arith.constant 0 : i32
    return %arg0, %c0_i32, %c0_i32_0 : i32, i32, i32
  }
  func.func @transform_13(%arg0: i32) -> (i32, i32, i32) {
    %c0_i32 = arith.constant 0 : i32
    %c0_i32_0 = arith.constant 0 : i32
    %c0_i32_1 = arith.constant 0 : i32
    return %arg0, %c0_i32, %c0_i32_0 : i32, i32, i32
  }
}

module attributes {stable_mosaic.version = 11 : i64} {
  func.func @kernel(%arg0: i32, %arg1: memref<1x16x128xbf16, #tpu.memory_space<vmem>>, %arg2: memref<128x64xbf16, #tpu.memory_space<vmem>>, %arg3: memref<1x64xf32, #tpu.memory_space<vmem>>, %arg4: memref<9x16x1xf32, #tpu.memory_space<vmem>>, %arg5: memref<1x64xf32, #tpu.memory_space<vmem>>, %arg6: memref<1x64xf32, #tpu.memory_space<vmem>>, %arg7: memref<9x64x128xbf16, #tpu.memory_space<vmem>>, %arg8: memref<1x128xf32, #tpu.memory_space<vmem>>, %arg9: memref<128x64xbf16, #tpu.memory_space<vmem>>, %arg10: memref<9x64x128xbf16, #tpu.memory_space<vmem>>, %arg11: memref<1x128xf32, #tpu.memory_space<vmem>>, %arg12: memref<128x64xbf16, #tpu.memory_space<vmem>>, %arg13: memref<1x16x64xbf16, #tpu.memory_space<vmem>>, %arg14: memref<1x16x64xf32, #tpu.memory_space<vmem>>) attributes {dimension_semantics = [#tpu.dimension_semantics<parallel>], iteration_bounds = array<i64: 2>, scalar_prefetch = 0 : i64, scratch_operands = 0 : i64, tpu.core_type = #tpu.core_type<tc>, window_params = [{transform_indices = @transform_0, window_bounds = array<i64: 1, 16, 128>}, {pipeline_mode = #tpu.pipeline_mode<synchronous>, transform_indices = @transform_1, window_bounds = array<i64: 128, 64>}, {pipeline_mode = #tpu.pipeline_mode<synchronous>, transform_indices = @transform_2, window_bounds = array<i64: 1, 64>}, {pipeline_mode = #tpu.pipeline_mode<synchronous>, transform_indices = @transform_3, window_bounds = array<i64: 9, 16, 1>}, {pipeline_mode = #tpu.pipeline_mode<synchronous>, transform_indices = @transform_4, window_bounds = array<i64: 1, 64>}, {pipeline_mode = #tpu.pipeline_mode<synchronous>, transform_indices = @transform_5, window_bounds = array<i64: 1, 64>}, {pipeline_mode = #tpu.pipeline_mode<synchronous>, transform_indices = @transform_6, window_bounds = array<i64: 9, 64, 128>}, {pipeline_mode = #tpu.pipeline_mode<synchronous>, transform_indices = @transform_7, window_bounds = array<i64: 1, 128>}, {pipeline_mode = #tpu.pipeline_mode<synchronous>, transform_indices = @transform_8, window_bounds = array<i64: 128, 64>}, {pipeline_mode = #tpu.pipeline_mode<synchronous>, transform_indices = @transform_9, window_bounds = array<i64: 9, 64, 128>}, {pipeline_mode = #tpu.pipeline_mode<synchronous>, transform_indices = @transform_10, window_bounds = array<i64: 1, 128>}, {pipeline_mode = #tpu.pipeline_mode<synchronous>, transform_indices = @transform_11, window_bounds = array<i64: 128, 64>}, {transform_indices = @transform_12, window_bounds = array<i64: 1, 16, 64>}, {transform_indices = @transform_13, window_bounds = array<i64: 1, 16, 64>}]} {
    %c0 = arith.constant 0 : index
    %c0_0 = arith.constant 0 : index
    %c0_1 = arith.constant 0 : index
    %0 = vector.load %arg1[%c0, %c0_0, %c0_1] : memref<1x16x128xbf16, #tpu.memory_space<vmem>>, vector<1x16x128xbf16>
    %1 = vector.shape_cast %0 : vector<1x16x128xbf16> to vector<16x128xbf16>
    %c0_2 = arith.constant 0 : index
    %c0_3 = arith.constant 0 : index
    %2 = vector.load %arg2[%c0_2, %c0_3] : memref<128x64xbf16, #tpu.memory_space<vmem>>, vector<128x64xbf16>
    %cst = arith.constant dense<0.000000e+00> : vector<16x64xf32>
    %3 = tpu.matmul %1, %2, %cst {dimension_numbers = #tpu.dot_dimension_numbers<[1], [0], [0], [1], [0, 0, 1, 1], [], []>} : vector<16x128xbf16>, vector<128x64xbf16>, vector<16x64xf32> -> vector<16x64xf32>
    %c0_4 = arith.constant 0 : index
    %c0_5 = arith.constant 0 : index
    %4 = vector.load %arg3[%c0_4, %c0_5] : memref<1x64xf32, #tpu.memory_space<vmem>>, vector<1x64xf32>
    %5 = vector.broadcast %4 : vector<1x64xf32> to vector<16x64xf32>
    %6 = arith.addf %3, %5 : vector<16x64xf32>
    %c0_6 = arith.constant 0 : index
    %c0_7 = arith.constant 0 : index
    %c0_8 = arith.constant 0 : index
    %7 = vector.load %arg4[%c0_6, %c0_7, %c0_8] : memref<9x16x1xf32, #tpu.memory_space<vmem>>, vector<1x16x1xf32>
    %8 = vector.shape_cast %7 : vector<1x16x1xf32> to vector<16x1xf32>
    %c1 = arith.constant 1 : index
    %c0_9 = arith.constant 0 : index
    %c0_10 = arith.constant 0 : index
    %9 = vector.load %arg4[%c1, %c0_9, %c0_10] : memref<9x16x1xf32, #tpu.memory_space<vmem>>, vector<1x16x1xf32>
    %10 = vector.shape_cast %9 : vector<1x16x1xf32> to vector<16x1xf32>
    %c2 = arith.constant 2 : index
    %c0_11 = arith.constant 0 : index
    %c0_12 = arith.constant 0 : index
    %11 = vector.load %arg4[%c2, %c0_11, %c0_12] : memref<9x16x1xf32, #tpu.memory_space<vmem>>, vector<1x16x1xf32>
    %12 = vector.shape_cast %11 : vector<1x16x1xf32> to vector<16x1xf32>
    %c3 = arith.constant 3 : index
    %c0_13 = arith.constant 0 : index
    %c0_14 = arith.constant 0 : index
    %13 = vector.load %arg4[%c3, %c0_13, %c0_14] : memref<9x16x1xf32, #tpu.memory_space<vmem>>, vector<1x16x1xf32>
    %14 = vector.shape_cast %13 : vector<1x16x1xf32> to vector<16x1xf32>
    %c5 = arith.constant 5 : index
    %c0_15 = arith.constant 0 : index
    %c0_16 = arith.constant 0 : index
    %15 = vector.load %arg4[%c5, %c0_15, %c0_16] : memref<9x16x1xf32, #tpu.memory_space<vmem>>, vector<1x16x1xf32>
    %16 = vector.shape_cast %15 : vector<1x16x1xf32> to vector<16x1xf32>
    %c6 = arith.constant 6 : index
    %c0_17 = arith.constant 0 : index
    %c0_18 = arith.constant 0 : index
    %17 = vector.load %arg4[%c6, %c0_17, %c0_18] : memref<9x16x1xf32, #tpu.memory_space<vmem>>, vector<1x16x1xf32>
    %18 = vector.shape_cast %17 : vector<1x16x1xf32> to vector<16x1xf32>
    %c7 = arith.constant 7 : index
    %c0_19 = arith.constant 0 : index
    %c0_20 = arith.constant 0 : index
    %19 = vector.load %arg4[%c7, %c0_19, %c0_20] : memref<9x16x1xf32, #tpu.memory_space<vmem>>, vector<1x16x1xf32>
    %20 = vector.shape_cast %19 : vector<1x16x1xf32> to vector<16x1xf32>
    %c8 = arith.constant 8 : index
    %c0_21 = arith.constant 0 : index
    %c0_22 = arith.constant 0 : index
    %21 = vector.load %arg4[%c8, %c0_21, %c0_22] : memref<9x16x1xf32, #tpu.memory_space<vmem>>, vector<1x16x1xf32>
    %22 = vector.shape_cast %21 : vector<1x16x1xf32> to vector<16x1xf32>
    %23 = arith.truncf %6 : vector<16x64xf32> to vector<16x64xbf16>
    %c4 = arith.constant 4 : index
    %c0_23 = arith.constant 0 : index
    %c0_24 = arith.constant 0 : index
    %24 = vector.load %arg7[%c4, %c0_23, %c0_24] : memref<9x64x128xbf16, #tpu.memory_space<vmem>>, vector<1x64x128xbf16>
    %25 = vector.shape_cast %24 : vector<1x64x128xbf16> to vector<64x128xbf16>
    %cst_25 = arith.constant dense<0.000000e+00> : vector<16x128xf32>
    %26 = tpu.matmul %23, %25, %cst_25 {dimension_numbers = #tpu.dot_dimension_numbers<[1], [0], [0], [1], [0, 0, 1, 1], [], []>} : vector<16x64xbf16>, vector<64x128xbf16>, vector<16x128xf32> -> vector<16x128xf32>
    %c5_i32 = arith.constant 5 : i32
    %27 = tpu.dynamic_rotate %6 by %c5_i32 dim 0 : vector<16x64xf32>, i32 -> vector<16x64xf32>
    %28 = vector.broadcast %8 : vector<16x1xf32> to vector<16x64xf32>
    %29 = arith.mulf %27, %28 : vector<16x64xf32>
    %30 = arith.truncf %29 : vector<16x64xf32> to vector<16x64xbf16>
    %c0_26 = arith.constant 0 : index
    %c0_27 = arith.constant 0 : index
    %c0_28 = arith.constant 0 : index
    %31 = vector.load %arg7[%c0_26, %c0_27, %c0_28] : memref<9x64x128xbf16, #tpu.memory_space<vmem>>, vector<1x64x128xbf16>
    %32 = vector.shape_cast %31 : vector<1x64x128xbf16> to vector<64x128xbf16>
    %cst_29 = arith.constant dense<0.000000e+00> : vector<16x128xf32>
    %33 = tpu.matmul %30, %32, %cst_29 {dimension_numbers = #tpu.dot_dimension_numbers<[1], [0], [0], [1], [0, 0, 1, 1], [], []>} : vector<16x64xbf16>, vector<64x128xbf16>, vector<16x128xf32> -> vector<16x128xf32>
    %34 = arith.addf %26, %33 : vector<16x128xf32>
    %c4_i32 = arith.constant 4 : i32
    %35 = tpu.dynamic_rotate %6 by %c4_i32 dim 0 : vector<16x64xf32>, i32 -> vector<16x64xf32>
    %36 = vector.broadcast %10 : vector<16x1xf32> to vector<16x64xf32>
    %37 = arith.mulf %35, %36 : vector<16x64xf32>
    %38 = arith.truncf %37 : vector<16x64xf32> to vector<16x64xbf16>
    %c1_30 = arith.constant 1 : index
    %c0_31 = arith.constant 0 : index
    %c0_32 = arith.constant 0 : index
    %39 = vector.load %arg7[%c1_30, %c0_31, %c0_32] : memref<9x64x128xbf16, #tpu.memory_space<vmem>>, vector<1x64x128xbf16>
    %40 = vector.shape_cast %39 : vector<1x64x128xbf16> to vector<64x128xbf16>
    %cst_33 = arith.constant dense<0.000000e+00> : vector<16x128xf32>
    %41 = tpu.matmul %38, %40, %cst_33 {dimension_numbers = #tpu.dot_dimension_numbers<[1], [0], [0], [1], [0, 0, 1, 1], [], []>} : vector<16x64xbf16>, vector<64x128xbf16>, vector<16x128xf32> -> vector<16x128xf32>
    %42 = arith.addf %34, %41 : vector<16x128xf32>
    %c3_i32 = arith.constant 3 : i32
    %43 = tpu.dynamic_rotate %6 by %c3_i32 dim 0 : vector<16x64xf32>, i32 -> vector<16x64xf32>
    %44 = vector.broadcast %12 : vector<16x1xf32> to vector<16x64xf32>
    %45 = arith.mulf %43, %44 : vector<16x64xf32>
    %46 = arith.truncf %45 : vector<16x64xf32> to vector<16x64xbf16>
    %c2_34 = arith.constant 2 : index
    %c0_35 = arith.constant 0 : index
    %c0_36 = arith.constant 0 : index
    %47 = vector.load %arg7[%c2_34, %c0_35, %c0_36] : memref<9x64x128xbf16, #tpu.memory_space<vmem>>, vector<1x64x128xbf16>
    %48 = vector.shape_cast %47 : vector<1x64x128xbf16> to vector<64x128xbf16>
    %cst_37 = arith.constant dense<0.000000e+00> : vector<16x128xf32>
    %49 = tpu.matmul %46, %48, %cst_37 {dimension_numbers = #tpu.dot_dimension_numbers<[1], [0], [0], [1], [0, 0, 1, 1], [], []>} : vector<16x64xbf16>, vector<64x128xbf16>, vector<16x128xf32> -> vector<16x128xf32>
    %50 = arith.addf %42, %49 : vector<16x128xf32>
    %c1_i32 = arith.constant 1 : i32
    %51 = tpu.dynamic_rotate %6 by %c1_i32 dim 0 : vector<16x64xf32>, i32 -> vector<16x64xf32>
    %52 = vector.broadcast %14 : vector<16x1xf32> to vector<16x64xf32>
    %53 = arith.mulf %51, %52 : vector<16x64xf32>
    %54 = arith.truncf %53 : vector<16x64xf32> to vector<16x64xbf16>
    %c3_38 = arith.constant 3 : index
    %c0_39 = arith.constant 0 : index
    %c0_40 = arith.constant 0 : index
    %55 = vector.load %arg7[%c3_38, %c0_39, %c0_40] : memref<9x64x128xbf16, #tpu.memory_space<vmem>>, vector<1x64x128xbf16>
    %56 = vector.shape_cast %55 : vector<1x64x128xbf16> to vector<64x128xbf16>
    %cst_41 = arith.constant dense<0.000000e+00> : vector<16x128xf32>
    %57 = tpu.matmul %54, %56, %cst_41 {dimension_numbers = #tpu.dot_dimension_numbers<[1], [0], [0], [1], [0, 0, 1, 1], [], []>} : vector<16x64xbf16>, vector<64x128xbf16>, vector<16x128xf32> -> vector<16x128xf32>
    %58 = arith.addf %50, %57 : vector<16x128xf32>
    %c15_i32 = arith.constant 15 : i32
    %59 = tpu.dynamic_rotate %6 by %c15_i32 dim 0 : vector<16x64xf32>, i32 -> vector<16x64xf32>
    %60 = vector.broadcast %16 : vector<16x1xf32> to vector<16x64xf32>
    %61 = arith.mulf %59, %60 : vector<16x64xf32>
    %62 = arith.truncf %61 : vector<16x64xf32> to vector<16x64xbf16>
    %c5_42 = arith.constant 5 : index
    %c0_43 = arith.constant 0 : index
    %c0_44 = arith.constant 0 : index
    %63 = vector.load %arg7[%c5_42, %c0_43, %c0_44] : memref<9x64x128xbf16, #tpu.memory_space<vmem>>, vector<1x64x128xbf16>
    %64 = vector.shape_cast %63 : vector<1x64x128xbf16> to vector<64x128xbf16>
    %cst_45 = arith.constant dense<0.000000e+00> : vector<16x128xf32>
    %65 = tpu.matmul %62, %64, %cst_45 {dimension_numbers = #tpu.dot_dimension_numbers<[1], [0], [0], [1], [0, 0, 1, 1], [], []>} : vector<16x64xbf16>, vector<64x128xbf16>, vector<16x128xf32> -> vector<16x128xf32>
    %66 = arith.addf %58, %65 : vector<16x128xf32>
    %c13_i32 = arith.constant 13 : i32
    %67 = tpu.dynamic_rotate %6 by %c13_i32 dim 0 : vector<16x64xf32>, i32 -> vector<16x64xf32>
    %68 = vector.broadcast %18 : vector<16x1xf32> to vector<16x64xf32>
    %69 = arith.mulf %67, %68 : vector<16x64xf32>
    %70 = arith.truncf %69 : vector<16x64xf32> to vector<16x64xbf16>
    %c6_46 = arith.constant 6 : index
    %c0_47 = arith.constant 0 : index
    %c0_48 = arith.constant 0 : index
    %71 = vector.load %arg7[%c6_46, %c0_47, %c0_48] : memref<9x64x128xbf16, #tpu.memory_space<vmem>>, vector<1x64x128xbf16>
    %72 = vector.shape_cast %71 : vector<1x64x128xbf16> to vector<64x128xbf16>
    %cst_49 = arith.constant dense<0.000000e+00> : vector<16x128xf32>
    %73 = tpu.matmul %70, %72, %cst_49 {dimension_numbers = #tpu.dot_dimension_numbers<[1], [0], [0], [1], [0, 0, 1, 1], [], []>} : vector<16x64xbf16>, vector<64x128xbf16>, vector<16x128xf32> -> vector<16x128xf32>
    %74 = arith.addf %66, %73 : vector<16x128xf32>
    %c12_i32 = arith.constant 12 : i32
    %75 = tpu.dynamic_rotate %6 by %c12_i32 dim 0 : vector<16x64xf32>, i32 -> vector<16x64xf32>
    %76 = vector.broadcast %20 : vector<16x1xf32> to vector<16x64xf32>
    %77 = arith.mulf %75, %76 : vector<16x64xf32>
    %78 = arith.truncf %77 : vector<16x64xf32> to vector<16x64xbf16>
    %c7_50 = arith.constant 7 : index
    %c0_51 = arith.constant 0 : index
    %c0_52 = arith.constant 0 : index
    %79 = vector.load %arg7[%c7_50, %c0_51, %c0_52] : memref<9x64x128xbf16, #tpu.memory_space<vmem>>, vector<1x64x128xbf16>
    %80 = vector.shape_cast %79 : vector<1x64x128xbf16> to vector<64x128xbf16>
    %cst_53 = arith.constant dense<0.000000e+00> : vector<16x128xf32>
    %81 = tpu.matmul %78, %80, %cst_53 {dimension_numbers = #tpu.dot_dimension_numbers<[1], [0], [0], [1], [0, 0, 1, 1], [], []>} : vector<16x64xbf16>, vector<64x128xbf16>, vector<16x128xf32> -> vector<16x128xf32>
    %82 = arith.addf %74, %81 : vector<16x128xf32>
    %c11_i32 = arith.constant 11 : i32
    %83 = tpu.dynamic_rotate %6 by %c11_i32 dim 0 : vector<16x64xf32>, i32 -> vector<16x64xf32>
    %84 = vector.broadcast %22 : vector<16x1xf32> to vector<16x64xf32>
    %85 = arith.mulf %83, %84 : vector<16x64xf32>
    %86 = arith.truncf %85 : vector<16x64xf32> to vector<16x64xbf16>
    %c8_54 = arith.constant 8 : index
    %c0_55 = arith.constant 0 : index
    %c0_56 = arith.constant 0 : index
    %87 = vector.load %arg7[%c8_54, %c0_55, %c0_56] : memref<9x64x128xbf16, #tpu.memory_space<vmem>>, vector<1x64x128xbf16>
    %88 = vector.shape_cast %87 : vector<1x64x128xbf16> to vector<64x128xbf16>
    %cst_57 = arith.constant dense<0.000000e+00> : vector<16x128xf32>
    %89 = tpu.matmul %86, %88, %cst_57 {dimension_numbers = #tpu.dot_dimension_numbers<[1], [0], [0], [1], [0, 0, 1, 1], [], []>} : vector<16x64xbf16>, vector<64x128xbf16>, vector<16x128xf32> -> vector<16x128xf32>
    %90 = arith.addf %82, %89 : vector<16x128xf32>
    %c0_58 = arith.constant 0 : index
    %c0_59 = arith.constant 0 : index
    %91 = vector.load %arg8[%c0_58, %c0_59] : memref<1x128xf32, #tpu.memory_space<vmem>>, vector<1x128xf32>
    %92 = vector.broadcast %91 : vector<1x128xf32> to vector<16x128xf32>
    %93 = arith.addf %90, %92 : vector<16x128xf32>
    %cst_60 = arith.constant 0.000000e+00 : f32
    %94 = vector.broadcast %cst_60 : f32 to vector<16x128xf32>
    %95 = arith.maximumf %93, %94 : vector<16x128xf32>
    %96 = arith.truncf %95 : vector<16x128xf32> to vector<16x128xbf16>
    %c0_61 = arith.constant 0 : index
    %c0_62 = arith.constant 0 : index
    %97 = vector.load %arg9[%c0_61, %c0_62] : memref<128x64xbf16, #tpu.memory_space<vmem>>, vector<128x64xbf16>
    %cst_63 = arith.constant dense<0.000000e+00> : vector<16x64xf32>
    %98 = tpu.matmul %96, %97, %cst_63 {dimension_numbers = #tpu.dot_dimension_numbers<[1], [0], [0], [1], [0, 0, 1, 1], [], []>} : vector<16x128xbf16>, vector<128x64xbf16>, vector<16x64xf32> -> vector<16x64xf32>
    %99 = arith.addf %6, %98 : vector<16x64xf32>
    %100 = arith.truncf %99 : vector<16x64xf32> to vector<16x64xbf16>
    %c4_64 = arith.constant 4 : index
    %c0_65 = arith.constant 0 : index
    %c0_66 = arith.constant 0 : index
    %101 = vector.load %arg10[%c4_64, %c0_65, %c0_66] : memref<9x64x128xbf16, #tpu.memory_space<vmem>>, vector<1x64x128xbf16>
    %102 = vector.shape_cast %101 : vector<1x64x128xbf16> to vector<64x128xbf16>
    %cst_67 = arith.constant dense<0.000000e+00> : vector<16x128xf32>
    %103 = tpu.matmul %100, %102, %cst_67 {dimension_numbers = #tpu.dot_dimension_numbers<[1], [0], [0], [1], [0, 0, 1, 1], [], []>} : vector<16x64xbf16>, vector<64x128xbf16>, vector<16x128xf32> -> vector<16x128xf32>
    %c5_i32_68 = arith.constant 5 : i32
    %104 = tpu.dynamic_rotate %99 by %c5_i32_68 dim 0 : vector<16x64xf32>, i32 -> vector<16x64xf32>
    %105 = vector.broadcast %8 : vector<16x1xf32> to vector<16x64xf32>
    %106 = arith.mulf %104, %105 : vector<16x64xf32>
    %107 = arith.truncf %106 : vector<16x64xf32> to vector<16x64xbf16>
    %c0_69 = arith.constant 0 : index
    %c0_70 = arith.constant 0 : index
    %c0_71 = arith.constant 0 : index
    %108 = vector.load %arg10[%c0_69, %c0_70, %c0_71] : memref<9x64x128xbf16, #tpu.memory_space<vmem>>, vector<1x64x128xbf16>
    %109 = vector.shape_cast %108 : vector<1x64x128xbf16> to vector<64x128xbf16>
    %cst_72 = arith.constant dense<0.000000e+00> : vector<16x128xf32>
    %110 = tpu.matmul %107, %109, %cst_72 {dimension_numbers = #tpu.dot_dimension_numbers<[1], [0], [0], [1], [0, 0, 1, 1], [], []>} : vector<16x64xbf16>, vector<64x128xbf16>, vector<16x128xf32> -> vector<16x128xf32>
    %111 = arith.addf %103, %110 : vector<16x128xf32>
    %c4_i32_73 = arith.constant 4 : i32
    %112 = tpu.dynamic_rotate %99 by %c4_i32_73 dim 0 : vector<16x64xf32>, i32 -> vector<16x64xf32>
    %113 = vector.broadcast %10 : vector<16x1xf32> to vector<16x64xf32>
    %114 = arith.mulf %112, %113 : vector<16x64xf32>
    %115 = arith.truncf %114 : vector<16x64xf32> to vector<16x64xbf16>
    %c1_74 = arith.constant 1 : index
    %c0_75 = arith.constant 0 : index
    %c0_76 = arith.constant 0 : index
    %116 = vector.load %arg10[%c1_74, %c0_75, %c0_76] : memref<9x64x128xbf16, #tpu.memory_space<vmem>>, vector<1x64x128xbf16>
    %117 = vector.shape_cast %116 : vector<1x64x128xbf16> to vector<64x128xbf16>
    %cst_77 = arith.constant dense<0.000000e+00> : vector<16x128xf32>
    %118 = tpu.matmul %115, %117, %cst_77 {dimension_numbers = #tpu.dot_dimension_numbers<[1], [0], [0], [1], [0, 0, 1, 1], [], []>} : vector<16x64xbf16>, vector<64x128xbf16>, vector<16x128xf32> -> vector<16x128xf32>
    %119 = arith.addf %111, %118 : vector<16x128xf32>
    %c3_i32_78 = arith.constant 3 : i32
    %120 = tpu.dynamic_rotate %99 by %c3_i32_78 dim 0 : vector<16x64xf32>, i32 -> vector<16x64xf32>
    %121 = vector.broadcast %12 : vector<16x1xf32> to vector<16x64xf32>
    %122 = arith.mulf %120, %121 : vector<16x64xf32>
    %123 = arith.truncf %122 : vector<16x64xf32> to vector<16x64xbf16>
    %c2_79 = arith.constant 2 : index
    %c0_80 = arith.constant 0 : index
    %c0_81 = arith.constant 0 : index
    %124 = vector.load %arg10[%c2_79, %c0_80, %c0_81] : memref<9x64x128xbf16, #tpu.memory_space<vmem>>, vector<1x64x128xbf16>
    %125 = vector.shape_cast %124 : vector<1x64x128xbf16> to vector<64x128xbf16>
    %cst_82 = arith.constant dense<0.000000e+00> : vector<16x128xf32>
    %126 = tpu.matmul %123, %125, %cst_82 {dimension_numbers = #tpu.dot_dimension_numbers<[1], [0], [0], [1], [0, 0, 1, 1], [], []>} : vector<16x64xbf16>, vector<64x128xbf16>, vector<16x128xf32> -> vector<16x128xf32>
    %127 = arith.addf %119, %126 : vector<16x128xf32>
    %c1_i32_83 = arith.constant 1 : i32
    %128 = tpu.dynamic_rotate %99 by %c1_i32_83 dim 0 : vector<16x64xf32>, i32 -> vector<16x64xf32>
    %129 = vector.broadcast %14 : vector<16x1xf32> to vector<16x64xf32>
    %130 = arith.mulf %128, %129 : vector<16x64xf32>
    %131 = arith.truncf %130 : vector<16x64xf32> to vector<16x64xbf16>
    %c3_84 = arith.constant 3 : index
    %c0_85 = arith.constant 0 : index
    %c0_86 = arith.constant 0 : index
    %132 = vector.load %arg10[%c3_84, %c0_85, %c0_86] : memref<9x64x128xbf16, #tpu.memory_space<vmem>>, vector<1x64x128xbf16>
    %133 = vector.shape_cast %132 : vector<1x64x128xbf16> to vector<64x128xbf16>
    %cst_87 = arith.constant dense<0.000000e+00> : vector<16x128xf32>
    %134 = tpu.matmul %131, %133, %cst_87 {dimension_numbers = #tpu.dot_dimension_numbers<[1], [0], [0], [1], [0, 0, 1, 1], [], []>} : vector<16x64xbf16>, vector<64x128xbf16>, vector<16x128xf32> -> vector<16x128xf32>
    %135 = arith.addf %127, %134 : vector<16x128xf32>
    %c15_i32_88 = arith.constant 15 : i32
    %136 = tpu.dynamic_rotate %99 by %c15_i32_88 dim 0 : vector<16x64xf32>, i32 -> vector<16x64xf32>
    %137 = vector.broadcast %16 : vector<16x1xf32> to vector<16x64xf32>
    %138 = arith.mulf %136, %137 : vector<16x64xf32>
    %139 = arith.truncf %138 : vector<16x64xf32> to vector<16x64xbf16>
    %c5_89 = arith.constant 5 : index
    %c0_90 = arith.constant 0 : index
    %c0_91 = arith.constant 0 : index
    %140 = vector.load %arg10[%c5_89, %c0_90, %c0_91] : memref<9x64x128xbf16, #tpu.memory_space<vmem>>, vector<1x64x128xbf16>
    %141 = vector.shape_cast %140 : vector<1x64x128xbf16> to vector<64x128xbf16>
    %cst_92 = arith.constant dense<0.000000e+00> : vector<16x128xf32>
    %142 = tpu.matmul %139, %141, %cst_92 {dimension_numbers = #tpu.dot_dimension_numbers<[1], [0], [0], [1], [0, 0, 1, 1], [], []>} : vector<16x64xbf16>, vector<64x128xbf16>, vector<16x128xf32> -> vector<16x128xf32>
    %143 = arith.addf %135, %142 : vector<16x128xf32>
    %c13_i32_93 = arith.constant 13 : i32
    %144 = tpu.dynamic_rotate %99 by %c13_i32_93 dim 0 : vector<16x64xf32>, i32 -> vector<16x64xf32>
    %145 = vector.broadcast %18 : vector<16x1xf32> to vector<16x64xf32>
    %146 = arith.mulf %144, %145 : vector<16x64xf32>
    %147 = arith.truncf %146 : vector<16x64xf32> to vector<16x64xbf16>
    %c6_94 = arith.constant 6 : index
    %c0_95 = arith.constant 0 : index
    %c0_96 = arith.constant 0 : index
    %148 = vector.load %arg10[%c6_94, %c0_95, %c0_96] : memref<9x64x128xbf16, #tpu.memory_space<vmem>>, vector<1x64x128xbf16>
    %149 = vector.shape_cast %148 : vector<1x64x128xbf16> to vector<64x128xbf16>
    %cst_97 = arith.constant dense<0.000000e+00> : vector<16x128xf32>
    %150 = tpu.matmul %147, %149, %cst_97 {dimension_numbers = #tpu.dot_dimension_numbers<[1], [0], [0], [1], [0, 0, 1, 1], [], []>} : vector<16x64xbf16>, vector<64x128xbf16>, vector<16x128xf32> -> vector<16x128xf32>
    %151 = arith.addf %143, %150 : vector<16x128xf32>
    %c12_i32_98 = arith.constant 12 : i32
    %152 = tpu.dynamic_rotate %99 by %c12_i32_98 dim 0 : vector<16x64xf32>, i32 -> vector<16x64xf32>
    %153 = vector.broadcast %20 : vector<16x1xf32> to vector<16x64xf32>
    %154 = arith.mulf %152, %153 : vector<16x64xf32>
    %155 = arith.truncf %154 : vector<16x64xf32> to vector<16x64xbf16>
    %c7_99 = arith.constant 7 : index
    %c0_100 = arith.constant 0 : index
    %c0_101 = arith.constant 0 : index
    %156 = vector.load %arg10[%c7_99, %c0_100, %c0_101] : memref<9x64x128xbf16, #tpu.memory_space<vmem>>, vector<1x64x128xbf16>
    %157 = vector.shape_cast %156 : vector<1x64x128xbf16> to vector<64x128xbf16>
    %cst_102 = arith.constant dense<0.000000e+00> : vector<16x128xf32>
    %158 = tpu.matmul %155, %157, %cst_102 {dimension_numbers = #tpu.dot_dimension_numbers<[1], [0], [0], [1], [0, 0, 1, 1], [], []>} : vector<16x64xbf16>, vector<64x128xbf16>, vector<16x128xf32> -> vector<16x128xf32>
    %159 = arith.addf %151, %158 : vector<16x128xf32>
    %c11_i32_103 = arith.constant 11 : i32
    %160 = tpu.dynamic_rotate %99 by %c11_i32_103 dim 0 : vector<16x64xf32>, i32 -> vector<16x64xf32>
    %161 = vector.broadcast %22 : vector<16x1xf32> to vector<16x64xf32>
    %162 = arith.mulf %160, %161 : vector<16x64xf32>
    %163 = arith.truncf %162 : vector<16x64xf32> to vector<16x64xbf16>
    %c8_104 = arith.constant 8 : index
    %c0_105 = arith.constant 0 : index
    %c0_106 = arith.constant 0 : index
    %164 = vector.load %arg10[%c8_104, %c0_105, %c0_106] : memref<9x64x128xbf16, #tpu.memory_space<vmem>>, vector<1x64x128xbf16>
    %165 = vector.shape_cast %164 : vector<1x64x128xbf16> to vector<64x128xbf16>
    %cst_107 = arith.constant dense<0.000000e+00> : vector<16x128xf32>
    %166 = tpu.matmul %163, %165, %cst_107 {dimension_numbers = #tpu.dot_dimension_numbers<[1], [0], [0], [1], [0, 0, 1, 1], [], []>} : vector<16x64xbf16>, vector<64x128xbf16>, vector<16x128xf32> -> vector<16x128xf32>
    %167 = arith.addf %159, %166 : vector<16x128xf32>
    %c0_108 = arith.constant 0 : index
    %c0_109 = arith.constant 0 : index
    %168 = vector.load %arg11[%c0_108, %c0_109] : memref<1x128xf32, #tpu.memory_space<vmem>>, vector<1x128xf32>
    %169 = vector.broadcast %168 : vector<1x128xf32> to vector<16x128xf32>
    %170 = arith.addf %167, %169 : vector<16x128xf32>
    %cst_110 = arith.constant 0.000000e+00 : f32
    %171 = vector.broadcast %cst_110 : f32 to vector<16x128xf32>
    %172 = arith.maximumf %170, %171 : vector<16x128xf32>
    %173 = arith.truncf %172 : vector<16x128xf32> to vector<16x128xbf16>
    %c0_111 = arith.constant 0 : index
    %c0_112 = arith.constant 0 : index
    %174 = vector.load %arg12[%c0_111, %c0_112] : memref<128x64xbf16, #tpu.memory_space<vmem>>, vector<128x64xbf16>
    %cst_113 = arith.constant dense<0.000000e+00> : vector<16x64xf32>
    %175 = tpu.matmul %173, %174, %cst_113 {dimension_numbers = #tpu.dot_dimension_numbers<[1], [0], [0], [1], [0, 0, 1, 1], [], []>} : vector<16x128xbf16>, vector<128x64xbf16>, vector<16x64xf32> -> vector<16x64xf32>
    %176 = arith.addf %99, %175 : vector<16x64xf32>
    %177 = arith.truncf %176 : vector<16x64xf32> to vector<16x64xbf16>
    %c0_114 = arith.constant 0 : index
    %c0_115 = arith.constant 0 : index
    %c0_116 = arith.constant 0 : index
    %178 = vector.load %arg13[%c0_114, %c0_115, %c0_116] : memref<1x16x64xbf16, #tpu.memory_space<vmem>>, vector<1x16x64xbf16>
    %179 = vector.shape_cast %178 : vector<1x16x64xbf16> to vector<16x64xbf16>
    %180 = vector.shape_cast %177 : vector<16x64xbf16> to vector<1x16x64xbf16>
    tpu.vector_store %arg13[%c0_114, %c0_115, %c0_116], %180 {strides = array<i32>} : memref<1x16x64xbf16, #tpu.memory_space<vmem>>, vector<1x16x64xbf16>,
    %c0_117 = arith.constant 0 : index
    %c0_118 = arith.constant 0 : index
    %181 = vector.load %arg5[%c0_117, %c0_118] : memref<1x64xf32, #tpu.memory_space<vmem>>, vector<1x64xf32>
    %182 = vector.broadcast %181 : vector<1x64xf32> to vector<16x64xf32>
    %183 = arith.mulf %176, %182 : vector<16x64xf32>
    %c0_119 = arith.constant 0 : index
    %c0_120 = arith.constant 0 : index
    %184 = vector.load %arg6[%c0_119, %c0_120] : memref<1x64xf32, #tpu.memory_space<vmem>>, vector<1x64xf32>
    %185 = vector.broadcast %184 : vector<1x64xf32> to vector<16x64xf32>
    %186 = arith.addf %183, %185 : vector<16x64xf32>
    %c0_121 = arith.constant 0 : index
    %c0_122 = arith.constant 0 : index
    %c0_123 = arith.constant 0 : index
    %187 = vector.load %arg14[%c0_121, %c0_122, %c0_123] : memref<1x16x64xf32, #tpu.memory_space<vmem>>, vector<1x16x64xf32>
    %188 = vector.shape_cast %187 : vector<1x16x64xf32> to vector<16x64xf32>
    %189 = vector.shape_cast %186 : vector<16x64xf32> to vector<1x16x64xf32>
    tpu.vector_store %arg14[%c0_121, %c0_122, %c0_123], %189 {strides = array<i32>} : memref<1x16x64xf32, #tpu.memory_space<vmem>>, vector<1x16x64xf32>,
    return
  }
  func.func @transform_0(%arg0: i32) -> (i32, i32, i32) {
    %c0_i32 = arith.constant 0 : i32
    %c0_i32_0 = arith.constant 0 : i32
    %c0_i32_1 = arith.constant 0 : i32
    return %arg0, %c0_i32, %c0_i32_0 : i32, i32, i32
  }
  func.func @transform_1(%arg0: i32) -> (i32, i32) {
    %c0_i32 = arith.constant 0 : i32
    %c0_i32_0 = arith.constant 0 : i32
    %c0_i32_1 = arith.constant 0 : i32
    return %c0_i32, %c0_i32_0 : i32, i32
  }
  func.func @transform_2(%arg0: i32) -> (i32, i32) {
    %c0_i32 = arith.constant 0 : i32
    %c0_i32_0 = arith.constant 0 : i32
    %c0_i32_1 = arith.constant 0 : i32
    return %c0_i32, %c0_i32_0 : i32, i32
  }
  func.func @transform_3(%arg0: i32) -> (i32, i32, i32) {
    %c0_i32 = arith.constant 0 : i32
    %c0_i32_0 = arith.constant 0 : i32
    %c0_i32_1 = arith.constant 0 : i32
    %c0_i32_2 = arith.constant 0 : i32
    return %c0_i32, %c0_i32_0, %c0_i32_1 : i32, i32, i32
  }
  func.func @transform_4(%arg0: i32) -> (i32, i32) {
    %c0_i32 = arith.constant 0 : i32
    %c0_i32_0 = arith.constant 0 : i32
    %c0_i32_1 = arith.constant 0 : i32
    return %c0_i32, %c0_i32_0 : i32, i32
  }
  func.func @transform_5(%arg0: i32) -> (i32, i32) {
    %c0_i32 = arith.constant 0 : i32
    %c0_i32_0 = arith.constant 0 : i32
    %c0_i32_1 = arith.constant 0 : i32
    return %c0_i32, %c0_i32_0 : i32, i32
  }
  func.func @transform_6(%arg0: i32) -> (i32, i32, i32) {
    %c0_i32 = arith.constant 0 : i32
    %c0_i32_0 = arith.constant 0 : i32
    %c0_i32_1 = arith.constant 0 : i32
    %c0_i32_2 = arith.constant 0 : i32
    return %c0_i32, %c0_i32_0, %c0_i32_1 : i32, i32, i32
  }
  func.func @transform_7(%arg0: i32) -> (i32, i32) {
    %c0_i32 = arith.constant 0 : i32
    %c0_i32_0 = arith.constant 0 : i32
    %c0_i32_1 = arith.constant 0 : i32
    return %c0_i32, %c0_i32_0 : i32, i32
  }
  func.func @transform_8(%arg0: i32) -> (i32, i32) {
    %c0_i32 = arith.constant 0 : i32
    %c0_i32_0 = arith.constant 0 : i32
    %c0_i32_1 = arith.constant 0 : i32
    return %c0_i32, %c0_i32_0 : i32, i32
  }
  func.func @transform_9(%arg0: i32) -> (i32, i32, i32) {
    %c0_i32 = arith.constant 0 : i32
    %c0_i32_0 = arith.constant 0 : i32
    %c0_i32_1 = arith.constant 0 : i32
    %c0_i32_2 = arith.constant 0 : i32
    return %c0_i32, %c0_i32_0, %c0_i32_1 : i32, i32, i32
  }
  func.func @transform_10(%arg0: i32) -> (i32, i32) {
    %c0_i32 = arith.constant 0 : i32
    %c0_i32_0 = arith.constant 0 : i32
    %c0_i32_1 = arith.constant 0 : i32
    return %c0_i32, %c0_i32_0 : i32, i32
  }
  func.func @transform_11(%arg0: i32) -> (i32, i32) {
    %c0_i32 = arith.constant 0 : i32
    %c0_i32_0 = arith.constant 0 : i32
    %c0_i32_1 = arith.constant 0 : i32
    return %c0_i32, %c0_i32_0 : i32, i32
  }
  func.func @transform_12(%arg0: i32) -> (i32, i32, i32) {
    %c0_i32 = arith.constant 0 : i32
    %c0_i32_0 = arith.constant 0 : i32
    %c0_i32_1 = arith.constant 0 : i32
    return %arg0, %c0_i32, %c0_i32_0 : i32, i32, i32
  }
  func.func @transform_13(%arg0: i32) -> (i32, i32, i32) {
    %c0_i32 = arith.constant 0 : i32
    %c0_i32_0 = arith.constant 0 : i32
    %c0_i32_1 = arith.constant 0 : i32
    return %arg0, %c0_i32, %c0_i32_0 : i32, i32, i32
  }
}

module attributes {stable_mosaic.version = 11 : i64} {
  func.func @kernel(%arg0: i32, %arg1: memref<1x4x256xbf16, #tpu.memory_space<vmem>>, %arg2: memref<256x128xbf16, #tpu.memory_space<vmem>>, %arg3: memref<1x128xf32, #tpu.memory_space<vmem>>, %arg4: memref<9x4x4xf32, #tpu.memory_space<vmem>>, %arg5: memref<1x128xf32, #tpu.memory_space<vmem>>, %arg6: memref<1x128xf32, #tpu.memory_space<vmem>>, %arg7: memref<9x128x256xbf16, #tpu.memory_space<vmem>>, %arg8: memref<1x256xf32, #tpu.memory_space<vmem>>, %arg9: memref<256x128xbf16, #tpu.memory_space<vmem>>, %arg10: memref<1x4x128xbf16, #tpu.memory_space<vmem>>, %arg11: memref<1x4x128xf32, #tpu.memory_space<vmem>>) attributes {dimension_semantics = [#tpu.dimension_semantics<parallel>], iteration_bounds = array<i64: 2>, scalar_prefetch = 0 : i64, scratch_operands = 0 : i64, tpu.core_type = #tpu.core_type<tc>, window_params = [{transform_indices = @transform_0, window_bounds = array<i64: 1, 4, 256>}, {pipeline_mode = #tpu.pipeline_mode<synchronous>, transform_indices = @transform_1, window_bounds = array<i64: 256, 128>}, {pipeline_mode = #tpu.pipeline_mode<synchronous>, transform_indices = @transform_2, window_bounds = array<i64: 1, 128>}, {pipeline_mode = #tpu.pipeline_mode<synchronous>, transform_indices = @transform_3, window_bounds = array<i64: 9, 4, 4>}, {pipeline_mode = #tpu.pipeline_mode<synchronous>, transform_indices = @transform_4, window_bounds = array<i64: 1, 128>}, {pipeline_mode = #tpu.pipeline_mode<synchronous>, transform_indices = @transform_5, window_bounds = array<i64: 1, 128>}, {pipeline_mode = #tpu.pipeline_mode<synchronous>, transform_indices = @transform_6, window_bounds = array<i64: 9, 128, 256>}, {pipeline_mode = #tpu.pipeline_mode<synchronous>, transform_indices = @transform_7, window_bounds = array<i64: 1, 256>}, {pipeline_mode = #tpu.pipeline_mode<synchronous>, transform_indices = @transform_8, window_bounds = array<i64: 256, 128>}, {transform_indices = @transform_9, window_bounds = array<i64: 1, 4, 128>}, {transform_indices = @transform_10, window_bounds = array<i64: 1, 4, 128>}]} {
    %c0 = arith.constant 0 : index
    %c0_0 = arith.constant 0 : index
    %c0_1 = arith.constant 0 : index
    %0 = vector.load %arg1[%c0, %c0_0, %c0_1] : memref<1x4x256xbf16, #tpu.memory_space<vmem>>, vector<1x4x256xbf16>
    %1 = vector.shape_cast %0 : vector<1x4x256xbf16> to vector<4x256xbf16>
    %c0_2 = arith.constant 0 : index
    %c0_3 = arith.constant 0 : index
    %2 = vector.load %arg2[%c0_2, %c0_3] : memref<256x128xbf16, #tpu.memory_space<vmem>>, vector<256x128xbf16>
    %cst = arith.constant dense<0.000000e+00> : vector<4x128xf32>
    %3 = tpu.matmul %1, %2, %cst {dimension_numbers = #tpu.dot_dimension_numbers<[1], [0], [0], [1], [0, 0, 1, 1], [], []>} : vector<4x256xbf16>, vector<256x128xbf16>, vector<4x128xf32> -> vector<4x128xf32>
    %c0_4 = arith.constant 0 : index
    %c0_5 = arith.constant 0 : index
    %4 = vector.load %arg3[%c0_4, %c0_5] : memref<1x128xf32, #tpu.memory_space<vmem>>, vector<1x128xf32>
    %5 = vector.broadcast %4 : vector<1x128xf32> to vector<4x128xf32>
    %6 = arith.addf %3, %5 : vector<4x128xf32>
    %c0_6 = arith.constant 0 : index
    %c0_7 = arith.constant 0 : index
    %c0_8 = arith.constant 0 : index
    %7 = vector.load %arg4[%c0_6, %c0_7, %c0_8] : memref<9x4x4xf32, #tpu.memory_space<vmem>>, vector<1x4x4xf32>
    %8 = vector.shape_cast %7 : vector<1x4x4xf32> to vector<4x4xf32>
    %c1 = arith.constant 1 : index
    %c0_9 = arith.constant 0 : index
    %c0_10 = arith.constant 0 : index
    %9 = vector.load %arg4[%c1, %c0_9, %c0_10] : memref<9x4x4xf32, #tpu.memory_space<vmem>>, vector<1x4x4xf32>
    %10 = vector.shape_cast %9 : vector<1x4x4xf32> to vector<4x4xf32>
    %c2 = arith.constant 2 : index
    %c0_11 = arith.constant 0 : index
    %c0_12 = arith.constant 0 : index
    %11 = vector.load %arg4[%c2, %c0_11, %c0_12] : memref<9x4x4xf32, #tpu.memory_space<vmem>>, vector<1x4x4xf32>
    %12 = vector.shape_cast %11 : vector<1x4x4xf32> to vector<4x4xf32>
    %c3 = arith.constant 3 : index
    %c0_13 = arith.constant 0 : index
    %c0_14 = arith.constant 0 : index
    %13 = vector.load %arg4[%c3, %c0_13, %c0_14] : memref<9x4x4xf32, #tpu.memory_space<vmem>>, vector<1x4x4xf32>
    %14 = vector.shape_cast %13 : vector<1x4x4xf32> to vector<4x4xf32>
    %c5 = arith.constant 5 : index
    %c0_15 = arith.constant 0 : index
    %c0_16 = arith.constant 0 : index
    %15 = vector.load %arg4[%c5, %c0_15, %c0_16] : memref<9x4x4xf32, #tpu.memory_space<vmem>>, vector<1x4x4xf32>
    %16 = vector.shape_cast %15 : vector<1x4x4xf32> to vector<4x4xf32>
    %c6 = arith.constant 6 : index
    %c0_17 = arith.constant 0 : index
    %c0_18 = arith.constant 0 : index
    %17 = vector.load %arg4[%c6, %c0_17, %c0_18] : memref<9x4x4xf32, #tpu.memory_space<vmem>>, vector<1x4x4xf32>
    %18 = vector.shape_cast %17 : vector<1x4x4xf32> to vector<4x4xf32>
    %c7 = arith.constant 7 : index
    %c0_19 = arith.constant 0 : index
    %c0_20 = arith.constant 0 : index
    %19 = vector.load %arg4[%c7, %c0_19, %c0_20] : memref<9x4x4xf32, #tpu.memory_space<vmem>>, vector<1x4x4xf32>
    %20 = vector.shape_cast %19 : vector<1x4x4xf32> to vector<4x4xf32>
    %c8 = arith.constant 8 : index
    %c0_21 = arith.constant 0 : index
    %c0_22 = arith.constant 0 : index
    %21 = vector.load %arg4[%c8, %c0_21, %c0_22] : memref<9x4x4xf32, #tpu.memory_space<vmem>>, vector<1x4x4xf32>
    %22 = vector.shape_cast %21 : vector<1x4x4xf32> to vector<4x4xf32>
    %23 = arith.truncf %6 : vector<4x128xf32> to vector<4x128xbf16>
    %c4 = arith.constant 4 : index
    %c0_23 = arith.constant 0 : index
    %c0_24 = arith.constant 0 : index
    %24 = vector.load %arg7[%c4, %c0_23, %c0_24] : memref<9x128x256xbf16, #tpu.memory_space<vmem>>, vector<1x128x256xbf16>
    %25 = vector.shape_cast %24 : vector<1x128x256xbf16> to vector<128x256xbf16>
    %cst_25 = arith.constant dense<0.000000e+00> : vector<4x256xf32>
    %26 = tpu.matmul %23, %25, %cst_25 {dimension_numbers = #tpu.dot_dimension_numbers<[1], [0], [0], [1], [0, 0, 1, 1], [], []>} : vector<4x128xbf16>, vector<128x256xbf16>, vector<4x256xf32> -> vector<4x256xf32>
    %cst_26 = arith.constant dense<0.000000e+00> : vector<4x128xf32>
    %27 = tpu.matmul %8, %6, %cst_26 {dimension_numbers = #tpu.dot_dimension_numbers<[1], [0], [0], [1], [0, 0, 1, 1], [], []>} : vector<4x4xf32>, vector<4x128xf32>, vector<4x128xf32> -> vector<4x128xf32>
    %28 = arith.truncf %27 : vector<4x128xf32> to vector<4x128xbf16>
    %c0_27 = arith.constant 0 : index
    %c0_28 = arith.constant 0 : index
    %c0_29 = arith.constant 0 : index
    %29 = vector.load %arg7[%c0_27, %c0_28, %c0_29] : memref<9x128x256xbf16, #tpu.memory_space<vmem>>, vector<1x128x256xbf16>
    %30 = vector.shape_cast %29 : vector<1x128x256xbf16> to vector<128x256xbf16>
    %cst_30 = arith.constant dense<0.000000e+00> : vector<4x256xf32>
    %31 = tpu.matmul %28, %30, %cst_30 {dimension_numbers = #tpu.dot_dimension_numbers<[1], [0], [0], [1], [0, 0, 1, 1], [], []>} : vector<4x128xbf16>, vector<128x256xbf16>, vector<4x256xf32> -> vector<4x256xf32>
    %32 = arith.addf %26, %31 : vector<4x256xf32>
    %cst_31 = arith.constant dense<0.000000e+00> : vector<4x128xf32>
    %33 = tpu.matmul %10, %6, %cst_31 {dimension_numbers = #tpu.dot_dimension_numbers<[1], [0], [0], [1], [0, 0, 1, 1], [], []>} : vector<4x4xf32>, vector<4x128xf32>, vector<4x128xf32> -> vector<4x128xf32>
    %34 = arith.truncf %33 : vector<4x128xf32> to vector<4x128xbf16>
    %c1_32 = arith.constant 1 : index
    %c0_33 = arith.constant 0 : index
    %c0_34 = arith.constant 0 : index
    %35 = vector.load %arg7[%c1_32, %c0_33, %c0_34] : memref<9x128x256xbf16, #tpu.memory_space<vmem>>, vector<1x128x256xbf16>
    %36 = vector.shape_cast %35 : vector<1x128x256xbf16> to vector<128x256xbf16>
    %cst_35 = arith.constant dense<0.000000e+00> : vector<4x256xf32>
    %37 = tpu.matmul %34, %36, %cst_35 {dimension_numbers = #tpu.dot_dimension_numbers<[1], [0], [0], [1], [0, 0, 1, 1], [], []>} : vector<4x128xbf16>, vector<128x256xbf16>, vector<4x256xf32> -> vector<4x256xf32>
    %38 = arith.addf %32, %37 : vector<4x256xf32>
    %cst_36 = arith.constant dense<0.000000e+00> : vector<4x128xf32>
    %39 = tpu.matmul %12, %6, %cst_36 {dimension_numbers = #tpu.dot_dimension_numbers<[1], [0], [0], [1], [0, 0, 1, 1], [], []>} : vector<4x4xf32>, vector<4x128xf32>, vector<4x128xf32> -> vector<4x128xf32>
    %40 = arith.truncf %39 : vector<4x128xf32> to vector<4x128xbf16>
    %c2_37 = arith.constant 2 : index
    %c0_38 = arith.constant 0 : index
    %c0_39 = arith.constant 0 : index
    %41 = vector.load %arg7[%c2_37, %c0_38, %c0_39] : memref<9x128x256xbf16, #tpu.memory_space<vmem>>, vector<1x128x256xbf16>
    %42 = vector.shape_cast %41 : vector<1x128x256xbf16> to vector<128x256xbf16>
    %cst_40 = arith.constant dense<0.000000e+00> : vector<4x256xf32>
    %43 = tpu.matmul %40, %42, %cst_40 {dimension_numbers = #tpu.dot_dimension_numbers<[1], [0], [0], [1], [0, 0, 1, 1], [], []>} : vector<4x128xbf16>, vector<128x256xbf16>, vector<4x256xf32> -> vector<4x256xf32>
    %44 = arith.addf %38, %43 : vector<4x256xf32>
    %cst_41 = arith.constant dense<0.000000e+00> : vector<4x128xf32>
    %45 = tpu.matmul %14, %6, %cst_41 {dimension_numbers = #tpu.dot_dimension_numbers<[1], [0], [0], [1], [0, 0, 1, 1], [], []>} : vector<4x4xf32>, vector<4x128xf32>, vector<4x128xf32> -> vector<4x128xf32>
    %46 = arith.truncf %45 : vector<4x128xf32> to vector<4x128xbf16>
    %c3_42 = arith.constant 3 : index
    %c0_43 = arith.constant 0 : index
    %c0_44 = arith.constant 0 : index
    %47 = vector.load %arg7[%c3_42, %c0_43, %c0_44] : memref<9x128x256xbf16, #tpu.memory_space<vmem>>, vector<1x128x256xbf16>
    %48 = vector.shape_cast %47 : vector<1x128x256xbf16> to vector<128x256xbf16>
    %cst_45 = arith.constant dense<0.000000e+00> : vector<4x256xf32>
    %49 = tpu.matmul %46, %48, %cst_45 {dimension_numbers = #tpu.dot_dimension_numbers<[1], [0], [0], [1], [0, 0, 1, 1], [], []>} : vector<4x128xbf16>, vector<128x256xbf16>, vector<4x256xf32> -> vector<4x256xf32>
    %50 = arith.addf %44, %49 : vector<4x256xf32>
    %cst_46 = arith.constant dense<0.000000e+00> : vector<4x128xf32>
    %51 = tpu.matmul %16, %6, %cst_46 {dimension_numbers = #tpu.dot_dimension_numbers<[1], [0], [0], [1], [0, 0, 1, 1], [], []>} : vector<4x4xf32>, vector<4x128xf32>, vector<4x128xf32> -> vector<4x128xf32>
    %52 = arith.truncf %51 : vector<4x128xf32> to vector<4x128xbf16>
    %c5_47 = arith.constant 5 : index
    %c0_48 = arith.constant 0 : index
    %c0_49 = arith.constant 0 : index
    %53 = vector.load %arg7[%c5_47, %c0_48, %c0_49] : memref<9x128x256xbf16, #tpu.memory_space<vmem>>, vector<1x128x256xbf16>
    %54 = vector.shape_cast %53 : vector<1x128x256xbf16> to vector<128x256xbf16>
    %cst_50 = arith.constant dense<0.000000e+00> : vector<4x256xf32>
    %55 = tpu.matmul %52, %54, %cst_50 {dimension_numbers = #tpu.dot_dimension_numbers<[1], [0], [0], [1], [0, 0, 1, 1], [], []>} : vector<4x128xbf16>, vector<128x256xbf16>, vector<4x256xf32> -> vector<4x256xf32>
    %56 = arith.addf %50, %55 : vector<4x256xf32>
    %cst_51 = arith.constant dense<0.000000e+00> : vector<4x128xf32>
    %57 = tpu.matmul %18, %6, %cst_51 {dimension_numbers = #tpu.dot_dimension_numbers<[1], [0], [0], [1], [0, 0, 1, 1], [], []>} : vector<4x4xf32>, vector<4x128xf32>, vector<4x128xf32> -> vector<4x128xf32>
    %58 = arith.truncf %57 : vector<4x128xf32> to vector<4x128xbf16>
    %c6_52 = arith.constant 6 : index
    %c0_53 = arith.constant 0 : index
    %c0_54 = arith.constant 0 : index
    %59 = vector.load %arg7[%c6_52, %c0_53, %c0_54] : memref<9x128x256xbf16, #tpu.memory_space<vmem>>, vector<1x128x256xbf16>
    %60 = vector.shape_cast %59 : vector<1x128x256xbf16> to vector<128x256xbf16>
    %cst_55 = arith.constant dense<0.000000e+00> : vector<4x256xf32>
    %61 = tpu.matmul %58, %60, %cst_55 {dimension_numbers = #tpu.dot_dimension_numbers<[1], [0], [0], [1], [0, 0, 1, 1], [], []>} : vector<4x128xbf16>, vector<128x256xbf16>, vector<4x256xf32> -> vector<4x256xf32>
    %62 = arith.addf %56, %61 : vector<4x256xf32>
    %cst_56 = arith.constant dense<0.000000e+00> : vector<4x128xf32>
    %63 = tpu.matmul %20, %6, %cst_56 {dimension_numbers = #tpu.dot_dimension_numbers<[1], [0], [0], [1], [0, 0, 1, 1], [], []>} : vector<4x4xf32>, vector<4x128xf32>, vector<4x128xf32> -> vector<4x128xf32>
    %64 = arith.truncf %63 : vector<4x128xf32> to vector<4x128xbf16>
    %c7_57 = arith.constant 7 : index
    %c0_58 = arith.constant 0 : index
    %c0_59 = arith.constant 0 : index
    %65 = vector.load %arg7[%c7_57, %c0_58, %c0_59] : memref<9x128x256xbf16, #tpu.memory_space<vmem>>, vector<1x128x256xbf16>
    %66 = vector.shape_cast %65 : vector<1x128x256xbf16> to vector<128x256xbf16>
    %cst_60 = arith.constant dense<0.000000e+00> : vector<4x256xf32>
    %67 = tpu.matmul %64, %66, %cst_60 {dimension_numbers = #tpu.dot_dimension_numbers<[1], [0], [0], [1], [0, 0, 1, 1], [], []>} : vector<4x128xbf16>, vector<128x256xbf16>, vector<4x256xf32> -> vector<4x256xf32>
    %68 = arith.addf %62, %67 : vector<4x256xf32>
    %cst_61 = arith.constant dense<0.000000e+00> : vector<4x128xf32>
    %69 = tpu.matmul %22, %6, %cst_61 {dimension_numbers = #tpu.dot_dimension_numbers<[1], [0], [0], [1], [0, 0, 1, 1], [], []>} : vector<4x4xf32>, vector<4x128xf32>, vector<4x128xf32> -> vector<4x128xf32>
    %70 = arith.truncf %69 : vector<4x128xf32> to vector<4x128xbf16>
    %c8_62 = arith.constant 8 : index
    %c0_63 = arith.constant 0 : index
    %c0_64 = arith.constant 0 : index
    %71 = vector.load %arg7[%c8_62, %c0_63, %c0_64] : memref<9x128x256xbf16, #tpu.memory_space<vmem>>, vector<1x128x256xbf16>
    %72 = vector.shape_cast %71 : vector<1x128x256xbf16> to vector<128x256xbf16>
    %cst_65 = arith.constant dense<0.000000e+00> : vector<4x256xf32>
    %73 = tpu.matmul %70, %72, %cst_65 {dimension_numbers = #tpu.dot_dimension_numbers<[1], [0], [0], [1], [0, 0, 1, 1], [], []>} : vector<4x128xbf16>, vector<128x256xbf16>, vector<4x256xf32> -> vector<4x256xf32>
    %74 = arith.addf %68, %73 : vector<4x256xf32>
    %c0_66 = arith.constant 0 : index
    %c0_67 = arith.constant 0 : index
    %75 = vector.load %arg8[%c0_66, %c0_67] : memref<1x256xf32, #tpu.memory_space<vmem>>, vector<1x256xf32>
    %76 = vector.broadcast %75 : vector<1x256xf32> to vector<4x256xf32>
    %77 = arith.addf %74, %76 : vector<4x256xf32>
    %cst_68 = arith.constant 0.000000e+00 : f32
    %78 = vector.broadcast %cst_68 : f32 to vector<4x256xf32>
    %79 = arith.maximumf %77, %78 : vector<4x256xf32>
    %80 = arith.truncf %79 : vector<4x256xf32> to vector<4x256xbf16>
    %c0_69 = arith.constant 0 : index
    %c0_70 = arith.constant 0 : index
    %81 = vector.load %arg9[%c0_69, %c0_70] : memref<256x128xbf16, #tpu.memory_space<vmem>>, vector<256x128xbf16>
    %cst_71 = arith.constant dense<0.000000e+00> : vector<4x128xf32>
    %82 = tpu.matmul %80, %81, %cst_71 {dimension_numbers = #tpu.dot_dimension_numbers<[1], [0], [0], [1], [0, 0, 1, 1], [], []>} : vector<4x256xbf16>, vector<256x128xbf16>, vector<4x128xf32> -> vector<4x128xf32>
    %83 = arith.addf %6, %82 : vector<4x128xf32>
    %84 = arith.truncf %83 : vector<4x128xf32> to vector<4x128xbf16>
    %c0_72 = arith.constant 0 : index
    %c0_73 = arith.constant 0 : index
    %c0_74 = arith.constant 0 : index
    %85 = vector.load %arg10[%c0_72, %c0_73, %c0_74] : memref<1x4x128xbf16, #tpu.memory_space<vmem>>, vector<1x4x128xbf16>
    %86 = vector.shape_cast %85 : vector<1x4x128xbf16> to vector<4x128xbf16>
    %87 = vector.shape_cast %84 : vector<4x128xbf16> to vector<1x4x128xbf16>
    tpu.vector_store %arg10[%c0_72, %c0_73, %c0_74], %87 {strides = array<i32>} : memref<1x4x128xbf16, #tpu.memory_space<vmem>>, vector<1x4x128xbf16>,
    %c0_75 = arith.constant 0 : index
    %c0_76 = arith.constant 0 : index
    %88 = vector.load %arg5[%c0_75, %c0_76] : memref<1x128xf32, #tpu.memory_space<vmem>>, vector<1x128xf32>
    %89 = vector.broadcast %88 : vector<1x128xf32> to vector<4x128xf32>
    %90 = arith.mulf %83, %89 : vector<4x128xf32>
    %c0_77 = arith.constant 0 : index
    %c0_78 = arith.constant 0 : index
    %91 = vector.load %arg6[%c0_77, %c0_78] : memref<1x128xf32, #tpu.memory_space<vmem>>, vector<1x128xf32>
    %92 = vector.broadcast %91 : vector<1x128xf32> to vector<4x128xf32>
    %93 = arith.addf %90, %92 : vector<4x128xf32>
    %c0_79 = arith.constant 0 : index
    %c0_80 = arith.constant 0 : index
    %c0_81 = arith.constant 0 : index
    %94 = vector.load %arg11[%c0_79, %c0_80, %c0_81] : memref<1x4x128xf32, #tpu.memory_space<vmem>>, vector<1x4x128xf32>
    %95 = vector.shape_cast %94 : vector<1x4x128xf32> to vector<4x128xf32>
    %96 = vector.shape_cast %93 : vector<4x128xf32> to vector<1x4x128xf32>
    tpu.vector_store %arg11[%c0_79, %c0_80, %c0_81], %96 {strides = array<i32>} : memref<1x4x128xf32, #tpu.memory_space<vmem>>, vector<1x4x128xf32>,
    return
  }
  func.func @transform_0(%arg0: i32) -> (i32, i32, i32) {
    %c0_i32 = arith.constant 0 : i32
    %c0_i32_0 = arith.constant 0 : i32
    %c0_i32_1 = arith.constant 0 : i32
    return %arg0, %c0_i32, %c0_i32_0 : i32, i32, i32
  }
  func.func @transform_1(%arg0: i32) -> (i32, i32) {
    %c0_i32 = arith.constant 0 : i32
    %c0_i32_0 = arith.constant 0 : i32
    %c0_i32_1 = arith.constant 0 : i32
    return %c0_i32, %c0_i32_0 : i32, i32
  }
  func.func @transform_2(%arg0: i32) -> (i32, i32) {
    %c0_i32 = arith.constant 0 : i32
    %c0_i32_0 = arith.constant 0 : i32
    %c0_i32_1 = arith.constant 0 : i32
    return %c0_i32, %c0_i32_0 : i32, i32
  }
  func.func @transform_3(%arg0: i32) -> (i32, i32, i32) {
    %c0_i32 = arith.constant 0 : i32
    %c0_i32_0 = arith.constant 0 : i32
    %c0_i32_1 = arith.constant 0 : i32
    %c0_i32_2 = arith.constant 0 : i32
    return %c0_i32, %c0_i32_0, %c0_i32_1 : i32, i32, i32
  }
  func.func @transform_4(%arg0: i32) -> (i32, i32) {
    %c0_i32 = arith.constant 0 : i32
    %c0_i32_0 = arith.constant 0 : i32
    %c0_i32_1 = arith.constant 0 : i32
    return %c0_i32, %c0_i32_0 : i32, i32
  }
  func.func @transform_5(%arg0: i32) -> (i32, i32) {
    %c0_i32 = arith.constant 0 : i32
    %c0_i32_0 = arith.constant 0 : i32
    %c0_i32_1 = arith.constant 0 : i32
    return %c0_i32, %c0_i32_0 : i32, i32
  }
  func.func @transform_6(%arg0: i32) -> (i32, i32, i32) {
    %c0_i32 = arith.constant 0 : i32
    %c0_i32_0 = arith.constant 0 : i32
    %c0_i32_1 = arith.constant 0 : i32
    %c0_i32_2 = arith.constant 0 : i32
    return %c0_i32, %c0_i32_0, %c0_i32_1 : i32, i32, i32
  }
  func.func @transform_7(%arg0: i32) -> (i32, i32) {
    %c0_i32 = arith.constant 0 : i32
    %c0_i32_0 = arith.constant 0 : i32
    %c0_i32_1 = arith.constant 0 : i32
    return %c0_i32, %c0_i32_0 : i32, i32
  }
  func.func @transform_8(%arg0: i32) -> (i32, i32) {
    %c0_i32 = arith.constant 0 : i32
    %c0_i32_0 = arith.constant 0 : i32
    %c0_i32_1 = arith.constant 0 : i32
    return %c0_i32, %c0_i32_0 : i32, i32
  }
  func.func @transform_9(%arg0: i32) -> (i32, i32, i32) {
    %c0_i32 = arith.constant 0 : i32
    %c0_i32_0 = arith.constant 0 : i32
    %c0_i32_1 = arith.constant 0 : i32
    return %arg0, %c0_i32, %c0_i32_0 : i32, i32, i32
  }
  func.func @transform_10(%arg0: i32) -> (i32, i32, i32) {
    %c0_i32 = arith.constant 0 : i32
    %c0_i32_0 = arith.constant 0 : i32
    %c0_i32_1 = arith.constant 0 : i32
    return %arg0, %c0_i32, %c0_i32_0 : i32, i32, i32
  }
}

</mosaic_0001>

<bundles_post_ra>
// kernel: fasternet_forward.4
= control target key start
LH: loop header
LB: loop body
LE: loop exit
PB: predicated region body
PF: predicated region fallthrough
CT: control target
= control target key end

     0   :  { %s7156_s13 = smov 0   ;;  %s9850_s0 = inlined_call_operand.vmem [shape: bf16[2,256,48], index: 0, kind: input, shape index: {}]   ;;  %s9851_s1 = inlined_call_operand.vmem [shape: bf16[48,16], index: 1, kind: input, shape index: {}]   ;;  %s9852_s2 = inlined_call_operand.vmem [shape: f32[1,16], index: 2, kind: input, shape index: {}]   ;;  %s9853_s3 = inlined_call_operand.vmem [shape: f32[9,256,1], index: 3, kind: input, shape index: {}]   ;;  %s9854_s4 = inlined_call_operand.vmem [shape: f32[1,16], index: 4, kind: input, shape index: {}]   ;;  %s9855_s5 = inlined_call_operand.vmem [shape: f32[1,16], index: 5, kind: input, shape index: {}]   ;;  %s9856_s6 = inlined_call_operand.vmem [shape: bf16[9,16,32], index: 6, kind: input, shape index: {}]   ;;  %s9857_s7 = inlined_call_operand.vmem [shape: f32[1,32], index: 7, kind: input, shape index: {}]   ;;  %s9858_s8 = inlined_call_operand.vmem [shape: bf16[32,16], index: 8, kind: input, shape index: {}]   ;;  %s9859_s9 = inlined_call_operand.vmem [shape: bf16[2,256,16], index: 9, kind: output, shape index: {0}]   ;;  %s9860_s10 = inlined_call_operand.vmem [shape: f32[2,256,16], index: 10, kind: output, shape index: {1}]  }
   0x1 LB: > { %s5692_s14 = sadd.s32 4294967295, %s7098_s13   ;;  %p5696_p0 = scmp.ge.s32.totalorder %s7098_s13, 1  ;;  %s7098_s13 = sphi %s7156_s13, %s21_s13  }
   0x2   : > { %p315_p1 = scmp.lt.s32.totalorder %s7098_s13, 3 }
   0x4   : > { %p316_p2 = pnand %p5696_p0, %p315_p1 }
   0x6   : > { %319 = sbr.rel (%p316_p2) target bundleno = 1103 (0x44f), region = 56 }
   0xd   : > { %v729_v0 = vld [vmem:[%s9853_s3 + $0x10] sm:$0xff]  ;;  %v727_v1 = vld [vmem:[%s9853_s3] sm:$0xff]  ;;  %p358_p3 = scmp.lt.s32.totalorder %s5692_s14, 1  ;;  %v7100_v2 = vmov 0   ;;  %v730_v4 = vld [vmem:[%s9853_s3 + $0x18] sm:$0xff]  ;;  %vm517_vm0 = vcmask 392192  }
   0xe   : > { %7060 = vset.pattern.permute.xlu1 %v7100_v2  ;;  %7059 = vset.pattern.permute.xlu0 %v7100_v2  ;;  %v7061_v3 = vld [vmem:[%s9851_s1] sm:$0xff]   ;;  %v728_v5 = vld [vmem:[%s9853_s3 + $0x8] sm:$0xff]  ;;  %v7063_v8 = vld [vmem:[%s9851_s1 + $0x10] sm:$0xff]   ;;  %vm1292_vm2 = vcmask 130048   ;;  %vm5091_vm4 = vcmask 261120   ;;  %vm5461_vm5 = vcmask 125952  }
   0xf   : > { %1088 = vperm.xlu1 %7060, %v729_v0   ;;  %1078 = vperm.xlu0 %7059, %v727_v1   ;;  %s10340_s14 = smov (!%p358_p3, %s5692_s14), 1  ;;  %v7062_v6 = vld [vmem:[%s9851_s1 + $0x8] sm:$0xff]   ;;  %v731_v10 = vld [vmem:[%s9853_s3 + $0x20] sm:$0xff]  ;;  %v734_v11 = vld [vmem:[%s9853_s3 + $0x38] sm:$0xff] }
  0x10   : > { %6412 = vmatprep.subr.bf16.mxu0 %v7061_v3  ;;  %s6187_s27 = sshll.u32 %s10340_s14, 7  ;;  %v732_v7 = vld [vmem:[%s9853_s3 + $0x28] sm:$0xff]  ;;  %v733_v12 = vld [vmem:[%s9853_s3 + $0x30] sm:$0xff]  ;;  %v735_v16 = vld [vmem:[%s9853_s3 + $0x40] sm:$0xff]  ;;  %s6189_s25 = sshll.u32 %s10340_s14, 8 }
  0x11   : > { %6413 = vmatpush3.bf16.msra.mxu0 %v7061_v3  ;;  %s7196_s16 = scalar_lea.vmem %s9850_s0, %s6187_s27  ;;  %v736_v15 = vld [vmem:[%s9853_s3 + $0x48] sm:$0xff]  ;;  %v738_v17 = vld [vmem:[%s9853_s3 + $0x58] sm:$0xff]  ;;  %v737_v18 = vld [vmem:[%s9853_s3 + $0x50] sm:$0xff]  ;;  %s9612_s29 = scalar_lea.vmem %s9859_s9, %s6187_s27 }
  0x12   : > { %6414 = vmatprep.subr.bf16.mxu0 %v7062_v6  ;;  %v7064_v9 = vld [vmem:[%s7196_s16] sm:$0xff]   ;;  %v7065_v13 = vld [vmem:[%s7196_s16 + $0x8] sm:$0xff]   ;;  %v7066_v14 = vld [vmem:[%s7196_s16 + $0x10] sm:$0xff]   ;;  %s9625_s12 = scalar_lea.vmem %s9860_s10, %s6189_s25 }
  0x13   : > { %1093 = vperm.xlu1 %7060, %v730_v4   ;;  %1083 = vperm.xlu0 %7059, %v728_v5   ;;  %v7067_v19 = vld [vmem:[%s7196_s16 + $0x18] sm:$0xff]   ;;  %v7068_v20 = vld [vmem:[%s7196_s16 + $0x20] sm:$0xff]   ;;  %v740_v21 = vld [vmem:[%s9853_s3 + $0x68] sm:$0xff] }
  0x14   : > { %6418 = vmatprep.mubr.msk.bf16.mxu0 %vm517_vm0, %v7064_v9  ;;  %v739_v22 = vld [vmem:[%s9853_s3 + $0x60] sm:$0xff]  ;;  %v742_v23 = vld [vmem:[%s9853_s3 + $0x78] sm:$0xff]  ;;  %v741_v24 = vld [vmem:[%s9853_s3 + $0x70] sm:$0xff] }
  0x15   : > { %6415 = vmatpush3.bf16.msra.mxu0 %v7062_v6  ;;  %v7069_v25 = vld [vmem:[%s7196_s16 + $0x28] sm:$0xff]   ;;  %v7070_v26 = vld [vmem:[%s7196_s16 + $0x30] sm:$0xff]   ;;  %v743_v28 = vld [vmem:[%s9853_s3 + $0x80] sm:$0xff] }
  0x16   : > { %6416 = vmatprep.subr.bf16.mxu0 %v7063_v8  ;;  %v744_v27 = vld [vmem:[%s9853_s3 + $0x88] sm:$0xff]  ;;  %v746_v29 = vld [vmem:[%s9853_s3 + $0x98] sm:$0xff]  ;;  %v745_v30 = vld [vmem:[%s9853_s3 + $0x90] sm:$0xff] }
  0x17   : > { %1103 = vperm.xlu1 %7060, %v732_v7   ;;  %1098 = vperm.xlu0 %7059, %v731_v10   ;;  %v7071_v31 = vld [vmem:[%s7196_s16 + $0x38] sm:$0xff]   ;;  %v7072_v32 = vld [vmem:[%s7196_s16 + $0x40] sm:$0xff]   ;;  %v748_v33 = vld [vmem:[%s9853_s3 + $0xa8] sm:$0xff] }
  0x18   : > { %v747_v34 = vld [vmem:[%s9853_s3 + $0xa0] sm:$0xff]  ;;  %v750_v35 = vld [vmem:[%s9853_s3 + $0xb8] sm:$0xff]  ;;  %v749_v36 = vld [vmem:[%s9853_s3 + $0xb0] sm:$0xff] }
  0x19   : > { %6417 = vmatpush3.bf16.msra.mxu0 %v7063_v8  ;;  %v7073_v37 = vld [vmem:[%s7196_s16 + $0x48] sm:$0xff]   ;;  %v7074_v38 = vld [vmem:[%s7196_s16 + $0x50] sm:$0xff]   ;;  %v751_v40 = vld [vmem:[%s9853_s3 + $0xc0] sm:$0xff] }
  0x1a   : > { %v752_v39 = vld [vmem:[%s9853_s3 + $0xc8] sm:$0xff]  ;;  %v754_v41 = vld [vmem:[%s9853_s3 + $0xd8] sm:$0xff]  ;;  %v753_v42 = vld [vmem:[%s9853_s3 + $0xd0] sm:$0xff] }
  0x1b   : > { %1113 = vperm.xlu1 %7060, %v734_v11   ;;  %1108 = vperm.xlu0 %7059, %v733_v12   ;;  %v7075_v43 = vld [vmem:[%s7196_s16 + $0x58] sm:$0xff]   ;;  %v7076_v44 = vld [vmem:[%s7196_s16 + $0x60] sm:$0xff]   ;;  %v756_v45 = vld [vmem:[%s9853_s3 + $0xe8] sm:$0xff] }
  0x1c   : > { %6419 = vmatmul.mubr.msk.bf16.vlgmr.msra.gmra.mrb[0].mxu0 %vm517_vm0, %v7065_v13  ;;  %v755_v46 = vld [vmem:[%s9853_s3 + $0xe0] sm:$0xff]  ;;  %v758_v47 = vld [vmem:[%s9853_s3 + $0xf8] sm:$0xff]  ;;  %v757_v48 = vld [vmem:[%s9853_s3 + $0xf0] sm:$0xff] }
  0x1d   : > { %6422 = vmatprep.mubr.msk.bf16.mxu0 %vm517_vm0, %v7066_v14  ;;  %v7077_v49 = vld [vmem:[%s7196_s16 + $0x68] sm:$0xff]   ;;  %v7078_v50 = vld [vmem:[%s7196_s16 + $0x70] sm:$0xff]   ;;  %v5739_v52 = vld [vmem:[%s9853_s3 + $0x100] sm:$0xff] }
  0x1e   : > { %v5740_v51 = vld [vmem:[%s9853_s3 + $0x108] sm:$0xff]  ;;  %v5742_v53 = vld [vmem:[%s9853_s3 + $0x118] sm:$0xff]  ;;  %v5741_v54 = vld [vmem:[%s9853_s3 + $0x110] sm:$0xff] }
  0x1f   : > { %1123 = vperm.xlu1 %7060, %v736_v15   ;;  %1118 = vperm.xlu0 %7059, %v735_v16   ;;  %v7079_v55 = vld [vmem:[%s7196_s16 + $0x78] sm:$0xff]   ;;  %v5744_v56 = vld [vmem:[%s9853_s3 + $0x128] sm:$0xff]  ;;  %v5743_v57 = vld [vmem:[%s9853_s3 + $0x120] sm:$0xff] }
  0x20   : > { %v5746_v58 = vld [vmem:[%s9853_s3 + $0x138] sm:$0xff]  ;;  %v5745_v59 = vld [vmem:[%s9853_s3 + $0x130] sm:$0xff]  ;;  %v5784_v60 = vld [vmem:[%s9853_s3 + $0x268] sm:$0xff] }
  0x21   : > { %v5783_v61 = vld [vmem:[%s9853_s3 + $0x260] sm:$0xff]  ;;  %v5786_v62 = vld [vmem:[%s9853_s3 + $0x278] sm:$0xff]  ;;  %v5785_v63 = vld [vmem:[%s9853_s3 + $0x270] sm:$0xff] }
  0x22   : > { %v5788_v0 = vld [vmem:[%s9853_s3 + $0x288] sm:$0xff]  ;;  %v5787_v1 = vld [vmem:[%s9853_s3 + $0x280] sm:$0xff]  ;;  %v5790_v2 = vld [vmem:[%s9853_s3 + $0x298] sm:$0xff] }
  0x23   : > { %1133 = vperm.xlu1 %7060, %v738_v17   ;;  %1128 = vperm.xlu0 %7059, %v737_v18   ;;  %v5789_v3 = vld [vmem:[%s9853_s3 + $0x290] sm:$0xff]  ;;  %v5792_v4 = vld [vmem:[%s9853_s3 + $0x2a8] sm:$0xff]  ;;  %v5791_v5 = vld [vmem:[%s9853_s3 + $0x2a0] sm:$0xff] }
  0x24   : > { %6423 = vmatmul.mubr.msk.bf16.gmra.mrb[4].mxu0 %vm517_vm0, %v7067_v19  ;;  %v5794_v6 = vld [vmem:[%s9853_s3 + $0x2b8] sm:$0xff]  ;;  %v5793_v7 = vld [vmem:[%s9853_s3 + $0x2b0] sm:$0xff]  ;;  %v5796_v8 = vld [vmem:[%s9853_s3 + $0x2c8] sm:$0xff] }
  0x25   : > { %6426 = vmatprep.mubr.msk.bf16.mxu0 %vm517_vm0, %v7068_v20  ;;  %v5795_v9 = vld [vmem:[%s9853_s3 + $0x2c0] sm:$0xff]  ;;  %v5798_v10 = vld [vmem:[%s9853_s3 + $0x2d8] sm:$0xff]  ;;  %v5797_v11 = vld [vmem:[%s9853_s3 + $0x2d0] sm:$0xff] }
  0x26   : > { %v5800_v12 = vld [vmem:[%s9853_s3 + $0x2e8] sm:$0xff]  ;;  %v5799_v13 = vld [vmem:[%s9853_s3 + $0x2e0] sm:$0xff]  ;;  %v5802_v14 = vld [vmem:[%s9853_s3 + $0x2f8] sm:$0xff] }
  0x27   : > { %1143 = vperm.xlu1 %7060, %v740_v21   ;;  %1138 = vperm.xlu0 %7059, %v739_v22   ;;  %v5801_v15 = vld [vmem:[%s9853_s3 + $0x2f0] sm:$0xff]  ;;  %v5804_v16 = vld [vmem:[%s9853_s3 + $0x308] sm:$0xff]  ;;  %v5803_v17 = vld [vmem:[%s9853_s3 + $0x300] sm:$0xff] }
  0x28   : > { %v5806_v18 = vld [vmem:[%s9853_s3 + $0x318] sm:$0xff]  ;;  %v5805_v19 = vld [vmem:[%s9853_s3 + $0x310] sm:$0xff]  ;;  %v5808_v20 = vld [vmem:[%s9853_s3 + $0x328] sm:$0xff] }
  0x29   : > { %v5807_v21 = vld [vmem:[%s9853_s3 + $0x320] sm:$0xff] }
  0x2b   : > { %1153 = vperm.xlu1 %7060, %v742_v23   ;;  %1148 = vperm.xlu0 %7059, %v741_v24   ;;  %v7080_v24 = vld [vmem:[%s9856_s6 + $0x10] sm:$0xff]  }
  0x2c   : > { %6427 = vmatmul.mubr.msk.bf16.gmra.mrb[8].mxu0 %vm517_vm0, %v7069_v25  ;;  %v5810_v25 = vld [vmem:[%s9853_s3 + $0x338] sm:$0xff]  ;;  %6792 = vmatprep.subr.bf16.mxu1 %v7080_v24 }
  0x2d   : > { %6430 = vmatprep.mubr.msk.bf16.mxu0 %vm517_vm0, %v7070_v26  ;;  %v5809_v26 = vld [vmem:[%s9853_s3 + $0x330] sm:$0xff]  ;;  %6793 = vmatpush3.bf16.msra.mxu1 %v7080_v24 }
  0x2f   : > { %1163 = vperm.xlu1 %7060, %v744_v27   ;;  %1158 = vperm.xlu0 %7059, %v743_v28  }
  0x33   : > { %1173 = vperm.xlu1 %7060, %v746_v29   ;;  %1168 = vperm.xlu0 %7059, %v745_v30   ;;  %v5812_v29 = vld [vmem:[%s9853_s3 + $0x348] sm:$0xff]  ;;  %v5811_v30 = vld [vmem:[%s9853_s3 + $0x340] sm:$0xff] }
  0x34   : > { %6431 = vmatmul.mubr.msk.bf16.gmra.mrb[12].mxu0 %vm517_vm0, %v7071_v31 }
  0x35   : > { %6434 = vmatprep.mubr.msk.bf16.mxu0 %vm517_vm0, %v7072_v32 }
  0x37   : > { %1183 = vperm.xlu1 %7060, %v748_v33   ;;  %1178 = vperm.xlu0 %7059, %v747_v34   ;;  %v5814_v33 = vld [vmem:[%s9853_s3 + $0x358] sm:$0xff]  ;;  %v5813_v34 = vld [vmem:[%s9853_s3 + $0x350] sm:$0xff] }
  0x3b   : > { %1193 = vperm.xlu1 %7060, %v750_v35   ;;  %1188 = vperm.xlu0 %7059, %v749_v36  }
  0x3c   : > { %6435 = vmatmul.mubr.msk.bf16.gmra.mrb[16].mxu0 %vm517_vm0, %v7073_v37  ;;  %v5816_v37 = vld [vmem:[%s9853_s3 + $0x368] sm:$0xff] }
  0x3d   : > { %6438 = vmatprep.mubr.msk.bf16.mxu0 %vm517_vm0, %v7074_v38  ;;  %v5815_v38 = vld [vmem:[%s9853_s3 + $0x360] sm:$0xff] }
  0x3f   : > { %1203 = vperm.xlu1 %7060, %v752_v39   ;;  %1198 = vperm.xlu0 %7059, %v751_v40  }
  0x43   : > { %1213 = vperm.xlu1 %7060, %v754_v41   ;;  %1208 = vperm.xlu0 %7059, %v753_v42   ;;  %v5818_v41 = vld [vmem:[%s9853_s3 + $0x378] sm:$0xff]  ;;  %v5817_v42 = vld [vmem:[%s9853_s3 + $0x370] sm:$0xff] }
  0x44   : > { %6439 = vmatmul.mubr.msk.bf16.gmra.mrb[20].mxu0 %vm517_vm0, %v7075_v43 }
  0x45   : > { %6442 = vmatprep.mubr.msk.bf16.mxu0 %vm517_vm0, %v7076_v44 }
  0x47   : > { %1223 = vperm.xlu1 %7060, %v756_v45   ;;  %1218 = vperm.xlu0 %7059, %v755_v46   ;;  %v5820_v45 = vld [vmem:[%s9853_s3 + $0x388] sm:$0xff]  ;;  %v5819_v46 = vld [vmem:[%s9853_s3 + $0x380] sm:$0xff] }
  0x4b   : > { %1233 = vperm.xlu1 %7060, %v758_v47   ;;  %1228 = vperm.xlu0 %7059, %v757_v48  }
  0x4c   : > { %6443 = vmatmul.mubr.msk.bf16.gmra.mrb[24].mxu0 %vm517_vm0, %v7077_v49  ;;  %v5822_v49 = vld [vmem:[%s9853_s3 + $0x398] sm:$0xff] }
  0x4d   : > { %6446 = vmatprep.mubr.msk.bf16.mxu0 %vm517_vm0, %v7078_v50  ;;  %v5821_v50 = vld [vmem:[%s9853_s3 + $0x390] sm:$0xff] }
  0x4f   : > { %1724 = vperm.xlu1 %7060, %v5740_v51   ;;  %1719 = vperm.xlu0 %7059, %v5739_v52  }
  0x53   : > { %1734 = vperm.xlu1 %7060, %v5742_v53   ;;  %1729 = vperm.xlu0 %7059, %v5741_v54   ;;  %v5824_v53 = vld [vmem:[%s9853_s3 + $0x3a8] sm:$0xff]  ;;  %v5823_v54 = vld [vmem:[%s9853_s3 + $0x3a0] sm:$0xff] }
  0x54   : > { %6447 = vmatmul.mubr.msk.bf16.gmra.mrb[28].mxu0 %vm517_vm0, %v7079_v55  ;;  %v7499_v55 = vld [vmem:[%s9856_s6 + $0x18] sm:$0xff]  }
  0x55   : > { %6586 = vmatprep.subr.bf16.mxu1 %v7499_v55 }
  0x57   : > { %1744 = vperm.xlu1 %7060, %v5744_v56   ;;  %1739 = vperm.xlu0 %7059, %v5743_v57  }
  0x5b   : > { %1754 = vperm.xlu1 %7060, %v5746_v58   ;;  %1749 = vperm.xlu0 %7059, %v5745_v59   ;;  %v5826_v58 = vld [vmem:[%s9853_s3 + $0x3b8] sm:$0xff]  ;;  %v5825_v59 = vld [vmem:[%s9853_s3 + $0x3b0] sm:$0xff] }
  0x5f   : > { %2307 = vperm.xlu1 %7060, %v5784_v60   ;;  %2302 = vperm.xlu0 %7059, %v5783_v61   ;;  %v7082_v60 = vld [vmem:[%s9856_s6] sm:$0xff]  }
  0x60   : > { %6450 = vmatprep.subr.bf16.mxu0 %v7082_v60 }
  0x61   : > { %6451 = vmatpush3.bf16.msra.mxu0 %v7082_v60 }
  0x63   : > { %2317 = vperm.xlu1 %7060, %v5786_v62   ;;  %2312 = vperm.xlu0 %7059, %v5785_v63   ;;  %v5828_v63 = vld [vmem:[%s9853_s3 + $0x3c8] sm:$0xff] }
  0x67   : > { %2327 = vperm.xlu1 %7060, %v5788_v0   ;;  %2322 = vperm.xlu0 %7059, %v5787_v1   ;;  %v5827_v0 = vld [vmem:[%s9853_s3 + $0x3c0] sm:$0xff] }
  0x6b   : > { %2337 = vperm.xlu1 %7060, %v5790_v2   ;;  %2332 = vperm.xlu0 %7059, %v5789_v3   ;;  %v5830_v3 = vld [vmem:[%s9853_s3 + $0x3d8] sm:$0xff] }
  0x6f   : > { %2347 = vperm.xlu1 %7060, %v5792_v4   ;;  %2342 = vperm.xlu0 %7059, %v5791_v5   ;;  %v5829_v4 = vld [vmem:[%s9853_s3 + $0x3d0] sm:$0xff] }
  0x73   : > { %2357 = vperm.xlu1 %7060, %v5794_v6   ;;  %2352 = vperm.xlu0 %7059, %v5793_v7   ;;  %v5832_v7 = vld [vmem:[%s9853_s3 + $0x3e8] sm:$0xff] }
  0x77   : > { %2367 = vperm.xlu1 %7060, %v5796_v8   ;;  %2362 = vperm.xlu0 %7059, %v5795_v9   ;;  %v5831_v8 = vld [vmem:[%s9853_s3 + $0x3e0] sm:$0xff] }
  0x7b   : > { %2377 = vperm.xlu1 %7060, %v5798_v10   ;;  %2372 = vperm.xlu0 %7059, %v5797_v11   ;;  %v5834_v11 = vld [vmem:[%s9853_s3 + $0x3f8] sm:$0xff] }
  0x7f   : > { %2387 = vperm.xlu1 %7060, %v5800_v12   ;;  %2382 = vperm.xlu0 %7059, %v5799_v13   ;;  %v5833_v12 = vld [vmem:[%s9853_s3 + $0x3f0] sm:$0xff] }
  0x83   : > { %2397 = vperm.xlu1 %7060, %v5802_v14   ;;  %2392 = vperm.xlu0 %7059, %v5801_v15   ;;  %v5836_v15 = vld [vmem:[%s9853_s3 + $0x508] sm:$0xff] }
  0x87   : > { %2705 = vperm.xlu1 %7060, %v5804_v16   ;;  %2700 = vperm.xlu0 %7059, %v5803_v17   ;;  %v5835_v16 = vld [vmem:[%s9853_s3 + $0x500] sm:$0xff] }
  0x8b   : > { %2715 = vperm.xlu1 %7060, %v5806_v18   ;;  %2710 = vperm.xlu0 %7059, %v5805_v19   ;;  %v5838_v19 = vld [vmem:[%s9853_s3 + $0x518] sm:$0xff] }
  0x8e   : > { %v7413_v22 = vpop.permute.xlu1 %1088  ;;  %v7415_v23 = vpop.permute.xlu0 %1078 }
  0x8f   : > { %2725 = vperm.xlu1 %7060, %v5808_v20   ;;  %2720 = vperm.xlu0 %7059, %v5807_v21   ;;  %v5837_v20 = vld [vmem:[%s9853_s3 + $0x510] sm:$0xff] }
  0x92   : > { %v7426_v27 = vpop.permute.xlu1 %1093  ;;  %v7428_v28 = vpop.permute.xlu0 %1083 }
  0x93   : > { %2735 = vperm.xlu1 %7060, %v5810_v25   ;;  %2730 = vperm.xlu0 %7059, %v5809_v26   ;;  %v5840_v25 = vld [vmem:[%s9853_s3 + $0x528] sm:$0xff]  ;;  %v5839_v26 = vld [vmem:[%s9853_s3 + $0x520] sm:$0xff] }
  0x96   : > { %v7436_v31 = vpop.permute.xlu1 %1103  ;;  %v7438_v32 = vpop.permute.xlu0 %1098 }
  0x97   : > { %2745 = vperm.xlu1 %7060, %v5812_v29   ;;  %2740 = vperm.xlu0 %7059, %v5811_v30  }
  0x9a   : > { %v7446_v35 = vpop.permute.xlu1 %1113  ;;  %v7448_v36 = vpop.permute.xlu0 %1108 }
  0x9b   : > { %2755 = vperm.xlu1 %7060, %v5814_v33   ;;  %2750 = vperm.xlu0 %7059, %v5813_v34   ;;  %v5842_v33 = vld [vmem:[%s9853_s3 + $0x538] sm:$0xff]  ;;  %v5841_v34 = vld [vmem:[%s9853_s3 + $0x530] sm:$0xff] }
  0x9e   : > { %v7456_v39 = vpop.permute.xlu1 %1123  ;;  %v7458_v40 = vpop.permute.xlu0 %1118 }
  0x9f   : > { %2765 = vperm.xlu1 %7060, %v5816_v37   ;;  %2760 = vperm.xlu0 %7059, %v5815_v38  }
  0xa2   : > { %v7466_v43 = vpop.permute.xlu1 %1133  ;;  %v7468_v44 = vpop.permute.xlu0 %1128 }
  0xa3   : > { %10026 = vst [vmem:[#allocation2_spill] sm:$0xff] %v7466_v43  ;;  %10027 = vst [vmem:[#allocation3_spill] sm:$0xff] %v7468_v44  ;;  %2775 = vperm.xlu1 %7060, %v5818_v41   ;;  %2770 = vperm.xlu0 %7059, %v5817_v42   ;;  %v5844_v41 = vld [vmem:[%s9853_s3 + $0x548] sm:$0xff]  ;;  %v5843_v42 = vld [vmem:[%s9853_s3 + $0x540] sm:$0xff] }
  0xa4   : > { %v5872_v44 = vld [vmem:[%s9853_s3 + $0x628] sm:$0xff] }
  0xa6   : > { %v7476_v47 = vpop.permute.xlu1 %1143  ;;  %v7478_v48 = vpop.permute.xlu0 %1138 }
  0xa7   : > { %10028 = vst [vmem:[#allocation4_spill] sm:$0xff] %v7476_v47  ;;  %10029 = vst [vmem:[#allocation5_spill] sm:$0xff] %v7478_v48  ;;  %2785 = vperm.xlu1 %7060, %v5820_v45   ;;  %2780 = vperm.xlu0 %7059, %v5819_v46  }
  0xaa   : > { %v7486_v51 = vpop.permute.xlu1 %1153  ;;  %v7488_v52 = vpop.permute.xlu0 %1148 }
  0xab   : > { %10030 = vst [vmem:[#allocation6_spill] sm:$0xff] %v7486_v51  ;;  %10031 = vst [vmem:[#allocation7_spill] sm:$0xff] %v7488_v52  ;;  %2795 = vperm.xlu1 %7060, %v5822_v49   ;;  %2790 = vperm.xlu0 %7059, %v5821_v50   ;;  %v5846_v49 = vld [vmem:[%s9853_s3 + $0x558] sm:$0xff]  ;;  %v5845_v50 = vld [vmem:[%s9853_s3 + $0x550] sm:$0xff] }
  0xae   : > { %v7501_v56 = vpop.permute.xlu1 %1163  ;;  %v7503_v57 = vpop.permute.xlu0 %1158 }
  0xaf   : > { %10032 = vst [vmem:[#allocation8_spill] sm:$0xff] %v7501_v56  ;;  %10033 = vst [vmem:[#allocation9_spill] sm:$0xff] %v7503_v57  ;;  %2805 = vperm.xlu1 %7060, %v5824_v53   ;;  %2800 = vperm.xlu0 %7059, %v5823_v54   ;;  %v5869_v57 = vld [vmem:[%s9853_s3 + $0x610] sm:$0xff] }
  0xb2   : > { %v7515_v61 = vpop.permute.xlu1 %1173  ;;  %v7517_v62 = vpop.permute.xlu0 %1168 }
  0xb3   : > { %10034 = vst [vmem:[#allocation10_spill] sm:$0xff] %v7515_v61  ;;  %10035 = vst [vmem:[#allocation11_spill] sm:$0xff] %v7517_v62  ;;  %2815 = vperm.xlu1 %7060, %v5826_v58   ;;  %2810 = vperm.xlu0 %7059, %v5825_v59   ;;  %v5848_v58 = vld [vmem:[%s9853_s3 + $0x568] sm:$0xff]  ;;  %v5847_v59 = vld [vmem:[%s9853_s3 + $0x560] sm:$0xff] }
  0xb6   : > { %v7525_v1 = vpop.permute.xlu1 %1183  ;;  %v7527_v2 = vpop.permute.xlu0 %1178 }
  0xb7   : > { %10036 = vst [vmem:[#allocation12_spill] sm:$0xff] %v7525_v1  ;;  %10037 = vst [vmem:[#allocation13_spill] sm:$0xff] %v7527_v2  ;;  %2825 = vperm.xlu1 %7060, %v5828_v63   ;;  %2820 = vperm.xlu0 %7059, %v5827_v0   ;;  %v5850_v0 = vld [vmem:[%s9853_s3 + $0x578] sm:$0xff] }
  0xba   : > { %v7535_v5 = vpop.permute.xlu1 %1193  ;;  %v7537_v6 = vpop.permute.xlu0 %1188 }
  0xbb   : > { %10038 = vst [vmem:[#allocation14_spill] sm:$0xff] %v7535_v5  ;;  %10039 = vst [vmem:[#allocation15_spill] sm:$0xff] %v7537_v6  ;;  %2835 = vperm.xlu1 %7060, %v5830_v3   ;;  %2830 = vperm.xlu0 %7059, %v5829_v4   ;;  %v5849_v3 = vld [vmem:[%s9853_s3 + $0x570] sm:$0xff]  ;;  %v5868_v6 = vld [vmem:[%s9853_s3 + $0x608] sm:$0xff] }
  0xbc   : > { %v5867_v5 = vld [vmem:[%s9853_s3 + $0x600] sm:$0xff] }
  0xbe   : > { %v7545_v9 = vpop.permute.xlu1 %1203  ;;  %v7547_v10 = vpop.permute.xlu0 %1198 }
  0xbf   : > { %10040 = vst [vmem:[#allocation16_spill] sm:$0xff] %v7545_v9  ;;  %10041 = vst [vmem:[#allocation17_spill] sm:$0xff] %v7547_v10  ;;  %2845 = vperm.xlu1 %7060, %v5832_v7   ;;  %2840 = vperm.xlu0 %7059, %v5831_v8   ;;  %v5852_v8 = vld [vmem:[%s9853_s3 + $0x588] sm:$0xff] }
  0xc2   : > { %v7555_v13 = vpop.permute.xlu1 %1213  ;;  %v7557_v14 = vpop.permute.xlu0 %1208 }
  0xc3   : > { %10042 = vst [vmem:[#allocation18_spill] sm:$0xff] %v7555_v13  ;;  %10043 = vst [vmem:[#allocation19_spill] sm:$0xff] %v7557_v14  ;;  %2855 = vperm.xlu1 %7060, %v5834_v11   ;;  %2850 = vperm.xlu0 %7059, %v5833_v12   ;;  %v5851_v11 = vld [vmem:[%s9853_s3 + $0x580] sm:$0xff] }
  0xc6   : > { %v7565_v17 = vpop.permute.xlu1 %1223  ;;  %v7567_v18 = vpop.permute.xlu0 %1218 }
  0xc7   : > { %10044 = vst [vmem:[#allocation20_spill] sm:$0xff] %v7565_v17  ;;  %10045 = vst [vmem:[#allocation21_spill] sm:$0xff] %v7567_v18  ;;  %3163 = vperm.xlu1 %7060, %v5836_v15   ;;  %3158 = vperm.xlu0 %7059, %v5835_v16   ;;  %v5854_v16 = vld [vmem:[%s9853_s3 + $0x598] sm:$0xff]  ;;  %v7742_v18 = vld [vmem:[%s9852_s2] ss:$0 sm:$0xff] }
  0xca   : > { %v7575_v21 = vpop.permute.xlu1 %1233  ;;  %v7577_v24 = vpop.permute.xlu0 %1228 }
  0xcb   : > { %10046 = vst [vmem:[#allocation22_spill] sm:$0xff] %v7575_v21  ;;  %10047 = vst [vmem:[#allocation23_spill] sm:$0xff] %v7577_v24  ;;  %3173 = vperm.xlu1 %7060, %v5838_v19   ;;  %3168 = vperm.xlu0 %7059, %v5837_v20   ;;  %v5853_v19 = vld [vmem:[%s9853_s3 + $0x590] sm:$0xff] }
  0xce   : > { %v7585_v29 = vpop.permute.xlu1 %1724  ;;  %v7587_v30 = vpop.permute.xlu0 %1719 }
  0xcf   : > { %10048 = vst [vmem:[#allocation24_spill] sm:$0xff] %v7585_v29  ;;  %10049 = vst [vmem:[#allocation25_spill] sm:$0xff] %v7587_v30  ;;  %3183 = vperm.xlu1 %7060, %v5840_v25   ;;  %3178 = vperm.xlu0 %7059, %v5839_v26   ;;  %v5856_v26 = vld [vmem:[%s9853_s3 + $0x5a8] sm:$0xff] }
  0xd2   : > { %v7595_v37 = vpop.permute.xlu1 %1734  ;;  %v7597_v38 = vpop.permute.xlu0 %1729 }
  0xd3   : > { %10050 = vst [vmem:[#allocation26_spill] sm:$0xff] %v7595_v37  ;;  %10051 = vst [vmem:[#allocation27_spill] sm:$0xff] %v7597_v38  ;;  %3193 = vperm.xlu1 %7060, %v5842_v33   ;;  %3188 = vperm.xlu0 %7059, %v5841_v34   ;;  %v5855_v33 = vld [vmem:[%s9853_s3 + $0x5a0] sm:$0xff] }
  0xd4   : > { %v5863_v37 = vld [vmem:[%s9853_s3 + $0x5e0] sm:$0xff] }
  0xd6   : > { %v7605_v45 = vpop.permute.xlu1 %1744  ;;  %v7607_v46 = vpop.permute.xlu0 %1739 }
  0xd7   : > { %10052 = vst [vmem:[#allocation28_spill] sm:$0xff] %v7605_v45  ;;  %10053 = vst [vmem:[#allocation29_spill] sm:$0xff] %v7607_v46  ;;  %3203 = vperm.xlu1 %7060, %v5844_v41   ;;  %3198 = vperm.xlu0 %7059, %v5843_v42  }
  0xda   : > { %v7615_v53 = vpop.permute.xlu1 %1754  ;;  %v7617_v54 = vpop.permute.xlu0 %1749 }
  0xdb   : > { %10054 = vst [vmem:[#allocation30_spill] sm:$0xff] %v7615_v53  ;;  %10055 = vst [vmem:[#allocation31_spill] sm:$0xff] %v7617_v54  ;;  %3213 = vperm.xlu1 %7060, %v5846_v49   ;;  %3208 = vperm.xlu0 %7059, %v5845_v50   ;;  %v5858_v50 = vld [vmem:[%s9853_s3 + $0x5b8] sm:$0xff]  ;;  %v5861_v53 = vld [vmem:[%s9853_s3 + $0x5d0] sm:$0xff] }
  0xde   : > { %v7625_v60 = vpop.permute.xlu1 %2307  ;;  %v7627_v63 = vpop.permute.xlu0 %2302 }
  0xdf   : > { %3223 = vperm.xlu1 %7060, %v5848_v58   ;;  %3218 = vperm.xlu0 %7059, %v5847_v59   ;;  %v5857_v58 = vld [vmem:[%s9853_s3 + $0x5b0] sm:$0xff] }
  0xe2   : > { %v7635_v4 = vpop.permute.xlu1 %2317  ;;  %v7637_v7 = vpop.permute.xlu0 %2312 }
  0xe3   : > { %3233 = vperm.xlu1 %7060, %v5850_v0   ;;  %3228 = vperm.xlu0 %7059, %v5849_v3   ;;  %v7684_v0 = vld [vmem:[%s9856_s6 + $0x20] sm:$0xff]  }
  0xe4   : > { %10056 = vst [vmem:[#allocation32_spill] sm:$0xff] %v7684_v0  ;;  %6484 = vmatprep.subr.bf16.mxu0 %v7684_v0 }
  0xe6   : > { %v7645_v12 = vpop.permute.xlu1 %2327  ;;  %v7647_v15 = vpop.permute.xlu0 %2322 }
  0xe7   : > { %3243 = vperm.xlu1 %7060, %v5852_v8   ;;  %3238 = vperm.xlu0 %7059, %v5851_v11  }
  0xea   : > { %v7655_v20 = vpop.permute.xlu1 %2337  ;;  %v7657_v25 = vpop.permute.xlu0 %2332 }
  0xeb   : > { %3253 = vperm.xlu1 %7060, %v5854_v16   ;;  %3248 = vperm.xlu0 %7059, %v5853_v19   ;;  %v5860_v16 = vld [vmem:[%s9853_s3 + $0x5c8] sm:$0xff]  ;;  %v5859_v19 = vld [vmem:[%s9853_s3 + $0x5c0] sm:$0xff] }
  0xee   : > { %v7665_v34 = vpop.permute.xlu1 %2347  ;;  %v7667_v41 = vpop.permute.xlu0 %2342 }
  0xef   : > { %3263 = vperm.xlu1 %7060, %v5856_v26   ;;  %3258 = vperm.xlu0 %7059, %v5855_v33   ;;  %v7669_v42 = vpop.f32.mrb[0].mxu0 }
  0xf0   : > { %v7671_v49 = vpop.f32.mrb[1].mxu0 }
  0xf1   : > { %v7679_v59 = vpop.f32.mrb[2].mxu0 }
  0xf2   : > { %v7686_v3 = vpop.permute.xlu1 %2357  ;;  %v7688_v8 = vpop.permute.xlu0 %2352 }
  0xf3   : > { %v7690_v11 = vpop.f32.mrb[3].mxu0  ;;  %3273 = vperm.xlu1 %7060, %v5858_v50   ;;  %3268 = vperm.xlu0 %7059, %v5857_v58   ;;  %v5862_v58 = vld [vmem:[%s9853_s3 + $0x5d8] sm:$0xff] }
  0xf6   : > { %v7699_v26 = vpop.permute.xlu1 %2367  ;;  %v7701_v33 = vpop.permute.xlu0 %2362 }
  0xf7   : > { %3283 = vperm.xlu1 %7060, %v5860_v16   ;;  %3278 = vperm.xlu0 %7059, %v5859_v19   ;;  %v7703_v54 = vpop.f32.mrb[4].mxu0  ;;  %v5864_v19 = vld [vmem:[%s9853_s3 + $0x5e8] sm:$0xff] }
  0xf8   : > { %v7705_v50 = vpop.f32.mrb[5].mxu0 }
  0xf9   : > { %v7713_v46 = vpop.f32.mrb[6].mxu0 }
  0xfa   : > { %v7715_v38 = vpop.permute.xlu1 %2377  ;;  %v7717_v45 = vpop.permute.xlu0 %2372 }
  0xfb   : > { %v7719_v16 = vpop.f32.mrb[7].mxu0  ;;  %3293 = vperm.xlu1 %7060, %v5862_v58   ;;  %3288 = vperm.xlu0 %7059, %v5861_v53   ;;  %v5866_v53 = vld [vmem:[%s9853_s3 + $0x5f8] sm:$0xff]  ;;  %v5865_v58 = vld [vmem:[%s9853_s3 + $0x5f0] sm:$0xff] }
  0xfe   : > { %v7727_v30 = vpop.permute.xlu1 %2387  ;;  %v7729_v29 = vpop.permute.xlu0 %2382 }
  0xff   : > { %3303 = vperm.xlu1 %7060, %v5864_v19   ;;  %3298 = vperm.xlu0 %7059, %v5863_v37   ;;  %v6428_v24 = vpop.f32.mrb[8].mxu0  ;;  %v1041_v19 = vlaneseq }
 0x100   : > { %v7731_v21 = vpop.f32.mrb[9].mxu0  ;;  %v7749_v13 = vadd.f32 %v6428_v24, %v7742_v18 }
 0x101   : > { %v6429_v14 = vpop.f32.mrb[10].mxu0  ;;  %v7762_v2 = vshrl.u32 %v1041_v19, 7  ;;  %v5870_v19 = vld [vmem:[%s9853_s3 + $0x618] sm:$0xff] }
 0x102   : > { %v7744_v17 = vpop.permute.xlu1 %2397  ;;  %v7746_v37 = vpop.permute.xlu0 %2392  ;;  %10057 = vst [vmem:[#allocation33_spill] sm:$0xff] %v7749_v13  ;;  %v7752_v10 = vadd.f32 %v6429_v14, %v7742_v18  ;;  %v10062_v48 = vrot.slane %v7749_v13, 1 }
 0x103   : > { %v7754_v9 = vpop.f32.mrb[11].mxu0  ;;  %3313 = vperm.xlu1 %7060, %v5866_v53   ;;  %3308 = vperm.xlu0 %7059, %v5865_v58   ;;  %vm2207_vm1 = vcmp.lt.s32.totalorder %v7762_v2, 7  ;;  %vm1043_vm3 = vcmp.lt.s32.totalorder %v7762_v2, 1 }
 0x104   : > { %10058 = vst [vmem:[#allocation34_spill] sm:$0xff] %v7752_v10  ;;  %v2186_v58 = vrot.slane %v7752_v10, 1 }
 0x106   : > { %v7764_v1 = vpop.permute.xlu1 %2705  ;;  %v7766_v24 = vpop.permute.xlu0 %2700  ;;  %v7795_v47 = vsel %vm2207_vm1, %v10062_v48, %v2186_v58 }
 0x107   : > { %3621 = vperm.xlu1 %7060, %v5868_v6   ;;  %3616 = vperm.xlu0 %7059, %v5867_v5   ;;  %v6432_v14 = vpop.f32.mrb[12].mxu0  ;;  %10063 = vst [vmem:[#allocation38_spill] sm:$0xff] %v7795_v47 }
 0x108   : > { %v7771_v62 = vadd.f32 %v6432_v14, %v7742_v18  ;;  %v648_v61 = vpop.f32.mrb[13].mxu0 }
 0x109   : > { %v7781_v5 = vadd.f32 %v7742_v18, %v648_v61  ;;  %v6433_v6 = vpop.f32.mrb[14].mxu0 }
 0x10a   : > { %10059 = vst [vmem:[#allocation35_spill] sm:$0xff] %v7771_v62  ;;  %v7783_v53 = vpop.permute.xlu1 %2715  ;;  %v7785_v56 = vpop.permute.xlu0 %2710  ;;  %v7788_v14 = vadd.f32 %v6433_v6, %v7742_v18 }
 0x10b   : > { %10060 = vst [vmem:[#allocation36_spill] sm:$0xff] %v7781_v5  ;;  %v651_v52 = vpop.f32.mrb[15].mxu0  ;;  %3631 = vperm.xlu1 %7060, %v5870_v19   ;;  %3626 = vperm.xlu0 %7059, %v5869_v57   ;;  %v2187_v51 = vrot.slane %v7781_v5, 1  ;;  %v5871_v19 = vld [vmem:[%s9853_s3 + $0x620] sm:$0xff]  ;;  %v2189_v57 = vrot.slane %v7771_v62, 1 }
 0x10c   : > { %10061 = vst [vmem:[#allocation37_spill] sm:$0xff] %v7788_v14  ;;  %v7798_v61 = vadd.f32 %v7742_v18, %v651_v52  ;;  %v2412_v52 = vmul.f32 %v7627_v63, %v7795_v47  ;;  %v2190_v62 = vrot.slane %v7788_v14, 1  ;;  %v5874_v63 = vld [vmem:[%s9853_s3 + $0x638] sm:$0xff] }
 0x10d   : > { %v7809_v6 = vsel %vm2207_vm1, %v2186_v58, %v2187_v51 }
 0x10e   : > { %10064 = vst [vmem:[#allocation39_spill] sm:$0xff] %v7798_v61  ;;  %10065 = vst [vmem:[#allocation40_spill] sm:$0xff] %v7809_v6  ;;  %v7811_v5 = vpop.permute.xlu1 %2725  ;;  %v7813_v48 = vpop.permute.xlu0 %2720  ;;  %v2413_v43 = vmul.f32 %v7625_v60, %v7809_v6  ;;  %v2188_v0 = vrot.slane %v7798_v61, 1  ;;  %v5873_v60 = vld [vmem:[%s9853_s3 + $0x630] sm:$0xff] }
 0x10f   : > { %10066 = vst [vmem:[#allocation41_spill] sm:$0xff] %v7811_v5  ;;  %3641 = vperm.xlu1 %7060, %v5872_v44   ;;  %3636 = vperm.xlu0 %7059, %v5871_v19   ;;  %v6436_v10 = vpop.f32.mrb[16].mxu0 }
 0x110   : > { %v7822_v58 = vadd.f32 %v6436_v10, %v7742_v18  ;;  %v664_v5 = vpop.f32.mrb[17].mxu0  ;;  %v2438_v13 = vpack.c.bf16 %v2413_v43, %v2412_v52  ;;  %v7832_v44 = vsel %vm2207_vm1, %v2188_v0, %v2189_v57  ;;  %v7836_v19 = vsel %vm2207_vm1, %v2187_v51, %v2188_v0 }
 0x111   : > { %10068 = vst [vmem:[#allocation43_spill] sm:$0xff] %v7832_v44  ;;  %10069 = vst [vmem:[#allocation44_spill] sm:$0xff] %v7836_v19  ;;  %v7839_v10 = vadd.f32 %v7742_v18, %v664_v5  ;;  %v6437_v43 = vpop.f32.mrb[18].mxu0  ;;  %v2414_v52 = vmul.f32 %v7637_v7, %v7836_v19  ;;  %v2415_v47 = vmul.f32 %v7635_v4, %v7832_v44 }
 0x112   : > { %10067 = vst [vmem:[#allocation42_spill] sm:$0xff] %v7822_v58  ;;  %v7845_v6 = vpop.permute.xlu1 %2735  ;;  %v7847_v14 = vpop.permute.xlu0 %2730  ;;  %6566 = vmatprep.mubr.msk.bf16.mxu1 %vm1292_vm2, %v2438_v13  ;;  %v7851_v61 = vadd.f32 %v6437_v43, %v7742_v18  ;;  %v7856_v7 = vsel %vm2207_vm1, %v2189_v57, %v2190_v62  ;;  %v5876_v13 = vld [vmem:[%s9853_s3 + $0x648] sm:$0xff]  ;;  %v5875_v43 = vld [vmem:[%s9853_s3 + $0x640] sm:$0xff] }
 0x113   : > { %10070 = vst [vmem:[#allocation45_spill] sm:$0xff] %v7839_v10  ;;  %v667_v51 = vpop.f32.mrb[19].mxu0  ;;  %3651 = vperm.xlu1 %7060, %v5874_v63   ;;  %3646 = vperm.xlu0 %7059, %v5873_v60   ;;  %v2439_v0 = vpack.c.bf16 %v2415_v47, %v2414_v52  ;;  %v2191_v5 = vrot.slane %v7839_v10, 1  ;;  %10072 = vst [vmem:[#allocation47_spill] sm:$0xff] %v7856_v7  ;;  %v2193_v63 = vrot.slane %v7822_v58, 1  ;;  %v7871_v47 = vld [vmem:[%s9856_s6 + $0x28] sm:$0xff]  }
 0x114   : > { %10071 = vst [vmem:[#allocation46_spill] sm:$0xff] %v7851_v61  ;;  %v7859_v4 = vadd.f32 %v7742_v18, %v667_v51  ;;  %v2416_v51 = vmul.f32 %v7647_v15, %v7856_v7  ;;  %v5878_v15 = vld [vmem:[%s9853_s3 + $0x658] sm:$0xff] }
 0x115   : > { %6567 = vmatmul.mubr.msk.bf16.vlgmr.msra.gmra.mrb[0].mxu1 %vm1292_vm2, %v2439_v0  ;;  %v7876_v57 = vsel %vm2207_vm1, %v2190_v62, %v2191_v5  ;;  %v2194_v62 = vrot.slane %v7851_v61, 1 }
 0x116   : > { %10073 = vst [vmem:[#allocation48_spill] sm:$0xff] %v7859_v4  ;;  %10074 = vst [vmem:[#allocation49_spill] sm:$0xff] %v7876_v57  ;;  %v7878_v60 = vpop.permute.xlu1 %2745  ;;  %v7880_v52 = vpop.permute.xlu0 %2740  ;;  %v2417_v19 = vmul.f32 %v7645_v12, %v7876_v57  ;;  %v2192_v44 = vrot.slane %v7859_v4, 1  ;;  %6587 = vmatpush3.bf16.msra.mxu1 %v7499_v55  ;;  %v5877_v12 = vld [vmem:[%s9853_s3 + $0x650] sm:$0xff] }
 0x117   : > { %10075 = vst [vmem:[#allocation50_spill] sm:$0xff] %v7880_v52  ;;  %3661 = vperm.xlu1 %7060, %v5876_v13   ;;  %3656 = vperm.xlu0 %7059, %v5875_v43   ;;  %v6440_v0 = vpop.f32.mrb[20].mxu0 }
 0x118   : > { %v7890_v58 = vadd.f32 %v6440_v0, %v7742_v18  ;;  %v680_v10 = vpop.f32.mrb[21].mxu0  ;;  %v2440_v52 = vpack.c.bf16 %v2417_v19, %v2416_v51  ;;  %v7900_v55 = vsel %vm2207_vm1, %v2192_v44, %v2193_v63  ;;  %v7904_v13 = vsel %vm2207_vm1, %v2191_v5, %v2192_v44  ;;  %6620 = vmatprep.subr.bf16.mxu1 %v7871_v47 }
 0x119   : > { %10077 = vst [vmem:[#allocation52_spill] sm:$0xff] %v7900_v55  ;;  %10078 = vst [vmem:[#allocation53_spill] sm:$0xff] %v7904_v13  ;;  %v7908_v19 = vadd.f32 %v7742_v18, %v680_v10  ;;  %v6441_v43 = vpop.f32.mrb[22].mxu0  ;;  %v2418_v51 = vmul.f32 %v7657_v25, %v7904_v13  ;;  %v2419_v0 = vmul.f32 %v7655_v20, %v7900_v55 }
 0x11a   : > { %10076 = vst [vmem:[#allocation51_spill] sm:$0xff] %v7890_v58  ;;  %v7914_v7 = vpop.permute.xlu1 %2755  ;;  %v7916_v57 = vpop.permute.xlu0 %2750  ;;  %6570 = vmatprep.mubr.msk.bf16.mxu1 %vm1292_vm2, %v2440_v52  ;;  %v7920_v44 = vadd.f32 %v6441_v43, %v7742_v18  ;;  %v7925_v25 = vsel %vm2207_vm1, %v2193_v63, %v2194_v62  ;;  %v5880_v52 = vld [vmem:[%s9853_s3 + $0x668] sm:$0xff]  ;;  %v5879_v43 = vld [vmem:[%s9853_s3 + $0x660] sm:$0xff]  ;;  %v7943_v63 = vadd.f32 %v7679_v59, %v7742_v18 }
 0x11b   : > { %10079 = vst [vmem:[#allocation54_spill] sm:$0xff] %v7908_v19  ;;  %v683_v5 = vpop.f32.mrb[23].mxu0  ;;  %3671 = vperm.xlu1 %7060, %v5878_v15   ;;  %3666 = vperm.xlu0 %7059, %v5877_v12   ;;  %v2441_v10 = vpack.c.bf16 %v2419_v0, %v2418_v51  ;;  %v2195_v61 = vrot.slane %v7908_v19, 1  ;;  %10081 = vst [vmem:[#allocation56_spill] sm:$0xff] %v7925_v25  ;;  %v2197_v15 = vrot.slane %v7890_v58, 1 }
 0x11c   : > { %10080 = vst [vmem:[#allocation55_spill] sm:$0xff] %v7920_v44  ;;  %v7928_v20 = vadd.f32 %v7742_v18, %v683_v5  ;;  %v7939_v12 = vadd.f32 %v7669_v42, %v7742_v18  ;;  %v2420_v13 = vmul.f32 %v7667_v41, %v7925_v25  ;;  %v7961_v59 = vadd.f32 %v7742_v18, %v7690_v11  ;;  %v5881_v11 = vld [vmem:[%s9853_s3 + $0x670] sm:$0xff] }
 0x11d   : > { %6571 = vmatmul.mubr.msk.bf16.gmra.mrb[4].mxu1 %vm1292_vm2, %v2441_v10  ;;  %v7948_v51 = vsel %vm2207_vm1, %v2194_v62, %v2195_v61  ;;  %v2198_v58 = vrot.slane %v7920_v44, 1 }
 0x11e   : > { %10082 = vst [vmem:[#allocation57_spill] sm:$0xff] %v7928_v20  ;;  %10083 = vst [vmem:[#allocation58_spill] sm:$0xff] %v7939_v12  ;;  %v7950_v0 = vpop.permute.xlu1 %2765  ;;  %v7952_v5 = vpop.permute.xlu0 %2760  ;;  %v2421_v42 = vmul.f32 %v7665_v34, %v7948_v51  ;;  %v2196_v55 = vrot.slane %v7928_v20, 1  ;;  %v1011_v10 = vrot.slane %v7939_v12, 7  ;;  %v5882_v34 = vld [vmem:[%s9853_s3 + $0x678] sm:$0xff] }
 0x11f   : > { %10084 = vst [vmem:[#allocation59_spill] sm:$0xff] %v7948_v51  ;;  %10085 = vst [vmem:[#allocation60_spill] sm:$0xff] %v7961_v59  ;;  %3681 = vperm.xlu1 %7060, %v5880_v52   ;;  %3676 = vperm.xlu0 %7059, %v5879_v43   ;;  %v6444_v62 = vpop.f32.mrb[24].mxu0 }
 0x120   : > { %v7966_v19 = vadd.f32 %v6444_v62, %v7742_v18  ;;  %v696_v41 = vpop.f32.mrb[25].mxu0  ;;  %v2442_v25 = vpack.c.bf16 %v2421_v42, %v2420_v13  ;;  %v7976_v52 = vsel %vm2207_vm1, %v2196_v55, %v2197_v15  ;;  %v7980_v43 = vsel %vm2207_vm1, %v2195_v61, %v2196_v55 }
 0x121   : > { %10087 = vst [vmem:[#allocation62_spill] sm:$0xff] %v7976_v52  ;;  %10088 = vst [vmem:[#allocation63_spill] sm:$0xff] %v7980_v43  ;;  %v7984_v13 = vadd.f32 %v7742_v18, %v696_v41  ;;  %v6445_v42 = vpop.f32.mrb[26].mxu0  ;;  %v2422_v51 = vmul.f32 %v7688_v8, %v7980_v43  ;;  %v2423_v12 = vmul.f32 %v7686_v3, %v7976_v52 }
 0x122   : > { %10086 = vst [vmem:[#allocation61_spill] sm:$0xff] %v7966_v19  ;;  %v7991_v44 = vpop.permute.xlu1 %2775  ;;  %v7993_v20 = vpop.permute.xlu0 %2770  ;;  %6574 = vmatprep.mubr.msk.bf16.mxu1 %vm1292_vm2, %v2442_v25  ;;  %v7998_v61 = vadd.f32 %v7742_v18, %v7671_v49  ;;  %v8003_v3 = vsel %vm2207_vm1, %v2197_v15, %v2198_v58  ;;  %v5884_v25 = vld [vmem:[%s9853_s3 + $0x688] sm:$0xff]  ;;  %v5883_v49 = vld [vmem:[%s9853_s3 + $0x680] sm:$0xff]  ;;  %v10093_v15 = vrot.slane %v7943_v63, 7  ;;  %v8029_v43 = vadd.f32 %v6445_v42, %v7742_v18 }
 0x123   : > { %10089 = vst [vmem:[#allocation64_spill] sm:$0xff] %v7984_v13  ;;  %v699_v55 = vpop.f32.mrb[27].mxu0  ;;  %3691 = vperm.xlu1 %7060, %v5882_v34   ;;  %3686 = vperm.xlu0 %7059, %v5881_v11   ;;  %v2443_v41 = vpack.c.bf16 %v2423_v12, %v2422_v51  ;;  %v2199_v8 = vrot.slane %v7984_v13, 1  ;;  %10091 = vst [vmem:[#allocation66_spill] sm:$0xff] %v8003_v3  ;;  %v2201_v34 = vrot.slane %v7966_v19, 1  ;;  %v1010_v51 = vrot.slane %v7961_v59, 7 }
 0x124   : > { %10090 = vst [vmem:[#allocation65_spill] sm:$0xff] %v7998_v61  ;;  %v8006_v62 = vadd.f32 %v7742_v18, %v699_v55  ;;  %v8021_v11 = vsel %vm1043_vm3, %v1011_v10, %v10093_v15  ;;  %10096 = vst [vmem:[#allocation70_spill] sm:$0xff] %v8029_v43  ;;  %v2424_v59 = vmul.f32 %v7701_v33, %v8003_v3  ;;  %v5885_v33 = vld [vmem:[%s9853_s3 + $0x690] sm:$0xff] }
 0x125   : > { %10094 = vst [vmem:[#allocation68_spill] sm:$0xff] %v8021_v11  ;;  %6575 = vmatmul.mubr.msk.bf16.gmra.mrb[8].mxu1 %vm1292_vm2, %v2443_v41  ;;  %v8026_v55 = vsel %vm2207_vm1, %v2198_v58, %v2199_v8  ;;  %v8042_v58 = vmul.f32 %v7436_v31, %v8021_v11  ;;  %v10100_v31 = vrot.slane %v7998_v61, 7 }
 0x126   : > { %10092 = vst [vmem:[#allocation67_spill] sm:$0xff] %v8006_v62  ;;  %10095 = vst [vmem:[#allocation69_spill] sm:$0xff] %v8026_v55  ;;  %v8031_v52 = vpop.permute.xlu1 %2785  ;;  %v8033_v12 = vpop.permute.xlu0 %2780  ;;  %v2425_v15 = vmul.f32 %v7699_v26, %v8026_v55  ;;  %v2200_v13 = vrot.slane %v8006_v62, 1 }
 0x127   : > { %10097 = vst [vmem:[#allocation71_spill] sm:$0xff] %v8033_v12  ;;  %3701 = vperm.xlu1 %7060, %v5884_v25   ;;  %3696 = vperm.xlu0 %7059, %v5883_v49   ;;  %v6448_v41 = vpop.f32.mrb[28].mxu0  ;;  %v5886_v12 = vld [vmem:[%s9853_s3 + $0x698] sm:$0xff] }
 0x128   : > { %v712_v42 = vpop.f32.mrb[29].mxu0  ;;  %v2444_v19 = vpack.c.bf16 %v2425_v15, %v2424_v59  ;;  %v8052_v26 = vsel %vm2207_vm1, %v2200_v13, %v2201_v34  ;;  %v8056_v25 = vsel %vm2207_vm1, %v2199_v8, %v2200_v13  ;;  %v8062_v59 = vsel %vm1043_vm3, %v10100_v31, %v1010_v51 }
 0x129   : > { %10098 = vst [vmem:[#allocation72_spill] sm:$0xff] %v8052_v26  ;;  %10099 = vst [vmem:[#allocation73_spill] sm:$0xff] %v8056_v25  ;;  %v8065_v49 = vadd.f32 %v7742_v18, %v712_v42  ;;  %v6449_v15 = vpop.f32.mrb[30].mxu0  ;;  %v2426_v3 = vmul.f32 %v7717_v45, %v8056_v25  ;;  %v2427_v55 = vmul.f32 %v7715_v38, %v8052_v26  ;;  %v2202_v45 = vrot.slane %v8029_v43, 1 }
 0x12a   : > { %10101 = vst [vmem:[#allocation74_spill] sm:$0xff] %v8062_v59  ;;  %v8073_v13 = vadd.f32 %v7703_v54, %v7742_v18  ;;  %v8077_v8 = vsel %vm1043_vm3, %v1010_v51, %v1011_v10  ;;  %v8080_v31 = vadd.f32 %v6449_v15, %v7742_v18  ;;  %v8082_v42 = vpop.permute.xlu1 %2795  ;;  %v8084_v62 = vpop.permute.xlu0 %2790  ;;  %6578 = vmatprep.mubr.msk.bf16.mxu1 %vm1292_vm2, %v2444_v19 }
 0x12b   : > { %10102 = vst [vmem:[#allocation75_spill] sm:$0xff] %v8065_v49  ;;  %10104 = vst [vmem:[#allocation77_spill] sm:$0xff] %v8077_v8  ;;  %v8090_v38 = vadd.f32 %v7742_v18, %v7705_v50  ;;  %v8093_v54 = vadd.f32 %v6448_v41, %v7742_v18  ;;  %v715_v10 = vpop.f32.mrb[31].mxu0  ;;  %3711 = vperm.xlu1 %7060, %v5886_v12   ;;  %3706 = vperm.xlu0 %7059, %v5885_v33   ;;  %v2203_v15 = vrot.slane %v8065_v49, 1  ;;  %v5888_v50 = vld [vmem:[%s9853_s3 + $0x6a8] sm:$0xff] }
 0x12c   : > { %10103 = vst [vmem:[#allocation76_spill] sm:$0xff] %v8073_v13  ;;  %10105 = vst [vmem:[#allocation78_spill] sm:$0xff] %v8080_v31  ;;  %v2445_v51 = vpack.c.bf16 %v2427_v55, %v2426_v3  ;;  %v8098_v25 = vadd.f32 %v7713_v46, %v7742_v18  ;;  %v1239_v19 = vmul.f32 %v7426_v27, %v8062_v59  ;;  %v5887_v3 = vld [vmem:[%s9853_s3 + $0x6a0] sm:$0xff] }
 0x12d   : > { %10106 = vst [vmem:[#allocation79_spill] sm:$0xff] %v8090_v38  ;;  %10107 = vst [vmem:[#allocation80_spill] sm:$0xff] %v8093_v54  ;;  %v8103_v26 = vadd.f32 %v7742_v18, %v715_v10  ;;  %v8113_v12 = vsel %vm2207_vm1, %v2201_v34, %v2202_v45  ;;  %v8117_v46 = vadd.f32 %v7742_v18, %v7719_v16  ;;  %v1039_v41 = vrot.slane %v8093_v54, 7  ;;  %v5889_v16 = vld [vmem:[%s9853_s3 + $0x6b0] sm:$0xff] }
 0x12e   : > { %10108 = vst [vmem:[#allocation81_spill] sm:$0xff] %v8098_v25  ;;  %10110 = vst [vmem:[#allocation83_spill] sm:$0xff] %v8113_v12  ;;  %6579 = vmatmul.mubr.msk.bf16.gmra.mrb[12].mxu1 %vm1292_vm2, %v2445_v51  ;;  %v8122_v27 = vsel %vm2207_vm1, %v2202_v45, %v2203_v15  ;;  %v2428_v55 = vmul.f32 %v7729_v29, %v8113_v12  ;;  %v8127_v33 = vpop.permute.xlu1 %2805  ;;  %v8129_v10 = vpop.permute.xlu0 %2800  ;;  %v1040_v51 = vrot.slane %v8080_v31, 7  ;;  %v1013_v29 = vrot.slane %v8090_v38, 7 }
 0x12f   : > { %10109 = vst [vmem:[#allocation82_spill] sm:$0xff] %v8103_v26  ;;  %10111 = vst [vmem:[#allocation84_spill] sm:$0xff] %v8122_v27  ;;  %v2429_v34 = vmul.f32 %v7727_v30, %v8122_v27  ;;  %v2204_v49 = vrot.slane %v8103_v26, 1  ;;  %v1240_v45 = vmul.f32 %v7438_v32, %v8077_v8  ;;  %v1015_v12 = vrot.slane %v8073_v13, 7  ;;  %3721 = vperm.xlu1 %7060, %v5888_v50   ;;  %v5890_v30 = vld [vmem:[%s9853_s3 + $0x6b8] sm:$0xff] }
 0x130   : > { %10112 = vst [vmem:[#allocation85_spill] sm:$0xff] %v8127_v33  ;;  %10113 = vst [vmem:[#allocation86_spill] sm:$0xff] %v8129_v10  ;;  %3716 = vperm.xlu0 %7059, %v5887_v3   ;;  %v8149_v32 = vsel %vm1043_vm3, %v1039_v41, %v1040_v51  ;;  %v10115_v27 = vrot.slane %v8103_v26, 7  ;;  %v10117_v3 = vrot.slane %v7998_v61, 7  ;;  %v10119_v13 = vrot.slane %v8093_v54, 1 }
 0x131   : > { %v2446_v33 = vpack.c.bf16 %v2429_v34, %v2428_v55  ;;  %10114 = vst [vmem:[#allocation87_spill] sm:$0xff] %v8149_v32  ;;  %v1014_v34 = vrot.slane %v8117_v46, 7  ;;  %v1237_v31 = vmul.f32 %v7428_v28, %v8149_v32 }
 0x132   : > { %v8155_v50 = vsel %vm1043_vm3, %v10115_v27, %v1039_v41  ;;  %v8161_v55 = vsel %vm1043_vm3, %v1040_v51, %v10117_v3  ;;  %v8172_v27 = vsel %vm2207_vm1, %v2204_v49, %v10119_v13  ;;  %v1016_v41 = vrot.slane %v8098_v25, 7  ;;  %v8175_v38 = vpop.permute.xlu1 %2815  ;;  %v8177_v51 = vpop.permute.xlu0 %2810 }
 0x133   : > { %10116 = vst [vmem:[#allocation88_spill] sm:$0xff] %v8155_v50  ;;  %10118 = vst [vmem:[#allocation89_spill] sm:$0xff] %v8161_v55  ;;  %v1236_v10 = vmul.f32 %v7415_v23, %v8155_v50  ;;  %6582 = vmatprep.mubr.msk.bf16.mxu1 %vm1292_vm2, %v2446_v33  ;;  %v8182_v23 = vsel %vm2207_vm1, %v2203_v15, %v2204_v49  ;;  %v2431_v28 = vmul.f32 %v7744_v17, %v8172_v27 }
 0x134   : > { %10120 = vst [vmem:[#allocation90_spill] sm:$0xff] %v8172_v27  ;;  %10121 = vst [vmem:[#allocation91_spill] sm:$0xff] %v8182_v23  ;;  %v1238_v3 = vmul.f32 %v7413_v22, %v8161_v55  ;;  %3731 = vperm.xlu1 %7060, %v5890_v30   ;;  %3726 = vperm.xlu0 %7059, %v5889_v16   ;;  %v2858_v54 = vmul.f32 %v7766_v24, %v8161_v55  ;;  %v10122_v25 = vrot.slane %v7943_v63, 7  ;;  %v5892_v22 = vld [vmem:[%s9853_s3 + $0x6c8] sm:$0xff] }
 0x135   : > { %v1268_v13 = vpack.c.bf16 %v1237_v31, %v1236_v10  ;;  %v2430_v49 = vmul.f32 %v7746_v37, %v8182_v23  ;;  %v1270_v17 = vpack.c.bf16 %v8042_v58, %v1240_v45  ;;  %v8204_v31 = vadd.f32 %v7742_v18, %v7731_v21  ;;  %v5891_v58 = vld [vmem:[%s9853_s3 + $0x6c0] sm:$0xff] }
 0x136   : > { %v8194_v33 = vsel %vm1043_vm3, %v10122_v25, %v1013_v29  ;;  %v1269_v15 = vpack.c.bf16 %v1239_v19, %v1238_v3  ;;  %v8208_v24 = vadd.f32 %v7742_v18, %v7754_v9  ;;  %v2859_v25 = vmul.f32 %v7764_v1, %v8062_v59  ;;  %v8229_v1 = vpop.permute.xlu1 %2825  ;;  %v8231_v19 = vpop.permute.xlu0 %2820  ;;  %v10140_v59 = vld [vmem:[#allocation39_spill] sm:$0xff] }
 0x137   : > { %10123 = vst [vmem:[#allocation92_spill] sm:$0xff] %v8194_v33  ;;  %v8214_v37 = vsel %vm1043_vm3, %v1013_v29, %v1014_v34  ;;  %6452 = vmatprep.mubr.msk.bf16.mxu0 %vm1292_vm2, %v1268_v13  ;;  %v8222_v21 = vsel %vm1043_vm3, %v1015_v12, %v1016_v41  ;;  %v8226_v9 = vsel %vm1043_vm3, %v1014_v34, %v1015_v12  ;;  %v5894_v12 = vld [vmem:[%s9853_s3 + $0x6d8] sm:$0xff]  ;;  %v1017_v30 = vrot.slane %v8204_v31, 7  ;;  %v8255_v34 = vld [vmem:[%s9856_s6 + $0x8] sm:$0xff]   ;;  %v10128_v13 = vld [vmem:[#allocation34_spill] sm:$0xff] }
 0x138   : > { %10124 = vst [vmem:[#allocation93_spill] sm:$0xff] %v8214_v37  ;;  %10125 = vst [vmem:[#allocation94_spill] sm:$0xff] %v8222_v21  ;;  %v2447_v18 = vpack.c.bf16 %v2431_v28, %v2430_v49  ;;  %6453 = vmatmul.mubr.msk.bf16.vlgmr.msra.gmra.mrb[32].mxu0 %vm1292_vm2, %v1269_v15  ;;  %v2890_v10 = vpack.c.bf16 %v2859_v25, %v2858_v54  ;;  %3741 = vperm.xlu1 %7060, %v5892_v22   ;;  %v10127_v28 = vld [vmem:[#allocation33_spill] sm:$0xff]  ;;  %v1020_v49 = vrot.slane %v10128_v13, 7  ;;  %v10129_v22 = vld [vmem:[#allocation32_spill] sm:$0xff] }
 0x139   : > { %10126 = vst [vmem:[#allocation95_spill] sm:$0xff] %v8226_v9  ;;  %6456 = vmatprep.mubr.msk.bf16.mxu0 %vm1292_vm2, %v1270_v17  ;;  %v1243_v16 = vmul.f32 %v7446_v35, %v8214_v37  ;;  %v1242_v45 = vmul.f32 %v7448_v36, %v8194_v33  ;;  %3736 = vperm.xlu0 %7059, %v5891_v58   ;;  %v1018_v35 = vrot.slane %v8208_v24, 7  ;;  %v5893_v36 = vld [vmem:[%s9853_s3 + $0x6d0] sm:$0xff]  ;;  %v1019_v3 = vrot.slane %v10127_v28, 7  ;;  %v10130_v25 = vld [vmem:[#allocation41_spill] sm:$0xff] }
 0x13a   : > { %6583 = vmatmul.mubr.msk.bf16.gmra.mrb[16].mxu1 %vm1292_vm2, %v2447_v18  ;;  %v1245_v29 = vmul.f32 %v7456_v39, %v8222_v21  ;;  %v1244_v54 = vmul.f32 %v7458_v40, %v8226_v9  ;;  %v2861_v39 = vmul.f32 %v7783_v53, %v8021_v11  ;;  %v2860_v40 = vmul.f32 %v7785_v56, %v8077_v8  ;;  %v8263_v15 = vpop.permute.xlu1 %2835  ;;  %v8265_v17 = vpop.permute.xlu0 %2830  ;;  %v5896_v56 = vld [vmem:[%s9853_s3 + $0x6e8] sm:$0xff] }
 0x13b   : > { %6588 = vmatprep.mubr.msk.bf16.mxu1 %vm1292_vm2, %v2890_v10  ;;  %6485 = vmatpush3.bf16.msra.mxu0 %v10129_v22  ;;  %v2863_v58 = vmul.f32 %v10130_v25, %v8214_v37  ;;  %v2862_v18 = vmul.f32 %v7813_v48, %v8194_v33  ;;  %v1271_v53 = vpack.c.bf16 %v1243_v16, %v1242_v45  ;;  %v5895_v48 = vld [vmem:[%s9853_s3 + $0x6e0] sm:$0xff]  ;;  %v10137_v25 = vld [vmem:[#allocation4_spill] sm:$0xff]  ;;  %v10142_v33 = vld [vmem:[#allocation37_spill] sm:$0xff] }
 0x13c   : > { %3751 = vperm.xlu1 %7060, %v5894_v12   ;;  %v8277_v10 = vsel %vm1043_vm3, %v1017_v30, %v1018_v35  ;;  %v8281_v22 = vsel %vm1043_vm3, %v1016_v41, %v1017_v30  ;;  %v1272_v55 = vpack.c.bf16 %v1245_v29, %v1244_v54  ;;  %6518 = vmatprep.subr.bf16.mxu0 %v8255_v34  ;;  %v8303_v54 = vld [vmem:[%s9856_s6 + $0x30] sm:$0xff]   ;;  %v1024_v37 = vrot.slane %v10142_v33, 7 }
 0x13d   : > { %3746 = vperm.xlu0 %7059, %v5893_v36   ;;  %10131 = vst [vmem:[#allocation33_spill] sm:$0xff] %v8277_v10  ;;  %10132 = vst [vmem:[#allocation34_spill] sm:$0xff] %v8281_v22  ;;  %v2891_v16 = vpack.c.bf16 %v2861_v39, %v2860_v40  ;;  %v8289_v45 = vsel %vm1043_vm3, %v1019_v3, %v1020_v49  ;;  %v8293_v12 = vsel %vm1043_vm3, %v1018_v35, %v1019_v3  ;;  %v10135_v36 = vld [vmem:[#allocation2_spill] sm:$0xff]  ;;  %v10136_v35 = vld [vmem:[#allocation3_spill] sm:$0xff] }
 0x13e   : > { %10133 = vst [vmem:[#allocation32_spill] sm:$0xff] %v8289_v45  ;;  %10134 = vst [vmem:[#allocation41_spill] sm:$0xff] %v8293_v12  ;;  %v8296_v41 = vpop.permute.xlu1 %2845  ;;  %v8298_v29 = vpop.permute.xlu0 %2840  ;;  %v2892_v30 = vpack.c.bf16 %v2863_v58, %v2862_v18  ;;  %v1247_v39 = vmul.f32 %v10135_v36, %v8277_v10  ;;  %v1246_v40 = vmul.f32 %v10136_v35, %v8281_v22  ;;  %v5898_v3 = vld [vmem:[%s9853_s3 + $0x6f8] sm:$0xff]  ;;  %v10139_v18 = vld [vmem:[#allocation36_spill] sm:$0xff]  ;;  %v1022_v36 = vrot.slane %v10140_v59, 7 }
 0x13f   : > { %v10138_v58 = vld [vmem:[#allocation5_spill] sm:$0xff]  ;;  %v2864_v35 = vmul.f32 %v7847_v14, %v8226_v9  ;;  %v5900_v14 = vld [vmem:[%s9853_s3 + $0x708] sm:$0xff] }
 0x140   : > { %6457 = vmatmul.mubr.msk.bf16.gmra.mrb[36].mxu0 %vm1292_vm2, %v1271_v53  ;;  %3761 = vperm.xlu1 %7060, %v5896_v56   ;;  %v1249_v53 = vmul.f32 %v10137_v25, %v8289_v45  ;;  %v1021_v56 = vrot.slane %v10139_v18, 7  ;;  %v10141_v25 = vld [vmem:[#allocation35_spill] sm:$0xff] }
 0x141   : > { %6460 = vmatprep.mubr.msk.bf16.mxu0 %vm1292_vm2, %v1272_v55  ;;  %3756 = vperm.xlu0 %7059, %v5895_v48   ;;  %v1248_v55 = vmul.f32 %v10138_v58, %v8293_v12  ;;  %v5897_v48 = vld [vmem:[%s9853_s3 + $0x6f0] sm:$0xff]  ;;  %v1023_v58 = vrot.slane %v10141_v25, 7 }
 0x142   : > { %6589 = vmatmul.mubr.msk.bf16.vlgmr.msra.gmra.mrb[20].mxu1 %vm1292_vm2, %v2891_v16  ;;  %v2865_v16 = vmul.f32 %v7845_v6, %v8222_v21  ;;  %v8331_v8 = vpop.permute.xlu1 %2855  ;;  %v8333_v11 = vpop.permute.xlu0 %2850  ;;  %v1273_v6 = vpack.c.bf16 %v1247_v39, %v1246_v40  ;;  %v8345_v9 = vsel %vm1043_vm3, %v1021_v56, %v1022_v36  ;;  %v8349_v21 = vsel %vm1043_vm3, %v1020_v49, %v1021_v56  ;;  %v10179_v25 = vld [vmem:[#allocation64_spill] sm:$0xff] }
 0x143   : > { %6592 = vmatprep.mubr.msk.bf16.mxu1 %vm1292_vm2, %v2892_v30  ;;  %6621 = vmatpush3.bf16.msra.mxu1 %v7871_v47  ;;  %v2867_v30 = vmul.f32 %v7878_v60, %v8277_v10  ;;  %v10143_v47 = vld [vmem:[#allocation50_spill] sm:$0xff]  ;;  %10144 = vst [vmem:[#allocation2_spill] sm:$0xff] %v8345_v9  ;;  %10145 = vst [vmem:[#allocation3_spill] sm:$0xff] %v8349_v21  ;;  %v1274_v27 = vpack.c.bf16 %v1249_v53, %v1248_v55  ;;  %v1033_v59 = vrot.slane %v10179_v25, 7 }
 0x144   : > { %6654 = vmatprep.subr.bf16.mxu1 %v8303_v54  ;;  %v2866_v23 = vmul.f32 %v10143_v47, %v8281_v22  ;;  %3771 = vperm.xlu1 %7060, %v5898_v3   ;;  %v5899_v60 = vld [vmem:[%s9853_s3 + $0x700] sm:$0xff]  ;;  %v2893_v3 = vpack.c.bf16 %v2865_v16, %v2864_v35  ;;  %v8356_v39 = vsel %vm1043_vm3, %v1023_v58, %v1024_v37  ;;  %v10149_v16 = vld [vmem:[#allocation7_spill] sm:$0xff] }
 0x145   : > { %3766 = vperm.xlu0 %7059, %v5897_v48   ;;  %10146 = vst [vmem:[#allocation4_spill] sm:$0xff] %v8356_v39  ;;  %v8360_v40 = vsel %vm1043_vm3, %v1022_v36, %v1023_v58  ;;  %v10148_v55 = vld [vmem:[#allocation6_spill] sm:$0xff]  ;;  %v1250_v35 = vmul.f32 %v10149_v16, %v8349_v21  ;;  %v5902_v36 = vld [vmem:[%s9853_s3 + $0x718] sm:$0xff]  ;;  %v10150_v58 = vld [vmem:[#allocation8_spill] sm:$0xff] }
 0x146   : > { %10147 = vst [vmem:[#allocation5_spill] sm:$0xff] %v8360_v40  ;;  %v8363_v48 = vpop.permute.xlu1 %3163  ;;  %v8365_v49 = vpop.permute.xlu0 %3158  ;;  %v2894_v53 = vpack.c.bf16 %v2867_v30, %v2866_v23  ;;  %v1251_v56 = vmul.f32 %v10148_v55, %v8345_v9  ;;  %v1253_v47 = vmul.f32 %v10150_v58, %v8356_v39  ;;  %v10151_v23 = vld [vmem:[#allocation9_spill] sm:$0xff]  ;;  %v2868_v55 = vmul.f32 %v7916_v57, %v8293_v12  ;;  %v10153_v16 = vld [vmem:[#allocation42_spill] sm:$0xff]  ;;  %v5904_v57 = vld [vmem:[%s9853_s3 + $0x728] sm:$0xff] }
 0x147   : > { %v10152_v30 = vld [vmem:[#allocation45_spill] sm:$0xff]  ;;  %v1027_v58 = vrot.slane %v10153_v16, 7  ;;  %v10154_v22 = vld [vmem:[#allocation46_spill] sm:$0xff] }
 0x148   : > { %6461 = vmatmul.mubr.msk.bf16.gmra.mrb[40].mxu0 %vm1292_vm2, %v1273_v6  ;;  %4079 = vperm.xlu1 %7060, %v5900_v14   ;;  %v1025_v6 = vrot.slane %v10152_v30, 7  ;;  %v1026_v14 = vrot.slane %v7859_v4, 7  ;;  %v2870_v4 = vmul.f32 %v7952_v5, %v8349_v21 }
 0x149   : > { %6464 = vmatprep.mubr.msk.bf16.mxu0 %vm1292_vm2, %v1274_v27  ;;  %4074 = vperm.xlu0 %7059, %v5899_v60   ;;  %v1252_v27 = vmul.f32 %v10151_v23, %v8360_v40  ;;  %v5901_v60 = vld [vmem:[%s9853_s3 + $0x710] sm:$0xff]  ;;  %v1028_v23 = vrot.slane %v10154_v22, 7 }
 0x14a   : > { %6593 = vmatmul.mubr.msk.bf16.gmra.mrb[24].mxu1 %vm1292_vm2, %v2893_v3  ;;  %v2869_v3 = vmul.f32 %v7914_v7, %v8289_v45  ;;  %v8392_v10 = vpop.permute.xlu1 %3173  ;;  %v8394_v30 = vpop.permute.xlu0 %3168  ;;  %v1275_v7 = vpack.c.bf16 %v1251_v56, %v1250_v35  ;;  %v8405_v12 = vsel %vm1043_vm3, %v1025_v6, %v1026_v14  ;;  %v8409_v45 = vsel %vm1043_vm3, %v1024_v37, %v1025_v6 }
 0x14b   : > { %6596 = vmatprep.mubr.msk.bf16.mxu1 %vm1292_vm2, %v2894_v53  ;;  %v2871_v53 = vmul.f32 %v7950_v0, %v8345_v9  ;;  %10155 = vst [vmem:[#allocation50_spill] sm:$0xff] %v8405_v12  ;;  %10156 = vst [vmem:[#allocation6_spill] sm:$0xff] %v8409_v45  ;;  %v1276_v22 = vpack.c.bf16 %v1253_v47, %v1252_v27  ;;  %v5903_v0 = vld [vmem:[%s9853_s3 + $0x720] sm:$0xff]  ;;  %v8416_v56 = vsel %vm1043_vm3, %v1027_v58, %v1028_v23  ;;  %v10166_v9 = vld [vmem:[#allocation55_spill] sm:$0xff] }
 0x14c   : > { %4089 = vperm.xlu1 %7060, %v5902_v36   ;;  %v2895_v5 = vpack.c.bf16 %v2869_v3, %v2868_v55  ;;  %10157 = vst [vmem:[#allocation7_spill] sm:$0xff] %v8416_v56  ;;  %v8420_v35 = vsel %vm1043_vm3, %v1026_v14, %v1027_v58  ;;  %v10159_v27 = vld [vmem:[#allocation10_spill] sm:$0xff]  ;;  %v5906_v14 = vld [vmem:[%s9853_s3 + $0x738] sm:$0xff]  ;;  %v10161_v55 = vld [vmem:[#allocation12_spill] sm:$0xff] }
 0x14d   : > { %4084 = vperm.xlu0 %7059, %v5901_v60   ;;  %10158 = vst [vmem:[#allocation8_spill] sm:$0xff] %v8420_v35  ;;  %v2896_v47 = vpack.c.bf16 %v2871_v53, %v2870_v4  ;;  %v1255_v6 = vmul.f32 %v10159_v27, %v8405_v12  ;;  %v10160_v60 = vld [vmem:[#allocation11_spill] sm:$0xff]  ;;  %v1257_v58 = vmul.f32 %v10161_v55, %v8416_v56  ;;  %v10162_v4 = vld [vmem:[#allocation13_spill] sm:$0xff]  ;;  %v10163_v53 = vld [vmem:[#allocation54_spill] sm:$0xff] }
 0x14e   : > { %v8423_v36 = vpop.permute.xlu1 %3183  ;;  %v8425_v37 = vpop.permute.xlu0 %3178  ;;  %v1254_v3 = vmul.f32 %v10160_v60, %v8409_v45  ;;  %v2872_v60 = vmul.f32 %v7993_v20, %v8360_v40  ;;  %v10165_v55 = vld [vmem:[#allocation51_spill] sm:$0xff] }
 0x14f   : > { %v1031_v21 = vrot.slane %v10165_v55, 7  ;;  %v5748_v20 = vld [vmem:[%s9853_s3 + $0x148] sm:$0xff] }
 0x150   : > { %6465 = vmatmul.mubr.msk.bf16.gmra.mrb[44].mxu0 %vm1292_vm2, %v1275_v7  ;;  %4099 = vperm.xlu1 %7060, %v5904_v57   ;;  %v1029_v7 = vrot.slane %v10163_v53, 7  ;;  %v10164_v57 = vld [vmem:[#allocation57_spill] sm:$0xff] }
 0x151   : > { %6468 = vmatprep.mubr.msk.bf16.mxu0 %vm1292_vm2, %v1276_v22  ;;  %4094 = vperm.xlu0 %7059, %v5903_v0   ;;  %v1256_v22 = vmul.f32 %v10162_v4, %v8420_v35  ;;  %v1030_v27 = vrot.slane %v10164_v57, 7  ;;  %v5905_v0 = vld [vmem:[%s9853_s3 + $0x730] sm:$0xff]  ;;  %v1032_v4 = vrot.slane %v10166_v9, 7  ;;  %v10167_v57 = vld [vmem:[#allocation71_spill] sm:$0xff]  ;;  %v5747_v9 = vld [vmem:[%s9853_s3 + $0x140] sm:$0xff] }
 0x152   : > { %6597 = vmatmul.mubr.msk.bf16.gmra.mrb[28].mxu1 %vm1292_vm2, %v2895_v5  ;;  %v2873_v5 = vmul.f32 %v7991_v44, %v8356_v39  ;;  %v8452_v16 = vpop.permute.xlu1 %3193  ;;  %v8454_v53 = vpop.permute.xlu0 %3188  ;;  %v2874_v33 = vmul.f32 %v10167_v57, %v8409_v45  ;;  %v1277_v44 = vpack.c.bf16 %v1255_v6, %v1254_v3  ;;  %v8472_v57 = vsel %vm1043_vm3, %v1028_v23, %v1029_v7  ;;  %v10171_v23 = vld [vmem:[#allocation14_spill] sm:$0xff] }
 0x153   : > { %6600 = vmatprep.mubr.msk.bf16.mxu1 %vm1292_vm2, %v2896_v47  ;;  %v2875_v47 = vmul.f32 %v8031_v52, %v8405_v12  ;;  %v8465_v40 = vsel %vm1043_vm3, %v1029_v7, %v1030_v27  ;;  %v1278_v39 = vpack.c.bf16 %v1257_v58, %v1256_v22  ;;  %v8476_v6 = vsel %vm1043_vm3, %v1031_v21, %v1032_v4 }
 0x154   : > { %4109 = vperm.xlu1 %7060, %v5906_v14   ;;  %10168 = vst [vmem:[#allocation9_spill] sm:$0xff] %v8465_v40  ;;  %v2897_v52 = vpack.c.bf16 %v2873_v5, %v2872_v60  ;;  %10169 = vst [vmem:[#allocation10_spill] sm:$0xff] %v8476_v6  ;;  %v8480_v3 = vsel %vm1043_vm3, %v1030_v27, %v1031_v21  ;;  %v1259_v7 = vmul.f32 %v10171_v23, %v8465_v40  ;;  %v5908_v21 = vld [vmem:[%s9853_s3 + $0x748] sm:$0xff]  ;;  %v10173_v5 = vld [vmem:[#allocation16_spill] sm:$0xff] }
 0x155   : > { %4104 = vperm.xlu0 %7059, %v5905_v0   ;;  %10170 = vst [vmem:[#allocation11_spill] sm:$0xff] %v8480_v3  ;;  %v2898_v22 = vpack.c.bf16 %v2875_v47, %v2874_v33  ;;  %v10172_v27 = vld [vmem:[#allocation15_spill] sm:$0xff]  ;;  %v1261_v60 = vmul.f32 %v10173_v5, %v8476_v6  ;;  %v10174_v33 = vld [vmem:[#allocation17_spill] sm:$0xff]  ;;  %v1036_v5 = vrot.slane %v8029_v43, 7 }
 0x156   : > { %v8483_v14 = vpop.permute.xlu1 %3203  ;;  %v8485_v58 = vpop.permute.xlu0 %3198  ;;  %v1258_v0 = vmul.f32 %v10172_v27, %v8472_v57  ;;  %v10175_v47 = vld [vmem:[#allocation67_spill] sm:$0xff]  ;;  %v10176_v23 = vld [vmem:[#allocation61_spill] sm:$0xff] }
 0x157   : > { %v1035_v27 = vrot.slane %v10176_v23, 7 }
 0x158   : > { %6469 = vmatmul.mubr.msk.bf16.gmra.mrb[48].mxu0 %vm1292_vm2, %v1277_v44  ;;  %1764 = vperm.xlu1 %7060, %v5748_v20   ;;  %v1034_v44 = vrot.slane %v10175_v47, 7  ;;  %v2877_v20 = vmul.f32 %v8082_v42, %v8416_v56  ;;  %v10178_v47 = vld [vmem:[#allocation86_spill] sm:$0xff]  ;;  %v1279_v42 = vpack.c.bf16 %v1259_v7, %v1258_v0 }
 0x159   : > { %6472 = vmatprep.mubr.msk.bf16.mxu0 %vm1292_vm2, %v1278_v39  ;;  %1759 = vperm.xlu0 %7059, %v5747_v9   ;;  %v1260_v39 = vmul.f32 %v10174_v33, %v8480_v3  ;;  %v5907_v9 = vld [vmem:[%s9853_s3 + $0x740] sm:$0xff]  ;;  %v2878_v55 = vmul.f32 %v10178_v47, %v8472_v57  ;;  %v8532_v47 = vsel %vm1043_vm3, %v1035_v27, %v1036_v5 }
 0x15a   : > { %6601 = vmatmul.mubr.msk.bf16.gmra.mrb[0].mxu1 %vm1292_vm2, %v2897_v52  ;;  %v2876_v52 = vmul.f32 %v8084_v62, %v8420_v35  ;;  %v8511_v45 = vpop.permute.xlu1 %3213  ;;  %v8513_v33 = vpop.permute.xlu0 %3208  ;;  %v5750_v62 = vld [vmem:[%s9853_s3 + $0x158] sm:$0xff]  ;;  %v8525_v35 = vsel %vm1043_vm3, %v1033_v59, %v1034_v44  ;;  %v8536_v7 = vsel %vm1043_vm3, %v1034_v44, %v1035_v27  ;;  %v10184_v27 = vld [vmem:[#allocation19_spill] sm:$0xff] }
 0x15b   : > { %6604 = vmatprep.mubr.msk.bf16.mxu1 %vm1292_vm2, %v2898_v22  ;;  %v10177_v22 = vld [vmem:[#allocation85_spill] sm:$0xff]  ;;  %v1280_v56 = vpack.c.bf16 %v1261_v60, %v1260_v39  ;;  %10180 = vst [vmem:[#allocation12_spill] sm:$0xff] %v8536_v7  ;;  %v8545_v39 = vsel %vm1043_vm3, %v1032_v4, %v1033_v59  ;;  %v2880_v4 = vmul.f32 %v8177_v51, %v8480_v3  ;;  %v5752_v51 = vld [vmem:[%s9853_s3 + $0x168] sm:$0xff] }
 0x15c   : > { %v2879_v12 = vmul.f32 %v10177_v22, %v8465_v40  ;;  %4119 = vperm.xlu1 %7060, %v5908_v21   ;;  %v5749_v22 = vld [vmem:[%s9853_s3 + $0x150] sm:$0xff]  ;;  %v2899_v40 = vpack.c.bf16 %v2877_v20, %v2876_v52  ;;  %v5910_v44 = vld [vmem:[%s9853_s3 + $0x758] sm:$0xff] }
 0x15d   : > { %4114 = vperm.xlu0 %7059, %v5907_v9   ;;  %v10181_v9 = vld [vmem:[#allocation18_spill] sm:$0xff]  ;;  %v10182_v52 = vld [vmem:[#allocation20_spill] sm:$0xff] }
 0x15e   : > { %v8539_v21 = vpop.permute.xlu1 %3223  ;;  %v8541_v0 = vpop.permute.xlu0 %3218  ;;  %v2900_v60 = vpack.c.bf16 %v2879_v12, %v2878_v55  ;;  %v1263_v20 = vmul.f32 %v10181_v9, %v8525_v35  ;;  %v1265_v12 = vmul.f32 %v10182_v52, %v8532_v47  ;;  %v10183_v55 = vld [vmem:[#allocation21_spill] sm:$0xff]  ;;  %v2882_v9 = vmul.f32 %v8231_v19, %v8545_v39  ;;  %v10185_v52 = vld [vmem:[#allocation75_spill] sm:$0xff] }
 0x15f   : > { %v1264_v59 = vmul.f32 %v10183_v55, %v8536_v7  ;;  %v1037_v55 = vrot.slane %v10185_v52, 7 }
 0x160   : > { %6473 = vmatmul.mubr.msk.bf16.gmra.mrb[52].mxu0 %vm1292_vm2, %v1279_v42  ;;  %1774 = vperm.xlu1 %7060, %v5750_v62   ;;  %v1262_v42 = vmul.f32 %v10184_v27, %v8545_v39  ;;  %v10186_v27 = vrot.slane %v8103_v26, 7 }
 0x161   : > { %6476 = vmatprep.mubr.msk.bf16.mxu0 %vm1292_vm2, %v1280_v56  ;;  %1769 = vperm.xlu0 %7059, %v5749_v22   ;;  %v5909_v56 = vld [vmem:[%s9853_s3 + $0x750] sm:$0xff] }
 0x162   : > { %6605 = vmatmul.mubr.msk.bf16.gmra.mrb[4].mxu1 %vm1292_vm2, %v2899_v40  ;;  %v2881_v40 = vmul.f32 %v8175_v38, %v8476_v6  ;;  %v8568_v62 = vpop.permute.xlu1 %3233  ;;  %v8570_v22 = vpop.permute.xlu0 %3228  ;;  %v1281_v38 = vpack.c.bf16 %v1263_v20, %v1262_v42  ;;  %v8584_v3 = vsel %vm1043_vm3, %v1037_v55, %v10186_v27  ;;  %v1282_v6 = vpack.c.bf16 %v1265_v12, %v1264_v59  ;;  %v10189_v12 = vld [vmem:[#allocation22_spill] sm:$0xff] }
 0x163   : > { %6608 = vmatprep.mubr.msk.bf16.mxu1 %vm1292_vm2, %v2900_v60  ;;  %v2883_v60 = vmul.f32 %v8229_v1, %v8525_v35  ;;  %10187 = vst [vmem:[#allocation13_spill] sm:$0xff] %v8584_v3  ;;  %v5751_v1 = vld [vmem:[%s9853_s3 + $0x160] sm:$0xff]  ;;  %v8596_v42 = vsel %vm1043_vm3, %v1036_v5, %v1037_v55  ;;  %v1267_v59 = vmul.f32 %v10189_v12, %v8584_v3 }
 0x164   : > { %4129 = vperm.xlu1 %7060, %v5910_v44   ;;  %v2901_v19 = vpack.c.bf16 %v2881_v40, %v2880_v4  ;;  %10188 = vst [vmem:[#allocation71_spill] sm:$0xff] %v8596_v42  ;;  %v5912_v40 = vld [vmem:[%s9853_s3 + $0x768] sm:$0xff]  ;;  %v5911_v5 = vld [vmem:[%s9853_s3 + $0x760] sm:$0xff]  ;;  %v2884_v4 = vmul.f32 %v8265_v17, %v8536_v7  ;;  %v2886_v27 = vmul.f32 %v8298_v29, %v8596_v42  ;;  %v10191_v17 = vld [vmem:[#allocation60_spill] sm:$0xff]  ;;  %v9976_v29 = vrot.slane %v7998_v61, 1 }
 0x165   : > { %4124 = vperm.xlu0 %7059, %v5909_v56   ;;  %v2902_v56 = vpack.c.bf16 %v2883_v60, %v2882_v9  ;;  %v10190_v60 = vld [vmem:[#allocation23_spill] sm:$0xff] }
 0x166   : > { %v8590_v44 = vpop.permute.xlu1 %3243  ;;  %v8592_v20 = vpop.permute.xlu0 %3238  ;;  %v1266_v9 = vmul.f32 %v10190_v60, %v8596_v42  ;;  %v10192_v60 = vld [vmem:[#allocation58_spill] sm:$0xff] }
 0x168   : > { %6477 = vmatmul.mubr.msk.bf16.gmra.mrb[56].mxu0 %vm1292_vm2, %v1281_v38  ;;  %1784 = vperm.xlu1 %7060, %v5752_v51   ;;  %v2887_v51 = vmul.f32 %v8296_v41, %v8584_v3  ;;  %v2176_v41 = vrot.slane %v10191_v17, 1  ;;  %v2177_v3 = vrot.slane %v10192_v60, 1 }
 0x169   : > { %6480 = vmatprep.mubr.msk.bf16.mxu0 %vm1292_vm2, %v1282_v6  ;;  %1779 = vperm.xlu0 %7059, %v5751_v1   ;;  %v2885_v6 = vmul.f32 %v8263_v15, %v8532_v47  ;;  %v1283_v1 = vpack.c.bf16 %v1267_v59, %v1266_v9  ;;  %v5754_v15 = vld [vmem:[%s9853_s3 + $0x178] sm:$0xff]  ;;  %v2889_v9 = vmul.f32 %v8331_v8, %v8149_v32 }
 0x16a   : > { %6609 = vmatmul.mubr.msk.bf16.gmra.mrb[8].mxu1 %vm1292_vm2, %v2901_v19  ;;  %v8615_v55 = vpop.permute.xlu1 %3253  ;;  %v8617_v38 = vpop.permute.xlu0 %3248  ;;  %v990_v19 = vpack.c.bf16 %v10191_v17, %v7998_v61 }
 0x16b   : > { %6612 = vmatprep.mubr.msk.bf16.mxu1 %vm1292_vm2, %v2902_v56  ;;  %v5753_v56 = vld [vmem:[%s9853_s3 + $0x170] sm:$0xff]  ;;  %v2903_v12 = vpack.c.bf16 %v2885_v6, %v2884_v4  ;;  %v5914_v6 = vld [vmem:[%s9853_s3 + $0x778] sm:$0xff] }
 0x16c   : > { %4139 = vperm.xlu1 %7060, %v5912_v40   ;;  %v5913_v4 = vld [vmem:[%s9853_s3 + $0x770] sm:$0xff] }
 0x16d   : > { %4134 = vperm.xlu0 %7059, %v5911_v5   ;;  %v2904_v5 = vpack.c.bf16 %v2887_v51, %v2886_v27  ;;  %v2888_v51 = vmul.f32 %v8333_v11, %v8155_v50  ;;  %v8654_v27 = vsel %vm2207_vm1, %v2176_v41, %v2177_v3 }
 0x16e   : > { %v8635_v59 = vpop.permute.xlu1 %3263  ;;  %v8637_v40 = vpop.permute.xlu0 %3258  ;;  %10193 = vst [vmem:[#allocation14_spill] sm:$0xff] %v8654_v27  ;;  %v3317_v8 = vmul.f32 %v8363_v48, %v8654_v27  ;;  %v5755_v48 = vld [vmem:[%s9853_s3 + $0x180] sm:$0xff] }
 0x170   : > { %6481 = vmatmul.mubr.msk.bf16.gmra.mrb[60].mxu0 %vm1292_vm2, %v1283_v1  ;;  %1794 = vperm.xlu1 %7060, %v5754_v15   ;;  %v8660_v1 = vsel %vm2207_vm1, %v9976_v29, %v2176_v41  ;;  %v2178_v41 = vrot.slane %v7943_v63, 1 }
 0x171   : > { %6486 = vmatprep.mubr.msk.bf16.mxu0 %vm1292_vm2, %v990_v19  ;;  %1789 = vperm.xlu0 %7059, %v5753_v56   ;;  %10194 = vst [vmem:[#allocation15_spill] sm:$0xff] %v8660_v1  ;;  %v3316_v11 = vmul.f32 %v8365_v49, %v8660_v1  ;;  %v991_v56 = vpack.c.bf16 %v7943_v63, %v10192_v60 }
 0x172   : > { %6613 = vmatmul.mubr.msk.bf16.gmra.mrb[12].mxu1 %vm1292_vm2, %v2903_v12  ;;  %v8662_v15 = vpop.permute.xlu1 %3273  ;;  %v8664_v19 = vpop.permute.xlu0 %3268  ;;  %v5756_v12 = vld [vmem:[%s9853_s3 + $0x188] sm:$0xff]  ;;  %v2905_v49 = vpack.c.bf16 %v2889_v9, %v2888_v51 }
 0x173   : > { %6616 = vmatprep.mubr.msk.bf16.mxu1 %vm1292_vm2, %v2904_v5  ;;  %v10195_v5 = vld [vmem:[#allocation79_spill] sm:$0xff]  ;;  %v3348_v42 = vpack.c.bf16 %v3317_v8, %v3316_v11 }
 0x174   : > { %4149 = vperm.xlu1 %7060, %v5914_v6   ;;  %v2179_v29 = vrot.slane %v10195_v5, 1  ;;  %v992_v50 = vpack.c.bf16 %v8117_v46, %v10195_v5  ;;  %v2180_v6 = vrot.slane %v8117_v46, 1  ;;  %v5916_v9 = vld [vmem:[%s9853_s3 + $0x788] sm:$0xff] }
 0x175   : > { %4144 = vperm.xlu0 %7059, %v5913_v4   ;;  %v10196_v4 = vld [vmem:[#allocation76_spill] sm:$0xff] }
 0x176   : > { %v2181_v1 = vrot.slane %v10196_v4, 1  ;;  %v8685_v27 = vpop.permute.xlu1 %3283  ;;  %v8687_v32 = vpop.permute.xlu0 %3278  ;;  %v8696_v51 = vsel %vm2207_vm1, %v2178_v41, %v2179_v29 }
 0x177   : > { %10197 = vst [vmem:[#allocation16_spill] sm:$0xff] %v8696_v51  ;;  %v3319_v8 = vmul.f32 %v8392_v10, %v8696_v51  ;;  %v994_v51 = vpack.c.bf16 %v8208_v24, %v8204_v31 }
 0x178   : > { %6487 = vmatmul.mubr.msk.bf16.vlgmr.msra.gmra.mrb[32].mxu0 %vm1292_vm2, %v991_v56  ;;  %1804 = vperm.xlu1 %7060, %v5756_v12   ;;  %v8700_v56 = vsel %vm2207_vm1, %v2177_v3, %v2178_v41  ;;  %v8713_v12 = vsel %vm2207_vm1, %v2180_v6, %v2181_v1  ;;  %v8717_v3 = vsel %vm2207_vm1, %v2179_v29, %v2180_v6  ;;  %v10201_v29 = vld [vmem:[#allocation81_spill] sm:$0xff] }
 0x179   : > { %6490 = vmatprep.mubr.msk.bf16.mxu0 %vm1292_vm2, %v992_v50  ;;  %1799 = vperm.xlu0 %7059, %v5755_v48   ;;  %10198 = vst [vmem:[#allocation17_spill] sm:$0xff] %v8700_v56  ;;  %v5915_v50 = vld [vmem:[%s9853_s3 + $0x780] sm:$0xff]  ;;  %v3318_v11 = vmul.f32 %v8394_v30, %v8700_v56  ;;  %10199 = vst [vmem:[#allocation85_spill] sm:$0xff] %v8713_v12  ;;  %v3321_v10 = vmul.f32 %v8423_v36, %v8713_v12  ;;  %v2182_v6 = vrot.slane %v10201_v29, 1  ;;  %v5757_v36 = vld [vmem:[%s9853_s3 + $0x190] sm:$0xff] }
 0x17a   : > { %6617 = vmatmul.mubr.msk.bf16.gmra.mrb[16].mxu1 %vm1292_vm2, %v2905_v49  ;;  %6519 = vmatpush3.bf16.msra.mxu0 %v8255_v34  ;;  %10200 = vst [vmem:[#allocation86_spill] sm:$0xff] %v8717_v3  ;;  %v8721_v41 = vpop.permute.xlu0 %3288  ;;  %v8726_v34 = vld [vmem:[%s9856_s6 + $0x10] sm:$0xff]   ;;  %v3320_v30 = vmul.f32 %v8425_v37, %v8717_v3  ;;  %v993_v48 = vpack.c.bf16 %v10201_v29, %v10196_v4  ;;  %v5758_v49 = vld [vmem:[%s9853_s3 + $0x198] sm:$0xff]  ;;  %v2183_v56 = vrot.slane %v8204_v31, 1 }
 0x17b   : > { %6622 = vmatprep.mubr.msk.bf16.mxu1 %vm1292_vm2, %v3348_v42  ;;  %v8719_v42 = vpop.permute.xlu1 %3293  ;;  %6552 = vmatprep.subr.bf16.mxu0 %v8726_v34  ;;  %v3349_v37 = vpack.c.bf16 %v3319_v8, %v3318_v11  ;;  %v8754_v12 = vld [vmem:[%s9856_s6 + $0x38] sm:$0xff]  }
 0x17c   : > { %4159 = vperm.xlu1 %7060, %v5916_v9   ;;  %v2184_v9 = vrot.slane %v8208_v24, 1  ;;  %v3350_v7 = vpack.c.bf16 %v3321_v10, %v3320_v30  ;;  %v5918_v8 = vld [vmem:[%s9853_s3 + $0x798] sm:$0xff]  ;;  %v8763_v11 = vsel %vm2207_vm1, %v2182_v6, %v2183_v56 }
 0x17d   : > { %4154 = vperm.xlu0 %7059, %v5915_v50   ;;  %10202 = vst [vmem:[#allocation18_spill] sm:$0xff] %v8763_v11  ;;  %v3323_v10 = vmul.f32 %v8452_v16, %v8763_v11  ;;  %v10213_v11 = vld [vmem:[#allocation37_spill] sm:$0xff] }
 0x17e   : > { %v8749_v3 = vpop.permute.xlu0 %3298 }
 0x17f   : > { %v8747_v50 = vpop.permute.xlu1 %3303 }
 0x180   : > { %6491 = vmatmul.mubr.msk.bf16.gmra.mrb[36].mxu0 %vm1292_vm2, %v993_v48  ;;  %1814 = vperm.xlu1 %7060, %v5758_v49   ;;  %v8767_v48 = vsel %vm2207_vm1, %v2181_v1, %v2182_v6  ;;  %v10204_v49 = vrot.slane %v10127_v28, 1 }
 0x181   : > { %6494 = vmatprep.mubr.msk.bf16.mxu0 %vm1292_vm2, %v994_v51  ;;  %1809 = vperm.xlu0 %7059, %v5757_v36   ;;  %10203 = vst [vmem:[#allocation20_spill] sm:$0xff] %v8767_v48  ;;  %v5917_v51 = vld [vmem:[%s9853_s3 + $0x790] sm:$0xff]  ;;  %v3322_v30 = vmul.f32 %v8454_v53, %v8767_v48  ;;  %v995_v53 = vpack.c.bf16 %v10128_v13, %v10127_v28  ;;  %v10212_v48 = vld [vmem:[#allocation35_spill] sm:$0xff] }
 0x182   : > { %6623 = vmatmul.mubr.msk.bf16.vlgmr.msra.gmra.mrb[20].mxu1 %vm1292_vm2, %v3349_v37  ;;  %v8782_v1 = vsel %vm2207_vm1, %v2184_v9, %v10204_v49  ;;  %v8790_v36 = vpop.permute.xlu0 %3308  ;;  %v10207_v37 = vld [vmem:[#allocation39_spill] sm:$0xff]  ;;  %v5759_v49 = vld [vmem:[%s9853_s3 + $0x1a0] sm:$0xff] }
 0x183   : > { %6626 = vmatprep.mubr.msk.bf16.mxu1 %vm1292_vm2, %v3350_v7  ;;  %6655 = vmatpush3.bf16.msra.mxu1 %v8303_v54  ;;  %10205 = vst [vmem:[#allocation21_spill] sm:$0xff] %v8782_v1  ;;  %v8786_v7 = vsel %vm2207_vm1, %v2183_v56, %v2184_v9  ;;  %v8788_v6 = vpop.permute.xlu1 %3313  ;;  %v3325_v54 = vmul.f32 %v8483_v14, %v8782_v1  ;;  %v5760_v56 = vld [vmem:[%s9853_s3 + $0x1a8] sm:$0xff]  ;;  %v10211_v1 = vld [vmem:[#allocation44_spill] sm:$0xff] }
 0x184   : > { %10206 = vst [vmem:[#allocation19_spill] sm:$0xff] %v8786_v7  ;;  %6688 = vmatprep.subr.bf16.mxu1 %v8754_v12  ;;  %v3324_v16 = vmul.f32 %v8485_v58, %v8786_v7  ;;  %4169 = vperm.xlu1 %7060, %v5918_v8   ;;  %v996_v9 = vpack.c.bf16 %v10207_v37, %v10139_v18  ;;  %v5920_v7 = vld [vmem:[%s9853_s3 + $0x7a8] sm:$0xff]  ;;  %v5761_v37 = vld [vmem:[%s9853_s3 + $0x1b0] sm:$0xff] }
 0x185   : > { %4164 = vperm.xlu0 %7059, %v5917_v51   ;;  %v3351_v14 = vpack.c.bf16 %v3323_v10, %v3322_v30  ;;  %v5919_v10 = vld [vmem:[%s9853_s3 + $0x7a0] sm:$0xff]  ;;  %v10208_v30 = vld [vmem:[#allocation40_spill] sm:$0xff]  ;;  %v997_v18 = vpack.c.bf16 %v10213_v11, %v10212_v48 }
 0x186   : > { %v8810_v8 = vpop.permute.xlu0 %3616  ;;  %v3352_v51 = vpack.c.bf16 %v3325_v54, %v3324_v16  ;;  %v10209_v54 = vld [vmem:[#allocation38_spill] sm:$0xff] }
 0x187   : > { %v8808_v58 = vpop.permute.xlu1 %3621  ;;  %v3326_v16 = vmul.f32 %v8513_v33, %v10209_v54  ;;  %v10214_v33 = vld [vmem:[#allocation45_spill] sm:$0xff]  ;;  %v10215_v54 = vld [vmem:[#allocation48_spill] sm:$0xff]  ;;  %v5763_v11 = vld [vmem:[%s9853_s3 + $0x1c0] sm:$0xff] }
 0x188   : > { %6495 = vmatmul.mubr.msk.bf16.gmra.mrb[40].mxu0 %vm1292_vm2, %v995_v53  ;;  %1824 = vperm.xlu1 %7060, %v5760_v56   ;;  %v3327_v53 = vmul.f32 %v8511_v45, %v10208_v30  ;;  %v5762_v45 = vld [vmem:[%s9853_s3 + $0x1b8] sm:$0xff]  ;;  %v998_v30 = vpack.c.bf16 %v10215_v54, %v10214_v33  ;;  %v10220_v33 = vld [vmem:[#allocation42_spill] sm:$0xff] }
 0x189   : > { %6498 = vmatprep.mubr.msk.bf16.mxu0 %vm1292_vm2, %v996_v9  ;;  %1819 = vperm.xlu0 %7059, %v5759_v49   ;;  %v10210_v49 = vld [vmem:[#allocation43_spill] sm:$0xff]  ;;  %v10221_v54 = vld [vmem:[#allocation46_spill] sm:$0xff] }
 0x18a   : > { %6627 = vmatmul.mubr.msk.bf16.gmra.mrb[24].mxu1 %vm1292_vm2, %v3351_v14  ;;  %v8827_v9 = vpop.permute.xlu0 %3626  ;;  %v3329_v14 = vmul.f32 %v8539_v21, %v10210_v49  ;;  %v3353_v21 = vpack.c.bf16 %v3327_v53, %v3326_v16  ;;  %v10216_v53 = vld [vmem:[#allocation49_spill] sm:$0xff]  ;;  %v999_v48 = vpack.c.bf16 %v10221_v54, %v10220_v33 }
 0x18b   : > { %6630 = vmatprep.mubr.msk.bf16.mxu1 %vm1292_vm2, %v3352_v51  ;;  %v8825_v56 = vpop.permute.xlu1 %3631  ;;  %v3328_v51 = vmul.f32 %v8541_v0, %v10211_v1  ;;  %v5922_v1 = vld [vmem:[%s9853_s3 + $0x7b8] sm:$0xff]  ;;  %v3331_v16 = vmul.f32 %v8568_v62, %v10216_v53  ;;  %v5764_v62 = vld [vmem:[%s9853_s3 + $0x1c8] sm:$0xff] }
 0x18c   : > { %4179 = vperm.xlu1 %7060, %v5920_v7   ;;  %v10219_v49 = vld [vmem:[#allocation53_spill] sm:$0xff] }
 0x18d   : > { %4174 = vperm.xlu0 %7059, %v5919_v10   ;;  %v3354_v10 = vpack.c.bf16 %v3329_v14, %v3328_v51  ;;  %v10217_v14 = vld [vmem:[#allocation47_spill] sm:$0xff] }
 0x18e   : > { %v8846_v7 = vpop.permute.xlu0 %3636 }
 0x18f   : > { %v8844_v0 = vpop.permute.xlu1 %3641 }
 0x190   : > { %6499 = vmatmul.mubr.msk.bf16.gmra.mrb[44].mxu0 %vm1292_vm2, %v997_v18  ;;  %1834 = vperm.xlu1 %7060, %v5762_v45   ;;  %v5921_v18 = vld [vmem:[%s9853_s3 + $0x7b0] sm:$0xff] }
 0x191   : > { %6502 = vmatprep.mubr.msk.bf16.mxu0 %vm1292_vm2, %v998_v30  ;;  %1829 = vperm.xlu0 %7059, %v5761_v37   ;;  %v3330_v30 = vmul.f32 %v8570_v22, %v10217_v14  ;;  %v10218_v37 = vld [vmem:[#allocation52_spill] sm:$0xff]  ;;  %v10222_v22 = vld [vmem:[#allocation54_spill] sm:$0xff]  ;;  %v10223_v14 = vld [vmem:[#allocation57_spill] sm:$0xff] }
 0x192   : > { %6631 = vmatmul.mubr.msk.bf16.gmra.mrb[28].mxu1 %vm1292_vm2, %v3353_v21  ;;  %v8863_v45 = vpop.permute.xlu0 %3646  ;;  %v3333_v21 = vmul.f32 %v8590_v44, %v10218_v37  ;;  %v1000_v53 = vpack.c.bf16 %v10223_v14, %v10222_v22  ;;  %v10227_v37 = vld [vmem:[#allocation63_spill] sm:$0xff] }
 0x193   : > { %6634 = vmatprep.mubr.msk.bf16.mxu1 %vm1292_vm2, %v3354_v10  ;;  %v8861_v51 = vpop.permute.xlu1 %3651  ;;  %v3332_v10 = vmul.f32 %v8592_v20, %v10219_v49  ;;  %v3355_v44 = vpack.c.bf16 %v3331_v16, %v3330_v30  ;;  %v5924_v49 = vld [vmem:[%s9853_s3 + $0x7c8] sm:$0xff] }
 0x194   : > { %4189 = vperm.xlu1 %7060, %v5922_v1   ;;  %v10224_v16 = vld [vmem:[#allocation59_spill] sm:$0xff] }
 0x195   : > { %4184 = vperm.xlu0 %7059, %v5921_v18   ;;  %v3356_v18 = vpack.c.bf16 %v3333_v21, %v3332_v10  ;;  %v3335_v30 = vmul.f32 %v8615_v55, %v10224_v16  ;;  %v10225_v21 = vld [vmem:[#allocation56_spill] sm:$0xff]  ;;  %v10228_v22 = vld [vmem:[#allocation51_spill] sm:$0xff]  ;;  %v5766_v55 = vld [vmem:[%s9853_s3 + $0x1d8] sm:$0xff] }
 0x196   : > { %v8882_v1 = vpop.permute.xlu0 %3656  ;;  %v10229_v14 = vld [vmem:[#allocation55_spill] sm:$0xff]  ;;  %v5765_v16 = vld [vmem:[%s9853_s3 + $0x1d0] sm:$0xff] }
 0x197   : > { %v8880_v20 = vpop.permute.xlu1 %3661  ;;  %v1001_v33 = vpack.c.bf16 %v10229_v14, %v10228_v22 }
 0x198   : > { %6503 = vmatmul.mubr.msk.bf16.gmra.mrb[48].mxu0 %vm1292_vm2, %v999_v48  ;;  %1844 = vperm.xlu1 %7060, %v5764_v62   ;;  %v5923_v48 = vld [vmem:[%s9853_s3 + $0x7c0] sm:$0xff] }
 0x199   : > { %6506 = vmatprep.mubr.msk.bf16.mxu0 %vm1292_vm2, %v1000_v53  ;;  %1839 = vperm.xlu0 %7059, %v5763_v11   ;;  %v3334_v53 = vmul.f32 %v8617_v38, %v10225_v21  ;;  %v10226_v11 = vld [vmem:[#allocation62_spill] sm:$0xff]  ;;  %v10230_v38 = vld [vmem:[#allocation67_spill] sm:$0xff] }
 0x19a   : > { %6635 = vmatmul.mubr.msk.bf16.gmra.mrb[0].mxu1 %vm1292_vm2, %v3355_v44  ;;  %v8899_v62 = vpop.permute.xlu0 %3666  ;;  %v3337_v44 = vmul.f32 %v8635_v59, %v10226_v11  ;;  %v1002_v21 = vpack.c.bf16 %v10230_v38, %v10179_v25  ;;  %v10234_v11 = vld [vmem:[#allocation73_spill] sm:$0xff]  ;;  %v1003_v25 = vpack.c.bf16 %v8029_v43, %v10176_v23  ;;  %v10241_v23 = vld [vmem:[#allocation80_spill] sm:$0xff] }
 0x19b   : > { %6638 = vmatprep.mubr.msk.bf16.mxu1 %vm1292_vm2, %v3356_v18  ;;  %v8897_v10 = vpop.permute.xlu1 %3671  ;;  %v3336_v18 = vmul.f32 %v8637_v40, %v10227_v37  ;;  %v3357_v59 = vpack.c.bf16 %v3335_v30, %v3334_v53  ;;  %v5926_v37 = vld [vmem:[%s9853_s3 + $0x7d8] sm:$0xff] }
 0x19c   : > { %4199 = vperm.xlu1 %7060, %v5924_v49   ;;  %v10231_v30 = vld [vmem:[#allocation69_spill] sm:$0xff] }
 0x19d   : > { %4194 = vperm.xlu0 %7059, %v5923_v48   ;;  %v3358_v48 = vpack.c.bf16 %v3337_v44, %v3336_v18  ;;  %v3339_v53 = vmul.f32 %v8662_v15, %v10231_v30  ;;  %v10232_v44 = vld [vmem:[#allocation66_spill] sm:$0xff]  ;;  %v5768_v15 = vld [vmem:[%s9853_s3 + $0x1e8] sm:$0xff]  ;;  %v10242_v43 = vld [vmem:[#allocation25_spill] sm:$0xff] }
 0x19e   : > { %v8918_v49 = vpop.permute.xlu0 %3676  ;;  %v10239_v30 = vld [vmem:[#allocation90_spill] sm:$0xff] }
 0x19f   : > { %v8916_v40 = vpop.permute.xlu1 %3681 }
 0x1a0   : > { %6507 = vmatmul.mubr.msk.bf16.gmra.mrb[52].mxu0 %vm1292_vm2, %v1001_v33  ;;  %1854 = vperm.xlu1 %7060, %v5766_v55   ;;  %v5925_v33 = vld [vmem:[%s9853_s3 + $0x7d0] sm:$0xff] }
 0x1a1   : > { %6510 = vmatprep.mubr.msk.bf16.mxu0 %vm1292_vm2, %v1002_v21  ;;  %1849 = vperm.xlu0 %7059, %v5765_v16   ;;  %v3338_v21 = vmul.f32 %v8664_v19, %v10232_v44  ;;  %v10233_v16 = vld [vmem:[#allocation72_spill] sm:$0xff]  ;;  %v1004_v19 = vpack.c.bf16 %v8103_v26, %v10185_v52  ;;  %v5767_v44 = vld [vmem:[%s9853_s3 + $0x1e0] sm:$0xff]  ;;  %v10240_v52 = vld [vmem:[#allocation91_spill] sm:$0xff] }
 0x1a2   : > { %6639 = vmatmul.mubr.msk.bf16.gmra.mrb[4].mxu1 %vm1292_vm2, %v3357_v59  ;;  %v8935_v55 = vpop.permute.xlu0 %3686  ;;  %v3341_v59 = vmul.f32 %v8685_v27, %v10233_v16  ;;  %v3344_v26 = vmul.f32 %v8749_v3, %v10240_v52  ;;  %v10243_v52 = vld [vmem:[#allocation26_spill] sm:$0xff] }
 0x1a3   : > { %6642 = vmatprep.mubr.msk.bf16.mxu1 %vm1292_vm2, %v3358_v48  ;;  %v8933_v18 = vpop.permute.xlu1 %3691  ;;  %v3340_v48 = vmul.f32 %v8687_v32, %v10234_v11  ;;  %v3359_v27 = vpack.c.bf16 %v3339_v53, %v3338_v21  ;;  %v5928_v11 = vld [vmem:[%s9853_s3 + $0x7e8] sm:$0xff]  ;;  %v10235_v53 = vld [vmem:[#allocation78_spill] sm:$0xff]  ;;  %v10236_v21 = vld [vmem:[#allocation24_spill] sm:$0xff] }
 0x1a4   : > { %4209 = vperm.xlu1 %7060, %v5926_v37   ;;  %v1878_v16 = vmul.f32 %v10236_v21, %v10235_v53  ;;  %v1877_v21 = vmul.f32 %v10242_v43, %v10241_v23 }
 0x1a5   : > { %4204 = vperm.xlu0 %7059, %v5925_v33   ;;  %v3360_v33 = vpack.c.bf16 %v3341_v59, %v3340_v48  ;;  %v10237_v59 = vld [vmem:[#allocation84_spill] sm:$0xff] }
 0x1a6   : > { %v8954_v37 = vpop.permute.xlu0 %3696  ;;  %v3343_v48 = vmul.f32 %v8719_v42, %v10237_v59  ;;  %v1005_v42 = vpack.c.bf16 %v10235_v53, %v10241_v23  ;;  %v1909_v59 = vpack.c.bf16 %v1878_v16, %v1877_v21  ;;  %v5930_v16 = vld [vmem:[%s9853_s3 + $0x7f8] sm:$0xff] }
 0x1a7   : > { %v8952_v32 = vpop.permute.xlu1 %3701 }
 0x1a8   : > { %6511 = vmatmul.mubr.msk.bf16.gmra.mrb[56].mxu0 %vm1292_vm2, %v1003_v25  ;;  %1864 = vperm.xlu1 %7060, %v5768_v15   ;;  %v5927_v25 = vld [vmem:[%s9853_s3 + $0x7e0] sm:$0xff]  ;;  %v10238_v15 = vld [vmem:[#allocation83_spill] sm:$0xff] }
 0x1a9   : > { %6514 = vmatprep.mubr.msk.bf16.mxu0 %vm1292_vm2, %v1004_v19  ;;  %1859 = vperm.xlu0 %7059, %v5767_v44   ;;  %v3342_v19 = vmul.f32 %v8721_v41, %v10238_v15  ;;  %v5770_v41 = vld [vmem:[%s9853_s3 + $0x1f8] sm:$0xff]  ;;  %v2206_v15 = vrot.slane %v10235_v53, 1 }
 0x1aa   : > { %6643 = vmatmul.mubr.msk.bf16.gmra.mrb[8].mxu1 %vm1292_vm2, %v3359_v27  ;;  %v8973_v27 = vpop.permute.xlu0 %3706 }
 0x1ab   : > { %6646 = vmatprep.mubr.msk.bf16.mxu1 %vm1292_vm2, %v3360_v33  ;;  %v8971_v44 = vpop.permute.xlu1 %3711  ;;  %v3345_v33 = vmul.f32 %v8747_v50, %v10239_v30  ;;  %v5769_v50 = vld [vmem:[%s9853_s3 + $0x1f0] sm:$0xff]  ;;  %v3361_v3 = vpack.c.bf16 %v3343_v48, %v3342_v19  ;;  %v1880_v30 = vmul.f32 %v10243_v52, %v10191_v17  ;;  %v10244_v48 = vrot.slane %v7998_v61, 1 }
 0x1ac   : > { %4219 = vperm.xlu1 %7060, %v5928_v11   ;;  %v5929_v52 = vld [vmem:[%s9853_s3 + $0x7f0] sm:$0xff] }
 0x1ad   : > { %4214 = vperm.xlu0 %7059, %v5927_v25   ;;  %v3362_v25 = vpack.c.bf16 %v3345_v33, %v3344_v26  ;;  %v9006_v19 = vsel %vm2207_vm1, %v2206_v15, %v10244_v48  ;;  %v10246_v26 = vrot.slane %v10241_v23, 1  ;;  %v10248_v33 = vld [vmem:[#allocation28_spill] sm:$0xff] }
 0x1ae   : > { %10245 = vst [vmem:[#allocation22_spill] sm:$0xff] %v9006_v19  ;;  %v1882_v21 = vmul.f32 %v10248_v33, %v7943_v63  ;;  %v10252_v33 = vld [vmem:[#allocation29_spill] sm:$0xff] }
 0x1af   : > { %v8991_v11 = vpop.permute.xlu1 %3721  ;;  %v8993_v43 = vpop.permute.xlu0 %3716 }
 0x1b0   : > { %6515 = vmatmul.mubr.msk.bf16.gmra.mrb[60].mxu0 %vm1292_vm2, %v1005_v42  ;;  %1874 = vperm.xlu1 %7060, %v5770_v41   ;;  %v10249_v42 = vld [vmem:[#allocation27_spill] sm:$0xff] }
 0x1b1   : > { %6520 = vmatprep.mubr.msk.bf16.mxu0 %vm1292_vm2, %v1909_v59  ;;  %1869 = vperm.xlu0 %7059, %v5769_v50   ;;  %v9012_v59 = vsel %vm2207_vm1, %v10246_v26, %v2206_v15  ;;  %v1879_v41 = vmul.f32 %v10249_v42, %v7998_v61  ;;  %v3347_v50 = vmul.f32 %v8788_v6, %v9006_v19  ;;  %v10251_v26 = vld [vmem:[#allocation77_spill] sm:$0xff]  ;;  %v5772_v6 = vld [vmem:[%s9853_s3 + $0x208] sm:$0xff] }
 0x1b2   : > { %6647 = vmatmul.mubr.msk.bf16.gmra.mrb[12].mxu1 %vm1292_vm2, %v3361_v3  ;;  %10247 = vst [vmem:[#allocation23_spill] sm:$0xff] %v9012_v59  ;;  %v3346_v2 = vmul.f32 %v8790_v36, %v9012_v59  ;;  %v3774_v17 = vmul.f32 %v8810_v8, %v10251_v26  ;;  %v1881_v42 = vmul.f32 %v10252_v33, %v10192_v60  ;;  %v5771_v59 = vld [vmem:[%s9853_s3 + $0x200] sm:$0xff]  ;;  %v10258_v33 = vld [vmem:[#allocation95_spill] sm:$0xff] }
 0x1b3   : > { %6650 = vmatprep.mubr.msk.bf16.mxu1 %vm1292_vm2, %v3362_v25  ;;  %v9026_v15 = vpop.permute.xlu1 %3731  ;;  %v9028_v3 = vpop.permute.xlu0 %3726  ;;  %v10250_v25 = vld [vmem:[#allocation68_spill] sm:$0xff]  ;;  %v1910_v61 = vpack.c.bf16 %v1880_v30, %v1879_v41  ;;  %v5932_v30 = vld [vmem:[%s9853_s3 + $0x808] sm:$0xff] }
 0x1b4   : > { %v3775_v48 = vmul.f32 %v8808_v58, %v10250_v25  ;;  %4229 = vperm.xlu1 %7060, %v5930_v16   ;;  %v1911_v36 = vpack.c.bf16 %v1882_v21, %v1881_v42  ;;  %v3363_v19 = vpack.c.bf16 %v3347_v50, %v3346_v2  ;;  %v10256_v2 = vld [vmem:[#allocation31_spill] sm:$0xff]  ;;  %v3778_v42 = vmul.f32 %v8846_v7, %v10258_v33  ;;  %v9085_v7 = vld [vmem:[%s9856_s6 + $0x40] sm:$0xff]  }
 0x1b5   : > { %4224 = vperm.xlu0 %7059, %v5929_v52   ;;  %v10253_v52 = vld [vmem:[#allocation30_spill] sm:$0xff]  ;;  %v1883_v25 = vmul.f32 %v10256_v2, %v10195_v5  ;;  %v10261_v2 = vld [vmem:[#allocation32_spill] sm:$0xff] }
 0x1b6   : > { %v3806_v8 = vpack.c.bf16 %v3775_v48, %v3774_v17  ;;  %v1884_v21 = vmul.f32 %v10253_v52, %v8117_v46  ;;  %v10254_v17 = vld [vmem:[#allocation93_spill] sm:$0xff]  ;;  %v10257_v48 = vld [vmem:[#allocation94_spill] sm:$0xff] }
 0x1b7   : > { %v9043_v58 = vpop.permute.xlu1 %3741  ;;  %v3777_v41 = vmul.f32 %v8825_v56, %v10254_v17  ;;  %v3779_v26 = vmul.f32 %v8844_v0, %v10257_v48  ;;  %v5774_v56 = vld [vmem:[%s9853_s3 + $0x218] sm:$0xff] }
 0x1b8   : > { %6521 = vmatmul.mubr.msk.bf16.vlgmr.msra.gmra.mrb[32].mxu0 %vm1292_vm2, %v1910_v61  ;;  %v9045_v16 = vpop.permute.xlu0 %3736  ;;  %2247 = vperm.xlu1 %7060, %v5772_v6   ;;  %v5931_v61 = vld [vmem:[%s9853_s3 + $0x800] sm:$0xff]  ;;  %v5934_v52 = vld [vmem:[%s9853_s3 + $0x818] sm:$0xff] }
 0x1b9   : > { %6524 = vmatprep.mubr.msk.bf16.mxu0 %vm1292_vm2, %v1911_v36  ;;  %2242 = vperm.xlu0 %7059, %v5771_v59   ;;  %v10262_v48 = vld [vmem:[#allocation41_spill] sm:$0xff] }
 0x1ba   : > { %6651 = vmatmul.mubr.msk.bf16.gmra.mrb[16].mxu1 %vm1292_vm2, %v3363_v19  ;;  %6553 = vmatpush3.bf16.msra.mxu0 %v8726_v34  ;;  %v10255_v19 = vld [vmem:[#allocation92_spill] sm:$0xff]  ;;  %v1912_v34 = vpack.c.bf16 %v1884_v21, %v1883_v25  ;;  %v3783_v25 = vmul.f32 %v8880_v20, %v10261_v2 }
 0x1bb   : > { %6656 = vmatprep.mubr.msk.bf16.mxu1 %vm1292_vm2, %v3806_v8  ;;  %v3776_v59 = vmul.f32 %v8827_v9, %v10255_v19  ;;  %v9063_v50 = vpop.permute.xlu1 %3751  ;;  %v5773_v9 = vld [vmem:[%s9853_s3 + $0x210] sm:$0xff]  ;;  %v3808_v8 = vpack.c.bf16 %v3779_v26, %v3778_v42  ;;  %v3782_v26 = vmul.f32 %v8882_v1, %v10262_v48  ;;  %v5936_v1 = vld [vmem:[%s9853_s3 + $0x828] sm:$0xff] }
 0x1bc   : > { %v9071_v6 = vpop.permute.xlu0 %3746  ;;  %4537 = vperm.xlu1 %7060, %v5932_v30   ;;  %v5933_v21 = vld [vmem:[%s9853_s3 + $0x810] sm:$0xff] }
 0x1bd   : > { %4532 = vperm.xlu0 %7059, %v5931_v61   ;;  %v3807_v36 = vpack.c.bf16 %v3777_v41, %v3776_v59  ;;  %v10259_v61 = vld [vmem:[#allocation33_spill] sm:$0xff]  ;;  %v10260_v41 = vld [vmem:[#allocation34_spill] sm:$0xff] }
 0x1be   : > { %v3781_v17 = vmul.f32 %v8861_v51, %v10259_v61  ;;  %v3780_v19 = vmul.f32 %v8863_v45, %v10260_v41  ;;  %v5775_v51 = vld [vmem:[%s9853_s3 + $0x220] sm:$0xff]  ;;  %v10265_v61 = vld [vmem:[#allocation4_spill] sm:$0xff]  ;;  %v10266_v41 = vld [vmem:[#allocation5_spill] sm:$0xff] }
 0x1bf   : > { %v9080_v0 = vpop.permute.xlu1 %3761 }
 0x1c0   : > { %6525 = vmatmul.mubr.msk.bf16.gmra.mrb[36].mxu0 %vm1292_vm2, %v1912_v34  ;;  %v9087_v30 = vpop.permute.xlu0 %3756  ;;  %2257 = vperm.xlu1 %7060, %v5774_v56   ;;  %v3809_v45 = vpack.c.bf16 %v3781_v17, %v3780_v19  ;;  %v3810_v34 = vpack.c.bf16 %v3783_v25, %v3782_v26  ;;  %v5935_v56 = vld [vmem:[%s9853_s3 + $0x820] sm:$0xff]  ;;  %v3787_v17 = vmul.f32 %v8916_v40, %v10265_v61  ;;  %v5778_v25 = vld [vmem:[%s9853_s3 + $0x238] sm:$0xff] }
 0x1c1   : > { %2252 = vperm.xlu0 %7059, %v5773_v9   ;;  %v10263_v9 = vld [vmem:[#allocation2_spill] sm:$0xff]  ;;  %v3786_v19 = vmul.f32 %v8918_v49, %v10266_v41  ;;  %v5938_v49 = vld [vmem:[%s9853_s3 + $0x838] sm:$0xff] }
 0x1c2   : > { %6657 = vmatmul.mubr.msk.bf16.vlgmr.msra.gmra.mrb[20].mxu1 %vm1292_vm2, %v3807_v36  ;;  %v3785_v36 = vmul.f32 %v8897_v10, %v10263_v9  ;;  %v5777_v10 = vld [vmem:[%s9853_s3 + $0x230] sm:$0xff]  ;;  %v10269_v9 = vld [vmem:[#allocation7_spill] sm:$0xff] }
 0x1c3   : > { %6660 = vmatprep.mubr.msk.bf16.mxu1 %vm1292_vm2, %v3808_v8  ;;  %6689 = vmatpush3.bf16.msra.mxu1 %v8754_v12  ;;  %v9102_v59 = vpop.permute.xlu1 %3771  ;;  %v5776_v12 = vld [vmem:[%s9853_s3 + $0x228] sm:$0xff]  ;;  %v3812_v26 = vpack.c.bf16 %v3787_v17, %v3786_v19 }
 0x1c4   : > { %6722 = vmatprep.subr.bf16.mxu1 %v9085_v7  ;;  %v9109_v33 = vpop.permute.xlu0 %3766  ;;  %4547 = vperm.xlu1 %7060, %v5934_v52   ;;  %v10264_v8 = vld [vmem:[#allocation3_spill] sm:$0xff] }
 0x1c5   : > { %4542 = vperm.xlu0 %7059, %v5933_v21   ;;  %v3784_v52 = vmul.f32 %v8899_v62, %v10264_v8  ;;  %v10270_v8 = vld [vmem:[#allocation8_spill] sm:$0xff]  ;;  %v5780_v17 = vld [vmem:[%s9853_s3 + $0x248] sm:$0xff] }
 0x1c7   : > { %v9117_v42 = vpop.permute.xlu1 %4079  ;;  %v3811_v62 = vpack.c.bf16 %v3785_v36, %v3784_v52  ;;  %v3791_v36 = vmul.f32 %v8952_v32, %v10269_v9  ;;  %v3790_v52 = vmul.f32 %v8954_v37, %v10270_v8  ;;  %v10273_v9 = vld [vmem:[#allocation11_spill] sm:$0xff] }
 0x1c8   : > { %v9119_v20 = vpop.permute.xlu0 %4074  ;;  %2267 = vperm.xlu1 %7060, %v5776_v12   ;;  %v5937_v12 = vld [vmem:[%s9853_s3 + $0x830] sm:$0xff] }
 0x1c9   : > { %2262 = vperm.xlu0 %7059, %v5775_v51   ;;  %v10267_v51 = vld [vmem:[#allocation50_spill] sm:$0xff]  ;;  %v3814_v19 = vpack.c.bf16 %v3791_v36, %v3790_v52  ;;  %v3794_v36 = vmul.f32 %v8993_v43, %v10273_v9 }
 0x1ca   : > { %6661 = vmatmul.mubr.msk.bf16.gmra.mrb[24].mxu1 %vm1292_vm2, %v3809_v45  ;;  %v3789_v45 = vmul.f32 %v8933_v18, %v10267_v51  ;;  %v5779_v18 = vld [vmem:[%s9853_s3 + $0x240] sm:$0xff] }
 0x1cb   : > { %6664 = vmatprep.mubr.msk.bf16.mxu1 %vm1292_vm2, %v3810_v34  ;;  %v9133_v21 = vpop.permute.xlu1 %4089  ;;  %v10268_v34 = vld [vmem:[#allocation6_spill] sm:$0xff] }
 0x1cc   : > { %v9139_v2 = vpop.permute.xlu0 %4084  ;;  %4557 = vperm.xlu1 %7060, %v5936_v1   ;;  %v3788_v1 = vmul.f32 %v8935_v55, %v10268_v34  ;;  %v10272_v34 = vld [vmem:[#allocation10_spill] sm:$0xff] }
 0x1cd   : > { %4552 = vperm.xlu0 %7059, %v5935_v56  }
 0x1ce   : > { %v3813_v55 = vpack.c.bf16 %v3789_v45, %v3788_v1  ;;  %v3795_v1 = vmul.f32 %v8991_v11, %v10272_v34  ;;  %v5945_v34 = vld [vmem:[%s9853_s3 + $0x870] sm:$0xff] }
 0x1cf   : > { %v9147_v48 = vpop.permute.xlu1 %4099 }
 0x1d0   : > { %v9149_v40 = vpop.permute.xlu0 %4094  ;;  %2277 = vperm.xlu1 %7060, %v5778_v25   ;;  %v3816_v11 = vpack.c.bf16 %v3795_v1, %v3794_v36  ;;  %v10275_v1 = vld [vmem:[#allocation13_spill] sm:$0xff]  ;;  %v10276_v36 = vld [vmem:[#allocation71_spill] sm:$0xff] }
 0x1d1   : > { %2272 = vperm.xlu0 %7059, %v5777_v10   ;;  %v5940_v10 = vld [vmem:[%s9853_s3 + $0x848] sm:$0xff]  ;;  %v3801_v9 = vmul.f32 %v9063_v50, %v10275_v1 }
 0x1d2   : > { %6665 = vmatmul.mubr.msk.bf16.gmra.mrb[28].mxu1 %vm1292_vm2, %v3811_v62  ;;  %v5939_v62 = vld [vmem:[%s9853_s3 + $0x840] sm:$0xff]  ;;  %v5948_v50 = vld [vmem:[%s9853_s3 + $0x888] sm:$0xff] }
 0x1d3   : > { %6668 = vmatprep.mubr.msk.bf16.mxu1 %vm1292_vm2, %v3812_v26  ;;  %v9163_v56 = vpop.permute.xlu1 %4109  ;;  %v10271_v26 = vld [vmem:[#allocation9_spill] sm:$0xff] }
 0x1d4   : > { %v9169_v61 = vpop.permute.xlu0 %4104  ;;  %4567 = vperm.xlu1 %7060, %v5938_v49   ;;  %v3793_v49 = vmul.f32 %v8971_v44, %v10271_v26  ;;  %v5782_v44 = vld [vmem:[%s9853_s3 + $0x258] sm:$0xff] }
 0x1d5   : > { %4562 = vperm.xlu0 %7059, %v5937_v12   ;;  %v3792_v12 = vmul.f32 %v8973_v27, %v8472_v57  ;;  %v5781_v57 = vld [vmem:[%s9853_s3 + $0x250] sm:$0xff] }
 0x1d7   : > { %v1765_v41 = vpop.permute.xlu1 %1764  ;;  %v3815_v27 = vpack.c.bf16 %v3793_v49, %v3792_v12 }
 0x1d8   : > { %v1886_v32 = vmul.f32 %v1765_v41, %v10201_v29  ;;  %v1760_v25 = vpop.permute.xlu0 %1759  ;;  %2287 = vperm.xlu1 %7060, %v5780_v17   ;;  %v5941_v41 = vld [vmem:[%s9853_s3 + $0x850] sm:$0xff] }
 0x1d9   : > { %v1885_v37 = vmul.f32 %v1760_v25, %v10196_v4  ;;  %2282 = vperm.xlu0 %7059, %v5779_v18  }
 0x1da   : > { %6669 = vmatmul.mubr.msk.bf16.gmra.mrb[0].mxu1 %vm1292_vm2, %v3813_v55  ;;  %v5942_v55 = vld [vmem:[%s9853_s3 + $0x858] sm:$0xff] }
 0x1db   : > { %6672 = vmatprep.mubr.msk.bf16.mxu1 %vm1292_vm2, %v3814_v19  ;;  %v1913_v51 = vpack.c.bf16 %v1886_v32, %v1885_v37  ;;  %v9191_v45 = vpop.permute.xlu1 %4119  ;;  %v3797_v19 = vmul.f32 %v9026_v15, %v8525_v35  ;;  %v3796_v32 = vmul.f32 %v9028_v3, %v8545_v39  ;;  %v5944_v35 = vld [vmem:[%s9853_s3 + $0x868] sm:$0xff]  ;;  %v5943_v39 = vld [vmem:[%s9853_s3 + $0x860] sm:$0xff] }
 0x1dc   : > { %v9197_v8 = vpop.permute.xlu0 %4114  ;;  %4577 = vperm.xlu1 %7060, %v5940_v10   ;;  %v3799_v10 = vmul.f32 %v9043_v58, %v8532_v47 }
 0x1dd   : > { %4572 = vperm.xlu0 %7059, %v5939_v62   ;;  %6528 = vmatprep.mubr.msk.bf16.mxu0 %vm1292_vm2, %v1913_v51  ;;  %v10274_v62 = vld [vmem:[#allocation12_spill] sm:$0xff]  ;;  %v3817_v15 = vpack.c.bf16 %v3797_v19, %v3796_v32  ;;  %v5946_v51 = vld [vmem:[%s9853_s3 + $0x878] sm:$0xff]  ;;  %v10279_v19 = vld [vmem:[#allocation39_spill] sm:$0xff] }
 0x1de   : > { %v3798_v26 = vmul.f32 %v9045_v16, %v10274_v62  ;;  %v5950_v62 = vld [vmem:[%s9853_s3 + $0x898] sm:$0xff] }
 0x1df   : > { %v1775_v52 = vpop.permute.xlu1 %1774 }
 0x1e0   : > { %v1888_v17 = vmul.f32 %v1775_v52, %v8208_v24  ;;  %v1770_v43 = vpop.permute.xlu0 %1769  ;;  %2297 = vperm.xlu1 %7060, %v5782_v44   ;;  %v3818_v47 = vpack.c.bf16 %v3799_v10, %v3798_v26  ;;  %v3800_v44 = vmul.f32 %v9071_v6, %v10276_v36  ;;  %v10277_v52 = vld [vmem:[#allocation87_spill] sm:$0xff]  ;;  %v5947_v6 = vld [vmem:[%s9853_s3 + $0x880] sm:$0xff]  ;;  %v5949_v26 = vld [vmem:[%s9853_s3 + $0x890] sm:$0xff] }
 0x1e1   : > { %v1887_v18 = vmul.f32 %v1770_v43, %v8204_v31  ;;  %2292 = vperm.xlu0 %7059, %v5781_v57  }
 0x1e2   : > { %6673 = vmatmul.mubr.msk.bf16.gmra.mrb[4].mxu1 %vm1292_vm2, %v3815_v27 }
 0x1e3   : > { %6676 = vmatprep.mubr.msk.bf16.mxu1 %vm1292_vm2, %v3816_v11  ;;  %v1914_v25 = vpack.c.bf16 %v1888_v17, %v1887_v18  ;;  %v9220_v37 = vpop.permute.xlu1 %4129  ;;  %v3803_v11 = vmul.f32 %v9080_v0, %v10277_v52  ;;  %v10278_v17 = vld [vmem:[#allocation88_spill] sm:$0xff]  ;;  %v5954_v52 = vld [vmem:[%s9853_s3 + $0x8b8] sm:$0xff] }
 0x1e4   : > { %v9226_v49 = vpop.permute.xlu0 %4124  ;;  %4587 = vperm.xlu1 %7060, %v5942_v55   ;;  %v3802_v43 = vmul.f32 %v9087_v30, %v10278_v17  ;;  %v3819_v55 = vpack.c.bf16 %v3801_v9, %v3800_v44  ;;  %v10283_v9 = vld [vmem:[#allocation37_spill] sm:$0xff]  ;;  %v10284_v44 = vld [vmem:[#allocation35_spill] sm:$0xff]  ;;  %v4235_v17 = vmul.f32 %v9133_v21, %v8117_v46 }
 0x1e5   : > { %4582 = vperm.xlu0 %7059, %v5941_v41   ;;  %6529 = vmatmul.mubr.msk.bf16.gmra.mrb[40].mxu0 %vm1292_vm2, %v1914_v25  ;;  %v10280_v25 = vld [vmem:[#allocation36_spill] sm:$0xff]  ;;  %v5956_v21 = vld [vmem:[%s9853_s3 + $0x8c8] sm:$0xff] }
 0x1e6   : > { %v3820_v0 = vpack.c.bf16 %v3803_v11, %v3802_v43  ;;  %v5953_v11 = vld [vmem:[%s9853_s3 + $0x8b0] sm:$0xff]  ;;  %v4234_v43 = vmul.f32 %v9139_v2, %v10195_v5  ;;  %v5955_v2 = vld [vmem:[%s9853_s3 + $0x8c0] sm:$0xff] }
 0x1e7   : > { %v1785_v3 = vpop.permute.xlu1 %1784 }
 0x1e8   : > { %v1890_v58 = vmul.f32 %v1785_v3, %v10128_v13  ;;  %v1780_v16 = vpop.permute.xlu0 %1779  ;;  %4597 = vperm.xlu1 %7060, %v5944_v35   ;;  %v10281_v35 = vld [vmem:[#allocation74_spill] sm:$0xff] }
 0x1e9   : > { %v1889_v12 = vmul.f32 %v1780_v16, %v10127_v28  ;;  %4592 = vperm.xlu0 %7059, %v5943_v39   ;;  %v3805_v39 = vmul.f32 %v9102_v59, %v10281_v35  ;;  %v4233_v16 = vmul.f32 %v9117_v42, %v7943_v63  ;;  %v5952_v59 = vld [vmem:[%s9853_s3 + $0x8a8] sm:$0xff] }
 0x1ea   : > { %6677 = vmatmul.mubr.msk.bf16.gmra.mrb[8].mxu1 %vm1292_vm2, %v3817_v15  ;;  %v10282_v15 = vld [vmem:[#allocation89_spill] sm:$0xff] }
 0x1eb   : > { %6680 = vmatprep.mubr.msk.bf16.mxu1 %vm1292_vm2, %v3818_v47  ;;  %v1915_v57 = vpack.c.bf16 %v1890_v58, %v1889_v12  ;;  %v9249_v27 = vpop.permute.xlu1 %4139  ;;  %v3804_v3 = vmul.f32 %v9109_v33, %v10282_v15  ;;  %v4232_v12 = vmul.f32 %v9119_v20, %v10192_v60  ;;  %v5951_v33 = vld [vmem:[%s9853_s3 + $0x8a0] sm:$0xff]  ;;  %v5957_v15 = vld [vmem:[%s9853_s3 + $0x8d0] sm:$0xff] }
 0x1ec   : > { %v9255_v18 = vpop.permute.xlu0 %4134  ;;  %4607 = vperm.xlu1 %7060, %v5946_v51  }
 0x1ed   : > { %4602 = vperm.xlu0 %7059, %v5945_v34   ;;  %6532 = vmatprep.mubr.msk.bf16.mxu0 %vm1292_vm2, %v1915_v57  ;;  %v3821_v34 = vpack.c.bf16 %v3805_v39, %v3804_v3  ;;  %v4264_v42 = vpack.c.bf16 %v4233_v16, %v4232_v12  ;;  %v5958_v39 = vld [vmem:[%s9853_s3 + $0x8d8] sm:$0xff]  ;;  %v4239_v3 = vmul.f32 %v9163_v56, %v8208_v24  ;;  %v5959_v56 = vld [vmem:[%s9853_s3 + $0x8e0] sm:$0xff] }
 0x1ef   : > { %v1795_v41 = vpop.permute.xlu1 %1794 }
 0x1f0   : > { %v1892_v32 = vmul.f32 %v1795_v41, %v10279_v19  ;;  %v1790_v30 = vpop.permute.xlu0 %1789  ;;  %4617 = vperm.xlu1 %7060, %v5948_v50   ;;  %v4236_v41 = vmul.f32 %v9149_v40, %v10196_v4 }
 0x1f1   : > { %v1891_v10 = vmul.f32 %v1790_v30, %v10280_v25  ;;  %4612 = vperm.xlu0 %7059, %v5947_v6  }
 0x1f2   : > { %6681 = vmatmul.mubr.msk.bf16.gmra.mrb[12].mxu1 %vm1292_vm2, %v3819_v55  ;;  %v4237_v55 = vmul.f32 %v9147_v48, %v10201_v29 }
 0x1f3   : > { %6684 = vmatprep.mubr.msk.bf16.mxu1 %vm1292_vm2, %v3820_v0  ;;  %v1916_v47 = vpack.c.bf16 %v1892_v32, %v1891_v10  ;;  %v9278_v58 = vpop.permute.xlu1 %4149  ;;  %v4265_v32 = vpack.c.bf16 %v4235_v17, %v4234_v43  ;;  %v10285_v10 = vld [vmem:[#allocation48_spill] sm:$0xff]  ;;  %v4242_v17 = vmul.f32 %v9226_v49, %v10280_v25  ;;  %v10289_v49 = vld [vmem:[#allocation54_spill] sm:$0xff] }
 0x1f4   : > { %v9284_v51 = vpop.permute.xlu0 %4144  ;;  %4627 = vperm.xlu1 %7060, %v5950_v62   ;;  %v4266_v48 = vpack.c.bf16 %v4237_v55, %v4236_v41  ;;  %v4245_v55 = vmul.f32 %v9249_v27, %v10283_v9  ;;  %v4244_v41 = vmul.f32 %v9255_v18, %v10284_v44  ;;  %v4247_v27 = vmul.f32 %v9278_v58, %v10285_v10 }
 0x1f5   : > { %4622 = vperm.xlu0 %7059, %v5949_v26   ;;  %6533 = vmatmul.mubr.msk.bf16.gmra.mrb[44].mxu0 %vm1292_vm2, %v1916_v47  ;;  %v10286_v26 = vld [vmem:[#allocation45_spill] sm:$0xff]  ;;  %v4238_v47 = vmul.f32 %v9169_v61, %v8204_v31 }
 0x1f6   : > { %v4246_v18 = vmul.f32 %v9284_v51, %v10286_v26 }
 0x1f7   : > { %v1805_v1 = vpop.permute.xlu1 %1804  ;;  %v4267_v61 = vpack.c.bf16 %v4239_v3, %v4238_v47 }
 0x1f8   : > { %v1894_v36 = vmul.f32 %v1805_v1, %v10283_v9  ;;  %v1800_v20 = vpop.permute.xlu0 %1799  ;;  %4637 = vperm.xlu1 %7060, %v5952_v59   ;;  %v4241_v59 = vmul.f32 %v9191_v45, %v10128_v13 }
 0x1f9   : > { %v1893_v57 = vmul.f32 %v1800_v20, %v10284_v44  ;;  %4632 = vperm.xlu0 %7059, %v5951_v33   ;;  %v4240_v33 = vmul.f32 %v9197_v8, %v10127_v28  ;;  %v10287_v8 = vld [vmem:[#allocation42_spill] sm:$0xff] }
 0x1fa   : > { %6685 = vmatmul.mubr.msk.bf16.gmra.mrb[16].mxu1 %vm1292_vm2, %v3821_v34 }
 0x1fb   : > { %6690 = vmatprep.mubr.msk.bf16.mxu1 %vm1292_vm2, %v4264_v42  ;;  %v1917_v50 = vpack.c.bf16 %v1894_v36, %v1893_v57  ;;  %v9307_v6 = vpop.permute.xlu1 %4159  ;;  %v4268_v42 = vpack.c.bf16 %v4241_v59, %v4240_v33  ;;  %v5962_v57 = vld [vmem:[%s9853_s3 + $0x8f8] sm:$0xff] }
 0x1fc   : > { %v9313_v0 = vpop.permute.xlu0 %4154  ;;  %4647 = vperm.xlu1 %7060, %v5954_v52   ;;  %v5961_v52 = vld [vmem:[%s9853_s3 + $0x8f0] sm:$0xff] }
 0x1fd   : > { %4642 = vperm.xlu0 %7059, %v5953_v11   ;;  %6536 = vmatprep.mubr.msk.bf16.mxu0 %vm1292_vm2, %v1917_v50  ;;  %v4243_v11 = vmul.f32 %v9220_v37, %v10279_v19  ;;  %v10288_v37 = vld [vmem:[#allocation57_spill] sm:$0xff]  ;;  %v4248_v3 = vmul.f32 %v9313_v0, %v10287_v8 }
 0x1ff   : > { %v1815_v30 = vpop.permute.xlu1 %1814 }
 0x200   : > { %v1896_v62 = vmul.f32 %v1815_v30, %v10285_v10  ;;  %v1810_v40 = vpop.permute.xlu0 %1809  ;;  %4657 = vperm.xlu1 %7060, %v5956_v21   ;;  %v4270_v30 = vpack.c.bf16 %v4245_v55, %v4244_v41  ;;  %v10291_v41 = vld [vmem:[#allocation70_spill] sm:$0xff] }
 0x201   : > { %v1895_v35 = vmul.f32 %v1810_v40, %v10286_v26  ;;  %4652 = vperm.xlu0 %7059, %v5955_v2   ;;  %v4269_v2 = vpack.c.bf16 %v4243_v11, %v4242_v17 }
 0x202   : > { %6691 = vmatmul.mubr.msk.bf16.vlgmr.msra.gmra.mrb[20].mxu1 %vm1292_vm2, %v4265_v32 }
 0x203   : > { %6694 = vmatprep.mubr.msk.bf16.mxu1 %vm1292_vm2, %v4266_v48  ;;  %6723 = vmatpush3.bf16.msra.mxu1 %v9085_v7  ;;  %v1918_v16 = vpack.c.bf16 %v1896_v62, %v1895_v35  ;;  %v4170_v12 = vpop.permute.xlu1 %4169  ;;  %v5960_v7 = vld [vmem:[%s9853_s3 + $0x8e8] sm:$0xff] }
 0x204   : > { %v4165_v34 = vpop.permute.xlu0 %4164  ;;  %4667 = vperm.xlu1 %7060, %v5958_v39  }
 0x205   : > { %4662 = vperm.xlu0 %7059, %v5957_v15   ;;  %6537 = vmatmul.mubr.msk.bf16.gmra.mrb[48].mxu0 %vm1292_vm2, %v1918_v16  ;;  %v4249_v15 = vmul.f32 %v9307_v6, %v10221_v54  ;;  %v4271_v16 = vpack.c.bf16 %v4247_v27, %v4246_v18  ;;  %v4251_v6 = vmul.f32 %v4170_v12, %v10288_v37  ;;  %v10290_v12 = vld [vmem:[#allocation64_spill] sm:$0xff] }
 0x207   : > { %v1825_v1 = vpop.permute.xlu1 %1824  ;;  %v4272_v33 = vpack.c.bf16 %v4249_v15, %v4248_v3  ;;  %v10294_v3 = vld [vmem:[#allocation75_spill] sm:$0xff] }
 0x208   : > { %v1898_v45 = vmul.f32 %v1825_v1, %v10221_v54  ;;  %v1820_v36 = vpop.permute.xlu0 %1819  ;;  %4677 = vperm.xlu1 %7060, %v5960_v7  }
 0x209   : > { %v1897_v20 = vmul.f32 %v1820_v36, %v10287_v8  ;;  %4672 = vperm.xlu0 %7059, %v5959_v56   ;;  %v4250_v56 = vmul.f32 %v4165_v34, %v10289_v49 }
 0x20a   : > { %6695 = vmatmul.mubr.msk.bf16.gmra.mrb[24].mxu1 %vm1292_vm2, %v4267_v61 }
 0x20b   : > { %6698 = vmatprep.mubr.msk.bf16.mxu1 %vm1292_vm2, %v4268_v42  ;;  %v1919_v43 = vpack.c.bf16 %v1898_v45, %v1897_v20  ;;  %v4180_v50 = vpop.permute.xlu1 %4179  ;;  %v4273_v36 = vpack.c.bf16 %v4251_v6, %v4250_v56 }
 0x20c   : > { %v4175_v21 = vpop.permute.xlu0 %4174  ;;  %4687 = vperm.xlu1 %7060, %v5962_v57   ;;  %v4253_v1 = vmul.f32 %v4180_v50, %v10229_v14 }
 0x20d   : > { %4682 = vperm.xlu0 %7059, %v5961_v52   ;;  %6540 = vmatprep.mubr.msk.bf16.mxu0 %vm1292_vm2, %v1919_v43  ;;  %v4252_v42 = vmul.f32 %v4175_v21, %v10228_v22 }
 0x20f   : > { %v1835_v32 = vpop.permute.xlu1 %1834  ;;  %v4274_v57 = vpack.c.bf16 %v4253_v1, %v4252_v42 }
 0x210   : > { %v1900_v48 = vmul.f32 %v1835_v32, %v10288_v37  ;;  %v1830_v62 = vpop.permute.xlu0 %1829 }
 0x211   : > { %v1899_v40 = vmul.f32 %v1830_v62, %v10289_v49 }
 0x212   : > { %6699 = vmatmul.mubr.msk.bf16.gmra.mrb[28].mxu1 %vm1292_vm2, %v4269_v2  ;;  %v10292_v2 = vld [vmem:[#allocation61_spill] sm:$0xff] }
 0x213   : > { %6702 = vmatprep.mubr.msk.bf16.mxu1 %vm1292_vm2, %v4270_v30  ;;  %v1920_v35 = vpack.c.bf16 %v1900_v48, %v1899_v40  ;;  %v4190_v39 = vpop.permute.xlu1 %4189 }
 0x214   : > { %v4185_v47 = vpop.permute.xlu0 %4184  ;;  %v4255_v34 = vmul.f32 %v4190_v39, %v10230_v38  ;;  %v10293_v39 = vld [vmem:[#allocation82_spill] sm:$0xff] }
 0x215   : > { %6541 = vmatmul.mubr.msk.bf16.gmra.mrb[52].mxu0 %vm1292_vm2, %v1920_v35  ;;  %v4254_v43 = vmul.f32 %v4185_v47, %v10290_v12 }
 0x217   : > { %v1845_v59 = vpop.permute.xlu1 %1844  ;;  %v4275_v48 = vpack.c.bf16 %v4255_v34, %v4254_v43  ;;  %v10297_v43 = vld [vmem:[#allocation22_spill] sm:$0xff] }
 0x218   : > { %v1902_v7 = vmul.f32 %v1845_v59, %v10229_v14  ;;  %v1840_v58 = vpop.permute.xlu0 %1839 }
 0x219   : > { %v1901_v51 = vmul.f32 %v1840_v58, %v10228_v22 }
 0x21a   : > { %6703 = vmatmul.mubr.msk.bf16.gmra.mrb[0].mxu1 %vm1292_vm2, %v4271_v16 }
 0x21b   : > { %6706 = vmatprep.mubr.msk.bf16.mxu1 %vm1292_vm2, %v4272_v33  ;;  %v1921_v0 = vpack.c.bf16 %v1902_v7, %v1901_v51  ;;  %v4200_v61 = vpop.permute.xlu1 %4199 }
 0x21c   : > { %v4195_v45 = vpop.permute.xlu0 %4194  ;;  %v4257_v21 = vmul.f32 %v4200_v61, %v10291_v41 }
 0x21d   : > { %6544 = vmatprep.mubr.msk.bf16.mxu0 %vm1292_vm2, %v1921_v0  ;;  %v4256_v32 = vmul.f32 %v4195_v45, %v10292_v2 }
 0x21f   : > { %v1855_v20 = vpop.permute.xlu1 %1854  ;;  %v4276_v40 = vpack.c.bf16 %v4257_v21, %v4256_v32  ;;  %v10298_v21 = vld [vmem:[#allocation23_spill] sm:$0xff] }
 0x220   : > { %v1904_v52 = vmul.f32 %v1855_v20, %v10230_v38  ;;  %v1850_v11 = vpop.permute.xlu0 %1849 }
 0x221   : > { %v1903_v17 = vmul.f32 %v1850_v11, %v10290_v12 }
 0x222   : > { %6707 = vmatmul.mubr.msk.bf16.gmra.mrb[4].mxu1 %vm1292_vm2, %v4273_v36  ;;  %v10295_v36 = vld [vmem:[#allocation60_spill] sm:$0xff] }
 0x223   : > { %6710 = vmatprep.mubr.msk.bf16.mxu1 %vm1292_vm2, %v4274_v57  ;;  %v1922_v50 = vpack.c.bf16 %v1904_v52, %v1903_v17  ;;  %v4210_v55 = vpop.permute.xlu1 %4209  ;;  %v10296_v52 = vld [vmem:[#allocation65_spill] sm:$0xff] }
 0x224   : > { %v4205_v30 = vpop.permute.xlu0 %4204  ;;  %v4259_v15 = vmul.f32 %v4210_v55, %v10293_v39 }
 0x225   : > { %6545 = vmatmul.mubr.msk.bf16.gmra.mrb[56].mxu0 %vm1292_vm2, %v1922_v50  ;;  %v4258_v47 = vmul.f32 %v4205_v30, %v10294_v3 }
 0x227   : > { %v1865_v62 = vpop.permute.xlu1 %1864  ;;  %v4277_v51 = vpack.c.bf16 %v4259_v15, %v4258_v47 }
 0x228   : > { %v1906_v27 = vmul.f32 %v1865_v62, %v10291_v41  ;;  %v1860_v18 = vpop.permute.xlu0 %1859  ;;  %v10299_v62 = vld [vmem:[#allocation16_spill] sm:$0xff] }
 0x229   : > { %v1905_v35 = vmul.f32 %v1860_v18, %v10292_v2  ;;  %v10300_v18 = vld [vmem:[#allocation17_spill] sm:$0xff] }
 0x22a   : > { %6711 = vmatmul.mubr.msk.bf16.gmra.mrb[8].mxu1 %vm1292_vm2, %v4275_v48 }
 0x22b   : > { %6714 = vmatprep.mubr.msk.bf16.mxu1 %vm1292_vm2, %v4276_v40  ;;  %v1923_v16 = vpack.c.bf16 %v1906_v27, %v1905_v35  ;;  %v4220_v59 = vpop.permute.xlu1 %4219 }
 0x22c   : > { %v4261_v33 = vmul.f32 %v4220_v59, %v10235_v53  ;;  %v4215_v7 = vpop.permute.xlu0 %4214 }
 0x22d   : > { %v4260_v58 = vmul.f32 %v4215_v7, %v10241_v23  ;;  %6548 = vmatprep.mubr.msk.bf16.mxu0 %vm1292_vm2, %v1923_v16  ;;  %v10301_v16 = vld [vmem:[#allocation14_spill] sm:$0xff]  ;;  %v10302_v7 = vld [vmem:[#allocation15_spill] sm:$0xff] }
 0x22f   : > { %v4278_v6 = vpack.c.bf16 %v4261_v33, %v4260_v58  ;;  %v1875_v56 = vpop.permute.xlu1 %1874 }
 0x230   : > { %v1908_v0 = vmul.f32 %v1875_v56, %v10293_v39  ;;  %v1870_v61 = vpop.permute.xlu0 %1869  ;;  %v10303_v56 = vld [vmem:[#allocation85_spill] sm:$0xff] }
 0x231   : > { %v1907_v1 = vmul.f32 %v1870_v61, %v10294_v3 }
 0x232   : > { %6715 = vmatmul.mubr.msk.bf16.gmra.mrb[12].mxu1 %vm1292_vm2, %v4277_v51 }
 0x233   : > { %6718 = vmatprep.mubr.msk.bf16.mxu1 %vm1292_vm2, %v4278_v6  ;;  %v1924_v42 = vpack.c.bf16 %v1908_v0, %v1907_v1  ;;  %v4230_v45 = vpop.permute.xlu1 %4229  ;;  %v10304_v1 = vld [vmem:[#allocation86_spill] sm:$0xff] }
 0x234   : > { %v4263_v20 = vmul.f32 %v4230_v45, %v10295_v36  ;;  %v4225_v57 = vpop.permute.xlu0 %4224 }
 0x235   : > { %v4262_v11 = vmul.f32 %v4225_v57, %v10296_v52  ;;  %6549 = vmatmul.mubr.msk.bf16.gmra.mrb[60].mxu0 %vm1292_vm2, %v1924_v42 }
 0x237   : > { %v4279_v17 = vpack.c.bf16 %v4263_v20, %v4262_v11  ;;  %v2248_v34 = vpop.permute.xlu1 %2247 }
 0x238   : > { %v2401_v50 = vmul.f32 %v2248_v34, %v10297_v43  ;;  %v2243_v55 = vpop.permute.xlu0 %2242 }
 0x239   : > { %v2400_v32 = vmul.f32 %v2243_v55, %v10298_v21  ;;  %v10305_v55 = vld [vmem:[#allocation18_spill] sm:$0xff] }
 0x23a   : > { %6719 = vmatmul.mubr.msk.bf16.gmra.mrb[16].mxu1 %vm1292_vm2, %v4279_v17 }
 0x23b   : > { %v2432_v30 = vpack.c.bf16 %v2401_v50, %v2400_v32  ;;  %v4538_v48 = vpop.permute.xlu1 %4537 }
 0x23c   : > { %v4691_v40 = vmul.f32 %v4538_v48, %v10299_v62  ;;  %v4533_v27 = vpop.permute.xlu0 %4532  ;;  %v10306_v48 = vld [vmem:[#allocation20_spill] sm:$0xff] }
 0x23d   : > { %v4690_v35 = vmul.f32 %v4533_v27, %v10300_v18  ;;  %6554 = vmatprep.mubr.msk.bf16.mxu0 %vm1292_vm2, %v2432_v30 }
 0x23f   : > { %v4722_v15 = vpack.c.bf16 %v4691_v40, %v4690_v35  ;;  %v2258_v47 = vpop.permute.xlu1 %2257 }
 0x240   : > { %v2403_v59 = vmul.f32 %v2258_v47, %v10301_v16  ;;  %v2253_v33 = vpop.permute.xlu0 %2252 }
 0x241   : > { %v2402_v58 = vmul.f32 %v2253_v33, %v10302_v7  ;;  %6724 = vmatprep.mubr.msk.bf16.mxu1 %vm1292_vm2, %v4722_v15  ;;  %v10307_v33 = vld [vmem:[#allocation21_spill] sm:$0xff] }
 0x243   : > { %v2433_v51 = vpack.c.bf16 %v2403_v59, %v2402_v58  ;;  %v4548_v6 = vpop.permute.xlu1 %4547 }
 0x244   : > { %v4693_v0 = vmul.f32 %v4548_v6, %v10303_v56  ;;  %v4543_v61 = vpop.permute.xlu0 %4542  ;;  %v10308_v6 = vld [vmem:[#allocation19_spill] sm:$0xff] }
 0x245   : > { %v4692_v42 = vmul.f32 %v4543_v61, %v10304_v1  ;;  %6555 = vmatmul.mubr.msk.bf16.vlgmr.msra.gmra.mrb[32].mxu0 %vm1292_vm2, %v2433_v51 }
 0x247   : > { %v4723_v45 = vpack.c.bf16 %v4693_v0, %v4692_v42  ;;  %v2268_v20 = vpop.permute.xlu1 %2267 }
 0x248   : > { %v2405_v57 = vmul.f32 %v2268_v20, %v10299_v62  ;;  %v2263_v11 = vpop.permute.xlu0 %2262 }
 0x249   : > { %v2404_v17 = vmul.f32 %v2263_v11, %v10300_v18  ;;  %6725 = vmatmul.mubr.msk.bf16.vlgmr.msra.gmra.mrb[20].mxu1 %vm1292_vm2, %v4723_v45  ;;  %v10309_v11 = vld [vmem:[#allocation40_spill] sm:$0xff] }
 0x24b   : > { %v2434_v34 = vpack.c.bf16 %v2405_v57, %v2404_v17  ;;  %v4558_v50 = vpop.permute.xlu1 %4557 }
 0x24c   : > { %v4695_v32 = vmul.f32 %v4558_v50, %v10305_v55  ;;  %v4553_v30 = vpop.permute.xlu0 %4552  ;;  %v10310_v50 = vld [vmem:[#allocation38_spill] sm:$0xff] }
 0x24d   : > { %v4694_v40 = vmul.f32 %v4553_v30, %v10306_v48  ;;  %6558 = vmatprep.mubr.msk.bf16.mxu0 %vm1292_vm2, %v2434_v34 }
 0x24f   : > { %v4724_v27 = vpack.c.bf16 %v4695_v32, %v4694_v40  ;;  %v2278_v35 = vpop.permute.xlu1 %2277 }
 0x250   : > { %v2407_v15 = vmul.f32 %v2278_v35, %v10303_v56  ;;  %v2273_v47 = vpop.permute.xlu0 %2272 }
 0x251   : > { %v2406_v62 = vmul.f32 %v2273_v47, %v10304_v1  ;;  %6728 = vmatprep.mubr.msk.bf16.mxu1 %vm1292_vm2, %v4724_v27  ;;  %v10311_v47 = vld [vmem:[#allocation43_spill] sm:$0xff] }
 0x253   : > { %v2435_v18 = vpack.c.bf16 %v2407_v15, %v2406_v62  ;;  %v4568_v59 = vpop.permute.xlu1 %4567 }
 0x254   : > { %v4697_v58 = vmul.f32 %v4568_v59, %v10307_v33  ;;  %v4563_v51 = vpop.permute.xlu0 %4562  ;;  %v10312_v59 = vld [vmem:[#allocation44_spill] sm:$0xff] }
 0x255   : > { %v4696_v0 = vmul.f32 %v4563_v51, %v10308_v6  ;;  %6559 = vmatmul.mubr.msk.bf16.gmra.mrb[36].mxu0 %vm1292_vm2, %v2435_v18 }
 0x257   : > { %v4725_v61 = vpack.c.bf16 %v4697_v58, %v4696_v0  ;;  %v2288_v42 = vpop.permute.xlu1 %2287 }
 0x258   : > { %v2409_v45 = vmul.f32 %v2288_v42, %v10305_v55  ;;  %v2283_v20 = vpop.permute.xlu0 %2282 }
 0x259   : > { %v2408_v56 = vmul.f32 %v2283_v20, %v10306_v48  ;;  %6729 = vmatmul.mubr.msk.bf16.gmra.mrb[24].mxu1 %vm1292_vm2, %v4725_v61  ;;  %v10313_v61 = vld [vmem:[#allocation49_spill] sm:$0xff] }
 0x25b   : > { %v2436_v1 = vpack.c.bf16 %v2409_v45, %v2408_v56  ;;  %v4578_v57 = vpop.permute.xlu1 %4577 }
 0x25c   : > { %v4699_v17 = vmul.f32 %v4578_v57, %v10309_v11  ;;  %v4573_v34 = vpop.permute.xlu0 %4572 }
 0x25d   : > { %v4698_v32 = vmul.f32 %v4573_v34, %v10310_v50  ;;  %6562 = vmatprep.mubr.msk.bf16.mxu0 %vm1292_vm2, %v2436_v1  ;;  %v10315_v1 = vld [vmem:[#allocation52_spill] sm:$0xff] }
 0x25f   : > { %v4726_v30 = vpack.c.bf16 %v4699_v17, %v4698_v32  ;;  %v2298_v40 = vpop.permute.xlu1 %2297  ;;  %v10316_v17 = vld [vmem:[#allocation53_spill] sm:$0xff] }
 0x260   : > { %v2411_v27 = vmul.f32 %v2298_v40, %v10307_v33  ;;  %v2293_v35 = vpop.permute.xlu0 %2292  ;;  %v10314_v33 = vld [vmem:[#allocation47_spill] sm:$0xff] }
 0x261   : > { %v2410_v55 = vmul.f32 %v2293_v35, %v10308_v6  ;;  %6732 = vmatprep.mubr.msk.bf16.mxu1 %vm1292_vm2, %v4726_v30  ;;  %v10317_v30 = vld [vmem:[#allocation59_spill] sm:$0xff]  ;;  %v10318_v35 = vld [vmem:[#allocation56_spill] sm:$0xff] }
 0x263   : > { %v2437_v48 = vpack.c.bf16 %v2411_v27, %v2410_v55  ;;  %v4588_v15 = vpop.permute.xlu1 %4587 }
 0x264   : > { %v4701_v62 = vmul.f32 %v4588_v15, %v10311_v47  ;;  %v4583_v18 = vpop.permute.xlu0 %4582  ;;  %v10319_v47 = vld [vmem:[#allocation62_spill] sm:$0xff] }
 0x265   : > { %v4700_v58 = vmul.f32 %v4583_v18, %v10312_v59  ;;  %6563 = vmatmul.mubr.msk.bf16.gmra.mrb[40].mxu0 %vm1292_vm2, %v2437_v48  ;;  %v10320_v59 = vld [vmem:[#allocation63_spill] sm:$0xff] }
 0x267   : > { %v4727_v51 = vpack.c.bf16 %v4701_v62, %v4700_v58  ;;  %v4598_v0 = vpop.permute.xlu1 %4597 }
 0x268   : > { %v4703_v42 = vmul.f32 %v4598_v0, %v10313_v61  ;;  %v4593_v45 = vpop.permute.xlu0 %4592  ;;  %v10321_v61 = vld [vmem:[#allocation69_spill] sm:$0xff] }
 0x269   : > { %v4702_v20 = vmul.f32 %v4593_v45, %v10314_v33  ;;  %6733 = vmatmul.mubr.msk.bf16.gmra.mrb[28].mxu1 %vm1292_vm2, %v4727_v51  ;;  %v10322_v33 = vld [vmem:[#allocation66_spill] sm:$0xff] }
 0x26b   : > { %v4728_v6 = vpack.c.bf16 %v4703_v42, %v4702_v20  ;;  %v4608_v56 = vpop.permute.xlu1 %4607 }
 0x26c   : > { %v4705_v57 = vmul.f32 %v4608_v56, %v10315_v1  ;;  %v4603_v11 = vpop.permute.xlu0 %4602  ;;  %v10323_v1 = vld [vmem:[#allocation72_spill] sm:$0xff] }
 0x26d   : > { %v4704_v34 = vmul.f32 %v4603_v11, %v10316_v17  ;;  %6736 = vmatprep.mubr.msk.bf16.mxu1 %vm1292_vm2, %v4728_v6  ;;  %v10324_v17 = vld [vmem:[#allocation73_spill] sm:$0xff] }
 0x26f   : > { %v4729_v50 = vpack.c.bf16 %v4705_v57, %v4704_v34  ;;  %v4618_v32 = vpop.permute.xlu1 %4617 }
 0x270   : > { %v4707_v40 = vmul.f32 %v4618_v32, %v10317_v30  ;;  %v4613_v27 = vpop.permute.xlu0 %4612  ;;  %v10325_v30 = vld [vmem:[#allocation84_spill] sm:$0xff] }
 0x271   : > { %v4706_v55 = vmul.f32 %v4613_v27, %v10318_v35  ;;  %6737 = vmatmul.mubr.msk.bf16.gmra.mrb[0].mxu1 %vm1292_vm2, %v4729_v50  ;;  %v10326_v35 = vld [vmem:[#allocation83_spill] sm:$0xff] }
 0x273   : > { %v4730_v48 = vpack.c.bf16 %v4707_v40, %v4706_v55  ;;  %v4628_v15 = vpop.permute.xlu1 %4627 }
 0x274   : > { %v4709_v62 = vmul.f32 %v4628_v15, %v10319_v47  ;;  %v4623_v18 = vpop.permute.xlu0 %4622  ;;  %v10327_v47 = vld [vmem:[#allocation90_spill] sm:$0xff] }
 0x275   : > { %v4708_v58 = vmul.f32 %v4623_v18, %v10320_v59  ;;  %6740 = vmatprep.mubr.msk.bf16.mxu1 %vm1292_vm2, %v4730_v48  ;;  %v10328_v59 = vld [vmem:[#allocation91_spill] sm:$0xff] }
 0x277   : > { %v4731_v51 = vpack.c.bf16 %v4709_v62, %v4708_v58  ;;  %v4638_v0 = vpop.permute.xlu1 %4637 }
 0x278   : > { %v4711_v42 = vmul.f32 %v4638_v0, %v10321_v61  ;;  %v4633_v45 = vpop.permute.xlu0 %4632 }
 0x279   : > { %v4710_v20 = vmul.f32 %v4633_v45, %v10322_v33  ;;  %6741 = vmatmul.mubr.msk.bf16.gmra.mrb[4].mxu1 %vm1292_vm2, %v4731_v51 }
 0x27b   : > { %v4732_v6 = vpack.c.bf16 %v4711_v42, %v4710_v20  ;;  %v4648_v56 = vpop.permute.xlu1 %4647 }
 0x27c   : > { %v4713_v57 = vmul.f32 %v4648_v56, %v10323_v1  ;;  %v4643_v11 = vpop.permute.xlu0 %4642 }
 0x27d   : > { %v4712_v34 = vmul.f32 %v4643_v11, %v10324_v17  ;;  %6744 = vmatprep.mubr.msk.bf16.mxu1 %vm1292_vm2, %v4732_v6 }
 0x27f   : > { %v4733_v50 = vpack.c.bf16 %v4713_v57, %v4712_v34  ;;  %v4658_v32 = vpop.permute.xlu1 %4657 }
 0x280   : > { %v4715_v40 = vmul.f32 %v4658_v32, %v10325_v30  ;;  %v4653_v27 = vpop.permute.xlu0 %4652 }
 0x281   : > { %v4714_v55 = vmul.f32 %v4653_v27, %v10326_v35  ;;  %6745 = vmatmul.mubr.msk.bf16.gmra.mrb[8].mxu1 %vm1292_vm2, %v4733_v50 }
 0x283   : > { %v4734_v48 = vpack.c.bf16 %v4715_v40, %v4714_v55  ;;  %v4668_v15 = vpop.permute.xlu1 %4667 }
 0x284   : > { %v4717_v62 = vmul.f32 %v4668_v15, %v10327_v47  ;;  %v4663_v18 = vpop.permute.xlu0 %4662 }
 0x285   : > { %v4716_v58 = vmul.f32 %v4663_v18, %v10328_v59  ;;  %6748 = vmatprep.mubr.msk.bf16.mxu1 %vm1292_vm2, %v4734_v48 }
 0x287   : > { %v4735_v51 = vpack.c.bf16 %v4717_v62, %v4716_v58  ;;  %v4678_v0 = vpop.permute.xlu1 %4677 }
 0x288   : > { %v4719_v61 = vmul.f32 %v4678_v0, %v10297_v43  ;;  %v4673_v42 = vpop.permute.xlu0 %4672  ;;  %v7089_v43 = vld [vmem:[%s9858_s8] sm:$0xff]  }
 0x289   : > { %v4718_v45 = vmul.f32 %v4673_v42, %v10298_v21  ;;  %6749 = vmatmul.mubr.msk.bf16.gmra.mrb[12].mxu1 %vm1292_vm2, %v4735_v51  ;;  %v7090_v21 = vld [vmem:[%s9858_s8 + $0x8] sm:$0xff]   ;;  %6756 = vmatprep.subr.bf16.mxu0 %v7089_v43 }
 0x28a   : > { %6757 = vmatpush3.bf16.msra.mxu0 %v7089_v43 }
 0x28b   : > { %v4736_v33 = vpack.c.bf16 %v4719_v61, %v4718_v45  ;;  %v4688_v20 = vpop.permute.xlu1 %4687  ;;  %6758 = vmatprep.subr.bf16.mxu0 %v7090_v21 }
 0x28c   : > { %v4721_v6 = vmul.f32 %v4688_v20, %v10301_v16  ;;  %v4683_v56 = vpop.permute.xlu0 %4682  ;;  %v9530_v20 = vld [vmem:[%s9857_s7] ss:$0 sm:$0xff] }
 0x28d   : > { %v4720_v1 = vmul.f32 %v4683_v56, %v10302_v7  ;;  %6752 = vmatprep.mubr.msk.bf16.mxu1 %vm1292_vm2, %v4736_v33 }
 0x28e   : > { %6759 = vmatpush3.bf16.msra.mxu0 %v7090_v21 }
 0x28f   : > { %v4737_v57 = vpack.c.bf16 %v4721_v6, %v4720_v1 }
 0x291   : > { %6753 = vmatmul.mubr.msk.bf16.gmra.mrb[16].mxu1 %vm1292_vm2, %v4737_v57 }
 0x2c8   : > { %v9487_v16 = vpop.f32.mrb[44].mxu0 }
 0x2c9   : > { %v9489_v7 = vpop.f32.mrb[45].mxu0 }
 0x2ca   : > { %v9491_v11 = vpop.f32.mrb[46].mxu0 }
 0x2cb   : > { %v9493_v17 = vpop.f32.mrb[47].mxu0 }
 0x2d8   : > { %v9495_v34 = vpop.f32.mrb[48].mxu0 }
 0x2d9   : > { %v9497_v50 = vpop.f32.mrb[49].mxu0 }
 0x2da   : > { %v9499_v32 = vpop.f32.mrb[50].mxu0 }
 0x2db   : > { %v9501_v30 = vpop.f32.mrb[51].mxu0 }
 0x2e8   : > { %v9503_v40 = vpop.f32.mrb[52].mxu0 }
 0x2e9   : > { %v9505_v27 = vpop.f32.mrb[53].mxu0 }
 0x2ea   : > { %v9507_v35 = vpop.f32.mrb[54].mxu0 }
 0x2eb   : > { %v9509_v55 = vpop.f32.mrb[55].mxu0 }
 0x2f8   : > { %v9511_v48 = vpop.f32.mrb[56].mxu0 }
 0x2f9   : > { %v9513_v15 = vpop.f32.mrb[57].mxu0 }
 0x2fa   : > { %v9515_v47 = vpop.f32.mrb[58].mxu0 }
 0x2fb   : > { %v9517_v62 = vpop.f32.mrb[59].mxu0 }
 0x308   : > { %v9519_v18 = vpop.f32.mrb[60].mxu0 }
 0x309   : > { %v9521_v59 = vpop.f32.mrb[61].mxu0 }
 0x30a   : > { %v9523_v58 = vpop.f32.mrb[62].mxu0 }
 0x30b   : > { %v9525_v51 = vpop.f32.mrb[63].mxu0 }
 0x318   : > { %v6556_v0 = vpop.f32.mrb[32].mxu0 }
 0x319   : > { %v2539_v61 = vpop.f32.mrb[33].mxu0 }
 0x31a   : > { %v6557_v42 = vpop.f32.mrb[34].mxu0 }
 0x31b   : > { %v2542_v45 = vpop.f32.mrb[35].mxu0 }
 0x31c   : > { %v6726_v33 = vpop.f32.mrb[20].mxu1 }
 0x31d   : > { %v6794_v6 = vadd.f32 %v6726_v33, %v6556_v0  ;;  %v4829_v56 = vpop.f32.mrb[21].mxu1 }
 0x31e   : > { %v6795_v1 = vadd.f32 %v4829_v56, %v2539_v61  ;;  %v6727_v57 = vpop.f32.mrb[22].mxu1 }
 0x31f   : > { %v4997_v43 = vadd.f32 %v6794_v6, %v9530_v20  ;;  %v6796_v21 = vadd.f32 %v6727_v57, %v6557_v42  ;;  %v4832_v39 = vpop.f32.mrb[23].mxu1 }
 0x320   : > { %v4995_v53 = vadd.f32 %v6795_v1, %v9530_v20  ;;  %v6797_v3 = vadd.f32 %v4832_v39, %v2542_v45 }
 0x321   : > { %v4998_v23 = vadd.f32 %v6796_v21, %v9530_v20  ;;  %v5029_v41 = vmax.f32 %v4997_v43, 0.0 }
 0x322   : > { %v4996_v38 = vadd.f32 %v6797_v3, %v9530_v20  ;;  %v5027_v2 = vmax.f32 %v4995_v53, 0.0 }
 0x323   : > { %v5030_v12 = vmax.f32 %v4998_v23, 0.0 }
 0x324   : > { %v5028_v37 = vmax.f32 %v4996_v38, 0.0 }
 0x325   : > { %v5060_v14 = vpack.c.bf16 %v5030_v12, %v5029_v41 }
 0x326   : > { %v5059_v0 = vpack.c.bf16 %v5028_v37, %v5027_v2 }
 0x328   : > { %v6560_v61 = vpop.f32.mrb[36].mxu0  ;;  %6760 = vmatprep.mubr.msk.bf16.mxu0 %vm5091_vm4, %v5059_v0 }
 0x329   : > { %v2555_v33 = vpop.f32.mrb[37].mxu0  ;;  %6761 = vmatmul.mubr.msk.bf16.vlgmr.msra.gmra.mrb[64].mxu0 %vm5091_vm4, %v5060_v14 }
 0x32a   : > { %v6561_v42 = vpop.f32.mrb[38].mxu0 }
 0x32b   : > { %v2558_v6 = vpop.f32.mrb[39].mxu0 }
 0x32c   : > { %v6730_v39 = vpop.f32.mrb[24].mxu1 }
 0x32d   : > { %v6798_v45 = vadd.f32 %v6730_v39, %v6560_v61  ;;  %v4845_v56 = vpop.f32.mrb[25].mxu1 }
 0x32e   : > { %v6799_v1 = vadd.f32 %v4845_v56, %v2555_v33  ;;  %v6731_v3 = vpop.f32.mrb[26].mxu1 }
 0x32f   : > { %v5001_v23 = vadd.f32 %v6798_v45, %v9530_v20  ;;  %v6800_v53 = vadd.f32 %v6731_v3, %v6561_v42  ;;  %v4848_v38 = vpop.f32.mrb[27].mxu1 }
 0x330   : > { %v4999_v12 = vadd.f32 %v6799_v1, %v9530_v20  ;;  %v6801_v37 = vadd.f32 %v4848_v38, %v2558_v6 }
 0x331   : > { %v5002_v41 = vadd.f32 %v6800_v53, %v9530_v20  ;;  %v5033_v57 = vmax.f32 %v5001_v23, 0.0 }
 0x332   : > { %v5000_v2 = vadd.f32 %v6801_v37, %v9530_v20  ;;  %v5031_v43 = vmax.f32 %v4999_v12, 0.0 }
 0x333   : > { %v5034_v14 = vmax.f32 %v5002_v41, 0.0 }
 0x334   : > { %v5032_v21 = vmax.f32 %v5000_v2, 0.0 }
 0x335   : > { %v5062_v0 = vpack.c.bf16 %v5034_v14, %v5033_v57 }
 0x336   : > { %v5061_v61 = vpack.c.bf16 %v5032_v21, %v5031_v43 }
 0x338   : > { %v6564_v39 = vpop.f32.mrb[40].mxu0  ;;  %6764 = vmatprep.mubr.msk.bf16.mxu0 %vm5091_vm4, %v5061_v61 }
 0x339   : > { %v2571_v33 = vpop.f32.mrb[41].mxu0  ;;  %6765 = vmatmul.mubr.msk.bf16.gmra.mrb[68].mxu0 %vm5091_vm4, %v5062_v0 }
 0x33a   : > { %v6565_v42 = vpop.f32.mrb[42].mxu0 }
 0x33b   : > { %v2574_v45 = vpop.f32.mrb[43].mxu0 }
 0x33c   : > { %v6734_v56 = vpop.f32.mrb[28].mxu1 }
 0x33d   : > { %v6802_v6 = vadd.f32 %v6734_v56, %v6564_v39  ;;  %v4861_v1 = vpop.f32.mrb[29].mxu1 }
 0x33e   : > { %v6803_v3 = vadd.f32 %v4861_v1, %v2571_v33  ;;  %v6735_v53 = vpop.f32.mrb[30].mxu1 }
 0x33f   : > { %v5005_v23 = vadd.f32 %v6802_v6, %v9530_v20  ;;  %v6804_v38 = vadd.f32 %v6735_v53, %v6565_v42  ;;  %v4864_v12 = vpop.f32.mrb[31].mxu1 }
 0x340   : > { %v5003_v37 = vadd.f32 %v6803_v3, %v9530_v20  ;;  %v6805_v41 = vadd.f32 %v4864_v12, %v2574_v45 }
 0x341   : > { %v5006_v2 = vadd.f32 %v6804_v38, %v9530_v20  ;;  %v5037_v14 = vmax.f32 %v5005_v23, 0.0 }
 0x342   : > { %v5004_v57 = vadd.f32 %v6805_v41, %v9530_v20  ;;  %v5035_v21 = vmax.f32 %v5003_v37, 0.0 }
 0x343   : > { %v5038_v43 = vmax.f32 %v5006_v2, 0.0 }
 0x344   : > { %v5036_v0 = vmax.f32 %v5004_v57, 0.0  ;;  %v6738_v61 = vpop.f32.mrb[0].mxu1 }
 0x345   : > { %v5064_v39 = vpack.c.bf16 %v5038_v43, %v5037_v14  ;;  %v6806_v33 = vadd.f32 %v6738_v61, %v9487_v16  ;;  %v4877_v56 = vpop.f32.mrb[1].mxu1 }
 0x346   : > { %v5063_v1 = vpack.c.bf16 %v5036_v0, %v5035_v21  ;;  %v6807_v42 = vadd.f32 %v4877_v56, %v9489_v7  ;;  %v6739_v6 = vpop.f32.mrb[2].mxu1 }
 0x347   : > { %v5009_v3 = vadd.f32 %v6806_v33, %v9530_v20  ;;  %v6808_v45 = vadd.f32 %v6739_v6, %v9491_v11  ;;  %v4880_v53 = vpop.f32.mrb[3].mxu1 }
 0x348   : > { %v5007_v38 = vadd.f32 %v6807_v42, %v9530_v20  ;;  %v6809_v23 = vadd.f32 %v4880_v53, %v9493_v17  ;;  %6768 = vmatprep.mubr.msk.bf16.mxu0 %vm5091_vm4, %v5063_v1 }
 0x349   : > { %v5010_v12 = vadd.f32 %v6808_v45, %v9530_v20  ;;  %6769 = vmatmul.mubr.msk.bf16.gmra.mrb[72].mxu0 %vm5091_vm4, %v5064_v39  ;;  %v5041_v37 = vmax.f32 %v5009_v3, 0.0 }
 0x34a   : > { %v5008_v16 = vadd.f32 %v6809_v23, %v9530_v20  ;;  %v5039_v41 = vmax.f32 %v5007_v38, 0.0 }
 0x34b   : > { %v5042_v7 = vmax.f32 %v5010_v12, 0.0 }
 0x34c   : > { %v5040_v2 = vmax.f32 %v5008_v16, 0.0  ;;  %v6742_v57 = vpop.f32.mrb[4].mxu1 }
 0x34d   : > { %v5066_v14 = vpack.c.bf16 %v5042_v7, %v5041_v37  ;;  %v6810_v11 = vadd.f32 %v6742_v57, %v9495_v34  ;;  %v4893_v43 = vpop.f32.mrb[5].mxu1 }
 0x34e   : > { %v5065_v21 = vpack.c.bf16 %v5040_v2, %v5039_v41  ;;  %v6811_v17 = vadd.f32 %v4893_v43, %v9497_v50  ;;  %v6743_v0 = vpop.f32.mrb[6].mxu1 }
 0x34f   : > { %v5013_v61 = vadd.f32 %v6810_v11, %v9530_v20  ;;  %v6812_v33 = vadd.f32 %v6743_v0, %v9499_v32  ;;  %v4896_v39 = vpop.f32.mrb[7].mxu1 }
 0x350   : > { %v5011_v56 = vadd.f32 %v6811_v17, %v9530_v20  ;;  %v6813_v1 = vadd.f32 %v4896_v39, %v9501_v30  ;;  %6772 = vmatprep.mubr.msk.bf16.mxu0 %vm5091_vm4, %v5065_v21 }
 0x351   : > { %v5014_v42 = vadd.f32 %v6812_v33, %v9530_v20  ;;  %6773 = vmatmul.mubr.msk.bf16.gmra.mrb[76].mxu0 %vm5091_vm4, %v5066_v14  ;;  %v5045_v6 = vmax.f32 %v5013_v61, 0.0 }
 0x352   : > { %v5012_v34 = vadd.f32 %v6813_v1, %v9530_v20  ;;  %v5043_v3 = vmax.f32 %v5011_v56, 0.0 }
 0x353   : > { %v5046_v50 = vmax.f32 %v5014_v42, 0.0 }
 0x354   : > { %v5044_v45 = vmax.f32 %v5012_v34, 0.0  ;;  %v6746_v53 = vpop.f32.mrb[8].mxu1 }
 0x355   : > { %v5068_v38 = vpack.c.bf16 %v5046_v50, %v5045_v6  ;;  %v6814_v32 = vadd.f32 %v6746_v53, %v9503_v40  ;;  %v4909_v23 = vpop.f32.mrb[9].mxu1 }
 0x356   : > { %v5067_v12 = vpack.c.bf16 %v5044_v45, %v5043_v3  ;;  %v6815_v30 = vadd.f32 %v4909_v23, %v9505_v27  ;;  %v6747_v16 = vpop.f32.mrb[10].mxu1 }
 0x357   : > { %v5017_v37 = vadd.f32 %v6814_v32, %v9530_v20  ;;  %v6816_v7 = vadd.f32 %v6747_v16, %v9507_v35  ;;  %v4912_v41 = vpop.f32.mrb[11].mxu1 }
 0x358   : > { %v5015_v2 = vadd.f32 %v6815_v30, %v9530_v20  ;;  %v6817_v57 = vadd.f32 %v4912_v41, %v9509_v55  ;;  %6776 = vmatprep.mubr.msk.bf16.mxu0 %vm5091_vm4, %v5067_v12 }
 0x359   : > { %v5018_v14 = vadd.f32 %v6816_v7, %v9530_v20  ;;  %6777 = vmatmul.mubr.msk.bf16.gmra.mrb[80].mxu0 %vm5091_vm4, %v5068_v38  ;;  %v5049_v11 = vmax.f32 %v5017_v37, 0.0 }
 0x35a   : > { %v5016_v40 = vadd.f32 %v6817_v57, %v9530_v20  ;;  %v5047_v43 = vmax.f32 %v5015_v2, 0.0 }
 0x35b   : > { %v5050_v27 = vmax.f32 %v5018_v14, 0.0 }
 0x35c   : > { %v5048_v21 = vmax.f32 %v5016_v40, 0.0  ;;  %v6750_v17 = vpop.f32.mrb[12].mxu1 }
 0x35d   : > { %v5070_v0 = vpack.c.bf16 %v5050_v27, %v5049_v11  ;;  %v6818_v35 = vadd.f32 %v6750_v17, %v9511_v48  ;;  %v4925_v61 = vpop.f32.mrb[13].mxu1  ;;  %v9617_v17 = vld [vmem:[%s9855_s5] ss:$0 sm:$0xff] }
 0x35e   : > { %v5069_v33 = vpack.c.bf16 %v5048_v21, %v5047_v43  ;;  %v6819_v55 = vadd.f32 %v4925_v61, %v9513_v15  ;;  %v6751_v39 = vpop.f32.mrb[14].mxu1  ;;  %v9603_v43 = vld [vmem:[%s9854_s4] ss:$0 sm:$0xff] }
 0x35f   : > { %v5021_v56 = vadd.f32 %v6818_v35, %v9530_v20  ;;  %v6820_v1 = vadd.f32 %v6751_v39, %v9515_v47  ;;  %v4928_v42 = vpop.f32.mrb[15].mxu1 }
 0x360   : > { %v5019_v34 = vadd.f32 %v6819_v55, %v9530_v20  ;;  %v6821_v6 = vadd.f32 %v4928_v42, %v9517_v62  ;;  %6780 = vmatprep.mubr.msk.bf16.mxu0 %vm5091_vm4, %v5069_v33 }
 0x361   : > { %v5022_v50 = vadd.f32 %v6820_v1, %v9530_v20  ;;  %6781 = vmatmul.mubr.msk.bf16.gmra.mrb[84].mxu0 %vm5091_vm4, %v5070_v0  ;;  %v5053_v3 = vmax.f32 %v5021_v56, 0.0 }
 0x362   : > { %v5020_v48 = vadd.f32 %v6821_v6, %v9530_v20  ;;  %v5051_v45 = vmax.f32 %v5019_v34, 0.0 }
 0x363   : > { %v5054_v15 = vmax.f32 %v5022_v50, 0.0 }
 0x364   : > { %v5052_v53 = vmax.f32 %v5020_v48, 0.0  ;;  %v6754_v38 = vpop.f32.mrb[16].mxu1 }
 0x365   : > { %v5072_v32 = vpack.c.bf16 %v5054_v15, %v5053_v3  ;;  %v6822_v47 = vadd.f32 %v6754_v38, %v9519_v18  ;;  %v4941_v23 = vpop.f32.mrb[17].mxu1 }
 0x366   : > { %v5071_v12 = vpack.c.bf16 %v5052_v53, %v5051_v45  ;;  %v6823_v62 = vadd.f32 %v4941_v23, %v9521_v59  ;;  %v6755_v30 = vpop.f32.mrb[18].mxu1 }
 0x367   : > { %v5025_v16 = vadd.f32 %v6822_v47, %v9530_v20  ;;  %v6824_v37 = vadd.f32 %v6755_v30, %v9523_v58  ;;  %v4944_v7 = vpop.f32.mrb[19].mxu1 }
 0x368   : > { %v5023_v41 = vadd.f32 %v6823_v62, %v9530_v20  ;;  %v6825_v2 = vadd.f32 %v4944_v7, %v9525_v51  ;;  %6784 = vmatprep.mubr.msk.bf16.mxu0 %vm5091_vm4, %v5071_v12 }
 0x369   : > { %v5026_v57 = vadd.f32 %v6824_v37, %v9530_v20  ;;  %6785 = vmatmul.mubr.msk.bf16.gmra.mrb[88].mxu0 %vm5091_vm4, %v5072_v32  ;;  %v5057_v59 = vmax.f32 %v5025_v16, 0.0 }
 0x36a   : > { %v5024_v18 = vadd.f32 %v6825_v2, %v9530_v20  ;;  %v5055_v40 = vmax.f32 %v5023_v41, 0.0 }
 0x36b   : > { %v5058_v14 = vmax.f32 %v5026_v57, 0.0 }
 0x36c   : > { %v5056_v11 = vmax.f32 %v5024_v18, 0.0 }
 0x36d   : > { %v5074_v58 = vpack.c.bf16 %v5058_v14, %v5057_v59 }
 0x36e   : > { %v5073_v27 = vpack.c.bf16 %v5056_v11, %v5055_v40 }
 0x370   : > { %6788 = vmatprep.mubr.msk.bf16.mxu0 %vm5091_vm4, %v5073_v27 }
 0x371   : > { %6789 = vmatmul.mubr.msk.bf16.gmra.mrb[92].mxu0 %vm5091_vm4, %v5074_v58 }
 0x3fc   : > { %v6762_v51 = vpop.f32.mrb[64].mxu0 }
 0x3fd   : > { %v5303_v21 = vadd.f32 %v6762_v51, %v10192_v60  ;;  %v5174_v20 = vpop.f32.mrb[65].mxu0 }
 0x3fe   : > { %v5301_v0 = vadd.f32 %v5174_v20, %v10296_v52  ;;  %v6763_v35 = vpop.f32.mrb[66].mxu0 }
 0x3ff   : > { %v6192_v61 = vpack.c.bf16 %v5303_v21, %v5303_v21  ;;  %v5503_v60 = vmul.f32 %v9603_v43, %v5303_v21  ;;  %v5304_v33 = vadd.f32 %v6763_v35, %v7943_v63  ;;  %v5177_v55 = vpop.f32.mrb[67].mxu0 }
 0x400   : > { %v6190_v39 = vpack.c.bf16 %v5301_v0, %v5301_v0  ;;  %v5501_v56 = vmul.f32 %v9603_v43, %v5301_v0  ;;  %v5302_v52 = vadd.f32 %v5177_v55, %v10295_v36 }
 0x401   : > { %5464 = vst.msk [vmem:[%s9612_s29 + $0x8] sm:$0xf] %vm5461_vm5, %v6192_v61  ;;  %v5542_v63 = vadd.f32 %v9617_v17, %v5503_v60  ;;  %v6193_v1 = vpack.c.bf16 %v5304_v33, %v5304_v33  ;;  %v5504_v42 = vmul.f32 %v9603_v43, %v5304_v33 }
 0x402   : > { %5462 = vst.msk [vmem:[%s9612_s29] sm:$0xf] %vm5461_vm5, %v6190_v39  ;;  %v5540_v34 = vadd.f32 %v9617_v17, %v5501_v56  ;;  %v6191_v6 = vpack.c.bf16 %v5302_v52, %v5302_v52  ;;  %v5502_v50 = vmul.f32 %v9603_v43, %v5302_v52 }
 0x403   : > { %5574 = vst.msk [vmem:[%s9625_s12 + $0x10] sm:$0xff] %vm1292_vm2, %v5542_v63  ;;  %v5543_v36 = vadd.f32 %v9617_v17, %v5504_v42 }
 0x404   : > { %5465 = vst.msk [vmem:[%s9612_s29 + $0xc] sm:$0xf] %vm5461_vm5, %v6193_v1  ;;  %5463 = vst.msk [vmem:[%s9612_s29 + $0x4] sm:$0xf] %vm5461_vm5, %v6191_v6  ;;  %v5541_v48 = vadd.f32 %v9617_v17, %v5502_v50 }
 0x405   : > { %5572 = vst.msk [vmem:[%s9625_s12] sm:$0xff] %vm1292_vm2, %v5540_v34  ;;  %5575 = vst.msk [vmem:[%s9625_s12 + $0x18] sm:$0xff] %vm1292_vm2, %v5543_v36 }
 0x406   : > { %5573 = vst.msk [vmem:[%s9625_s12 + $0x8] sm:$0xff] %vm1292_vm2, %v5541_v48 }
 0x40c   : > { %v6766_v3 = vpop.f32.mrb[68].mxu0 }
 0x40d   : > { %v5307_v15 = vadd.f32 %v6766_v3, %v10196_v4  ;;  %v5190_v45 = vpop.f32.mrb[69].mxu0 }
 0x40e   : > { %v5305_v53 = vadd.f32 %v5190_v45, %v10195_v5  ;;  %v6767_v38 = vpop.f32.mrb[70].mxu0 }
 0x40f   : > { %v6196_v32 = vpack.c.bf16 %v5307_v15, %v5307_v15  ;;  %v5507_v47 = vmul.f32 %v9603_v43, %v5307_v15  ;;  %v5308_v23 = vadd.f32 %v6767_v38, %v10201_v29  ;;  %v5193_v12 = vpop.f32.mrb[71].mxu0 }
 0x410   : > { %v6194_v62 = vpack.c.bf16 %v5305_v53, %v5305_v53  ;;  %v5505_v30 = vmul.f32 %v9603_v43, %v5305_v53  ;;  %v5306_v4 = vadd.f32 %v5193_v12, %v8117_v46 }
 0x411   : > { %5468 = vst.msk [vmem:[%s9612_s29 + $0x18] sm:$0xf] %vm5461_vm5, %v6196_v32  ;;  %v5546_v5 = vadd.f32 %v9617_v17, %v5507_v47  ;;  %v6197_v16 = vpack.c.bf16 %v5308_v23, %v5308_v23  ;;  %v5508_v37 = vmul.f32 %v9603_v43, %v5308_v23 }
 0x412   : > { %5466 = vst.msk [vmem:[%s9612_s29 + $0x10] sm:$0xf] %vm5461_vm5, %v6194_v62  ;;  %v5544_v29 = vadd.f32 %v9617_v17, %v5505_v30  ;;  %v6195_v7 = vpack.c.bf16 %v5306_v4, %v5306_v4  ;;  %v5506_v41 = vmul.f32 %v9603_v43, %v5306_v4 }
 0x413   : > { %5578 = vst.msk [vmem:[%s9625_s12 + $0x30] sm:$0xff] %vm1292_vm2, %v5546_v5  ;;  %v5547_v46 = vadd.f32 %v9617_v17, %v5508_v37 }
 0x414   : > { %5469 = vst.msk [vmem:[%s9612_s29 + $0x1c] sm:$0xf] %vm5461_vm5, %v6197_v16  ;;  %5467 = vst.msk [vmem:[%s9612_s29 + $0x14] sm:$0xf] %vm5461_vm5, %v6195_v7  ;;  %v5545_v2 = vadd.f32 %v9617_v17, %v5506_v41 }
 0x415   : > { %5576 = vst.msk [vmem:[%s9625_s12 + $0x20] sm:$0xff] %vm1292_vm2, %v5544_v29  ;;  %5579 = vst.msk [vmem:[%s9625_s12 + $0x38] sm:$0xff] %vm1292_vm2, %v5547_v46 }
 0x416   : > { %5577 = vst.msk [vmem:[%s9625_s12 + $0x28] sm:$0xff] %vm1292_vm2, %v5545_v2 }
 0x41c   : > { %v6770_v57 = vpop.f32.mrb[72].mxu0 }
 0x41d   : > { %v5311_v18 = vadd.f32 %v6770_v57, %v10127_v28  ;;  %v5206_v59 = vpop.f32.mrb[73].mxu0 }
 0x41e   : > { %v5309_v14 = vadd.f32 %v5206_v59, %v8204_v31  ;;  %v6771_v40 = vpop.f32.mrb[74].mxu0 }
 0x41f   : > { %v6200_v11 = vpack.c.bf16 %v5311_v18, %v5311_v18  ;;  %v5511_v58 = vmul.f32 %v9603_v43, %v5311_v18  ;;  %v5312_v27 = vadd.f32 %v6771_v40, %v10128_v13  ;;  %v5209_v51 = vpop.f32.mrb[75].mxu0 }
 0x420   : > { %v6198_v21 = vpack.c.bf16 %v5309_v14, %v5309_v14  ;;  %v5509_v20 = vmul.f32 %v9603_v43, %v5309_v14  ;;  %v5310_v0 = vadd.f32 %v5209_v51, %v8208_v24 }
 0x421   : > { %5472 = vst.msk [vmem:[%s9612_s29 + $0x28] sm:$0xf] %vm5461_vm5, %v6200_v11  ;;  %v5550_v31 = vadd.f32 %v9617_v17, %v5511_v58  ;;  %v6201_v28 = vpack.c.bf16 %v5312_v27, %v5312_v27  ;;  %v5512_v35 = vmul.f32 %v9603_v43, %v5312_v27  ;;  %v10329_v27 = vld [vmem:[#allocation55_spill] sm:$0xff] }
 0x422   : > { %5470 = vst.msk [vmem:[%s9612_s29 + $0x20] sm:$0xf] %vm5461_vm5, %v6198_v21  ;;  %v5548_v13 = vadd.f32 %v9617_v17, %v5509_v20  ;;  %v6199_v61 = vpack.c.bf16 %v5310_v0, %v5310_v0  ;;  %v5510_v60 = vmul.f32 %v9603_v43, %v5310_v0  ;;  %v10330_v0 = vld [vmem:[#allocation57_spill] sm:$0xff] }
 0x423   : > { %5582 = vst.msk [vmem:[%s9625_s12 + $0x50] sm:$0xff] %vm1292_vm2, %v5550_v31  ;;  %v5551_v24 = vadd.f32 %v9617_v17, %v5512_v35 }
 0x424   : > { %5473 = vst.msk [vmem:[%s9612_s29 + $0x2c] sm:$0xf] %vm5461_vm5, %v6201_v28  ;;  %5471 = vst.msk [vmem:[%s9612_s29 + $0x24] sm:$0xf] %vm5461_vm5, %v6199_v61  ;;  %v5549_v33 = vadd.f32 %v9617_v17, %v5510_v60  ;;  %v6774_v55 = vpop.f32.mrb[76].mxu0 }
 0x425   : > { %5580 = vst.msk [vmem:[%s9625_s12 + $0x40] sm:$0xff] %vm1292_vm2, %v5548_v13  ;;  %5583 = vst.msk [vmem:[%s9625_s12 + $0x58] sm:$0xff] %vm1292_vm2, %v5551_v24  ;;  %v5315_v39 = vadd.f32 %v6774_v55, %v10284_v44  ;;  %v5222_v56 = vpop.f32.mrb[77].mxu0 }
 0x426   : > { %5581 = vst.msk [vmem:[%s9625_s12 + $0x48] sm:$0xff] %vm1292_vm2, %v5549_v33  ;;  %v5313_v52 = vadd.f32 %v5222_v56, %v10280_v25  ;;  %v6775_v63 = vpop.f32.mrb[78].mxu0 }
 0x427   : > { %v6204_v1 = vpack.c.bf16 %v5315_v39, %v5315_v39  ;;  %v5515_v42 = vmul.f32 %v9603_v43, %v5315_v39  ;;  %v5316_v34 = vadd.f32 %v6775_v63, %v10283_v9  ;;  %v5225_v6 = vpop.f32.mrb[79].mxu0  ;;  %v10331_v39 = vld [vmem:[#allocation61_spill] sm:$0xff]  ;;  %v10332_v63 = vld [vmem:[#allocation64_spill] sm:$0xff] }
 0x428   : > { %v6202_v50 = vpack.c.bf16 %v5313_v52, %v5313_v52  ;;  %v5513_v44 = vmul.f32 %v9603_v43, %v5313_v52  ;;  %v5314_v36 = vadd.f32 %v5225_v6, %v10279_v19 }
 0x429   : > { %5476 = vst.msk [vmem:[%s9612_s29 + $0x38] sm:$0xf] %vm5461_vm5, %v6204_v1  ;;  %v5554_v25 = vadd.f32 %v9617_v17, %v5515_v42  ;;  %v6205_v48 = vpack.c.bf16 %v5316_v34, %v5316_v34  ;;  %v5516_v3 = vmul.f32 %v9603_v43, %v5316_v34 }
 0x42a   : > { %5474 = vst.msk [vmem:[%s9612_s29 + $0x30] sm:$0xf] %vm5461_vm5, %v6202_v50  ;;  %v5552_v9 = vadd.f32 %v9617_v17, %v5513_v44  ;;  %v6203_v15 = vpack.c.bf16 %v5314_v36, %v5314_v36  ;;  %v5514_v45 = vmul.f32 %v9603_v43, %v5314_v36  ;;  %v10333_v50 = vld [vmem:[#allocation70_spill] sm:$0xff] }
 0x42b   : > { %5586 = vst.msk [vmem:[%s9625_s12 + $0x70] sm:$0xff] %vm1292_vm2, %v5554_v25  ;;  %v5555_v19 = vadd.f32 %v9617_v17, %v5516_v3  ;;  %v10334_v3 = vld [vmem:[#allocation67_spill] sm:$0xff] }
 0x42c   : > { %5477 = vst.msk [vmem:[%s9612_s29 + $0x3c] sm:$0xf] %vm5461_vm5, %v6205_v48  ;;  %5475 = vst.msk [vmem:[%s9612_s29 + $0x34] sm:$0xf] %vm5461_vm5, %v6203_v15  ;;  %v5553_v53 = vadd.f32 %v9617_v17, %v5514_v45  ;;  %v6778_v38 = vpop.f32.mrb[80].mxu0 }
 0x42d   : > { %5584 = vst.msk [vmem:[%s9625_s12 + $0x60] sm:$0xff] %vm1292_vm2, %v5552_v9  ;;  %5587 = vst.msk [vmem:[%s9625_s12 + $0x78] sm:$0xff] %vm1292_vm2, %v5555_v19  ;;  %v5319_v32 = vadd.f32 %v6778_v38, %v10287_v8  ;;  %v5238_v47 = vpop.f32.mrb[81].mxu0 }
 0x42e   : > { %5585 = vst.msk [vmem:[%s9625_s12 + $0x68] sm:$0xff] %vm1292_vm2, %v5553_v53  ;;  %v5317_v23 = vadd.f32 %v5238_v47, %v10286_v26  ;;  %v6779_v12 = vpop.f32.mrb[82].mxu0 }
 0x42f   : > { %v6208_v62 = vpack.c.bf16 %v5319_v32, %v5319_v32  ;;  %v5519_v30 = vmul.f32 %v9603_v43, %v5319_v32  ;;  %v5320_v4 = vadd.f32 %v6779_v12, %v10221_v54  ;;  %v5241_v5 = vpop.f32.mrb[83].mxu0 }
 0x430   : > { %v6206_v16 = vpack.c.bf16 %v5317_v23, %v5317_v23  ;;  %v5517_v8 = vmul.f32 %v9603_v43, %v5317_v23  ;;  %v5318_v37 = vadd.f32 %v5241_v5, %v10285_v10  ;;  %v10336_v5 = vld [vmem:[#allocation75_spill] sm:$0xff] }
 0x431   : > { %5480 = vst.msk [vmem:[%s9612_s29 + $0x48] sm:$0xf] %vm5461_vm5, %v6208_v62  ;;  %v5558_v26 = vadd.f32 %v9617_v17, %v5519_v30  ;;  %v6209_v29 = vpack.c.bf16 %v5320_v4, %v5320_v4  ;;  %v5520_v7 = vmul.f32 %v9603_v43, %v5320_v4  ;;  %v10335_v62 = vld [vmem:[#allocation80_spill] sm:$0xff] }
 0x432   : > { %5478 = vst.msk [vmem:[%s9612_s29 + $0x40] sm:$0xf] %vm5461_vm5, %v6206_v16  ;;  %v5556_v54 = vadd.f32 %v9617_v17, %v5517_v8  ;;  %v6207_v41 = vpack.c.bf16 %v5318_v37, %v5318_v37  ;;  %v5518_v46 = vmul.f32 %v9603_v43, %v5318_v37 }
 0x433   : > { %5590 = vst.msk [vmem:[%s9625_s12 + $0x90] sm:$0xff] %vm1292_vm2, %v5558_v26  ;;  %v5559_v10 = vadd.f32 %v9617_v17, %v5520_v7 }
 0x434   : > { %5481 = vst.msk [vmem:[%s9612_s29 + $0x4c] sm:$0xf] %vm5461_vm5, %v6209_v29  ;;  %5479 = vst.msk [vmem:[%s9612_s29 + $0x44] sm:$0xf] %vm5461_vm5, %v6207_v41  ;;  %v5557_v2 = vadd.f32 %v9617_v17, %v5518_v46  ;;  %v6782_v57 = vpop.f32.mrb[84].mxu0  ;;  %v10337_v29 = vld [vmem:[#allocation78_spill] sm:$0xff] }
 0x435   : > { %5588 = vst.msk [vmem:[%s9625_s12 + $0x80] sm:$0xff] %vm1292_vm2, %v5556_v54  ;;  %5591 = vst.msk [vmem:[%s9625_s12 + $0x98] sm:$0xff] %vm1292_vm2, %v5559_v10  ;;  %v5323_v18 = vadd.f32 %v6782_v57, %v10228_v22  ;;  %v5254_v59 = vpop.f32.mrb[85].mxu0  ;;  %v10338_v10 = vld [vmem:[#allocation82_spill] sm:$0xff] }
 0x436   : > { %5589 = vst.msk [vmem:[%s9625_s12 + $0x88] sm:$0xff] %vm1292_vm2, %v5557_v2  ;;  %v5321_v14 = vadd.f32 %v5254_v59, %v10289_v49  ;;  %v6783_v40 = vpop.f32.mrb[86].mxu0 }
 0x437   : > { %v6212_v11 = vpack.c.bf16 %v5323_v18, %v5323_v18  ;;  %v5523_v58 = vmul.f32 %v9603_v43, %v5323_v18  ;;  %v5324_v51 = vadd.f32 %v6783_v40, %v10329_v27  ;;  %v5257_v21 = vpop.f32.mrb[87].mxu0 }
 0x438   : > { %v6210_v20 = vpack.c.bf16 %v5321_v14, %v5321_v14  ;;  %v5521_v22 = vmul.f32 %v9603_v43, %v5321_v14  ;;  %v5322_v31 = vadd.f32 %v5257_v21, %v10330_v0 }
 0x439   : > { %5484 = vst.msk [vmem:[%s9612_s29 + $0x58] sm:$0xf] %vm5461_vm5, %v6212_v11  ;;  %v5562_v49 = vadd.f32 %v9617_v17, %v5523_v58  ;;  %v6213_v28 = vpack.c.bf16 %v5324_v51, %v5324_v51  ;;  %v5524_v35 = vmul.f32 %v9603_v43, %v5324_v51 }
 0x43a   : > { %5482 = vst.msk [vmem:[%s9612_s29 + $0x50] sm:$0xf] %vm5461_vm5, %v6210_v20  ;;  %v5560_v13 = vadd.f32 %v9617_v17, %v5521_v22  ;;  %v6211_v61 = vpack.c.bf16 %v5322_v31, %v5322_v31  ;;  %v5522_v60 = vmul.f32 %v9603_v43, %v5322_v31 }
 0x43b   : > { %5594 = vst.msk [vmem:[%s9625_s12 + $0xb0] sm:$0xff] %vm1292_vm2, %v5562_v49  ;;  %v5563_v24 = vadd.f32 %v9617_v17, %v5524_v35 }
 0x43c   : > { %5485 = vst.msk [vmem:[%s9612_s29 + $0x5c] sm:$0xf] %vm5461_vm5, %v6213_v28  ;;  %5483 = vst.msk [vmem:[%s9612_s29 + $0x54] sm:$0xf] %vm5461_vm5, %v6211_v61  ;;  %v5561_v33 = vadd.f32 %v9617_v17, %v5522_v60  ;;  %v6786_v55 = vpop.f32.mrb[88].mxu0 }
 0x43d   : > { %5592 = vst.msk [vmem:[%s9625_s12 + $0xa0] sm:$0xff] %vm1292_vm2, %v5560_v13  ;;  %5595 = vst.msk [vmem:[%s9625_s12 + $0xb8] sm:$0xff] %vm1292_vm2, %v5563_v24  ;;  %v5327_v56 = vadd.f32 %v6786_v55, %v10331_v39  ;;  %v5270_v52 = vpop.f32.mrb[89].mxu0 }
 0x43e   : > { %5593 = vst.msk [vmem:[%s9625_s12 + $0xa8] sm:$0xff] %vm1292_vm2, %v5561_v33  ;;  %v5325_v1 = vadd.f32 %v5270_v52, %v10332_v63  ;;  %v6787_v42 = vpop.f32.mrb[90].mxu0 }
 0x43f   : > { %v6216_v34 = vpack.c.bf16 %v5327_v56, %v5327_v56  ;;  %v5527_v6 = vmul.f32 %v9603_v43, %v5327_v56  ;;  %v5328_v44 = vadd.f32 %v6787_v42, %v10333_v50  ;;  %v5273_v36 = vpop.f32.mrb[91].mxu0 }
 0x440   : > { %v6214_v25 = vpack.c.bf16 %v5325_v1, %v5325_v1  ;;  %v5525_v48 = vmul.f32 %v9603_v43, %v5325_v1  ;;  %v5326_v9 = vadd.f32 %v5273_v36, %v10334_v3 }
 0x441   : > { %5488 = vst.msk [vmem:[%s9612_s29 + $0x68] sm:$0xf] %vm5461_vm5, %v6216_v34  ;;  %v5566_v15 = vadd.f32 %v9617_v17, %v5527_v6  ;;  %v6217_v45 = vpack.c.bf16 %v5328_v44, %v5328_v44  ;;  %v5528_v19 = vmul.f32 %v9603_v43, %v5328_v44 }
 0x442   : > { %5486 = vst.msk [vmem:[%s9612_s29 + $0x60] sm:$0xf] %vm5461_vm5, %v6214_v25  ;;  %v5564_v53 = vadd.f32 %v9617_v17, %v5525_v48  ;;  %v6215_v38 = vpack.c.bf16 %v5326_v9, %v5326_v9  ;;  %v5526_v32 = vmul.f32 %v9603_v43, %v5326_v9 }
 0x443   : > { %5598 = vst.msk [vmem:[%s9625_s12 + $0xd0] sm:$0xff] %vm1292_vm2, %v5566_v15  ;;  %v5567_v47 = vadd.f32 %v9617_v17, %v5528_v19 }
 0x444   : > { %5489 = vst.msk [vmem:[%s9612_s29 + $0x6c] sm:$0xf] %vm5461_vm5, %v6217_v45  ;;  %5487 = vst.msk [vmem:[%s9612_s29 + $0x64] sm:$0xf] %vm5461_vm5, %v6215_v38  ;;  %v5565_v23 = vadd.f32 %v9617_v17, %v5526_v32  ;;  %v6790_v12 = vpop.f32.mrb[92].mxu0 }
 0x445   : > { %5596 = vst.msk [vmem:[%s9625_s12 + $0xc0] sm:$0xff] %vm1292_vm2, %v5564_v53  ;;  %5599 = vst.msk [vmem:[%s9625_s12 + $0xd8] sm:$0xff] %vm1292_vm2, %v5567_v47  ;;  %v5331_v30 = vadd.f32 %v6790_v12, %v10335_v62  ;;  %v5286_v4 = vpop.f32.mrb[93].mxu0 }
 0x446   : > { %5597 = vst.msk [vmem:[%s9625_s12 + $0xc8] sm:$0xff] %vm1292_vm2, %v5565_v23  ;;  %v5329_v16 = vadd.f32 %v5286_v4, %v10336_v5  ;;  %v6791_v8 = vpop.f32.mrb[94].mxu0 }
 0x447   : > { %v6220_v37 = vpack.c.bf16 %v5331_v30, %v5331_v30  ;;  %v5531_v26 = vmul.f32 %v9603_v43, %v5331_v30  ;;  %v5332_v7 = vadd.f32 %v6791_v8, %v10337_v29  ;;  %v5289_v54 = vpop.f32.mrb[95].mxu0 }
 0x448   : > { %v6218_v41 = vpack.c.bf16 %v5329_v16, %v5329_v16  ;;  %v5529_v46 = vmul.f32 %v9603_v43, %v5329_v16  ;;  %v5330_v2 = vadd.f32 %v5289_v54, %v10338_v10 }
 0x449   : > { %5492 = vst.msk [vmem:[%s9612_s29 + $0x78] sm:$0xf] %vm5461_vm5, %v6220_v37  ;;  %v5570_v57 = vadd.f32 %v9617_v17, %v5531_v26  ;;  %v6221_v18 = vpack.c.bf16 %v5332_v7, %v5332_v7  ;;  %v5532_v59 = vmul.f32 %v9603_v43, %v5332_v7 }
 0x44a   : > { %5490 = vst.msk [vmem:[%s9612_s29 + $0x70] sm:$0xf] %vm5461_vm5, %v6218_v41  ;;  %v5568_v14 = vadd.f32 %v9617_v17, %v5529_v46  ;;  %v6219_v40 = vpack.c.bf16 %v5330_v2, %v5330_v2  ;;  %v5530_v11 = vmul.f32 %v9603_v43, %v5330_v2 }
 0x44b   : > { %5602 = vst.msk [vmem:[%s9625_s12 + $0xf0] sm:$0xff] %vm1292_vm2, %v5570_v57  ;;  %v5571_v58 = vadd.f32 %v9617_v17, %v5532_v59 }
 0x44c   : > { %5493 = vst.msk [vmem:[%s9612_s29 + $0x7c] sm:$0xf] %vm5461_vm5, %v6221_v18  ;;  %5491 = vst.msk [vmem:[%s9612_s29 + $0x74] sm:$0xf] %vm5461_vm5, %v6219_v40  ;;  %v5569_v27 = vadd.f32 %v9617_v17, %v5530_v11 }
 0x44d   : > { %5600 = vst.msk [vmem:[%s9625_s12 + $0xe0] sm:$0xff] %vm1292_vm2, %v5568_v14  ;;  %5603 = vst.msk [vmem:[%s9625_s12 + $0xf8] sm:$0xff] %vm1292_vm2, %v5571_v58 }
 0x44e   : > { %5601 = vst.msk [vmem:[%s9625_s12 + $0xe8] sm:$0xff] %vm1292_vm2, %v5569_v27 }
 0x44f PF: > { %s21_s13 = sadd.s32 1, %s7098_s13  }
 0x450   : > { %p18_p4 = scmp.ge.s32.totalorder %s21_s13, 4  }
 0x452   :  { %20 = sbr.rel (!%p18_p4) target bundleno = 1 (0x1), region = 113 }

// kernel: fasternet_forward.5
= control target key start
LH: loop header
LB: loop body
LE: loop exit
PB: predicated region body
PF: predicated region fallthrough
CT: control target
= control target key end

     0   :  { %19 = vsyncpa [#allocation3], 0  ;;  %s5945_s0 = inlined_call_operand.vmem [shape: bf16[2,64,64], index: 0, kind: input, shape index: {}]   ;;  %s5946_s1 = inlined_call_operand.vmem [shape: bf16[64,32], index: 1, kind: input, shape index: {}]   ;;  %s5947_s2 = inlined_call_operand.vmem [shape: f32[1,32], index: 2, kind: input, shape index: {}]   ;;  %s5948_s3 = inlined_call_operand.vmem [shape: f32[9,64,1], index: 3, kind: input, shape index: {}]   ;;  %s5949_s4 = inlined_call_operand.vmem [shape: f32[1,32], index: 4, kind: input, shape index: {}]   ;;  %s5950_s5 = inlined_call_operand.vmem [shape: f32[1,32], index: 5, kind: input, shape index: {}]   ;;  %s5951_s6 = inlined_call_operand.vmem [shape: bf16[9,32,64], index: 6, kind: input, shape index: {}]   ;;  %s5952_s7 = inlined_call_operand.vmem [shape: f32[1,64], index: 7, kind: input, shape index: {}]   ;;  %s5953_s8 = inlined_call_operand.vmem [shape: bf16[64,32], index: 8, kind: input, shape index: {}]   ;;  %s5954_s9 = inlined_call_operand.vmem [shape: bf16[9,32,64], index: 9, kind: input, shape index: {}]   ;;  %s5955_s10 = inlined_call_operand.vmem [shape: f32[1,64], index: 10, kind: input, shape index: {}]   ;;  %s5956_s11 = inlined_call_operand.vmem [shape: bf16[64,32], index: 11, kind: input, shape index: {}]   ;;  %s5957_s12 = inlined_call_operand.vmem [shape: bf16[2,64,32], index: 12, kind: output, shape index: {0}]   ;;  %s5958_s13 = inlined_call_operand.hbm [shape: f32[2,64,32], index: 13, kind: output, shape index: {1}]  }
   0x1   :  { %21 = vsyncpa [#allocation3 + $0x1], 0  ;;  %s4588_s25 = smov 0   ;;  %s4590_s26 = smov 0  }
   0x2   :  { %s4592_s27 = smov 0   ;;  %s4594_s28 = smov 0  }
   0x3 LB: > { %6031 = sst [smem:[#allocation5_spill]] %s4508_s27  ;;  %s4609_s29 = sadd.s32 4294967295, %s4512_s28   ;;  %s4512_s28 = sphi %s4594_s28, %s6201_s28   ;;  %s4508_s27 = sphi %s4592_s27, %s6206_s27   ;;  %s4504_s26 = sphi %s4590_s26, %s6205_s26   ;;  %s4500_s25 = sphi %s4588_s25, %s6204_s25  }
   0x4   : > { %s3536_s30 = sadd.s32 4294967294, %s4512_s28   ;;  %s4613_s14 = sadd.s32 1, %s4512_s28  }
   0x5   : > { %6032 = sst [smem:[#allocation6_spill]] %s4613_s14  ;;  %s317_s15 = sadd.s32 1, %s4508_s27 }
   0x6   : > { %s314_s16 = ssub.s32 %s4512_s28, %s4613_s14  ;;  %p327_p0 = scmp.ne.s32.totalorder %s4508_s27, %s4504_s26 }
   0x7   : > { %p315_p1 = scmp.eq.s32.totalorder %s314_s16, 0  ;;  %p328_p2 = scmp.eq.s32.totalorder %s4609_s29, 1 }
   0x8   : > { %p333_p3 = scmp.ne.s32.totalorder %s4504_s26, %s4500_s25  ;;  %p334_p4 = scmp.eq.s32.totalorder %s3536_s30, 1 }
   0x9   : > { %s4624_s17 = scalar_select %p315_p1, %s4508_s27, %s317_s15  }
   0xa   : > { %p4626_p5 = por %p328_p2, %p327_p0  ;;  %p4630_p6 = por %p334_p4, %p333_p3 }
   0xb   : > { %6033 = sst [smem:[#allocation7_spill]] %s4624_s17  ;;  %p3539_p7 = scmp.ge.s32.totalorder %s4512_s28, 1 }
   0xc   : > { %s6035_s19 = scalar_select %p4630_p6, 1, 0 }
   0xd   : > { %p393_p8 = scmp.lt.s32.totalorder %s4512_s28, 3 }
   0xe   : > { %6036 = sst [smem:[#allocation8_spill]] %s6035_s19 }
   0xf   : > { %p394_p9 = pnand %p3539_p7, %p393_p8 }
  0x11   : > { %397 = sbr.rel (%p394_p9) target bundleno = 1453 (0x5ad), region = 68 }
  0x18   : > { %v600_v0 = vld [vmem:[%s5948_s3 + $0x10] sm:$0xff]  ;;  %v598_v1 = vld [vmem:[%s5948_s3] sm:$0xff]  ;;  %p442_p10 = scmp.lt.s32.totalorder %s4609_s29, 1  ;;  %v4514_v2 = vmov 0   ;;  %v601_v4 = vld [vmem:[%s5948_s3 + $0x18] sm:$0xff]  ;;  %vm520_vm0 = vcmask 523264  }
  0x19   : > { %4397 = vset.pattern.permute.xlu1 %v4514_v2  ;;  %4396 = vset.pattern.permute.xlu0 %v4514_v2  ;;  %v4398_v3 = vld [vmem:[%s5946_s1] sm:$0xff]   ;;  %v599_v5 = vld [vmem:[%s5948_s3 + $0x8] sm:$0xff]  ;;  %v4400_v7 = vld [vmem:[%s5946_s1 + $0x10] sm:$0xff]   ;;  %vm765_vm3 = vcmask 261120   ;;  %s439_s30 = sand.u32 1, %s4504_s26   ;;  %vm3380_vm4 = vcmask 257024  }
  0x1a   : > { %709 = vperm.xlu1 %4397, %v600_v0   ;;  %699 = vperm.xlu0 %4396, %v598_v1   ;;  %s4647_s15 = scalar_select %p442_p10, %s4609_s29, 1  ;;  %v4399_v6 = vld [vmem:[%s5946_s1 + $0x8] sm:$0xff]   ;;  %v602_v9 = vld [vmem:[%s5948_s3 + $0x20] sm:$0xff]  ;;  %v4401_v11 = vld [vmem:[%s5946_s1 + $0x18] sm:$0xff]  }
  0x1b   : > { %3962 = vmatprep.subr.bf16.mxu0 %v4398_v3  ;;  %v603_v8 = vld [vmem:[%s5948_s3 + $0x28] sm:$0xff]  ;;  %v605_v12 = vld [vmem:[%s5948_s3 + $0x38] sm:$0xff]  ;;  %v604_v13 = vld [vmem:[%s5948_s3 + $0x30] sm:$0xff]  ;;  %s3540_s17 = sshll.u32 %s439_s30, 6  ;;  %s4515_s22 = smov [#allocation2]  }
  0x1c   : > { %3963 = vmatpush3.bf16.msra.mxu0 %v4398_v3  ;;  %s3819_s24 = sshll.u32 %s4647_s15, 5  ;;  %v3559_v14 = vld [vmem:[%s5948_s3 + $0x48] sm:$0xff]  ;;  %v3558_v15 = vld [vmem:[%s5948_s3 + $0x40] sm:$0xff]  ;;  %v3561_v18 = vld [vmem:[%s5948_s3 + $0x58] sm:$0xff]  ;;  %s5859_s15 = scalar_lea.vmem [#allocation2], %s3540_s17 }
  0x1d   : > { %3964 = vmatprep.subr.bf16.mxu0 %v4399_v6  ;;  %s4667_s16 = scalar_lea.vmem %s5945_s0, %s3819_s24  ;;  %v3560_v19 = vld [vmem:[%s5948_s3 + $0x50] sm:$0xff]  ;;  %v3563_v20 = vld [vmem:[%s5948_s3 + $0x68] sm:$0xff]  ;;  %v3562_v21 = vld [vmem:[%s5948_s3 + $0x60] sm:$0xff]  ;;  %s5847_s27 = scalar_lea.vmem %s5957_s12, %s3819_s24 }
  0x1e   : > { %714 = vperm.xlu1 %4397, %v601_v4   ;;  %704 = vperm.xlu0 %4396, %v599_v5   ;;  %v4402_v10 = vld [vmem:[%s4667_s16] sm:$0xff]   ;;  %v4403_v16 = vld [vmem:[%s4667_s16 + $0x8] sm:$0xff]   ;;  %v4404_v17 = vld [vmem:[%s4667_s16 + $0x10] sm:$0xff]   ;;  %s3829_s24 = sshll.u32 %s4609_s29, 10  ;;  %s3449_s23 = sshll.u32 %s5859_s15, 4  ;;  %s5892_s23 = int_to_ptr.vmem [resolvable:$true] %s3449_s23 }
  0x1f   : > { %3970 = vmatprep.mubr.msk.bf16.mxu0 %vm520_vm0, %v4402_v10  ;;  %v4405_v22 = vld [vmem:[%s4667_s16 + $0x18] sm:$0xff]   ;;  %v3564_v24 = vld [vmem:[%s5948_s3 + $0x70] sm:$0xff]  ;;  %v3567_v25 = vld [vmem:[%s5948_s3 + $0x88] sm:$0xff]  ;;  %s5890_s21 = scalar_lea.hbm %s5958_s13, %s3829_s24  ;;  %s5904_s17 = scalar_lea.sflag [#allocation3], %s439_s30 }
  0x20   : > { %3965 = vmatpush3.bf16.msra.mxu0 %v4399_v6  ;;  %v3565_v23 = vld [vmem:[%s5948_s3 + $0x78] sm:$0xff]  ;;  %v3566_v26 = vld [vmem:[%s5948_s3 + $0x80] sm:$0xff]  ;;  %v3568_v28 = vld [vmem:[%s5948_s3 + $0x90] sm:$0xff]  ;;  %s4450_s16 = scalar_lea.vmem %s5892_s23, 1024  ;;  %s4454_s14 = sshll.u32 %s4515_s22, 4  ;;  %s4455_s14 = int_to_ptr.vmem [resolvable:$false] %s4454_s14 }
  0x21   : > { %3966 = vmatprep.subr.bf16.mxu0 %v4400_v7  ;;  %v3569_v27 = vld [vmem:[%s5948_s3 + $0x98] sm:$0xff]  ;;  %v3571_v29 = vld [vmem:[%s5948_s3 + $0xa8] sm:$0xff]  ;;  %v3570_v30 = vld [vmem:[%s5948_s3 + $0xa0] sm:$0xff]  ;;  %p4451_p11 = scmp.ne.s32.totalorder %s5892_s23, %s4450_s16  ;;  %s4456_s19 = scalar_lea.vmem %s4455_s14, 2048 }
  0x22   : > { %724 = vperm.xlu1 %4397, %v603_v8   ;;  %719 = vperm.xlu0 %4396, %v602_v9   ;;  %v3573_v31 = vld [vmem:[%s5948_s3 + $0xb8] sm:$0xff]  ;;  %v3572_v32 = vld [vmem:[%s5948_s3 + $0xb0] sm:$0xff]  ;;  %v3575_v33 = vld [vmem:[%s5948_s3 + $0xc8] sm:$0xff]  ;;  %p4457_p0 = scmp.lt.s32.totalorder %s5892_s23, %s4455_s14  ;;  %p4458_p1 = scmp.lt.s32.totalorder %s4456_s19, %s4450_s16 }
  0x23   : > { %v3574_v34 = vld [vmem:[%s5948_s3 + $0xc0] sm:$0xff]  ;;  %v3577_v35 = vld [vmem:[%s5948_s3 + $0xd8] sm:$0xff]  ;;  %v3576_v36 = vld [vmem:[%s5948_s3 + $0xd0] sm:$0xff]  ;;  %p4452_p12 = pnand %p4451_p11, %p4626_p5 }
  0x24   : > { %3967 = vmatpush3.bf16.msra.mxu0 %v4400_v7  ;;  %v3579_v37 = vld [vmem:[%s5948_s3 + $0xe8] sm:$0xff]  ;;  %v3578_v38 = vld [vmem:[%s5948_s3 + $0xe0] sm:$0xff]  ;;  %v3581_v39 = vld [vmem:[%s5948_s3 + $0xf8] sm:$0xff]  ;;  %p4459_p2 = por %p4458_p1, %p4457_p0 }
  0x25   : > { %3968 = vmatprep.subr.bf16.mxu0 %v4401_v11  ;;  %v3580_v40 = vld [vmem:[%s5948_s3 + $0xf0] sm:$0xff]  ;;  %v3583_v41 = vld [vmem:[%s5948_s3 + $0x148] sm:$0xff]  ;;  %v3582_v42 = vld [vmem:[%s5948_s3 + $0x140] sm:$0xff]  ;;  %p4453_p13 = pneg %p4452_p12 }
  0x26   : > { %734 = vperm.xlu1 %4397, %v605_v12   ;;  %729 = vperm.xlu0 %4396, %v604_v13   ;;  %v3585_v43 = vld [vmem:[%s5948_s3 + $0x158] sm:$0xff]  ;;  %v3584_v44 = vld [vmem:[%s5948_s3 + $0x150] sm:$0xff]  ;;  %v3587_v45 = vld [vmem:[%s5948_s3 + $0x168] sm:$0xff] }
  0x27   : > { %v3586_v46 = vld [vmem:[%s5948_s3 + $0x160] sm:$0xff]  ;;  %v3589_v47 = vld [vmem:[%s5948_s3 + $0x178] sm:$0xff]  ;;  %v3588_v48 = vld [vmem:[%s5948_s3 + $0x170] sm:$0xff]  ;;  %p4460_p3 = pnand %p4459_p2, %p4453_p13 }
  0x28   : > { %3969 = vmatpush3.bf16.msra.mxu0 %v4401_v11  ;;  %v3591_v49 = vld [vmem:[%s5948_s3 + $0x188] sm:$0xff]  ;;  %v3590_v50 = vld [vmem:[%s5948_s3 + $0x180] sm:$0xff]  ;;  %v3593_v51 = vld [vmem:[%s5948_s3 + $0x198] sm:$0xff] }
  0x29   : > { %v3592_v52 = vld [vmem:[%s5948_s3 + $0x190] sm:$0xff]  ;;  %v3595_v53 = vld [vmem:[%s5948_s3 + $0x1a8] sm:$0xff]  ;;  %v3594_v54 = vld [vmem:[%s5948_s3 + $0x1a0] sm:$0xff] }
  0x2a   : > { %939 = vperm.xlu1 %4397, %v3559_v14   ;;  %934 = vperm.xlu0 %4396, %v3558_v15   ;;  %v3597_v55 = vld [vmem:[%s5948_s3 + $0x1b8] sm:$0xff]  ;;  %v3596_v56 = vld [vmem:[%s5948_s3 + $0x1b0] sm:$0xff]  ;;  %v3599_v57 = vld [vmem:[%s5948_s3 + $0x1c8] sm:$0xff] }
  0x2b   : > { %3971 = vmatmul.mubr.msk.bf16.vlgmr.msra.gmra.mrb[0].mxu0 %vm520_vm0, %v4403_v16  ;;  %v3598_v58 = vld [vmem:[%s5948_s3 + $0x1c0] sm:$0xff]  ;;  %v3601_v59 = vld [vmem:[%s5948_s3 + $0x1d8] sm:$0xff]  ;;  %v3600_v60 = vld [vmem:[%s5948_s3 + $0x1d0] sm:$0xff] }
  0x2c   : > { %3974 = vmatprep.mubr.msk.bf16.mxu0 %vm520_vm0, %v4404_v17  ;;  %v3603_v61 = vld [vmem:[%s5948_s3 + $0x1e8] sm:$0xff]  ;;  %v3602_v62 = vld [vmem:[%s5948_s3 + $0x1e0] sm:$0xff]  ;;  %v3605_v63 = vld [vmem:[%s5948_s3 + $0x1f8] sm:$0xff] }
  0x2d   : > { %v3604_v0 = vld [vmem:[%s5948_s3 + $0x1f0] sm:$0xff]  ;;  %v3607_v1 = vld [vmem:[%s5948_s3 + $0x208] sm:$0xff]  ;;  %v3606_v2 = vld [vmem:[%s5948_s3 + $0x200] sm:$0xff] }
  0x2e   : > { %949 = vperm.xlu1 %4397, %v3561_v18   ;;  %944 = vperm.xlu0 %4396, %v3560_v19   ;;  %v4406_v3 = vld [vmem:[%s5951_s6] sm:$0xff]   ;;  %v3609_v4 = vld [vmem:[%s5948_s3 + $0x218] sm:$0xff]  ;;  %v3608_v5 = vld [vmem:[%s5948_s3 + $0x210] sm:$0xff] }
  0x2f   : > { %3978 = vmatprep.subr.bf16.mxu1 %v4406_v3  ;;  %v4407_v6 = vld [vmem:[%s5951_s6 + $0x8] sm:$0xff]   ;;  %v3610_v8 = vld [vmem:[%s5948_s3 + $0x220] sm:$0xff]  ;;  %v3613_v9 = vld [vmem:[%s5948_s3 + $0x238] sm:$0xff] }
  0x30   : > { %3979 = vmatpush3.bf16.msra.mxu1 %v4406_v3  ;;  %v3611_v7 = vld [vmem:[%s5948_s3 + $0x228] sm:$0xff]  ;;  %v3612_v10 = vld [vmem:[%s5948_s3 + $0x230] sm:$0xff]  ;;  %v4869_v11 = vld [vmem:[%s5951_s6 + $0x40] sm:$0xff]  }
  0x31   : > { %3980 = vmatprep.subr.bf16.mxu1 %v4407_v6  ;;  %v3545_v3 = vld [vmem:[%s5947_s2] ss:$0 sm:$0xff] }
  0x32   : > { %959 = vperm.xlu1 %4397, %v3563_v20   ;;  %954 = vperm.xlu0 %4396, %v3562_v21  }
  0x33   : > { %3975 = vmatmul.mubr.msk.bf16.gmra.mrb[4].mxu0 %vm520_vm0, %v4405_v22 }
  0x34   : > { %3981 = vmatpush3.bf16.msra.mxu1 %v4407_v6 }
  0x35   : > { %3990 = vmatprep.subr.bf16.mxu1 %v4869_v11 }
  0x36   : > { %969 = vperm.xlu1 %4397, %v3565_v23   ;;  %964 = vperm.xlu0 %4396, %v3564_v24  }
  0x3a   : > { %1110 = vperm.xlu1 %4397, %v3567_v25   ;;  %1105 = vperm.xlu0 %4396, %v3566_v26  }
  0x3e   : > { %1120 = vperm.xlu1 %4397, %v3569_v27   ;;  %1115 = vperm.xlu0 %4396, %v3568_v28  }
  0x42   : > { %1130 = vperm.xlu1 %4397, %v3571_v29   ;;  %1125 = vperm.xlu0 %4396, %v3570_v30  }
  0x46   : > { %1140 = vperm.xlu1 %4397, %v3573_v31   ;;  %1135 = vperm.xlu0 %4396, %v3572_v32  }
  0x4a   : > { %1264 = vperm.xlu1 %4397, %v3575_v33   ;;  %1259 = vperm.xlu0 %4396, %v3574_v34  }
  0x4e   : > { %1274 = vperm.xlu1 %4397, %v3577_v35   ;;  %1269 = vperm.xlu0 %4396, %v3576_v36  }
  0x52   : > { %1284 = vperm.xlu1 %4397, %v3579_v37   ;;  %1279 = vperm.xlu0 %4396, %v3578_v38  }
  0x56   : > { %1294 = vperm.xlu1 %4397, %v3581_v39   ;;  %1289 = vperm.xlu0 %4396, %v3580_v40  }
  0x5a   : > { %1418 = vperm.xlu1 %4397, %v3583_v41   ;;  %1413 = vperm.xlu0 %4396, %v3582_v42  }
  0x5e   : > { %1428 = vperm.xlu1 %4397, %v3585_v43   ;;  %1423 = vperm.xlu0 %4396, %v3584_v44  }
  0x62   : > { %1438 = vperm.xlu1 %4397, %v3587_v45   ;;  %1433 = vperm.xlu0 %4396, %v3586_v46  }
  0x66   : > { %1448 = vperm.xlu1 %4397, %v3589_v47   ;;  %1443 = vperm.xlu0 %4396, %v3588_v48  }
  0x6a   : > { %1572 = vperm.xlu1 %4397, %v3591_v49   ;;  %1567 = vperm.xlu0 %4396, %v3590_v50  }
  0x6e   : > { %1582 = vperm.xlu1 %4397, %v3593_v51   ;;  %1577 = vperm.xlu0 %4396, %v3592_v52  }
  0x72   : > { %1592 = vperm.xlu1 %4397, %v3595_v53   ;;  %1587 = vperm.xlu0 %4396, %v3594_v54  }
  0x76   : > { %1602 = vperm.xlu1 %4397, %v3597_v55   ;;  %1597 = vperm.xlu0 %4396, %v3596_v56  }
  0x7a   : > { %1726 = vperm.xlu1 %4397, %v3599_v57   ;;  %1721 = vperm.xlu0 %4396, %v3598_v58  }
  0x7e   : > { %1736 = vperm.xlu1 %4397, %v3601_v59   ;;  %1731 = vperm.xlu0 %4396, %v3600_v60  }
  0x82   : > { %1746 = vperm.xlu1 %4397, %v3603_v61   ;;  %1741 = vperm.xlu0 %4396, %v3602_v62  }
  0x86   : > { %1756 = vperm.xlu1 %4397, %v3605_v63   ;;  %1751 = vperm.xlu0 %4396, %v3604_v0  }
  0x8a   : > { %1880 = vperm.xlu1 %4397, %v3607_v1   ;;  %1875 = vperm.xlu0 %4396, %v3606_v2   ;;  %v686_v1 = vlaneseq }
  0x8e   : > { %1890 = vperm.xlu1 %4397, %v3609_v4   ;;  %1885 = vperm.xlu0 %4396, %v3608_v5  }
  0x92   : > { %1900 = vperm.xlu1 %4397, %v3611_v7   ;;  %1895 = vperm.xlu0 %4396, %v3610_v8  }
  0x96   : > { %1910 = vperm.xlu1 %4397, %v3613_v9   ;;  %1905 = vperm.xlu0 %4396, %v3612_v10   ;;  %v4985_v9 = vshrl.u32 %v686_v1, 7 }
  0x98   : > { %vm1094_vm1 = vcmp.lt.s32.totalorder %v4985_v9, 7  ;;  %vm688_vm2 = vcmp.lt.s32.totalorder %v4985_v9, 1  ;;  %v4433_v9 = vld [vmem:[%s5954_s9 + $0x18] sm:$0xff]  }
  0x99   : > { %v4872_v12 = vpop.permute.xlu1 %709  ;;  %v4874_v13 = vpop.permute.xlu0 %699 }
  0x9a   : > { %6037 = vst [vmem:[#allocation9_spill] sm:$0xff] %v4872_v12  ;;  %6038 = vst [vmem:[#allocation10_spill] sm:$0xff] %v4874_v13 }
  0x9d   : > { %v4876_v14 = vpop.permute.xlu1 %714  ;;  %v4878_v15 = vpop.permute.xlu0 %704 }
  0x9e   : > { %6039 = vst [vmem:[#allocation11_spill] sm:$0xff] %v4876_v14  ;;  %6040 = vst [vmem:[#allocation12_spill] sm:$0xff] %v4878_v15 }
  0xa1   : > { %v4880_v16 = vpop.permute.xlu1 %724  ;;  %v4882_v17 = vpop.permute.xlu0 %719 }
  0xa2   : > { %6041 = vst [vmem:[#allocation13_spill] sm:$0xff] %v4880_v16  ;;  %6042 = vst [vmem:[#allocation14_spill] sm:$0xff] %v4882_v17 }
  0xa5   : > { %v4884_v18 = vpop.permute.xlu1 %734  ;;  %v4886_v19 = vpop.permute.xlu0 %729 }
  0xa9   : > { %v4888_v20 = vpop.permute.xlu1 %939  ;;  %v4890_v21 = vpop.permute.xlu0 %934 }
  0xaa   : > { %6043 = vst [vmem:[#allocation15_spill] sm:$0xff] %v4888_v20  ;;  %6044 = vst [vmem:[#allocation16_spill] sm:$0xff] %v4890_v21 }
  0xad   : > { %v4892_v22 = vpop.permute.xlu1 %949  ;;  %v4894_v23 = vpop.permute.xlu0 %944 }
  0xae   : > { %6045 = vst [vmem:[#allocation17_spill] sm:$0xff] %v4892_v22 }
  0xb1   : > { %v4896_v24 = vpop.permute.xlu1 %959  ;;  %v4898_v25 = vpop.permute.xlu0 %954 }
  0xb2   : > { %6046 = vst [vmem:[#allocation18_spill] sm:$0xff] %v4896_v24  ;;  %6047 = vst [vmem:[#allocation19_spill] sm:$0xff] %v4898_v25 }
  0xb5   : > { %v4900_v26 = vpop.permute.xlu1 %969  ;;  %v4902_v27 = vpop.permute.xlu0 %964 }
  0xb6   : > { %6048 = vst [vmem:[#allocation20_spill] sm:$0xff] %v4900_v26  ;;  %6049 = vst [vmem:[#allocation21_spill] sm:$0xff] %v4902_v27 }
  0xb9   : > { %v4904_v28 = vpop.permute.xlu1 %1110  ;;  %v4906_v29 = vpop.permute.xlu0 %1105 }
  0xba   : > { %6050 = vst [vmem:[#allocation22_spill] sm:$0xff] %v4904_v28  ;;  %6051 = vst [vmem:[#allocation23_spill] sm:$0xff] %v4906_v29 }
  0xbd   : > { %v4908_v30 = vpop.permute.xlu1 %1120  ;;  %v4910_v31 = vpop.permute.xlu0 %1115 }
  0xbe   : > { %6052 = vst [vmem:[#allocation24_spill] sm:$0xff] %v4908_v30  ;;  %6053 = vst [vmem:[#allocation25_spill] sm:$0xff] %v4910_v31 }
  0xc1   : > { %v4912_v32 = vpop.permute.xlu1 %1130  ;;  %v4914_v33 = vpop.permute.xlu0 %1125 }
  0xc2   : > { %6054 = vst [vmem:[#allocation26_spill] sm:$0xff] %v4912_v32  ;;  %6055 = vst [vmem:[#allocation27_spill] sm:$0xff] %v4914_v33 }
  0xc5   : > { %v4916_v34 = vpop.permute.xlu1 %1140  ;;  %v4918_v35 = vpop.permute.xlu0 %1135 }
  0xc6   : > { %6056 = vst [vmem:[#allocation28_spill] sm:$0xff] %v4916_v34  ;;  %6057 = vst [vmem:[#allocation29_spill] sm:$0xff] %v4918_v35 }
  0xc9   : > { %v4920_v36 = vpop.permute.xlu1 %1264  ;;  %v4922_v37 = vpop.permute.xlu0 %1259 }
  0xca   : > { %6058 = vst [vmem:[#allocation30_spill] sm:$0xff] %v4920_v36  ;;  %6059 = vst [vmem:[#allocation31_spill] sm:$0xff] %v4922_v37 }
  0xcd   : > { %v4924_v38 = vpop.permute.xlu1 %1274  ;;  %v4926_v39 = vpop.permute.xlu0 %1269 }
  0xce   : > { %6060 = vst [vmem:[#allocation32_spill] sm:$0xff] %v4924_v38  ;;  %6061 = vst [vmem:[#allocation33_spill] sm:$0xff] %v4926_v39 }
  0xd1   : > { %v4928_v40 = vpop.permute.xlu1 %1284  ;;  %v4930_v41 = vpop.permute.xlu0 %1279 }
  0xd2   : > { %6062 = vst [vmem:[#allocation34_spill] sm:$0xff] %v4928_v40  ;;  %6063 = vst [vmem:[#allocation35_spill] sm:$0xff] %v4930_v41 }
  0xd5   : > { %v4932_v42 = vpop.permute.xlu1 %1294  ;;  %v4934_v43 = vpop.permute.xlu0 %1289 }
  0xd9   : > { %v4936_v44 = vpop.permute.xlu1 %1418  ;;  %v4938_v45 = vpop.permute.xlu0 %1413 }
  0xda   : > { %6064 = vst [vmem:[#allocation36_spill] sm:$0xff] %v4936_v44  ;;  %6065 = vst [vmem:[#allocation37_spill] sm:$0xff] %v4938_v45 }
  0xdd   : > { %v4940_v46 = vpop.permute.xlu1 %1428  ;;  %v4942_v47 = vpop.permute.xlu0 %1423 }
  0xde   : > { %6066 = vst [vmem:[#allocation38_spill] sm:$0xff] %v4940_v46  ;;  %6067 = vst [vmem:[#allocation39_spill] sm:$0xff] %v4942_v47 }
  0xe1   : > { %v4944_v48 = vpop.permute.xlu1 %1438  ;;  %v4946_v49 = vpop.permute.xlu0 %1433 }
  0xe2   : > { %6068 = vst [vmem:[#allocation40_spill] sm:$0xff] %v4944_v48  ;;  %6069 = vst [vmem:[#allocation41_spill] sm:$0xff] %v4946_v49 }
  0xe5   : > { %v4948_v50 = vpop.permute.xlu1 %1448  ;;  %v4950_v51 = vpop.permute.xlu0 %1443 }
  0xe6   : > { %6070 = vst [vmem:[#allocation42_spill] sm:$0xff] %v4948_v50  ;;  %6071 = vst [vmem:[#allocation43_spill] sm:$0xff] %v4950_v51 }
  0xe9   : > { %v4952_v52 = vpop.permute.xlu1 %1572  ;;  %v4954_v53 = vpop.permute.xlu0 %1567 }
  0xed   : > { %v4956_v54 = vpop.permute.xlu1 %1582  ;;  %v4958_v55 = vpop.permute.xlu0 %1577 }
  0xee   : > { %6072 = vst [vmem:[#allocation44_spill] sm:$0xff] %v4956_v54  ;;  %6073 = vst [vmem:[#allocation45_spill] sm:$0xff] %v4958_v55 }
  0xf1   : > { %v4960_v56 = vpop.permute.xlu1 %1592  ;;  %v4962_v57 = vpop.permute.xlu0 %1587 }
  0xf5   : > { %v4964_v58 = vpop.permute.xlu1 %1602  ;;  %v4966_v59 = vpop.permute.xlu0 %1597 }
  0xf6   : > { %6074 = vst [vmem:[#allocation46_spill] sm:$0xff] %v4964_v58  ;;  %6075 = vst [vmem:[#allocation47_spill] sm:$0xff] %v4966_v59 }
  0xf9   : > { %v4968_v60 = vpop.permute.xlu1 %1726  ;;  %v4970_v61 = vpop.permute.xlu0 %1721 }
  0xfa   : > { %6076 = vst [vmem:[#allocation48_spill] sm:$0xff] %v4968_v60  ;;  %6077 = vst [vmem:[#allocation49_spill] sm:$0xff] %v4970_v61 }
  0xfd   : > { %v4972_v62 = vpop.permute.xlu1 %1736  ;;  %v4974_v63 = vpop.permute.xlu0 %1731 }
  0xfe   : > { %6078 = vst [vmem:[#allocation50_spill] sm:$0xff] %v4972_v62  ;;  %6079 = vst [vmem:[#allocation51_spill] sm:$0xff] %v4974_v63  ;;  %v3972_v0 = vpop.f32.mrb[0].mxu0 }
  0xff   : > { %v567_v2 = vpop.f32.mrb[1].mxu0  ;;  %v4987_v10 = vadd.f32 %v3972_v0, %v3545_v3 }
 0x100   : > { %v3973_v4 = vpop.f32.mrb[2].mxu0  ;;  %v4997_v50 = vadd.f32 %v3545_v3, %v567_v2 }
 0x101   : > { %v4979_v5 = vadd.f32 %v3973_v4, %v3545_v3  ;;  %v4981_v6 = vpop.permute.xlu1 %1746  ;;  %v4983_v7 = vpop.permute.xlu0 %1741  ;;  %v1088_v1 = vrot.slane %v4987_v10, 1  ;;  %v680_v45 = vrot.slane %v4987_v10, 7 }
 0x102   : > { %6080 = vst [vmem:[#allocation52_spill] sm:$0xff] %v4981_v6  ;;  %6081 = vst [vmem:[#allocation53_spill] sm:$0xff] %v4983_v7  ;;  %v570_v8 = vpop.f32.mrb[3].mxu0  ;;  %v678_v46 = vrot.slane %v4997_v50, 7 }
 0x103   : > { %v4989_v63 = vadd.f32 %v3545_v3, %v570_v8  ;;  %v1089_v61 = vrot.slane %v4979_v5, 1  ;;  %v681_v41 = vrot.slane %v4979_v5, 7 }
 0x105   : > { %v4991_v62 = vpop.permute.xlu1 %1756  ;;  %v4993_v60 = vpop.permute.xlu0 %1751  ;;  %v5012_v2 = vsel %vm1094_vm1, %v1088_v1, %v1089_v61  ;;  %v6086_v48 = vrot.slane %v4989_v63, 1 }
 0x106   : > { %6082 = vst [vmem:[#allocation54_spill] sm:$0xff] %v4991_v62  ;;  %6083 = vst [vmem:[#allocation55_spill] sm:$0xff] %v4993_v60  ;;  %v3976_v6 = vpop.f32.mrb[4].mxu0  ;;  %v679_v62 = vrot.slane %v4989_v63, 7 }
 0x107   : > { %v583_v7 = vpop.f32.mrb[5].mxu0  ;;  %v5001_v0 = vadd.f32 %v3976_v6, %v3545_v3  ;;  %v5020_v6 = vsel %vm1094_vm1, %v6086_v48, %v1088_v1 }
 0x108   : > { %v5003_v8 = vadd.f32 %v3545_v3, %v583_v7  ;;  %v3977_v51 = vpop.f32.mrb[6].mxu0 }
 0x109   : > { %v5006_v60 = vadd.f32 %v3977_v51, %v3545_v3  ;;  %v5008_v47 = vpop.permute.xlu1 %1880  ;;  %v5014_v4 = vpop.permute.xlu0 %1875  ;;  %v684_v40 = vrot.slane %v5001_v0, 7 }
 0x10a   : > { %6084 = vst [vmem:[#allocation56_spill] sm:$0xff] %v5008_v47  ;;  %6085 = vst [vmem:[#allocation57_spill] sm:$0xff] %v5014_v4  ;;  %v5025_v51 = vmul.f32 %v5008_v47, %v5012_v2  ;;  %v5029_v7 = vmul.f32 %v5014_v4, %v5020_v6  ;;  %v586_v49 = vpop.f32.mrb[7].mxu0  ;;  %v1090_v48 = vrot.slane %v5003_v8, 1  ;;  %v5043_v4 = vsel %vm688_vm2, %v679_v62, %v680_v45 }
 0x10b   : > { %v5033_v44 = vadd.f32 %v3545_v3, %v586_v49  ;;  %v685_v1 = vrot.slane %v5006_v60, 7  ;;  %v1093_v36 = vrot.slane %v5006_v60, 1  ;;  %v5057_v47 = vsel %vm688_vm2, %v678_v46, %v679_v62 }
 0x10c   : > { %6087 = vst [vmem:[#allocation58_spill] sm:$0xff] %v5025_v51  ;;  %6088 = vst [vmem:[#allocation59_spill] sm:$0xff] %v5029_v7  ;;  %v5052_v39 = vsel %vm1094_vm1, %v1089_v61, %v1090_v48  ;;  %v1092_v61 = vrot.slane %v5001_v0, 1  ;;  %v5076_v62 = vsel %vm688_vm2, %v680_v45, %v681_v41  ;;  %v739_v34 = vmul.f32 %v4872_v12, %v5057_v47 }
 0x10d   : > { %v5045_v38 = vpop.permute.xlu1 %1890  ;;  %v1091_v49 = vrot.slane %v5033_v44, 1  ;;  %v5048_v3 = vpop.permute.xlu0 %1885  ;;  %6091 = vst [vmem:[#allocation62_spill] sm:$0xff] %v5052_v39  ;;  %v689_v51 = vsel %vm688_vm2, %v684_v40, %v685_v1  ;;  %v5072_v35 = vsel %vm688_vm2, %v685_v1, %v678_v46  ;;  %v682_v33 = vrot.slane %v5003_v8, 7 }
 0x10e   : > { %6089 = vst [vmem:[#allocation60_spill] sm:$0xff] %v5045_v38  ;;  %6090 = vst [vmem:[#allocation61_spill] sm:$0xff] %v5048_v3  ;;  %v5061_v7 = vmul.f32 %v5048_v3, %v5052_v39  ;;  %v5091_v46 = vsel %vm1094_vm1, %v1092_v61, %v1093_v36  ;;  %v738_v12 = vmul.f32 %v4878_v15, %v5072_v35 }
 0x10f   : > { %v5067_v37 = vsel %vm1094_vm1, %v1090_v48, %v1091_v49  ;;  %v740_v48 = vmul.f32 %v4876_v14, %v5043_v4  ;;  %v5097_v1 = vsel %vm1094_vm1, %v1091_v49, %v1092_v61  ;;  %v1086_v49 = vrot.slane %v4997_v50, 1 }
 0x110   : > { %6092 = vst [vmem:[#allocation63_spill] sm:$0xff] %v5067_v37  ;;  %v5080_v3 = vmul.f32 %v5045_v38, %v5067_v37  ;;  %v737_v38 = vmul.f32 %v4874_v13, %v689_v51  ;;  %v5117_v15 = vsel %vm688_vm2, %v681_v41, %v682_v33  ;;  %v741_v14 = vmul.f32 %v4882_v17, %v5076_v62 }
 0x111   : > { %v5087_v39 = vpop.permute.xlu1 %1900  ;;  %v5093_v45 = vpop.permute.xlu0 %1895  ;;  %v746_v13 = vpack.c.bf16 %v740_v48, %v739_v34  ;;  %v5133_v34 = vmul.f32 %v4956_v54, %v5117_v15  ;;  %v6096_v48 = vrot.slane %v4989_v63, 1  ;;  %v5155_v54 = vsel %vm1094_vm1, %v1093_v36, %v1086_v49 }
 0x112   : > { %6093 = vst [vmem:[#allocation64_spill] sm:$0xff] %v5087_v39  ;;  %6094 = vst [vmem:[#allocation65_spill] sm:$0xff] %v5093_v45  ;;  %v5106_v32 = vmul.f32 %v5087_v39, %v5091_v46  ;;  %v5110_v37 = vmul.f32 %v5093_v45, %v5097_v1  ;;  %v745_v31 = vpack.c.bf16 %v738_v12, %v737_v38  ;;  %v4409_v39 = vld [vmem:[%s5951_s6 + $0x48] sm:$0xff]  }
 0x113   : > { %v742_v12 = vmul.f32 %v4880_v16, %v5117_v15  ;;  %v5129_v38 = vmul.f32 %v4958_v55, %v5076_v62  ;;  %v5141_v61 = vsel %vm1094_vm1, %v1086_v49, %v6096_v48  ;;  %v683_v48 = vrot.slane %v5033_v44, 7 }
 0x114   : > { %3982 = vmatprep.mubr.msk.bf16.mxu1 %vm765_vm3, %v745_v31  ;;  %v5178_v16 = vmul.f32 %v4932_v42, %v689_v51 }
 0x115   : > { %v5135_v41 = vpop.permute.xlu1 %1910  ;;  %v5143_v31 = vpop.permute.xlu0 %1905  ;;  %3983 = vmatmul.mubr.msk.bf16.vlgmr.msra.gmra.mrb[0].mxu1 %vm765_vm3, %v746_v13  ;;  %v747_v17 = vpack.c.bf16 %v742_v12, %v741_v14  ;;  %v4410_v13 = vld [vmem:[%s5951_s6 + $0x10] sm:$0xff]   ;;  %v5170_v14 = vsel %vm688_vm2, %v682_v33, %v683_v48  ;;  %v5185_v33 = vmul.f32 %v4964_v58, %v5072_v35  ;;  %v670_v58 = vpack.c.bf16 %v4979_v5, %v4987_v10 }
 0x116   : > { %6095 = vst [vmem:[#allocation66_spill] sm:$0xff] %v5135_v41  ;;  %6097 = vst [vmem:[#allocation67_spill] sm:$0xff] %v5143_v31  ;;  %v5148_v45 = vmul.f32 %v5135_v41, %v5141_v61  ;;  %3991 = vmatpush3.bf16.msra.mxu1 %v4869_v11  ;;  %v5160_v55 = vmul.f32 %v5143_v31, %v5155_v54  ;;  %v690_v11 = vsel %vm688_vm2, %v683_v48, %v684_v40  ;;  %v4412_v41 = vld [vmem:[%s5951_s6 + $0x20] sm:$0xff]  }
 0x117   : > { %3992 = vmatprep.subr.bf16.mxu1 %v4409_v39  ;;  %3986 = vmatprep.mubr.msk.bf16.mxu1 %vm765_vm3, %v747_v17  ;;  %v743_v49 = vmul.f32 %v4886_v19, %v5170_v14  ;;  %v744_v12 = vmul.f32 %v4884_v18, %v690_v11  ;;  %v5181_v17 = vmul.f32 %v4966_v59, %v689_v51 }
 0x118   : > { %v669_v48 = vpack.c.bf16 %v4989_v63, %v4997_v50  ;;  %v5191_v36 = vmul.f32 %v4934_v43, %v690_v11  ;;  %v5200_v51 = vmul.f32 %v4952_v52, %v5043_v4  ;;  %v671_v59 = vpack.c.bf16 %v5033_v44, %v5003_v8 }
 0x119   : > { %v748_v40 = vpack.c.bf16 %v744_v12, %v743_v49  ;;  %v5204_v49 = vmul.f32 %v4962_v57, %v5170_v14  ;;  %v5207_v12 = vmul.f32 %v4960_v56, %v690_v11  ;;  %v4411_v11 = vld [vmem:[%s5951_s6 + $0x18] sm:$0xff]   ;;  %v972_v31 = vmul.f32 %v4890_v21, %v5006_v60 }
 0x11a   : > { %3993 = vmatpush3.bf16.msra.mxu1 %v4409_v39  ;;  %v5195_v39 = vmul.f32 %v4954_v53, %v5057_v47 }
 0x11b   : > { %4002 = vmatprep.subr.bf16.mxu1 %v4410_v13 }
 0x11d   : > { %3987 = vmatmul.mubr.msk.bf16.gmra.mrb[4].mxu1 %vm765_vm3, %v748_v40  ;;  %v672_v40 = vpack.c.bf16 %v5006_v60, %v5001_v0 }
 0x11e   : > { %3994 = vmatprep.mubr.msk.bf16.mxu1 %vm765_vm3, %v669_v48  ;;  %v973_v48 = vmul.f32 %v4888_v20, %v4997_v50  ;;  %v976_v20 = vmul.f32 %v4898_v25, %v4979_v5  ;;  %v6100_v25 = vld [vmem:[#allocation26_spill] sm:$0xff] }
 0x125   : > { %3995 = vmatmul.mubr.msk.bf16.vlgmr.msra.gmra.mrb[0].mxu1 %vm765_vm3, %v670_v58  ;;  %v980_v58 = vpack.c.bf16 %v973_v48, %v972_v31  ;;  %v4413_v31 = vld [vmem:[%s5951_s6 + $0x28] sm:$0xff]   ;;  %v978_v48 = vmul.f32 %v4902_v27, %v5033_v44  ;;  %v6099_v27 = vld [vmem:[#allocation63_spill] sm:$0xff] }
 0x126   : > { %4003 = vmatpush3.bf16.msra.mxu1 %v4410_v13  ;;  %3998 = vmatprep.mubr.msk.bf16.mxu1 %vm765_vm3, %v671_v59  ;;  %v974_v59 = vmul.f32 %v4894_v23, %v4989_v63  ;;  %v977_v13 = vmul.f32 %v4896_v24, %v5003_v8  ;;  %v6102_v24 = vld [vmem:[#allocation27_spill] sm:$0xff] }
 0x127   : > { %4004 = vmatprep.subr.bf16.mxu1 %v4411_v11 }
 0x12a   : > { %4005 = vmatpush3.bf16.msra.mxu1 %v4411_v11  ;;  %v975_v11 = vmul.f32 %v4892_v22, %v4987_v10  ;;  %v6101_v22 = vld [vmem:[#allocation62_spill] sm:$0xff] }
 0x12b   : > { %4014 = vmatprep.subr.bf16.mxu1 %v4412_v41 }
 0x12c   : > { %v981_v21 = vpack.c.bf16 %v975_v11, %v974_v59  ;;  %v1143_v59 = vmul.f32 %v4906_v29, %v5155_v54  ;;  %v979_v11 = vmul.f32 %v4900_v26, %v5001_v0  ;;  %v1148_v26 = vmul.f32 %v6100_v25, %v6099_v27 }
 0x12d   : > { %3999 = vmatmul.mubr.msk.bf16.gmra.mrb[4].mxu1 %vm765_vm3, %v672_v40  ;;  %v982_v40 = vpack.c.bf16 %v977_v13, %v976_v20  ;;  %v1144_v20 = vmul.f32 %v4904_v28, %v5141_v61  ;;  %v1146_v13 = vmul.f32 %v4908_v30, %v5012_v2  ;;  %v1147_v28 = vmul.f32 %v6102_v24, %v6101_v22  ;;  %v6109_v30 = vld [vmem:[#allocation34_spill] sm:$0xff] }
 0x12e   : > { %4006 = vmatprep.mubr.msk.bf16.mxu1 %vm765_vm3, %v980_v58  ;;  %v4414_v58 = vld [vmem:[%s5951_s6 + $0x30] sm:$0xff]  }
 0x135   : > { %4007 = vmatmul.mubr.msk.bf16.vlgmr.msra.gmra.mrb[0].mxu1 %vm765_vm3, %v981_v21  ;;  %v983_v21 = vpack.c.bf16 %v979_v11, %v978_v48  ;;  %v4415_v48 = vld [vmem:[%s5951_s6 + $0x38] sm:$0xff]  }
 0x136   : > { %4015 = vmatpush3.bf16.msra.mxu1 %v4412_v41  ;;  %4010 = vmatprep.mubr.msk.bf16.mxu1 %vm765_vm3, %v982_v40  ;;  %v1151_v41 = vpack.c.bf16 %v1144_v20, %v1143_v59  ;;  %v6098_v40 = vld [vmem:[#allocation25_spill] sm:$0xff]  ;;  %v1153_v59 = vpack.c.bf16 %v1148_v26, %v1147_v28  ;;  %v6103_v11 = vld [vmem:[#allocation28_spill] sm:$0xff]  ;;  %v6106_v26 = vld [vmem:[#allocation30_spill] sm:$0xff] }
 0x137   : > { %4016 = vmatprep.subr.bf16.mxu1 %v4413_v31  ;;  %v1145_v29 = vmul.f32 %v6098_v40, %v5020_v6  ;;  %v1150_v20 = vmul.f32 %v6103_v11, %v5091_v46  ;;  %v1298_v28 = vmul.f32 %v6106_v26, %v5057_v47 }
 0x13a   : > { %4017 = vmatpush3.bf16.msra.mxu1 %v4413_v31  ;;  %v1152_v31 = vpack.c.bf16 %v1146_v13, %v1145_v29  ;;  %v4416_v29 = vld [vmem:[%s5951_s6 + $0x50] sm:$0xff]  }
 0x13b   : > { %4026 = vmatprep.subr.bf16.mxu1 %v4414_v58  ;;  %v6105_v13 = vld [vmem:[#allocation31_spill] sm:$0xff] }
 0x13c   : > { %v1297_v24 = vmul.f32 %v6105_v13, %v5072_v35  ;;  %v1302_v35 = vmul.f32 %v6109_v30, %v5170_v14 }
 0x13d   : > { %4011 = vmatmul.mubr.msk.bf16.gmra.mrb[4].mxu1 %vm765_vm3, %v983_v21  ;;  %v6104_v21 = vld [vmem:[#allocation29_spill] sm:$0xff] }
 0x13e   : > { %4018 = vmatprep.mubr.msk.bf16.mxu1 %vm765_vm3, %v1151_v41  ;;  %v1149_v41 = vmul.f32 %v6104_v21, %v5097_v1  ;;  %v6108_v21 = vld [vmem:[#allocation32_spill] sm:$0xff] }
 0x13f   : > { %v1300_v25 = vmul.f32 %v6108_v21, %v5076_v62  ;;  %v6111_v62 = vld [vmem:[#allocation36_spill] sm:$0xff] }
 0x140   : > { %v1452_v14 = vmul.f32 %v6111_v62, %v5020_v6  ;;  %v6116_v6 = vld [vmem:[#allocation40_spill] sm:$0xff] }
 0x145   : > { %4019 = vmatmul.mubr.msk.bf16.vlgmr.msra.gmra.mrb[0].mxu1 %vm765_vm3, %v1152_v31  ;;  %v1305_v31 = vpack.c.bf16 %v1298_v28, %v1297_v24  ;;  %v4417_v24 = vld [vmem:[%s5951_s6 + $0x58] sm:$0xff]   ;;  %v6115_v28 = vld [vmem:[#allocation41_spill] sm:$0xff] }
 0x146   : > { %4027 = vmatpush3.bf16.msra.mxu1 %v4414_v58  ;;  %4022 = vmatprep.mubr.msk.bf16.mxu1 %vm765_vm3, %v1153_v59  ;;  %v1154_v58 = vpack.c.bf16 %v1150_v20, %v1149_v41  ;;  %v6107_v59 = vld [vmem:[#allocation33_spill] sm:$0xff]  ;;  %v6113_v41 = vpack.c.bf16 %v5178_v16, %v5191_v36  ;;  %v4419_v16 = vld [vmem:[%s5951_s6 + $0x68] sm:$0xff]  }
 0x147   : > { %4028 = vmatprep.subr.bf16.mxu1 %v4415_v48  ;;  %v1299_v11 = vmul.f32 %v6107_v59, %v5043_v4  ;;  %v4418_v4 = vld [vmem:[%s5951_s6 + $0x60] sm:$0xff]  }
 0x149   : > { %v1306_v47 = vpack.c.bf16 %v1300_v25, %v1299_v11 }
 0x14a   : > { %4029 = vmatpush3.bf16.msra.mxu1 %v4415_v48  ;;  %v6110_v48 = vld [vmem:[#allocation35_spill] sm:$0xff] }
 0x14b   : > { %4038 = vmatprep.subr.bf16.mxu1 %v4416_v29  ;;  %v1301_v13 = vmul.f32 %v6110_v48, %v5117_v15  ;;  %v6112_v15 = vld [vmem:[#allocation37_spill] sm:$0xff] }
 0x14c   : > { %v1451_v25 = vmul.f32 %v6112_v15, %v5141_v61  ;;  %v6117_v61 = vld [vmem:[#allocation39_spill] sm:$0xff] }
 0x14d   : > { %4023 = vmatmul.mubr.msk.bf16.gmra.mrb[4].mxu1 %vm765_vm3, %v1154_v58  ;;  %v1307_v20 = vpack.c.bf16 %v1302_v35, %v1301_v13  ;;  %v1455_v58 = vmul.f32 %v6115_v28, %v6099_v27  ;;  %v1453_v35 = vmul.f32 %v6117_v61, %v5012_v2  ;;  %v4420_v2 = vld [vmem:[%s5951_s6 + $0x70] sm:$0xff]  }
 0x14e   : > { %4030 = vmatprep.mubr.msk.bf16.mxu1 %vm765_vm3, %v1305_v31  ;;  %v1459_v11 = vpack.c.bf16 %v1452_v14, %v1451_v25  ;;  %v1456_v31 = vmul.f32 %v6116_v6, %v5097_v1  ;;  %v6122_v14 = vpack.c.bf16 %v5207_v12, %v5204_v49  ;;  %v6126_v49 = vld [vmem:[#allocation50_spill] sm:$0xff] }
 0x14f   : > { %v1762_v12 = vmul.f32 %v6126_v49, %v5003_v8  ;;  %v6161_v49 = vld [vmem:[#allocation66_spill] sm:$0xff] }
 0x150   : > { %v1461_v36 = vpack.c.bf16 %v1456_v31, %v1455_v58  ;;  %v6128_v31 = vld [vmem:[#allocation51_spill] sm:$0xff] }
 0x155   : > { %4031 = vmatmul.mubr.msk.bf16.vlgmr.msra.gmra.mrb[0].mxu1 %vm765_vm3, %v1306_v47 }
 0x156   : > { %4039 = vmatpush3.bf16.msra.mxu1 %v4416_v29  ;;  %4034 = vmatprep.mubr.msk.bf16.mxu1 %vm765_vm3, %v1307_v20  ;;  %v6114_v29 = vld [vmem:[#allocation38_spill] sm:$0xff] }
 0x157   : > { %4040 = vmatprep.subr.bf16.mxu1 %v4417_v24  ;;  %v1454_v13 = vmul.f32 %v6114_v29, %v6101_v22  ;;  %v6118_v22 = vld [vmem:[#allocation43_spill] sm:$0xff] }
 0x158   : > { %v1457_v27 = vmul.f32 %v6118_v22, %v5091_v46  ;;  %v4421_v46 = vld [vmem:[%s5951_s6 + $0x78] sm:$0xff]  }
 0x159   : > { %v1460_v47 = vpack.c.bf16 %v1454_v13, %v1453_v35  ;;  %v6127_v13 = vld [vmem:[#allocation53_spill] sm:$0xff]  ;;  %v1761_v35 = vmul.f32 %v6128_v31, %v4979_v5 }
 0x15a   : > { %4041 = vmatpush3.bf16.msra.mxu1 %v4417_v24  ;;  %v6119_v24 = vld [vmem:[#allocation42_spill] sm:$0xff]  ;;  %v1763_v58 = vmul.f32 %v6127_v13, %v5033_v44 }
 0x15b   : > { %4050 = vmatprep.subr.bf16.mxu1 %v4418_v4  ;;  %v1458_v1 = vmul.f32 %v6119_v24, %v5155_v54  ;;  %v6121_v54 = vpack.c.bf16 %v5133_v34, %v5129_v38 }
 0x15d   : > { %4035 = vmatmul.mubr.msk.bf16.gmra.mrb[4].mxu1 %vm765_vm3, %v6113_v41  ;;  %v1462_v20 = vpack.c.bf16 %v1458_v1, %v1457_v27  ;;  %v6125_v41 = vpack.c.bf16 %v5185_v33, %v5181_v17  ;;  %v4423_v17 = vld [vmem:[%s5951_s6 + $0x88] sm:$0xff]   ;;  %v6130_v27 = vld [vmem:[#allocation55_spill] sm:$0xff] }
 0x15e   : > { %4042 = vmatprep.mubr.msk.bf16.mxu1 %vm765_vm3, %v1459_v11  ;;  %v6124_v11 = vld [vmem:[#allocation48_spill] sm:$0xff]  ;;  %v1765_v1 = vmul.f32 %v6130_v27, %v5006_v60 }
 0x15f   : > { %v1760_v38 = vmul.f32 %v6124_v11, %v4987_v10 }
 0x165   : > { %4043 = vmatmul.mubr.msk.bf16.vlgmr.msra.gmra.mrb[0].mxu1 %vm765_vm3, %v1460_v47  ;;  %v6129_v47 = vld [vmem:[#allocation52_spill] sm:$0xff] }
 0x166   : > { %4051 = vmatpush3.bf16.msra.mxu1 %v4418_v4  ;;  %4046 = vmatprep.mubr.msk.bf16.mxu1 %vm765_vm3, %v1461_v36  ;;  %v6120_v4 = vpack.c.bf16 %v5200_v51, %v5195_v39  ;;  %v4422_v39 = vld [vmem:[%s5951_s6 + $0x80] sm:$0xff]   ;;  %v1768_v36 = vpack.c.bf16 %v1762_v12, %v1761_v35  ;;  %v4426_v12 = vld [vmem:[%s5953_s8 + $0x10] sm:$0xff]  }
 0x167   : > { %4052 = vmatprep.subr.bf16.mxu1 %v4419_v16  ;;  %v6123_v51 = vld [vmem:[#allocation49_spill] sm:$0xff] }
 0x168   : > { %v1759_v25 = vmul.f32 %v6123_v51, %v4989_v63 }
 0x16a   : > { %4053 = vmatpush3.bf16.msra.mxu1 %v4419_v16  ;;  %v1767_v34 = vpack.c.bf16 %v1760_v38, %v1759_v25  ;;  %v1764_v16 = vmul.f32 %v6129_v47, %v5001_v0  ;;  %v4425_v25 = vld [vmem:[%s5953_s8 + $0x8] sm:$0xff]   ;;  %v6135_v38 = vpack.c.bf16 %v5080_v3, %v5061_v7  ;;  %v4427_v7 = vld [vmem:[%s5953_s8 + $0x18] sm:$0xff]  }
 0x16b   : > { %4062 = vmatprep.subr.bf16.mxu1 %v4420_v2 }
 0x16c   : > { %v1769_v33 = vpack.c.bf16 %v1764_v16, %v1763_v58 }
 0x16d   : > { %4047 = vmatmul.mubr.msk.bf16.gmra.mrb[4].mxu1 %vm765_vm3, %v1462_v20  ;;  %v6131_v20 = vld [vmem:[#allocation54_spill] sm:$0xff] }
 0x16e   : > { %4054 = vmatprep.mubr.msk.bf16.mxu1 %vm765_vm3, %v6120_v4  ;;  %v1766_v4 = vmul.f32 %v6131_v20, %v4997_v50 }
 0x175   : > { %4055 = vmatmul.mubr.msk.bf16.vlgmr.msra.gmra.mrb[0].mxu1 %vm765_vm3, %v6121_v54  ;;  %v6132_v54 = vld [vmem:[#allocation58_spill] sm:$0xff] }
 0x176   : > { %4063 = vmatpush3.bf16.msra.mxu1 %v4420_v2  ;;  %4058 = vmatprep.mubr.msk.bf16.mxu1 %vm765_vm3, %v6122_v14  ;;  %v4424_v2 = vld [vmem:[%s5953_s8] sm:$0xff]   ;;  %v6133_v14 = vld [vmem:[#allocation59_spill] sm:$0xff] }
 0x177   : > { %4064 = vmatprep.subr.bf16.mxu1 %v4421_v46 }
 0x17a   : > { %4065 = vmatpush3.bf16.msra.mxu1 %v4421_v46  ;;  %v1770_v46 = vpack.c.bf16 %v1766_v4, %v1765_v1 }
 0x17b   : > { %4074 = vmatprep.subr.bf16.mxu1 %v4422_v39 }
 0x17d   : > { %4059 = vmatmul.mubr.msk.bf16.gmra.mrb[4].mxu1 %vm765_vm3, %v6125_v41  ;;  %v6137_v41 = vpack.c.bf16 %v5148_v45, %v5160_v55 }
 0x17e   : > { %4066 = vmatprep.mubr.msk.bf16.mxu1 %vm765_vm3, %v1767_v34  ;;  %v6136_v34 = vpack.c.bf16 %v5106_v32, %v5110_v37  ;;  %v3700_v32 = vld [vmem:[%s5952_s7] ss:$0 sm:$0xff] }
 0x185   : > { %4067 = vmatmul.mubr.msk.bf16.vlgmr.msra.gmra.mrb[0].mxu1 %vm765_vm3, %v1768_v36 }
 0x186   : > { %4075 = vmatpush3.bf16.msra.mxu1 %v4422_v39  ;;  %4070 = vmatprep.mubr.msk.bf16.mxu1 %vm765_vm3, %v1769_v33  ;;  %v6134_v39 = vpack.c.bf16 %v6132_v54, %v6133_v14 }
 0x187   : > { %4076 = vmatprep.subr.bf16.mxu1 %v4423_v17 }
 0x18a   : > { %4077 = vmatpush3.bf16.msra.mxu1 %v4423_v17 }
 0x18b   : > { %4086 = vmatprep.subr.bf16.mxu1 %v4424_v2 }
 0x18d   : > { %4071 = vmatmul.mubr.msk.bf16.gmra.mrb[4].mxu1 %vm765_vm3, %v1770_v46 }
 0x18e   : > { %4078 = vmatprep.mubr.msk.bf16.mxu1 %vm765_vm3, %v6134_v39 }
 0x195   : > { %4079 = vmatmul.mubr.msk.bf16.vlgmr.msra.gmra.mrb[0].mxu1 %vm765_vm3, %v6135_v38 }
 0x196   : > { %4082 = vmatprep.mubr.msk.bf16.mxu1 %vm765_vm3, %v6136_v34  ;;  %4087 = vmatpush3.bf16.msra.mxu1 %v4424_v2 }
 0x197   : > { %4088 = vmatprep.subr.bf16.mxu1 %v4425_v25 }
 0x19a   : > { %4089 = vmatpush3.bf16.msra.mxu1 %v4425_v25 }
 0x19b   : > { %4090 = vmatprep.subr.bf16.mxu1 %v4426_v12 }
 0x19d   : > { %4083 = vmatmul.mubr.msk.bf16.gmra.mrb[4].mxu1 %vm765_vm3, %v6137_v41 }
 0x19e   : > { %4091 = vmatpush3.bf16.msra.mxu1 %v4426_v12 }
 0x19f   : > { %4092 = vmatprep.subr.bf16.mxu1 %v4427_v7 }
 0x1a2   : > { %4093 = vmatpush3.bf16.msra.mxu1 %v4427_v7 }
 0x268   : > { %v4080_v37 = vpop.f32.mrb[0].mxu1 }
 0x269   : > { %v2036_v55 = vadd.f32 %v4080_v37, %v3700_v32  ;;  %v1988_v3 = vpop.f32.mrb[1].mxu1 }
 0x26a   : > { %v2034_v45 = vadd.f32 %v3700_v32, %v1988_v3  ;;  %v4081_v58 = vpop.f32.mrb[2].mxu1 }
 0x26b   : > { %v2037_v35 = vadd.f32 %v4081_v58, %v3700_v32  ;;  %v1991_v16 = vpop.f32.mrb[3].mxu1  ;;  %v2044_v17 = vmax.f32 %v2036_v55, 0.0 }
 0x26c   : > { %v2035_v36 = vadd.f32 %v3700_v32, %v1991_v16  ;;  %v2042_v1 = vmax.f32 %v2034_v45, 0.0  ;;  %v4430_v16 = vld [vmem:[%s5954_s9 + $0x40] sm:$0xff]  }
 0x26d   : > { %v2045_v33 = vmax.f32 %v2037_v35, 0.0  ;;  %v4428_v35 = vld [vmem:[%s5954_s9] sm:$0xff]  }
 0x26e   : > { %v2043_v2 = vmax.f32 %v2035_v36, 0.0  ;;  %4102 = vmatprep.subr.bf16.mxu0 %v4428_v35 }
 0x26f   : > { %v2051_v4 = vpack.c.bf16 %v2045_v33, %v2044_v17  ;;  %4103 = vmatpush3.bf16.msra.mxu0 %v4428_v35  ;;  %v6139_v35 = vld [vmem:[#allocation11_spill] sm:$0xff] }
 0x270   : > { %v2050_v46 = vpack.c.bf16 %v2043_v2, %v2042_v1  ;;  %v4084_v54 = vpop.f32.mrb[4].mxu1 }
 0x271   : > { %v2040_v14 = vadd.f32 %v4084_v54, %v3700_v32  ;;  %v2004_v39 = vpop.f32.mrb[5].mxu1 }
 0x272   : > { %v2038_v25 = vadd.f32 %v3700_v32, %v2004_v39  ;;  %v4085_v38 = vpop.f32.mrb[6].mxu1  ;;  %4094 = vmatprep.mubr.msk.bf16.mxu1 %vm520_vm0, %v2050_v46 }
 0x273   : > { %v2041_v34 = vadd.f32 %v4085_v38, %v3700_v32  ;;  %v2007_v41 = vpop.f32.mrb[7].mxu1  ;;  %4095 = vmatmul.mubr.msk.bf16.vlgmr.msra.gmra.mrb[8].mxu1 %vm520_vm0, %v2051_v4  ;;  %v2048_v7 = vmax.f32 %v2040_v14, 0.0 }
 0x274   : > { %v2039_v12 = vadd.f32 %v3700_v32, %v2007_v41  ;;  %v2046_v55 = vmax.f32 %v2038_v25, 0.0  ;;  %v4429_v32 = vld [vmem:[%s5954_s9 + $0x8] sm:$0xff]  }
 0x275   : > { %v2049_v37 = vmax.f32 %v2041_v34, 0.0  ;;  %4104 = vmatprep.subr.bf16.mxu0 %v4429_v32 }
 0x276   : > { %v2047_v3 = vmax.f32 %v2039_v12, 0.0  ;;  %4105 = vmatpush3.bf16.msra.mxu0 %v4429_v32 }
 0x277   : > { %v2053_v45 = vpack.c.bf16 %v2049_v37, %v2048_v7  ;;  %4114 = vmatprep.subr.bf16.mxu0 %v4430_v16 }
 0x278   : > { %v2052_v58 = vpack.c.bf16 %v2047_v3, %v2046_v55 }
 0x27a   : > { %4098 = vmatprep.mubr.msk.bf16.mxu1 %vm520_vm0, %v2052_v58 }
 0x27b   : > { %4099 = vmatmul.mubr.msk.bf16.gmra.mrb[12].mxu1 %vm520_vm0, %v2053_v45  ;;  %v6138_v45 = vld [vmem:[#allocation9_spill] sm:$0xff] }
 0x346   : > { %v4096_v36 = vpop.f32.mrb[8].mxu1 }
 0x347   : > { %v2132_v17 = vpop.f32.mrb[9].mxu1  ;;  %v5431_v46 = vadd.f32 %v4096_v36, %v4987_v10 }
 0x348   : > { %v4097_v33 = vpop.f32.mrb[10].mxu1  ;;  %v5434_v54 = vadd.f32 %v2132_v17, %v4997_v50 }
 0x349   : > { %v2135_v1 = vpop.f32.mrb[11].mxu1  ;;  %v5425_v2 = vadd.f32 %v4097_v33, %v4979_v5  ;;  %v2182_v38 = vrot.slane %v5431_v46, 7  ;;  %v6140_v33 = vld [vmem:[#allocation45_spill] sm:$0xff] }
 0x34a   : > { %v5428_v4 = vadd.f32 %v2135_v1, %v4989_v63  ;;  %v2180_v63 = vrot.slane %v5434_v54, 7 }
 0x34b   : > { %v2183_v25 = vrot.slane %v5425_v2, 7 }
 0x34c   : > { %v2181_v14 = vrot.slane %v5428_v4, 7 }
 0x34e   : > { %v4100_v39 = vpop.f32.mrb[12].mxu1  ;;  %v5451_v7 = vsel %vm688_vm2, %v2180_v63, %v2181_v14  ;;  %v5455_v37 = vsel %vm688_vm2, %v2181_v14, %v2182_v38  ;;  %v6141_v14 = vld [vmem:[#allocation44_spill] sm:$0xff] }
 0x34f   : > { %v5440_v34 = vadd.f32 %v4100_v39, %v5001_v0  ;;  %v2148_v5 = vpop.f32.mrb[13].mxu1  ;;  %v2198_v58 = vmul.f32 %v5451_v7, %v6138_v45  ;;  %v2199_v32 = vmul.f32 %v5455_v37, %v6139_v35 }
 0x350   : > { %v5444_v41 = vadd.f32 %v2148_v5, %v5003_v8  ;;  %v4101_v10 = vpop.f32.mrb[14].mxu1  ;;  %v5463_v8 = vsel %vm688_vm2, %v2182_v38, %v2183_v25  ;;  %v6142_v38 = vld [vmem:[#allocation10_spill] sm:$0xff] }
 0x351   : > { %v5447_v50 = vadd.f32 %v4101_v10, %v5006_v60  ;;  %v2151_v12 = vpop.f32.mrb[15].mxu1  ;;  %v2186_v60 = vrot.slane %v5440_v34, 7  ;;  %v5483_v1 = vmul.f32 %v5463_v8, %v6140_v33  ;;  %v6143_v10 = vld [vmem:[#allocation12_spill] sm:$0xff]  ;;  %v6145_v33 = vld [vmem:[#allocation14_spill] sm:$0xff]  ;;  %v2205_v27 = vpack.c.bf16 %v2199_v32, %v2198_v58 }
 0x352   : > { %v5458_v0 = vadd.f32 %v2151_v12, %v5033_v44  ;;  %v2184_v55 = vrot.slane %v5444_v41, 7  ;;  %v6144_v12 = vld [vmem:[#allocation13_spill] sm:$0xff]  ;;  %v2200_v20 = vmul.f32 %v5463_v8, %v6145_v33 }
 0x353   : > { %v2187_v3 = vrot.slane %v5447_v50, 7 }
 0x354   : > { %v5473_v44 = vsel %vm688_vm2, %v2183_v25, %v2184_v55  ;;  %v2185_v35 = vrot.slane %v5458_v0, 7  ;;  %v2509_v58 = vrot.slane %v5458_v0, 1 }
 0x355   : > { %v2188_v36 = vsel %vm688_vm2, %v2186_v60, %v2187_v3  ;;  %v5479_v17 = vsel %vm688_vm2, %v2187_v3, %v2180_v63  ;;  %v5487_v39 = vmul.f32 %v5473_v44, %v6141_v14  ;;  %v2201_v45 = vmul.f32 %v5473_v44, %v6144_v12 }
 0x356   : > { %v2196_v5 = vmul.f32 %v2188_v36, %v6142_v38  ;;  %v2197_v25 = vmul.f32 %v5479_v17, %v6143_v10  ;;  %v2507_v14 = vrot.slane %v5425_v2, 1  ;;  %v4431_v38 = vld [vmem:[%s5954_s9 + $0x48] sm:$0xff]   ;;  %v2189_v12 = vsel %vm688_vm2, %v2185_v35, %v2186_v60  ;;  %v4432_v60 = vld [vmem:[%s5954_s9 + $0x10] sm:$0xff]  }
 0x357   : > { %v2206_v10 = vpack.c.bf16 %v2201_v45, %v2200_v20  ;;  %v5508_v63 = vsel %vm688_vm2, %v2184_v55, %v2185_v35  ;;  %v2203_v55 = vmul.f32 %v2189_v12, %v4884_v18  ;;  %v6148_v45 = vld [vmem:[#allocation60_spill] sm:$0xff]  ;;  %v5540_v33 = vmul.f32 %v2189_v12, %v4934_v43  ;;  %v4446_v43 = vld [vmem:[%s5956_s11] sm:$0xff]  }
 0x358   : > { %v2204_v3 = vpack.c.bf16 %v2197_v25, %v2196_v5  ;;  %v2508_v5 = vrot.slane %v5444_v41, 1  ;;  %v2202_v20 = vmul.f32 %v5508_v63, %v4886_v19  ;;  %v5567_v18 = vmul.f32 %v5451_v7, %v4954_v53  ;;  %4210 = vmatprep.subr.bf16.mxu1 %v4446_v43 }
 0x359   : > { %4211 = vmatpush3.bf16.msra.mxu1 %v4446_v43  ;;  %v2172_v43 = vpack.c.bf16 %v5425_v2, %v5431_v46 }
 0x35a   : > { %4106 = vmatprep.mubr.msk.bf16.mxu0 %vm765_vm3, %v2204_v3  ;;  %v5516_v32 = vsel %vm1094_vm1, %v2507_v14, %v2508_v5  ;;  %v2207_v19 = vpack.c.bf16 %v2203_v55, %v2202_v20  ;;  %v2505_v3 = vrot.slane %v5428_v4, 1  ;;  %v2504_v20 = vrot.slane %v5434_v54, 1 }
 0x35b   : > { %4107 = vmatmul.mubr.msk.bf16.vlgmr.msra.gmra.mrb[8].mxu0 %vm765_vm3, %v2205_v27  ;;  %v5526_v27 = vsel %vm1094_vm1, %v2508_v5, %v2509_v58  ;;  %v2506_v5 = vrot.slane %v5431_v46, 1  ;;  %v5571_v55 = vmul.f32 %v5455_v37, %v4952_v52 }
 0x35c   : > { %4115 = vmatpush3.bf16.msra.mxu0 %v4430_v16  ;;  %4110 = vmatprep.mubr.msk.bf16.mxu0 %vm765_vm3, %v2206_v10  ;;  %v6146_v16 = vld [vmem:[#allocation61_spill] sm:$0xff]  ;;  %v5534_v35 = vmul.f32 %v5526_v27, %v6148_v45  ;;  %v5543_v10 = vmul.f32 %v2188_v36, %v4932_v42  ;;  %v4447_v42 = vld [vmem:[%s5956_s11 + $0x8] sm:$0xff]  }
 0x35d   : > { %4116 = vmatprep.subr.bf16.mxu0 %v4431_v38  ;;  %v5530_v25 = vmul.f32 %v5516_v32, %v6146_v16  ;;  %v2171_v16 = vpack.c.bf16 %v5428_v4, %v5434_v54  ;;  %v5562_v45 = vsel %vm1094_vm1, %v2506_v5, %v2507_v14  ;;  %v5582_v14 = vmul.f32 %v2189_v12, %v4960_v56 }
 0x35e   : > { %6149 = vst [vmem:[#allocation63_spill] sm:$0xff] %v5534_v35  ;;  %v6150_v35 = vld [vmem:[#allocation47_spill] sm:$0xff]  ;;  %v5603_v56 = vsel %vm1094_vm1, %v2504_v20, %v2505_v3  ;;  %4212 = vmatprep.subr.bf16.mxu1 %v4447_v42 }
 0x35f   : > { %6147 = vst [vmem:[#allocation25_spill] sm:$0xff] %v5530_v25  ;;  %v5575_v25 = vsel %vm1094_vm1, %v2505_v3, %v2506_v5  ;;  %v5585_v47 = vmul.f32 %v2188_v36, %v6150_v35  ;;  %v6153_v35 = vld [vmem:[#allocation57_spill] sm:$0xff]  ;;  %v6154_v3 = vld [vmem:[#allocation56_spill] sm:$0xff]  ;;  %v6159_v5 = vld [vmem:[#allocation67_spill] sm:$0xff]  ;;  %4213 = vmatpush3.bf16.msra.mxu1 %v4447_v42 }
 0x360   : > { %4117 = vmatpush3.bf16.msra.mxu0 %v4431_v38  ;;  %v2511_v38 = vrot.slane %v5447_v50, 1  ;;  %v6163_v42 = vld [vmem:[#allocation16_spill] sm:$0xff] }
 0x361   : > { %4126 = vmatprep.subr.bf16.mxu0 %v4432_v60  ;;  %6151 = vst [vmem:[#allocation62_spill] sm:$0xff] %v5585_v47  ;;  %v5642_v47 = vmul.f32 %v5603_v56, %v6161_v49  ;;  %v4434_v49 = vld [vmem:[%s5954_s9 + $0x20] sm:$0xff]  }
 0x362   : > { %v5607_v36 = vsel %vm1094_vm1, %v2511_v38, %v2504_v20  ;;  %v6155_v20 = vld [vmem:[#allocation65_spill] sm:$0xff] }
 0x363   : > { %4111 = vmatmul.mubr.msk.bf16.gmra.mrb[12].mxu0 %vm765_vm3, %v2207_v19  ;;  %v2510_v19 = vrot.slane %v5440_v34, 1  ;;  %v5638_v13 = vmul.f32 %v5607_v36, %v6159_v5  ;;  %6162 = vst [vmem:[#allocation34_spill] sm:$0xff] %v5642_v47  ;;  %v2392_v5 = vmul.f32 %v5428_v4, %v4894_v23  ;;  %v6167_v47 = vld [vmem:[#allocation19_spill] sm:$0xff]  ;;  %v6168_v23 = vld [vmem:[#allocation21_spill] sm:$0xff] }
 0x364   : > { %4118 = vmatprep.mubr.msk.bf16.mxu0 %vm765_vm3, %v2171_v16  ;;  %v5579_v16 = vmul.f32 %v5508_v63, %v4962_v57  ;;  %v6152_v57 = vld [vmem:[#allocation46_spill] sm:$0xff] }
 0x365   : > { %v5589_v53 = vsel %vm1094_vm1, %v2510_v19, %v2511_v38  ;;  %v5593_v52 = vsel %vm1094_vm1, %v2509_v58, %v2510_v19  ;;  %v5599_v31 = vmul.f32 %v5479_v17, %v6152_v57  ;;  %v5615_v19 = vmul.f32 %v5575_v25, %v6153_v35  ;;  %v6157_v58 = vld [vmem:[#allocation64_spill] sm:$0xff]  ;;  %6160 = vst [vmem:[#allocation32_spill] sm:$0xff] %v5638_v13 }
 0x366   : > { %v5624_v38 = vmul.f32 %v5562_v45, %v6154_v3  ;;  %v5628_v57 = vmul.f32 %v5593_v52, %v6155_v20  ;;  %v5632_v12 = vmul.f32 %v5589_v53, %v6157_v58  ;;  %v2173_v35 = vpack.c.bf16 %v5458_v0, %v5444_v41  ;;  %v6164_v20 = vld [vmem:[#allocation15_spill] sm:$0xff]  ;;  %v6165_v58 = vld [vmem:[#allocation18_spill] sm:$0xff] }
 0x367   : > { %v2391_v3 = vmul.f32 %v5434_v54, %v6164_v20  ;;  %v2395_v13 = vmul.f32 %v5444_v41, %v6165_v58  ;;  %v2394_v20 = vmul.f32 %v5425_v2, %v6167_v47  ;;  %v2396_v58 = vmul.f32 %v5458_v0, %v6168_v23  ;;  %v6169_v47 = vld [vmem:[#allocation23_spill] sm:$0xff] }
 0x368   : > { %6156 = vst [vmem:[#allocation30_spill] sm:$0xff] %v5628_v57  ;;  %6158 = vst [vmem:[#allocation33_spill] sm:$0xff] %v5632_v12 }
 0x36b   : > { %4119 = vmatmul.mubr.msk.bf16.vlgmr.msra.gmra.mrb[8].mxu0 %vm765_vm3, %v2172_v43  ;;  %v2390_v43 = vmul.f32 %v5447_v50, %v6163_v42  ;;  %v6166_v42 = vld [vmem:[#allocation17_spill] sm:$0xff] }
 0x36c   : > { %4127 = vmatpush3.bf16.msra.mxu0 %v4432_v60  ;;  %4122 = vmatprep.mubr.msk.bf16.mxu0 %vm765_vm3, %v2173_v35  ;;  %v2174_v60 = vpack.c.bf16 %v5447_v50, %v5440_v34 }
 0x36d   : > { %4128 = vmatprep.subr.bf16.mxu0 %v4433_v9  ;;  %v2398_v35 = vpack.c.bf16 %v2391_v3, %v2390_v43  ;;  %v4435_v3 = vld [vmem:[%s5954_s9 + $0x28] sm:$0xff]   ;;  %v2400_v43 = vpack.c.bf16 %v2395_v13, %v2394_v20  ;;  %v2522_v20 = vmul.f32 %v5575_v25, %v6098_v40  ;;  %v6175_v40 = vld [vmem:[#allocation29_spill] sm:$0xff] }
 0x36e   : > { %v6171_v13 = vld [vmem:[#allocation22_spill] sm:$0xff] }
 0x370   : > { %4129 = vmatpush3.bf16.msra.mxu0 %v4433_v9  ;;  %v2393_v9 = vmul.f32 %v5431_v46, %v6166_v42 }
 0x371   : > { %4138 = vmatprep.subr.bf16.mxu0 %v4434_v49 }
 0x372   : > { %v2399_v57 = vpack.c.bf16 %v2393_v9, %v2392_v5  ;;  %v2520_v5 = vmul.f32 %v5607_v36, %v6169_v47  ;;  %v6173_v47 = vld [vmem:[#allocation26_spill] sm:$0xff] }
 0x373   : > { %4123 = vmatmul.mubr.msk.bf16.gmra.mrb[12].mxu0 %vm765_vm3, %v2174_v60  ;;  %v4436_v60 = vld [vmem:[%s5954_s9 + $0x30] sm:$0xff]  }
 0x374   : > { %4130 = vmatprep.mubr.msk.bf16.mxu0 %vm765_vm3, %v2398_v35  ;;  %v6170_v35 = vld [vmem:[#allocation20_spill] sm:$0xff] }
 0x375   : > { %v2397_v42 = vmul.f32 %v5440_v34, %v6170_v35  ;;  %v2525_v35 = vmul.f32 %v5526_v27, %v6173_v47  ;;  %v2636_v47 = vmul.f32 %v5455_v37, %v6107_v59  ;;  %v2749_v59 = vmul.f32 %v5575_v25, %v6111_v62  ;;  %v4441_v25 = vld [vmem:[%s5954_s9 + $0x68] sm:$0xff]  }
 0x376   : > { %v6178_v37 = vpack.c.bf16 %v5543_v10, %v5540_v33  ;;  %v2750_v62 = vmul.f32 %v5562_v45, %v6117_v61  ;;  %v2976_v10 = vmul.f32 %v5428_v4, %v6123_v51  ;;  %v6186_v51 = vld [vmem:[#allocation51_spill] sm:$0xff] }
 0x37b   : > { %4131 = vmatmul.mubr.msk.bf16.vlgmr.msra.gmra.mrb[8].mxu0 %vm765_vm3, %v2399_v57  ;;  %v2521_v57 = vmul.f32 %v5603_v56, %v6171_v13 }
 0x37c   : > { %4139 = vmatpush3.bf16.msra.mxu0 %v4434_v49  ;;  %4134 = vmatprep.mubr.msk.bf16.mxu0 %vm765_vm3, %v2400_v43  ;;  %v2401_v49 = vpack.c.bf16 %v2397_v42, %v2396_v58  ;;  %v6172_v43 = vld [vmem:[#allocation24_spill] sm:$0xff]  ;;  %v2526_v42 = vmul.f32 %v5593_v52, %v6175_v40  ;;  %v6188_v40 = vld [vmem:[#allocation55_spill] sm:$0xff] }
 0x37d   : > { %4140 = vmatprep.subr.bf16.mxu0 %v4435_v3  ;;  %v2528_v9 = vpack.c.bf16 %v2521_v57, %v2520_v5  ;;  %v2523_v23 = vmul.f32 %v5562_v45, %v6172_v43  ;;  %v4437_v58 = vld [vmem:[%s5954_s9 + $0x38] sm:$0xff]  }
 0x37e   : > { %v6176_v57 = vld [vmem:[#allocation28_spill] sm:$0xff] }
 0x37f   : > { %v2529_v13 = vpack.c.bf16 %v2523_v23, %v2522_v20  ;;  %v6177_v20 = vld [vmem:[#allocation31_spill] sm:$0xff] }
 0x380   : > { %4141 = vmatpush3.bf16.msra.mxu0 %v4435_v3  ;;  %v6174_v3 = vld [vmem:[#allocation27_spill] sm:$0xff]  ;;  %v2634_v43 = vmul.f32 %v5479_v17, %v6177_v20  ;;  %v2639_v17 = vmul.f32 %v5508_v63, %v6109_v30  ;;  %v2748_v30 = vmul.f32 %v5603_v56, %v6112_v15  ;;  %v2753_v15 = vmul.f32 %v5593_v52, %v6116_v6 }
 0x381   : > { %4150 = vmatprep.subr.bf16.mxu0 %v4436_v60  ;;  %v2524_v12 = vmul.f32 %v5516_v32, %v6174_v3  ;;  %v2638_v3 = vmul.f32 %v5473_v44, %v6110_v48  ;;  %v2752_v44 = vmul.f32 %v5526_v27, %v6115_v28  ;;  %v2755_v28 = vmul.f32 %v5607_v36, %v6119_v24  ;;  %v4442_v6 = vld [vmem:[%s5954_s9 + $0x70] sm:$0xff]   ;;  %v6187_v36 = vld [vmem:[#allocation52_spill] sm:$0xff] }
 0x382   : > { %v2756_v48 = vpack.c.bf16 %v2749_v59, %v2748_v30  ;;  %v6180_v24 = vpack.c.bf16 %v5487_v39, %v5483_v1  ;;  %v6181_v27 = vpack.c.bf16 %v5582_v14, %v5579_v16  ;;  %v2977_v1 = vmul.f32 %v5431_v46, %v6124_v11  ;;  %v6184_v16 = vld [vmem:[#allocation50_spill] sm:$0xff] }
 0x383   : > { %4135 = vmatmul.mubr.msk.bf16.gmra.mrb[12].mxu0 %vm765_vm3, %v2401_v49  ;;  %v2530_v5 = vpack.c.bf16 %v2525_v35, %v2524_v12  ;;  %v2527_v49 = vmul.f32 %v5589_v53, %v6176_v57  ;;  %v2635_v12 = vmul.f32 %v5451_v7, %v6106_v26  ;;  %v2637_v35 = vmul.f32 %v5463_v8, %v6108_v21  ;;  %v4439_v7 = vld [vmem:[%s5954_s9 + $0x58] sm:$0xff]   ;;  %v4440_v21 = vld [vmem:[%s5954_s9 + $0x60] sm:$0xff]   ;;  %v6189_v57 = vld [vmem:[#allocation54_spill] sm:$0xff] }
 0x384   : > { %4142 = vmatprep.mubr.msk.bf16.mxu0 %vm765_vm3, %v2528_v9  ;;  %v4438_v9 = vld [vmem:[%s5954_s9 + $0x50] sm:$0xff]   ;;  %v2751_v8 = vmul.f32 %v5516_v32, %v6114_v29  ;;  %v2758_v33 = vpack.c.bf16 %v2753_v15, %v2752_v44  ;;  %v2754_v29 = vmul.f32 %v5589_v53, %v6118_v22  ;;  %v6179_v32 = vpack.c.bf16 %v5571_v55, %v5567_v18  ;;  %v4443_v22 = vld [vmem:[%s5954_s9 + $0x78] sm:$0xff]   ;;  %v4444_v18 = vld [vmem:[%s5954_s9 + $0x80] sm:$0xff]  }
 0x385   : > { %v2642_v23 = vpack.c.bf16 %v2635_v12, %v2634_v43  ;;  %v2643_v26 = vpack.c.bf16 %v2637_v35, %v2636_v47  ;;  %v2984_v39 = vpack.c.bf16 %v2977_v1, %v2976_v10  ;;  %v6182_v55 = vld [vmem:[#allocation62_spill] sm:$0xff]  ;;  %v2979_v14 = vmul.f32 %v5444_v41, %v6184_v16  ;;  %v6185_v53 = vld [vmem:[#allocation53_spill] sm:$0xff]  ;;  %v6191_v43 = vld [vmem:[#allocation63_spill] sm:$0xff] }
 0x386   : > { %v2757_v63 = vpack.c.bf16 %v2751_v8, %v2750_v62  ;;  %v2759_v61 = vpack.c.bf16 %v2755_v28, %v2754_v29  ;;  %v6183_v45 = vpack.c.bf16 %v5599_v31, %v6182_v55  ;;  %v2980_v52 = vmul.f32 %v5458_v0, %v6185_v53  ;;  %v4445_v31 = vld [vmem:[%s5954_s9 + $0x88] sm:$0xff]   ;;  %v6192_v12 = vld [vmem:[#allocation25_spill] sm:$0xff] }
 0x387   : > { %v2978_v56 = vmul.f32 %v5425_v2, %v6186_v51  ;;  %v2981_v11 = vmul.f32 %v5440_v34, %v6187_v36  ;;  %v6190_v20 = vpack.c.bf16 %v5624_v38, %v5615_v19  ;;  %v6195_v47 = vld [vmem:[#allocation30_spill] sm:$0xff]  ;;  %v4448_v19 = vld [vmem:[%s5956_s11 + $0x10] sm:$0xff]   ;;  %v4449_v38 = vld [vmem:[%s5956_s11 + $0x18] sm:$0xff]  }
 0x388   : > { %4214 = vmatprep.subr.bf16.mxu1 %v4448_v19  ;;  %v3812_v53 = vld [vmem:[%s5949_s4] ss:$0 sm:$0xff] }
 0x389   : > { %4215 = vmatpush3.bf16.msra.mxu1 %v4448_v19 }
 0x38a   : > { %4216 = vmatprep.subr.bf16.mxu1 %v4449_v38 }
 0x38b   : > { %4143 = vmatmul.mubr.msk.bf16.vlgmr.msra.gmra.mrb[8].mxu0 %vm765_vm3, %v2529_v13  ;;  %v2644_v13 = vpack.c.bf16 %v2639_v17, %v2638_v3  ;;  %v6197_v17 = vld [vmem:[#allocation34_spill] sm:$0xff]  ;;  %v6198_v3 = vld [vmem:[#allocation32_spill] sm:$0xff] }
 0x38c   : > { %4151 = vmatpush3.bf16.msra.mxu0 %v4436_v60  ;;  %4146 = vmatprep.mubr.msk.bf16.mxu0 %vm765_vm3, %v2530_v5  ;;  %v2531_v60 = vpack.c.bf16 %v2527_v49, %v2526_v42  ;;  %v2986_v5 = vpack.c.bf16 %v2981_v11, %v2980_v52  ;;  %v2982_v42 = vmul.f32 %v5447_v50, %v6188_v40 }
 0x38d   : > { %4152 = vmatprep.subr.bf16.mxu0 %v4437_v58  ;;  %v2983_v49 = vmul.f32 %v5434_v54, %v6189_v57  ;;  %4217 = vmatpush3.bf16.msra.mxu1 %v4449_v38 }
 0x390   : > { %4153 = vmatpush3.bf16.msra.mxu0 %v4437_v58  ;;  %v2985_v58 = vpack.c.bf16 %v2979_v14, %v2978_v56  ;;  %v3813_v56 = vld [vmem:[%s5950_s5] ss:$0 sm:$0xff] }
 0x391   : > { %4162 = vmatprep.subr.bf16.mxu0 %v4438_v9 }
 0x393   : > { %4147 = vmatmul.mubr.msk.bf16.gmra.mrb[12].mxu0 %vm765_vm3, %v2531_v60  ;;  %v6193_v60 = vpack.c.bf16 %v6191_v43, %v6192_v12 }
 0x394   : > { %4154 = vmatprep.mubr.msk.bf16.mxu0 %vm765_vm3, %v2642_v23  ;;  %v6194_v23 = vld [vmem:[#allocation33_spill] sm:$0xff] }
 0x395   : > { %v6196_v35 = vpack.c.bf16 %v6194_v23, %v6195_v47 }
 0x39b   : > { %4155 = vmatmul.mubr.msk.bf16.vlgmr.msra.gmra.mrb[8].mxu0 %vm765_vm3, %v2643_v26  ;;  %v6199_v26 = vpack.c.bf16 %v6197_v17, %v6198_v3 }
 0x39c   : > { %4163 = vmatpush3.bf16.msra.mxu0 %v4438_v9  ;;  %4158 = vmatprep.mubr.msk.bf16.mxu0 %vm765_vm3, %v2644_v13  ;;  %v2987_v9 = vpack.c.bf16 %v2983_v49, %v2982_v42 }
 0x39d   : > { %4164 = vmatprep.subr.bf16.mxu0 %v4439_v7 }
 0x3a0   : > { %4165 = vmatpush3.bf16.msra.mxu0 %v4439_v7  ;;  %v3795_v7 = vld [vmem:[%s5955_s10] ss:$0 sm:$0xff] }
 0x3a1   : > { %4174 = vmatprep.subr.bf16.mxu0 %v4440_v21 }
 0x3a3   : > { %4159 = vmatmul.mubr.msk.bf16.gmra.mrb[12].mxu0 %vm765_vm3, %v6178_v37 }
 0x3a4   : > { %4166 = vmatprep.mubr.msk.bf16.mxu0 %vm765_vm3, %v2756_v48 }
 0x3ab   : > { %4167 = vmatmul.mubr.msk.bf16.vlgmr.msra.gmra.mrb[8].mxu0 %vm765_vm3, %v2757_v63 }
 0x3ac   : > { %4175 = vmatpush3.bf16.msra.mxu0 %v4440_v21  ;;  %4170 = vmatprep.mubr.msk.bf16.mxu0 %vm765_vm3, %v2758_v33 }
 0x3ad   : > { %4176 = vmatprep.subr.bf16.mxu0 %v4441_v25 }
 0x3b0   : > { %4177 = vmatpush3.bf16.msra.mxu0 %v4441_v25 }
 0x3b1   : > { %4186 = vmatprep.subr.bf16.mxu0 %v4442_v6 }
 0x3b3   : > { %4171 = vmatmul.mubr.msk.bf16.gmra.mrb[12].mxu0 %vm765_vm3, %v2759_v61 }
 0x3b4   : > { %4178 = vmatprep.mubr.msk.bf16.mxu0 %vm765_vm3, %v6179_v32 }
 0x3bb   : > { %4179 = vmatmul.mubr.msk.bf16.vlgmr.msra.gmra.mrb[8].mxu0 %vm765_vm3, %v6180_v24 }
 0x3bc   : > { %4187 = vmatpush3.bf16.msra.mxu0 %v4442_v6  ;;  %4182 = vmatprep.mubr.msk.bf16.mxu0 %vm765_vm3, %v6181_v27 }
 0x3bd   : > { %4188 = vmatprep.subr.bf16.mxu0 %v4443_v22 }
 0x3c0   : > { %4189 = vmatpush3.bf16.msra.mxu0 %v4443_v22 }
 0x3c1   : > { %4198 = vmatprep.subr.bf16.mxu0 %v4444_v18 }
 0x3c3   : > { %4183 = vmatmul.mubr.msk.bf16.gmra.mrb[12].mxu0 %vm765_vm3, %v6183_v45 }
 0x3c4   : > { %4190 = vmatprep.mubr.msk.bf16.mxu0 %vm765_vm3, %v2984_v39 }
 0x3cb   : > { %4191 = vmatmul.mubr.msk.bf16.vlgmr.msra.gmra.mrb[8].mxu0 %vm765_vm3, %v2985_v58 }
 0x3cc   : > { %4199 = vmatpush3.bf16.msra.mxu0 %v4444_v18  ;;  %4194 = vmatprep.mubr.msk.bf16.mxu0 %vm765_vm3, %v2986_v5 }
 0x3cd   : > { %4200 = vmatprep.subr.bf16.mxu0 %v4445_v31 }
 0x3d0   : > { %4201 = vmatpush3.bf16.msra.mxu0 %v4445_v31 }
 0x3d3   : > { %4195 = vmatmul.mubr.msk.bf16.gmra.mrb[12].mxu0 %vm765_vm3, %v2987_v9 }
 0x3d4   : > { %4202 = vmatprep.mubr.msk.bf16.mxu0 %vm765_vm3, %v6190_v20 }
 0x3db   : > { %4203 = vmatmul.mubr.msk.bf16.vlgmr.msra.gmra.mrb[8].mxu0 %vm765_vm3, %v6193_v60 }
 0x3dc   : > { %4206 = vmatprep.mubr.msk.bf16.mxu0 %vm765_vm3, %v6196_v35 }
 0x3e3   : > { %4207 = vmatmul.mubr.msk.bf16.gmra.mrb[12].mxu0 %vm765_vm3, %v6199_v26 }
 0x4ae   : > { %v4204_v13 = vpop.f32.mrb[8].mxu0 }
 0x4af   : > { %v3213_v21 = vadd.f32 %v4204_v13, %v3795_v7  ;;  %v3165_v30 = vpop.f32.mrb[9].mxu0 }
 0x4b0   : > { %v3211_v59 = vadd.f32 %v3795_v7, %v3165_v30  ;;  %v4205_v48 = vpop.f32.mrb[10].mxu0 }
 0x4b1   : > { %v3214_v37 = vadd.f32 %v4205_v48, %v3795_v7  ;;  %v3168_v8 = vpop.f32.mrb[11].mxu0  ;;  %v3221_v15 = vmax.f32 %v3213_v21, 0.0 }
 0x4b2   : > { %v3212_v44 = vadd.f32 %v3795_v7, %v3168_v8  ;;  %v3219_v63 = vmax.f32 %v3211_v59, 0.0 }
 0x4b3   : > { %v3222_v62 = vmax.f32 %v3214_v37, 0.0 }
 0x4b4   : > { %v3220_v25 = vmax.f32 %v3212_v44, 0.0 }
 0x4b5   : > { %v3228_v33 = vpack.c.bf16 %v3222_v62, %v3221_v15 }
 0x4b6   : > { %v3227_v29 = vpack.c.bf16 %v3220_v25, %v3219_v63  ;;  %v4208_v28 = vpop.f32.mrb[12].mxu0 }
 0x4b7   : > { %v3217_v6 = vadd.f32 %v4208_v28, %v3795_v7  ;;  %v3181_v61 = vpop.f32.mrb[13].mxu0 }
 0x4b8   : > { %v3215_v32 = vadd.f32 %v3795_v7, %v3181_v61  ;;  %v4209_v22 = vpop.f32.mrb[14].mxu0  ;;  %4218 = vmatprep.mubr.msk.bf16.mxu1 %vm520_vm0, %v3227_v29 }
 0x4b9   : > { %v3218_v24 = vadd.f32 %v4209_v22, %v3795_v7  ;;  %v3184_v27 = vpop.f32.mrb[15].mxu0  ;;  %4219 = vmatmul.mubr.msk.bf16.vlgmr.msra.gmra.mrb[16].mxu1 %vm520_vm0, %v3228_v33  ;;  %v3225_v10 = vmax.f32 %v3217_v6, 0.0 }
 0x4ba   : > { %v3216_v18 = vadd.f32 %v3795_v7, %v3184_v27  ;;  %v3223_v39 = vmax.f32 %v3215_v32, 0.0 }
 0x4bb   : > { %v3226_v1 = vmax.f32 %v3218_v24, 0.0 }
 0x4bc   : > { %v3224_v55 = vmax.f32 %v3216_v18, 0.0 }
 0x4bd   : > { %v3230_v45 = vpack.c.bf16 %v3226_v1, %v3225_v10 }
 0x4be   : > { %v3229_v16 = vpack.c.bf16 %v3224_v55, %v3223_v39 }
 0x4c0   : > { %4222 = vmatprep.mubr.msk.bf16.mxu1 %vm520_vm0, %v3229_v16 }
 0x4c1   : > { %4223 = vmatmul.mubr.msk.bf16.gmra.mrb[20].mxu1 %vm520_vm0, %v3230_v45 }
 0x58c   : > { %v4220_v14 = vpop.f32.mrb[16].mxu1 }
 0x58d   : > { %v3342_v52 = vadd.f32 %v4220_v14, %v5431_v46  ;;  %v3309_v51 = vpop.f32.mrb[17].mxu1 }
 0x58e   : > { %v3340_v36 = vadd.f32 %v3309_v51, %v5434_v54  ;;  %v4221_v11 = vpop.f32.mrb[18].mxu1 }
 0x58f   : > { %v3823_v58 = vpack.c.bf16 %v3342_v52, %v3342_v52  ;;  %v3398_v31 = vmul.f32 %v3812_v53, %v3342_v52  ;;  %v3343_v46 = vadd.f32 %v4221_v11, %v5425_v2  ;;  %v3312_v5 = vpop.f32.mrb[19].mxu1 }
 0x590   : > { %v3821_v40 = vpack.c.bf16 %v3340_v36, %v3340_v36  ;;  %v3396_v42 = vmul.f32 %v3812_v53, %v3340_v36  ;;  %v3341_v57 = vadd.f32 %v3312_v5, %v5428_v4 }
 0x591   : > { %3383 = vst.msk [vmem:[%s5847_s27 + $0x8] sm:$0xf] %vm3380_vm4, %v3823_v58  ;;  %v3413_v49 = vadd.f32 %v3813_v56, %v3398_v31  ;;  %v3824_v9 = vpack.c.bf16 %v3343_v46, %v3343_v46  ;;  %v3399_v20 = vmul.f32 %v3812_v53, %v3343_v46 }
 0x592   : > { %3381 = vst.msk [vmem:[%s5847_s27] sm:$0xf] %vm3380_vm4, %v3821_v40  ;;  %v3411_v54 = vadd.f32 %v3813_v56, %v3396_v42  ;;  %v3822_v43 = vpack.c.bf16 %v3341_v57, %v3341_v57  ;;  %v3397_v12 = vmul.f32 %v3812_v53, %v3341_v57 }
 0x593   : > { %3421 = vst.msk [vmem:[%s5859_s15 + $0x10] sm:$0xff] %vm765_vm3, %v3413_v49  ;;  %v3414_v2 = vadd.f32 %v3813_v56, %v3399_v20 }
 0x594   : > { %3384 = vst.msk [vmem:[%s5847_s27 + $0xc] sm:$0xf] %vm3380_vm4, %v3824_v9  ;;  %3382 = vst.msk [vmem:[%s5847_s27 + $0x4] sm:$0xf] %vm3380_vm4, %v3822_v43  ;;  %v3412_v4 = vadd.f32 %v3813_v56, %v3397_v12  ;;  %v4224_v60 = vpop.f32.mrb[20].mxu1 }
 0x595   : > { %3419 = vst.msk [vmem:[%s5859_s15] sm:$0xff] %vm765_vm3, %v3411_v54  ;;  %3422 = vst.msk [vmem:[%s5859_s15 + $0x18] sm:$0xff] %vm765_vm3, %v3414_v2  ;;  %v3346_v23 = vadd.f32 %v4224_v60, %v5440_v34  ;;  %v3325_v47 = vpop.f32.mrb[21].mxu1 }
 0x596   : > { %3420 = vst.msk [vmem:[%s5859_s15 + $0x8] sm:$0xff] %vm765_vm3, %v3412_v4  ;;  %v3344_v35 = vadd.f32 %v3325_v47, %v5444_v41  ;;  %v4225_v17 = vpop.f32.mrb[22].mxu1 }
 0x597   : > { %v3827_v3 = vpack.c.bf16 %v3346_v23, %v3346_v23  ;;  %v3402_v26 = vmul.f32 %v3812_v53, %v3346_v23  ;;  %v3347_v19 = vadd.f32 %v4225_v17, %v5447_v50  ;;  %v3328_v38 = vpop.f32.mrb[23].mxu1 }
 0x598   : > { %v3825_v7 = vpack.c.bf16 %v3344_v35, %v3344_v35  ;;  %v3400_v13 = vmul.f32 %v3812_v53, %v3344_v35  ;;  %v3345_v21 = vadd.f32 %v3328_v38, %v5458_v0 }
 0x599   : > { %3387 = vst.msk [vmem:[%s5847_s27 + $0x18] sm:$0xf] %vm3380_vm4, %v3827_v3  ;;  %v3417_v34 = vadd.f32 %v3813_v56, %v3402_v26  ;;  %v3828_v41 = vpack.c.bf16 %v3347_v19, %v3347_v19  ;;  %v3403_v30 = vmul.f32 %v3812_v53, %v3347_v19 }
 0x59a   : > { %3385 = vst.msk [vmem:[%s5847_s27 + $0x10] sm:$0xf] %vm3380_vm4, %v3825_v7  ;;  %v3415_v50 = vadd.f32 %v3813_v56, %v3400_v13  ;;  %v3826_v59 = vpack.c.bf16 %v3345_v21, %v3345_v21  ;;  %v3401_v48 = vmul.f32 %v3812_v53, %v3345_v21 }
 0x59b   : > { %3425 = vst.msk [vmem:[%s5859_s15 + $0x30] sm:$0xff] %vm765_vm3, %v3417_v34  ;;  %v3418_v0 = vadd.f32 %v3813_v56, %v3403_v30 }
 0x59c   : > { %3388 = vst.msk [vmem:[%s5847_s27 + $0x1c] sm:$0xf] %vm3380_vm4, %v3828_v41  ;;  %3386 = vst.msk [vmem:[%s5847_s27 + $0x14] sm:$0xf] %vm3380_vm4, %v3826_v59  ;;  %v3416_v37 = vadd.f32 %v3813_v56, %v3401_v48 }
 0x59d   : > { %3423 = vst.msk [vmem:[%s5859_s15 + $0x20] sm:$0xff] %vm765_vm3, %v3415_v50  ;;  %3426 = vst.msk [vmem:[%s5859_s15 + $0x38] sm:$0xff] %vm765_vm3, %v3418_v0 }
 0x59e   : > { %3424 = vst.msk [vmem:[%s5859_s15 + $0x28] sm:$0xff] %vm765_vm3, %v3416_v37 }
 0x59f   : > { %4463 = shalt.err (!%p4460_p3)
}
 0x5a0   : > { %s4464_s30 = scalar_lea.hbm %s5890_s21, 1024  ;;  %s4468_s24 = scalar_lea.hbm %s5958_s13, 2048 }
 0x5a1   : > { %p4465_p4 = scmp.ne.s32.totalorder %s5890_s21, %s4464_s30  ;;  %p4469_p9 = scmp.lt.u32.totalorder %s5890_s21, %s5958_s13 }
 0x5a2   : > { %p4470_p10 = scmp.lt.u32.totalorder %s4468_s24, %s4464_s30  ;;  %p4472_p12 = scmp.lt.u32.totalorder %s4464_s30, %s5890_s21 }
 0x5a3   : > { %p4466_p7 = pnand %p4465_p4, %p4626_p5 }
 0x5a4   : > { %p4471_p11 = por %p4470_p10, %p4469_p9 }
 0x5a5   : > { %p4467_p8 = pneg %p4466_p7 }
 0x5a6   : > { %p4473_p13 = por %p4472_p12, %p4471_p11 }
 0x5a8   : > { %p4474_p0 = pnand %p4473_p13, %p4467_p8 }
 0x5aa   : > { %4477 = shalt.err (!%p4474_p0)
}
 0x5ab   : > { %s4516_s16 = smov 128   ;;  %s4517_s22 = smov 8  }
 0x5ac   : > { %4354 = dma.vmem_to_hbm [thread:$0]  (%p4626_p5), %s5892_s23, 1024, %s5890_s21, %s5904_s17, %s4516_s16, %s4516_s16, %s4517_s22  }
 0x5ad PF: > { %p4360_p1 = scmp.ge.s32.totalorder %s4512_s28, 2  ;;  %s3472_s19 = sand.u32 1, %s4500_s25  }
 0x5ae   : > { %s3473_s30 = scalar_lea.sflag [#allocation3], %s3472_s19 }
 0x5af   : > { %p4357_p2 = pnand %p4360_p1, %p4630_p6 }
 0x5b1   : > { %4495 = dma.done.wait (!%p4357_p2), %s3473_s30, 1024  }
 0x5b2   : > { %4497 = vsyncadd (!%p4357_p2), %s3473_s30, 4294966272  ;;  %s6201_s28 = sld [smem:[#allocation6_spill]]  ;;  %s6202_s27 = sld [smem:[#allocation5_spill]] }
 0x5b3   : > { %s6203_s15 = sld [smem:[#allocation7_spill]]  ;;  %s6204_s25 = smov %s4504_s26 }
 0x5b8   : > { %p24_p3 = scmp.ge.s32.totalorder %s6201_s28, 4   ;;  %s6205_s26 = smov %s6202_s27 }
 0x5b9   : > { %s6206_s27 = smov %s6203_s15 }
 0x5ba   :  { %26 = sbr.rel (!%p24_p3) target bundleno = 3 (0x3), region = 138 }
 0x5c1   :  { %3478 = vsyncpa [#allocation3], 1 }
 0x5c2   :  { %3480 = vsyncpa [#allocation3 + $0x1], 1 }

// kernel: fasternet_forward.6
= control target key start
LH: loop header
LB: loop body
LE: loop exit
PB: predicated region body
PF: predicated region fallthrough
CT: control target
= control target key end

     0   :  { %s4322_s0 = inlined_call_operand.vmem [shape: bf16[2,16,128], index: 0, kind: input, shape index: {}]   ;;  %s4323_s1 = inlined_call_operand.vmem [shape: bf16[128,64], index: 1, kind: input, shape index: {}]   ;;  %s4324_s2 = inlined_call_operand.vmem [shape: f32[1,64], index: 2, kind: input, shape index: {}]   ;;  %s4325_s3 = inlined_call_operand.vmem [shape: f32[9,16,1], index: 3, kind: input, shape index: {}]   ;;  %s4326_s4 = inlined_call_operand.vmem [shape: f32[1,64], index: 4, kind: input, shape index: {}]   ;;  %s4327_s5 = inlined_call_operand.vmem [shape: f32[1,64], index: 5, kind: input, shape index: {}]   ;;  %s4328_s6 = inlined_call_operand.vmem [shape: bf16[9,64,128], index: 6, kind: input, shape index: {}]   ;;  %s4329_s7 = inlined_call_operand.vmem [shape: f32[1,128], index: 7, kind: input, shape index: {}]   ;;  %s4330_s8 = inlined_call_operand.vmem [shape: bf16[128,64], index: 8, kind: input, shape index: {}]   ;;  %s4331_s9 = inlined_call_operand.vmem [shape: bf16[9,64,128], index: 9, kind: input, shape index: {}]   ;;  %s4332_s10 = inlined_call_operand.vmem [shape: f32[1,128], index: 10, kind: input, shape index: {}]   ;;  %s4333_s11 = inlined_call_operand.vmem [shape: bf16[128,64], index: 11, kind: input, shape index: {}]   ;;  %s4334_s12 = inlined_call_operand.vmem [shape: bf16[2,16,64], index: 12, kind: output, shape index: {0}]   ;;  %s4335_s13 = inlined_call_operand.hbm [shape: f32[2,16,64], index: 13, kind: output, shape index: {1}]  }
   0x1   :  { %4340 = sst [smem:[#allocation8_spill]] %s4322_s0 }
   0x2   :  { %19 = vsyncpa [#allocation3], 0 }
   0x3   :  { %21 = vsyncpa [#allocation3 + $0x1], 0  ;;  %s3523_s25 = smov 0   ;;  %s3525_s26 = smov 0  }
   0x4   :  { %s3527_s27 = smov 0   ;;  %s3529_s28 = smov 0  }
   0x5 LB: > { %4341 = sst [smem:[#allocation5_spill]] %s3441_s27  ;;  %s3544_s29 = sadd.s32 4294967295, %s3445_s28   ;;  %s3445_s28 = sphi %s3529_s28, %s4348_s28   ;;  %s3441_s27 = sphi %s3527_s27, %s4350_s27   ;;  %s3437_s26 = sphi %s3525_s26, %s4352_s26   ;;  %s3433_s25 = sphi %s3523_s25, %s4351_s25  }
   0x6   : > { %s2564_s30 = sadd.s32 4294967294, %s3445_s28   ;;  %s3548_s14 = sadd.s32 1, %s3445_s28  }
   0x7   : > { %4342 = sst [smem:[#allocation6_spill]] %s3548_s14  ;;  %s317_s15 = sadd.s32 1, %s3441_s27 }
   0x8   : > { %s314_s16 = ssub.s32 %s3445_s28, %s3548_s14  ;;  %p327_p0 = scmp.ne.s32.totalorder %s3441_s27, %s3437_s26 }
   0x9   : > { %p315_p1 = scmp.eq.s32.totalorder %s314_s16, 0  ;;  %p328_p2 = scmp.eq.s32.totalorder %s3544_s29, 1 }
   0xa   : > { %p333_p3 = scmp.ne.s32.totalorder %s3437_s26, %s3433_s25  ;;  %p334_p4 = scmp.eq.s32.totalorder %s2564_s30, 1 }
   0xb   : > { %s3559_s17 = scalar_select %p315_p1, %s3441_s27, %s317_s15  }
   0xc   : > { %p3561_p5 = por %p328_p2, %p327_p0  ;;  %p3565_p6 = por %p334_p4, %p333_p3 }
   0xd   : > { %4343 = sst [smem:[#allocation7_spill]] %s3559_s17  ;;  %p2567_p7 = scmp.ge.s32.totalorder %s3445_s28, 1 }
   0xe   : > { %p393_p8 = scmp.lt.s32.totalorder %s3445_s28, 3 }
  0x10   : > { %p394_p9 = pnand %p2567_p7, %p393_p8 }
  0x11   : > { %v3286_v0 = vld [vmem:[%s4323_s1] sm:$0xff] (!%p394_p9)   ;;  %v3447_v1 = vmov (!%p394_p9), 0.0   ;;  %v3287_v2 = vld [vmem:[%s4323_s1 + $0x8] sm:$0xff] (!%p394_p9)   ;;  %vm3448_vm0 = vmmov (!%p394_p9), 0   ;;  %p442_p10 = scmp.lt.s32.totalorder (!%p394_p9), %s3544_s29, 1  ;;  %v3449_v3 = vmov (!%p394_p9), 0   ;;  %v608_v38 = vlaneseq (!%p394_p9) }
  0x12   : > { %397 = sbr.rel (%p394_p9) target bundleno = 1323 (0x52b), region = 68  ;;  %2964 = vmatprep.subr.bf16.mxu0 (!%p394_p9), %v3447_v1  ;;  %2984 = vmatprep.subr.bf16.mxu1 (!%p394_p9), %v3447_v1  ;;  %v3288_v4 = vld [vmem:[%s4323_s1 + $0x10] sm:$0xff] (!%p394_p9)   ;;  %s4346_s0 = sld [smem:[#allocation8_spill]] (!%p394_p9)  ;;  %v573_v5 = vld [vmem:[%s4325_s3] sm:$0xff] (!%p394_p9)  ;;  %v3289_v7 = vld [vmem:[%s4323_s1 + $0x18] sm:$0xff] (!%p394_p9)   ;;  %vm658_vm3 = vcmask (!%p394_p9), 523264  }
  0x13   : > { %2965 = vmatpush3.bf16.msra.mxu0 (!%p394_p9), %v3286_v0  ;;  %2980 = vmatprep.mubr.msk.bf16.mxu0 (!%p394_p9), %vm3448_vm0, %v3447_v1  ;;  %v2583_v6 = vld [vmem:[%s4325_s3 + $0x10] sm:$0xff] (!%p394_p9)  ;;  %v574_v8 = vld [vmem:[%s4325_s3 + $0x8] sm:$0xff] (!%p394_p9)  ;;  %v2584_v9 = vld [vmem:[%s4325_s3 + $0x18] sm:$0xff] (!%p394_p9)  ;;  %v3717_v45 = vshrl.u32 (!%p394_p9), %v608_v38, 7  ;;  %vm2432_vm7 = vcmask (!%p394_p9), 519168   ;;  %s2846_s20 = sshll.u32 (!%p394_p9), %s3544_s29, 8 }
  0x14   : > { %2966 = vmatprep.subr.bf16.mxu0 (!%p394_p9), %v3447_v1  ;;  %2992 = vmatprep.mubr.msk.bf16.mxu1 (!%p394_p9), %vm3448_vm0, %v3447_v1  ;;  %v3290_v10 = vld [vmem:[%s4323_s1 + $0x20] sm:$0xff] (!%p394_p9)   ;;  %v2586_v12 = vld [vmem:[%s4325_s3 + $0x28] sm:$0xff] (!%p394_p9)  ;;  %v2587_v14 = vld [vmem:[%s4325_s3 + $0x30] sm:$0xff] (!%p394_p9)  ;;  %s3450_s27 = smov (!%p394_p9), [#allocation2]  }
  0x15   : > { %3284 = vset.pattern.permute.xlu0 (!%p394_p9), %v3449_v3  ;;  %3285 = vset.pattern.permute.xlu1 (!%p394_p9), %v3449_v3  ;;  %v2585_v11 = vld [vmem:[%s4325_s3 + $0x20] sm:$0xff] (!%p394_p9)  ;;  %v3291_v13 = vld [vmem:[%s4323_s1 + $0x28] sm:$0xff] (!%p394_p9)   ;;  %v2588_v15 = vld [vmem:[%s4325_s3 + $0x38] sm:$0xff] (!%p394_p9)  ;;  %vm610_vm1 = vcmp.lt.s32.totalorder (!%p394_p9), %v3717_v45, 5  ;;  %vm967_vm2 = vcmp.lt.s32.totalorder (!%p394_p9), %v3717_v45, 1  ;;  %vm773_vm4 = vcmp.lt.s32.totalorder (!%p394_p9), %v3717_v45, 4 }
  0x16   : > { %615 = vperm.xlu0 (!%p394_p9), %3284, %v573_v5   ;;  %778 = vperm.xlu1 (!%p394_p9), %3285, %v2583_v6   ;;  %v3292_v16 = vld [vmem:[%s4323_s1 + $0x30] sm:$0xff] (!%p394_p9)   ;;  %v2590_v18 = vld [vmem:[%s4325_s3 + $0x58] sm:$0xff] (!%p394_p9)  ;;  %v2591_v20 = vld [vmem:[%s4325_s3 + $0x60] sm:$0xff] (!%p394_p9)  ;;  %vm870_vm5 = vcmp.lt.s32.totalorder (!%p394_p9), %v3717_v45, 3  ;;  %vm1064_vm6 = vcmp.lt.s32.totalorder (!%p394_p9), %v3717_v45, 7  ;;  %s3387_s30 = sshll.u32 (!%p394_p9), %s3450_s27, 4  ;;  %s3388_s30 = int_to_ptr.vmem [resolvable:$false] %s3387_s30 }
  0x17   : > { %2967 = vmatpush3.bf16.msra.mxu0 (!%p394_p9), %v3287_v2  ;;  %v2589_v17 = vld [vmem:[%s4325_s3 + $0x50] sm:$0xff] (!%p394_p9)  ;;  %v3293_v19 = vld [vmem:[%s4323_s1 + $0x38] sm:$0xff] (!%p394_p9)   ;;  %v2592_v21 = vld [vmem:[%s4325_s3 + $0x68] sm:$0xff] (!%p394_p9)  ;;  %s3389_s15 = scalar_lea.vmem (!%p394_p9), %s3388_s30, 512 }
  0x18   : > { %2968 = vmatprep.subr.bf16.mxu0 (!%p394_p9), %v3447_v1  ;;  %v2593_v23 = vld [vmem:[%s4325_s3 + $0x70] sm:$0xff] (!%p394_p9)  ;;  %v3295_v24 = vld [vmem:[%s4328_s6] sm:$0xff] (!%p394_p9)   ;;  %v2594_v26 = vld [vmem:[%s4325_s3 + $0x78] sm:$0xff] (!%p394_p9) }
  0x19   : > { %s3586_s24 = scalar_select %p442_p10, %s3544_s29, 1  ;;  %v3296_v25 = vld [vmem:[%s4328_s6 + $0x60] sm:$0xff]   ;;  %2985 = vmatpush3.bf16.msra.mxu1 %v3295_v24  ;;  %v2596_v28 = vld [vmem:[%s4325_s3 + $0x88] sm:$0xff]  ;;  %v3299_v31 = vld [vmem:[%s4328_s6 + $0x10] sm:$0xff]  }
  0x1a   : > { %620 = vperm.xlu0 %3284, %v574_v8   ;;  %783 = vperm.xlu1 %3285, %v2584_v9   ;;  %v2595_v27 = vld [vmem:[%s4325_s3 + $0x80] sm:$0xff]  ;;  %v3297_v29 = vld [vmem:[%s4328_s6 + $0x8] sm:$0xff]   ;;  %v3300_v32 = vld [vmem:[%s4328_s6 + $0x70] sm:$0xff]  }
  0x1b   : > { %s4339_s16 = sshll.u32 %s3586_s24, 3  ;;  %2969 = vmatpush3.bf16.msra.mxu0 %v3288_v4  ;;  %2986 = vmatprep.subr.bf16.mxu1 %v3447_v1  ;;  %v3298_v30 = vld [vmem:[%s4328_s6 + $0x68] sm:$0xff]   ;;  %v3301_v33 = vld [vmem:[%s4328_s6 + $0x18] sm:$0xff]   ;;  %v2573_v41 = vld [vmem:[%s4324_s2] ss:$0 sm:$0xff]  ;;  %s4347_s23 = sshll.u32 %s3586_s24, 3 }
  0x1c   : > { %s3598_s22 = scalar_lea.vmem %s4346_s0, %s4339_s16  ;;  %2970 = vmatprep.subr.bf16.mxu0 %v3447_v1  ;;  %v3302_v34 = vld [vmem:[%s4328_s6 + $0x78] sm:$0xff]   ;;  %v3303_v60 = vld [vmem:[%s4328_s6 + $0x80] sm:$0xff]   ;;  %v3305_v5 = vld [vmem:[%s4328_s6 + $0x88] sm:$0xff]   ;;  %s439_s16 = sand.u32 1, %s3437_s26  }
  0x1d   : > { %v3294_v22 = vld [vmem:[%s3598_s22] sm:$0xff]   ;;  %2987 = vmatpush3.bf16.msra.mxu1 %v3297_v29  ;;  %v3306_v6 = vld [vmem:[%s4328_s6 + $0xc8] sm:$0xff]   ;;  %v3307_v9 = vld [vmem:[%s4328_s6 + $0x90] sm:$0xff]   ;;  %s2568_s21 = sshll.u32 %s439_s16, 4  ;;  %s451_s14 = scalar_lea.vmem %s4334_s12, %s4347_s23 }
  0x1e   : > { %875 = vperm.xlu0 %3284, %v2585_v11   ;;  %880 = vperm.xlu1 %3285, %v2586_v12   ;;  %v3304_v3 = vld [vmem:[%s4328_s6 + $0xc0] sm:$0xff]   ;;  %v3309_v11 = vld [vmem:[%s4328_s6 + $0x98] sm:$0xff]   ;;  %v3314_v24 = vld [vmem:[%s4328_s6 + $0x108] sm:$0xff]   ;;  %s441_s17 = scalar_lea.vmem [#allocation2], %s2568_s21  ;;  %s4274_s22 = scalar_lea.hbm %s4335_s13, %s2846_s20 }
  0x1f   : > { %2971 = vmatpush3.bf16.msra.mxu0 %v3289_v7  ;;  %2988 = vmatprep.subr.bf16.mxu1 %v3447_v1  ;;  %s2477_s0 = sshll.u32 %s441_s17, 4  ;;  %s4281_s29 = scalar_lea.sflag [#allocation3], %s439_s16  ;;  %s4276_s0 = int_to_ptr.vmem [resolvable:$true] %s2477_s0 }
  0x20   : > { %2972 = vmatprep.subr.bf16.mxu0 %v3447_v1  ;;  %s3383_s21 = scalar_lea.vmem %s4276_s0, 256  ;;  %p3390_p0 = scmp.lt.s32.totalorder %s4276_s0, %s3388_s30 }
  0x21   : > { %2989 = vmatpush3.bf16.msra.mxu1 %v3299_v31  ;;  %p3384_p11 = scmp.ne.s32.totalorder %s4276_s0, %s3383_s21  ;;  %p3391_p1 = scmp.lt.s32.totalorder %s3389_s15, %s3383_s21 }
  0x22   : > { %972 = vperm.xlu0 %3284, %v2587_v14   ;;  %977 = vperm.xlu1 %3285, %v2588_v15   ;;  %v3310_v14 = vld [vmem:[%s4328_s6 + $0xd8] sm:$0xff]  }
  0x23   : > { %2973 = vmatpush3.bf16.msra.mxu0 %v3290_v10  ;;  %2990 = vmatprep.subr.bf16.mxu1 %v3447_v1  ;;  %v3308_v10 = vld [vmem:[%s4328_s6 + $0xd0] sm:$0xff]   ;;  %p3385_p12 = pnand %p3384_p11, %p3561_p5  ;;  %p3392_p2 = por %p3391_p1, %p3390_p0 }
  0x24   : > { %2974 = vmatprep.subr.bf16.mxu0 %v3447_v1 }
  0x25   : > { %2991 = vmatpush3.bf16.msra.mxu1 %v3301_v33  ;;  %p3386_p13 = pneg %p3385_p12 }
  0x26   : > { %1069 = vperm.xlu0 %3284, %v2589_v17   ;;  %1074 = vperm.xlu1 %3285, %v2590_v18   ;;  %v3311_v17 = vld [vmem:[%s4328_s6 + $0x20] sm:$0xff]  }
  0x27   : > { %2975 = vmatpush3.bf16.msra.mxu0 %v3291_v13  ;;  %2996 = vmatprep.subr.bf16.mxu1 %v3447_v1  ;;  %p3393_p3 = pnand %p3392_p2, %p3386_p13 }
  0x28   : > { %2976 = vmatprep.subr.bf16.mxu0 %v3447_v1 }
  0x2a   : > { %1161 = vperm.xlu0 %3284, %v2591_v20   ;;  %1166 = vperm.xlu1 %3285, %v2592_v21   ;;  %v3313_v21 = vld [vmem:[%s4328_s6 + $0x28] sm:$0xff]  }
  0x2b   : > { %2977 = vmatpush3.bf16.msra.mxu0 %v3292_v16 }
  0x2c   : > { %2978 = vmatprep.subr.bf16.mxu0 %v3447_v1 }
  0x2e   : > { %1253 = vperm.xlu0 %3284, %v2593_v23   ;;  %1258 = vperm.xlu1 %3285, %v2594_v26  }
  0x2f   : > { %2979 = vmatpush3.bf16.msra.mxu0 %v3293_v19  ;;  %v3312_v19 = vld [vmem:[%s4328_s6 + $0x100] sm:$0xff]  }
  0x30   : > { %3032 = vmatprep.subr.bf16.mxu0 %v3447_v1 }
  0x32   : > { %2981 = vmatmul.mubr.bf16.vlgmr.msra.gmra.mrb[0].mxu0 %v3294_v22  ;;  %1345 = vperm.xlu0 %3284, %v2595_v27  }
  0x33   : > { %3033 = vmatpush3.bf16.msra.mxu0 %v3296_v25  ;;  %3040 = vmatprep.mubr.msk.bf16.mxu0 %vm3448_vm0, %v3447_v1 }
  0x34   : > { %3034 = vmatprep.subr.bf16.mxu0 %v3447_v1  ;;  %1350 = vperm.xlu1 %3285, %v2596_v28   ;;  %v3315_v28 = vld [vmem:[%s4328_s6 + $0x30] sm:$0xff]  }
  0x37   : > { %3035 = vmatpush3.bf16.msra.mxu0 %v3298_v30 }
  0x38   : > { %3036 = vmatprep.subr.bf16.mxu0 %v3447_v1 }
  0x3b   : > { %3037 = vmatpush3.bf16.msra.mxu0 %v3300_v32  ;;  %v3316_v32 = vld [vmem:[%s4328_s6 + $0x110] sm:$0xff]  }
  0x3c   : > { %3038 = vmatprep.subr.bf16.mxu0 %v3447_v1 }
  0x3f   : > { %3039 = vmatpush3.bf16.msra.mxu0 %v3302_v34 }
  0x40   : > { %3056 = vmatprep.subr.bf16.mxu0 %v3447_v1 }
  0x95   : > { %v3704_v35 = vpop.permute.xlu0 %615  ;;  %v3706_v36 = vpop.permute.xlu1 %778 }
  0x99   : > { %v3708_v37 = vpop.permute.xlu0 %620  ;;  %v3710_v39 = vpop.permute.xlu1 %783 }
  0x9d   : > { %v3721_v48 = vpop.permute.xlu0 %875  ;;  %v3723_v49 = vpop.permute.xlu1 %880 }
  0xa1   : > { %v3737_v58 = vpop.permute.xlu0 %972  ;;  %v3739_v59 = vpop.permute.xlu1 %977 }
  0xa5   : > { %v3767_v7 = vpop.permute.xlu0 %1069  ;;  %v3769_v8 = vpop.permute.xlu1 %1074 }
  0xa9   : > { %v3783_v12 = vpop.permute.xlu0 %1161  ;;  %v3785_v13 = vpop.permute.xlu1 %1166 }
  0xad   : > { %v3811_v22 = vpop.permute.xlu1 %1258  ;;  %v3821_v25 = vpop.permute.xlu0 %1253 }
  0xb3   : > { %v3845_v34 = vpop.permute.xlu1 %1350 }
 0x105   : > { %v566_v40 = vpop.f32.mrb[0].mxu0 }
 0x106   : > { %v2982_v42 = vpop.f32.mrb[1].mxu0  ;;  %v3719_v47 = vadd.f32 %v2573_v41, %v566_v40  ;;  %v3317_v40 = vld [vmem:[%s4328_s6 + $0x38] sm:$0xff]  }
 0x107   : > { %v569_v43 = vpop.f32.mrb[2].mxu0 }
 0x108   : > { %v3715_v44 = vadd.f32 %v2573_v41, %v569_v43  ;;  %v2983_v46 = vpop.f32.mrb[3].mxu0  ;;  %v606_v51 = vrot.slane %v3719_v47, 3  ;;  %v965_v55 = vrot.slane %v3719_v47, 7  ;;  %v771_v26 = vrot.slane %v3719_v47, 4  ;;  %v3857_v43 = vpop.permute.xlu0 %1345 }
 0x109   : > { %v868_v31 = vrot.slane %v3719_v47, 5  ;;  %v3318_v46 = vld [vmem:[%s4328_s6 + $0x118] sm:$0xff]  }
 0x10a   : > { %v607_v50 = vrot.slane %v3715_v44, 3  ;;  %v966_v52 = vrot.slane %v3715_v44, 7  ;;  %v596_v18 = vpack.c.bf16 %v3715_v44, %v3719_v47  ;;  %v772_v23 = vrot.slane %v3715_v44, 4 }
 0x10b   : > { %v869_v27 = vrot.slane %v3715_v44, 5 }
 0x10c   : > { %v611_v53 = vsel %vm610_vm1, %v606_v51, %v607_v50  ;;  %v612_v54 = vsel %vm610_vm1, %v607_v50, %v606_v51  ;;  %v968_v61 = vsel %vm967_vm2, %v965_v55, %v966_v52  ;;  %v969_v62 = vsel %vm967_vm2, %v966_v52, %v965_v55  ;;  %v3319_v52 = vld [vmem:[%s4328_s6 + $0x40] sm:$0xff]   ;;  %v3320_v55 = vld [vmem:[%s4328_s6 + $0x48] sm:$0xff]  }
 0x10d   : > { %v623_v56 = vmul.f32 %v3704_v35, %v612_v54  ;;  %v624_v57 = vmul.f32 %v3708_v37, %v611_v53  ;;  %v980_v0 = vmul.f32 %v3737_v58, %v969_v62  ;;  %v981_v2 = vmul.f32 %v3739_v59, %v968_v61  ;;  %v3323_v62 = vld [vmem:[%s4328_s6 + $0xa0] sm:$0xff]  }
 0x10e   : > { %v1169_v15 = vmul.f32 %v3783_v12, %v611_v53  ;;  %v1170_v16 = vmul.f32 %v3785_v13, %v612_v54  ;;  %v3832_v29 = vsel %vm773_vm4, %v771_v26, %v772_v23  ;;  %v3836_v30 = vsel %vm773_vm4, %v772_v23, %v771_v26  ;;  %v3331_v23 = vld [vmem:[%s4330_s8] sm:$0xff]   ;;  %v3333_v26 = vld [vmem:[%s4330_s8 + $0x10] sm:$0xff]  }
 0x10f   : > { %v625_v63 = vpack.c.bf16 %v624_v57, %v623_v56  ;;  %v982_v4 = vpack.c.bf16 %v981_v2, %v980_v0  ;;  %v871_v33 = vsel %vm870_vm5, %v868_v31, %v869_v27  ;;  %v872_v38 = vsel %vm870_vm5, %v869_v27, %v868_v31  ;;  %v3321_v56 = vld [vmem:[%s4328_s6 + $0x50] sm:$0xff]   ;;  %v3322_v57 = vld [vmem:[%s4328_s6 + $0x58] sm:$0xff]   ;;  %v3324_v0 = vld [vmem:[%s4328_s6 + $0xa8] sm:$0xff]  }
 0x110   : > { %v1171_v20 = vpack.c.bf16 %v1170_v16, %v1169_v15  ;;  %v786_v41 = vmul.f32 %v3706_v36, %v3836_v30  ;;  %v787_v42 = vmul.f32 %v3710_v39, %v3832_v29  ;;  %v1353_v50 = vmul.f32 %v3857_v43, %v871_v33  ;;  %v3328_v16 = vld [vmem:[%s4328_s6 + $0xe8] sm:$0xff]   ;;  %v3334_v27 = vld [vmem:[%s4330_s8 + $0x18] sm:$0xff]  }
 0x111   : > { %2993 = vmatmul.mubr.msk.bf16.vlgmr.msra.gmra.mrb[0].mxu1 %vm658_vm3, %v625_v63  ;;  %3041 = vmatmul.mubr.msk.bf16.vlgmr.msra.gmra.mrb[4].mxu0 %vm658_vm3, %v982_v4  ;;  %v1354_v51 = vmul.f32 %v3845_v34, %v872_v38  ;;  %v883_v61 = vmul.f32 %v3721_v48, %v872_v38  ;;  %v1063_v2 = vrot.slane %v3715_v44, 1  ;;  %v1062_v4 = vrot.slane %v3719_v47, 1  ;;  %v3338_v31 = vld [vmem:[%s4330_s8 + $0x38] sm:$0xff]  }
 0x112   : > { %2997 = vmatpush3.bf16.msra.mxu1 %v3303_v60  ;;  %3004 = vmatprep.mubr.msk.bf16.mxu1 %vm3448_vm0, %v3447_v1  ;;  %v788_v53 = vpack.c.bf16 %v787_v42, %v786_v41  ;;  %v884_v60 = vmul.f32 %v3723_v49, %v871_v33 }
 0x113   : > { %2998 = vmatprep.subr.bf16.mxu1 %v3447_v1  ;;  %3057 = vmatpush3.bf16.msra.mxu0 %v3304_v3  ;;  %v1355_v54 = vpack.c.bf16 %v1354_v51, %v1353_v50  ;;  %v3325_v3 = vld [vmem:[%s4328_s6 + $0xb0] sm:$0xff]  }
 0x114   : > { %3064 = vmatprep.mubr.msk.bf16.mxu0 %vm3448_vm0, %v3447_v1  ;;  %3058 = vmatprep.subr.bf16.mxu0 %v3447_v1  ;;  %v885_v63 = vpack.c.bf16 %v884_v60, %v883_v61 }
 0x116   : > { %2999 = vmatpush3.bf16.msra.mxu1 %v3305_v5  ;;  %v1065_v5 = vsel %vm1064_vm6, %v1062_v4, %v1063_v2 }
 0x117   : > { %3000 = vmatprep.subr.bf16.mxu1 %v3447_v1  ;;  %3059 = vmatpush3.bf16.msra.mxu0 %v3306_v6  ;;  %v1066_v6 = vsel %vm1064_vm6, %v1063_v2, %v1062_v4 }
 0x118   : > { %3060 = vmatprep.subr.bf16.mxu0 %v3447_v1 }
 0x11a   : > { %3001 = vmatpush3.bf16.msra.mxu1 %v3307_v9  ;;  %v3326_v9 = vld [vmem:[%s4328_s6 + $0xb8] sm:$0xff]  }
 0x11b   : > { %3002 = vmatprep.subr.bf16.mxu1 %v3447_v1  ;;  %3061 = vmatpush3.bf16.msra.mxu0 %v3308_v10  ;;  %v1077_v10 = vmul.f32 %v3767_v7, %v1065_v5 }
 0x11c   : > { %3062 = vmatprep.subr.bf16.mxu0 %v3447_v1 }
 0x11e   : > { %3003 = vmatpush3.bf16.msra.mxu1 %v3309_v11  ;;  %v1078_v11 = vmul.f32 %v3769_v8, %v1066_v6 }
 0x11f   : > { %3008 = vmatprep.subr.bf16.mxu1 %v3447_v1  ;;  %3063 = vmatpush3.bf16.msra.mxu0 %v3310_v14  ;;  %v3327_v14 = vld [vmem:[%s4328_s6 + $0xe0] sm:$0xff]  }
 0x120   : > { %3080 = vmatprep.subr.bf16.mxu0 %v3447_v1  ;;  %v1079_v15 = vpack.c.bf16 %v1078_v11, %v1077_v10 }
 0x121   : > { %3005 = vmatmul.mubr.msk.bf16.vlgmr.msra.gmra.mrb[4].mxu1 %vm658_vm3, %v596_v18  ;;  %v3330_v18 = vld [vmem:[%s4328_s6 + $0xf8] sm:$0xff]  }
 0x122   : > { %3009 = vmatpush3.bf16.msra.mxu1 %v3311_v17  ;;  %3016 = vmatprep.mubr.msk.bf16.mxu1 %vm3448_vm0, %v3447_v1  ;;  %v3329_v17 = vld [vmem:[%s4328_s6 + $0xf0] sm:$0xff]  }
 0x123   : > { %3065 = vmatmul.mubr.msk.bf16.vlgmr.msra.gmra.mrb[8].mxu0 %vm658_vm3, %v1171_v20  ;;  %3010 = vmatprep.subr.bf16.mxu1 %v3447_v1  ;;  %v1262_v20 = vmul.f32 %v3811_v22, %v3836_v30  ;;  %v3337_v30 = vld [vmem:[%s4330_s8 + $0x30] sm:$0xff]  }
 0x124   : > { %3081 = vmatpush3.bf16.msra.mxu0 %v3312_v19  ;;  %3088 = vmatprep.mubr.msk.bf16.mxu0 %vm3448_vm0, %v3447_v1  ;;  %v1261_v19 = vmul.f32 %v3821_v25, %v3832_v29  ;;  %v3336_v29 = vld [vmem:[%s4330_s8 + $0x28] sm:$0xff]  }
 0x125   : > { %3082 = vmatprep.subr.bf16.mxu0 %v3447_v1 }
 0x126   : > { %3011 = vmatpush3.bf16.msra.mxu1 %v3313_v21  ;;  %v1263_v21 = vpack.c.bf16 %v1262_v20, %v1261_v19 }
 0x127   : > { %3012 = vmatprep.subr.bf16.mxu1 %v3447_v1 }
 0x128   : > { %3083 = vmatpush3.bf16.msra.mxu0 %v3314_v24  ;;  %v3332_v24 = vld [vmem:[%s4330_s8 + $0x8] sm:$0xff]  }
 0x129   : > { %3084 = vmatprep.subr.bf16.mxu0 %v3447_v1 }
 0x12a   : > { %3013 = vmatpush3.bf16.msra.mxu1 %v3315_v28  ;;  %v3335_v28 = vld [vmem:[%s4330_s8 + $0x20] sm:$0xff]  }
 0x12b   : > { %3014 = vmatprep.subr.bf16.mxu1 %v3447_v1 }
 0x12c   : > { %3085 = vmatpush3.bf16.msra.mxu0 %v3316_v32  ;;  %v3339_v32 = vld [vmem:[%s4331_s9] sm:$0xff]  }
 0x12d   : > { %3086 = vmatprep.subr.bf16.mxu0 %v3447_v1 }
 0x12e   : > { %3015 = vmatpush3.bf16.msra.mxu1 %v3317_v40 }
 0x12f   : > { %3020 = vmatprep.subr.bf16.mxu1 %v3447_v1 }
 0x130   : > { %3087 = vmatpush3.bf16.msra.mxu0 %v3318_v46 }
 0x131   : > { %3017 = vmatmul.mubr.msk.bf16.vlgmr.msra.gmra.mrb[8].mxu1 %vm658_vm3, %v788_v53  ;;  %3112 = vmatprep.subr.bf16.mxu0 %v3447_v1 }
 0x132   : > { %3021 = vmatpush3.bf16.msra.mxu1 %v3319_v52  ;;  %3028 = vmatprep.mubr.msk.bf16.mxu1 %vm3448_vm0, %v3447_v1 }
 0x133   : > { %3089 = vmatmul.mubr.msk.bf16.vlgmr.msra.gmra.mrb[12].mxu0 %vm658_vm3, %v1355_v54  ;;  %3022 = vmatprep.subr.bf16.mxu1 %v3447_v1 }
 0x134   : > { %3120 = vmatprep.mubr.msk.bf16.mxu0 %vm3448_vm0, %v3447_v1  ;;  %3113 = vmatpush3.bf16.msra.mxu0 %v3339_v32 }
 0x135   : > { %3114 = vmatprep.subr.bf16.mxu0 %v3447_v1 }
 0x136   : > { %3023 = vmatpush3.bf16.msra.mxu1 %v3320_v55 }
 0x137   : > { %3024 = vmatprep.subr.bf16.mxu1 %v3447_v1 }
 0x13a   : > { %3025 = vmatpush3.bf16.msra.mxu1 %v3321_v56 }
 0x13b   : > { %3026 = vmatprep.subr.bf16.mxu1 %v3447_v1 }
 0x13e   : > { %3027 = vmatpush3.bf16.msra.mxu1 %v3322_v57 }
 0x13f   : > { %3044 = vmatprep.subr.bf16.mxu1 %v3447_v1 }
 0x141   : > { %3029 = vmatmul.mubr.msk.bf16.vlgmr.msra.gmra.mrb[12].mxu1 %vm658_vm3, %v885_v63 }
 0x142   : > { %3045 = vmatpush3.bf16.msra.mxu1 %v3323_v62  ;;  %3052 = vmatprep.mubr.msk.bf16.mxu1 %vm3448_vm0, %v3447_v1 }
 0x143   : > { %3046 = vmatprep.subr.bf16.mxu1 %v3447_v1 }
 0x146   : > { %3047 = vmatpush3.bf16.msra.mxu1 %v3324_v0 }
 0x147   : > { %3048 = vmatprep.subr.bf16.mxu1 %v3447_v1 }
 0x14a   : > { %3049 = vmatpush3.bf16.msra.mxu1 %v3325_v3 }
 0x14b   : > { %3050 = vmatprep.subr.bf16.mxu1 %v3447_v1 }
 0x14e   : > { %3051 = vmatpush3.bf16.msra.mxu1 %v3326_v9 }
 0x14f   : > { %3068 = vmatprep.subr.bf16.mxu1 %v3447_v1 }
 0x151   : > { %3053 = vmatmul.mubr.msk.bf16.vlgmr.msra.gmra.mrb[16].mxu1 %vm658_vm3, %v1079_v15 }
 0x152   : > { %3069 = vmatpush3.bf16.msra.mxu1 %v3327_v14  ;;  %3076 = vmatprep.mubr.msk.bf16.mxu1 %vm3448_vm0, %v3447_v1 }
 0x153   : > { %3070 = vmatprep.subr.bf16.mxu1 %v3447_v1 }
 0x156   : > { %3071 = vmatpush3.bf16.msra.mxu1 %v3328_v16 }
 0x157   : > { %3072 = vmatprep.subr.bf16.mxu1 %v3447_v1 }
 0x15a   : > { %3073 = vmatpush3.bf16.msra.mxu1 %v3329_v17 }
 0x15b   : > { %3074 = vmatprep.subr.bf16.mxu1 %v3447_v1 }
 0x15e   : > { %3075 = vmatpush3.bf16.msra.mxu1 %v3330_v18 }
 0x15f   : > { %3092 = vmatprep.subr.bf16.mxu1 %v3447_v1 }
 0x161   : > { %3077 = vmatmul.mubr.msk.bf16.vlgmr.msra.gmra.mrb[20].mxu1 %vm658_vm3, %v1263_v21 }
 0x162   : > { %3108 = vmatprep.mubr.msk.bf16.mxu1 %vm3448_vm0, %v3447_v1  ;;  %3093 = vmatpush3.bf16.msra.mxu1 %v3331_v23 }
 0x163   : > { %3094 = vmatprep.subr.bf16.mxu1 %v3447_v1 }
 0x166   : > { %3095 = vmatpush3.bf16.msra.mxu1 %v3332_v24 }
 0x167   : > { %3096 = vmatprep.subr.bf16.mxu1 %v3447_v1 }
 0x16a   : > { %3097 = vmatpush3.bf16.msra.mxu1 %v3333_v26 }
 0x16b   : > { %3098 = vmatprep.subr.bf16.mxu1 %v3447_v1 }
 0x16e   : > { %3099 = vmatpush3.bf16.msra.mxu1 %v3334_v27 }
 0x16f   : > { %3100 = vmatprep.subr.bf16.mxu1 %v3447_v1 }
 0x172   : > { %3101 = vmatpush3.bf16.msra.mxu1 %v3335_v28 }
 0x173   : > { %3102 = vmatprep.subr.bf16.mxu1 %v3447_v1 }
 0x176   : > { %3103 = vmatpush3.bf16.msra.mxu1 %v3336_v29 }
 0x177   : > { %3104 = vmatprep.subr.bf16.mxu1 %v3447_v1 }
 0x17a   : > { %3105 = vmatpush3.bf16.msra.mxu1 %v3337_v30 }
 0x17b   : > { %3106 = vmatprep.subr.bf16.mxu1 %v3447_v1 }
 0x17e   : > { %3107 = vmatpush3.bf16.msra.mxu1 %v3338_v31 }
 0x17f   : > { %3136 = vmatprep.subr.bf16.mxu1 %v3447_v1 }
 0x1e4   : > { %v696_v33 = vpop.f32.mrb[0].mxu1  ;;  %v1053_v40 = vpop.f32.mrb[4].mxu0 }
 0x1e5   : > { %v2994_v38 = vpop.f32.mrb[1].mxu1  ;;  %v3042_v42 = vpop.f32.mrb[5].mxu0 }
 0x1e6   : > { %v699_v41 = vpop.f32.mrb[2].mxu1  ;;  %v1056_v50 = vpop.f32.mrb[6].mxu0  ;;  %v2706_v42 = vld [vmem:[%s4329_s7] ss:$0 sm:$0xff] }
 0x1e7   : > { %v2995_v46 = vpop.f32.mrb[3].mxu1  ;;  %v3043_v51 = vpop.f32.mrb[7].mxu0 }
 0x1f4   : > { %v764_v52 = vpop.f32.mrb[4].mxu1 }
 0x1f5   : > { %v765_v53 = vadd.f32 %v764_v52, %v696_v33  ;;  %v3006_v54 = vpop.f32.mrb[5].mxu1 }
 0x1f6   : > { %v1242_v55 = vpop.f32.mrb[8].mxu0  ;;  %v767_v56 = vpop.f32.mrb[6].mxu1 }
 0x1f7   : > { %v3066_v57 = vpop.f32.mrb[9].mxu0  ;;  %v768_v60 = vadd.f32 %v767_v56, %v699_v41  ;;  %v3007_v61 = vpop.f32.mrb[7].mxu1 }
 0x1f8   : > { %v1245_v62 = vpop.f32.mrb[10].mxu0  ;;  %v3341_v61 = vld [vmem:[%s4331_s9 + $0x8] sm:$0xff]  }
 0x1f9   : > { %v3067_v63 = vpop.f32.mrb[11].mxu0  ;;  %3115 = vmatpush3.bf16.msra.mxu0 %v3341_v61 }
 0x1fa   : > { %v3343_v63 = vld [vmem:[%s4331_s9 + $0x10] sm:$0xff]   ;;  %3116 = vmatprep.subr.bf16.mxu0 %v3447_v1 }
 0x1fd   : > { %3117 = vmatpush3.bf16.msra.mxu0 %v3343_v63  ;;  %v3362_v63 = vld [vmem:[%s4331_s9 + $0xd8] sm:$0xff]  }
 0x1fe   : > { %3118 = vmatprep.subr.bf16.mxu0 %v3447_v1 }
 0x204   : > { %v859_v0 = vpop.f32.mrb[8].mxu1 }
 0x205   : > { %v866_v2 = vadd.f32 %v859_v0, %v765_v53  ;;  %v3018_v3 = vpop.f32.mrb[9].mxu1  ;;  %v3344_v0 = vld [vmem:[%s4331_s9 + $0x30] sm:$0xff]  }
 0x206   : > { %v1426_v4 = vpop.f32.mrb[12].mxu0  ;;  %v862_v5 = vpop.f32.mrb[10].mxu1  ;;  %v3346_v3 = vld [vmem:[%s4331_s9 + $0x38] sm:$0xff]  }
 0x207   : > { %v3090_v6 = vpop.f32.mrb[13].mxu0  ;;  %v867_v9 = vadd.f32 %v862_v5, %v768_v60  ;;  %v3019_v10 = vpop.f32.mrb[11].mxu1 }
 0x208   : > { %v1429_v11 = vpop.f32.mrb[14].mxu0 }
 0x209   : > { %v3091_v14 = vpop.f32.mrb[15].mxu0 }
 0x214   : > { %v956_v15 = vpop.f32.mrb[12].mxu1 }
 0x215   : > { %v963_v16 = vadd.f32 %v956_v15, %v866_v2  ;;  %v3030_v17 = vpop.f32.mrb[13].mxu1  ;;  %v3345_v2 = vld [vmem:[%s4331_s9 + $0x18] sm:$0xff]  }
 0x216   : > { %v959_v18 = vpop.f32.mrb[14].mxu1  ;;  %3119 = vmatpush3.bf16.msra.mxu0 %v3345_v2 }
 0x217   : > { %v964_v19 = vadd.f32 %v959_v18, %v867_v9  ;;  %v3031_v20 = vpop.f32.mrb[15].mxu1  ;;  %v1060_v21 = vadd.f32 %v1053_v40, %v963_v16  ;;  %3124 = vmatprep.subr.bf16.mxu0 %v3447_v1 }
 0x219   : > { %v1061_v23 = vadd.f32 %v1056_v50, %v964_v19 }
 0x224   : > { %v1150_v24 = vpop.f32.mrb[16].mxu1 }
 0x225   : > { %v1157_v26 = vadd.f32 %v1150_v24, %v1060_v21  ;;  %v3054_v27 = vpop.f32.mrb[17].mxu1 }
 0x226   : > { %v1153_v28 = vpop.f32.mrb[18].mxu1  ;;  %v3348_v27 = vld [vmem:[%s4331_s9 + $0x60] sm:$0xff]  }
 0x227   : > { %v1158_v29 = vadd.f32 %v1153_v28, %v1061_v23  ;;  %v3055_v30 = vpop.f32.mrb[19].mxu1  ;;  %v1249_v31 = vadd.f32 %v1242_v55, %v1157_v26  ;;  %v3340_v55 = vld [vmem:[%s4331_s9 + $0x20] sm:$0xff]  }
 0x228   : > { %v3347_v26 = vld [vmem:[%s4331_s9 + $0x80] sm:$0xff]  }
 0x229   : > { %v1250_v32 = vadd.f32 %v1245_v62, %v1158_v29  ;;  %v3342_v62 = vld [vmem:[%s4331_s9 + $0x28] sm:$0xff]  }
 0x234   : > { %v1334_v33 = vpop.f32.mrb[20].mxu1 }
 0x235   : > { %v1341_v38 = vadd.f32 %v1334_v33, %v1249_v31  ;;  %v3078_v41 = vpop.f32.mrb[21].mxu1  ;;  %v3351_v31 = vld [vmem:[%s4331_s9 + $0x90] sm:$0xff]  }
 0x236   : > { %v1337_v46 = vpop.f32.mrb[22].mxu1  ;;  %v3353_v41 = vld [vmem:[%s4331_s9 + $0x98] sm:$0xff]  }
 0x237   : > { %v1433_v51 = vadd.f32 %v1426_v4, %v1341_v38  ;;  %v1342_v52 = vadd.f32 %v1337_v46, %v1250_v32  ;;  %v3079_v40 = vpop.f32.mrb[23].mxu1  ;;  %v3352_v32 = vld [vmem:[%s4331_s9 + $0x70] sm:$0xff]  }
 0x238   : > { %v3356_v40 = vld [vmem:[%s4331_s9 + $0xc0] sm:$0xff]  }
 0x239   : > { %v1442_v50 = vadd.f32 %v2706_v42, %v1433_v51  ;;  %v1434_v53 = vadd.f32 %v1429_v11, %v1342_v52  ;;  %v3355_v52 = vld [vmem:[%s4331_s9 + $0x40] sm:$0xff]  }
 0x23b   : > { %v1443_v54 = vadd.f32 %v2706_v42, %v1434_v53  ;;  %v1444_v56 = vmax.f32 %v1442_v50, 0.0  ;;  %v3354_v42 = vld [vmem:[%s4331_s9 + $0x78] sm:$0xff]  }
 0x23d   : > { %v1445_v57 = vmax.f32 %v1443_v54, 0.0 }
 0x23f   : > { %v1446_v60 = vpack.c.bf16 %v1445_v57, %v1444_v56  ;;  %v3359_v57 = vld [vmem:[%s4331_s9 + $0x50] sm:$0xff]  }
 0x241   : > { %3109 = vmatmul.mubr.bf16.vlgmr.msra.gmra.mrb[24].mxu1 %v1446_v60 }
 0x242   : > { %3137 = vmatpush3.bf16.msra.mxu1 %v3340_v55  ;;  %3144 = vmatprep.mubr.msk.bf16.mxu1 %vm3448_vm0, %v3447_v1  ;;  %v3360_v55 = vld [vmem:[%s4331_s9 + $0xd0] sm:$0xff]  }
 0x243   : > { %3138 = vmatprep.subr.bf16.mxu1 %v3447_v1 }
 0x246   : > { %3139 = vmatpush3.bf16.msra.mxu1 %v3342_v62  ;;  %v3361_v62 = vld [vmem:[%s4331_s9 + $0x58] sm:$0xff]  }
 0x247   : > { %3140 = vmatprep.subr.bf16.mxu1 %v3447_v1 }
 0x24a   : > { %3141 = vmatpush3.bf16.msra.mxu1 %v3344_v0 }
 0x24b   : > { %3142 = vmatprep.subr.bf16.mxu1 %v3447_v1 }
 0x24e   : > { %3143 = vmatpush3.bf16.msra.mxu1 %v3346_v3 }
 0x24f   : > { %3160 = vmatprep.subr.bf16.mxu1 %v3447_v1 }
 0x314   : > { %v1545_v4 = vpop.f32.mrb[24].mxu1 }
 0x315   : > { %v4015_v5 = vadd.f32 %v1545_v4, %v3719_v47  ;;  %v3110_v6 = vpop.f32.mrb[25].mxu1 }
 0x316   : > { %v1548_v9 = vpop.f32.mrb[26].mxu1  ;;  %v3363_v6 = vld [vmem:[%s4331_s9 + $0xa0] sm:$0xff]  }
 0x317   : > { %v4018_v10 = vadd.f32 %v1548_v9, %v3715_v44  ;;  %v3111_v11 = vpop.f32.mrb[27].mxu1  ;;  %v1564_v14 = vrot.slane %v4015_v5, 3  ;;  %v1715_v16 = vrot.slane %v4015_v5, 4  ;;  %v1887_v33 = vrot.slane %v4015_v5, 7 }
 0x318   : > { %v1801_v56 = vrot.slane %v4015_v5, 5 }
 0x319   : > { %v1565_v15 = vrot.slane %v4018_v10, 3  ;;  %v1716_v17 = vrot.slane %v4018_v10, 4  ;;  %v1554_v50 = vpack.c.bf16 %v4018_v10, %v4015_v5  ;;  %v1802_v54 = vrot.slane %v4018_v10, 5 }
 0x31a   : > { %v1974_v11 = vrot.slane %v4018_v10, 1 }
 0x31b   : > { %v4026_v18 = vsel %vm610_vm1, %v1564_v14, %v1565_v15  ;;  %v4030_v47 = vsel %vm610_vm1, %v1565_v15, %v1564_v14  ;;  %v1717_v44 = vsel %vm773_vm4, %v1715_v16, %v1716_v17  ;;  %v1718_v19 = vsel %vm773_vm4, %v1716_v17, %v1715_v16  ;;  %v3367_v15 = vld [vmem:[%s4331_s9 + $0xb0] sm:$0xff]  }
 0x31c   : > { %v1568_v20 = vmul.f32 %v4030_v47, %v3704_v35  ;;  %v1569_v21 = vmul.f32 %v4026_v18, %v3708_v37  ;;  %v1719_v23 = vmul.f32 %v1718_v19, %v3706_v36  ;;  %v1720_v24 = vmul.f32 %v1717_v44, %v3710_v39  ;;  %v3349_v35 = vld [vmem:[%s4331_s9 + $0x88] sm:$0xff]   ;;  %v3368_v16 = vld [vmem:[%s4331_s9 + $0x110] sm:$0xff]  }
 0x31d   : > { %v3350_v36 = vld [vmem:[%s4331_s9 + $0x68] sm:$0xff]   ;;  %v1888_v37 = vrot.slane %v4018_v10, 7  ;;  %v4064_v39 = vmul.f32 %v1717_v44, %v3821_v25  ;;  %v4067_v30 = vmul.f32 %v1718_v19, %v3811_v22  ;;  %v1804_v60 = vsel %vm870_vm5, %v1802_v54, %v1801_v56  ;;  %v3370_v44 = vld [vmem:[%s4331_s9 + $0x118] sm:$0xff]  }
 0x31e   : > { %v1570_v28 = vpack.c.bf16 %v1569_v21, %v1568_v20  ;;  %v1721_v29 = vpack.c.bf16 %v1720_v24, %v1719_v23  ;;  %v1803_v61 = vsel %vm870_vm5, %v1801_v56, %v1802_v54  ;;  %v1805_v0 = vmul.f32 %v1804_v60, %v3721_v48  ;;  %v3364_v48 = vld [vmem:[%s4331_s9 + $0x100] sm:$0xff]  }
 0x31f   : > { %v2143_v38 = vpack.c.bf16 %v4067_v30, %v4064_v39  ;;  %v1889_v22 = vsel %vm967_vm2, %v1887_v33, %v1888_v37  ;;  %v1890_v25 = vsel %vm967_vm2, %v1888_v37, %v1887_v33  ;;  %v1806_v2 = vmul.f32 %v1803_v61, %v3723_v49  ;;  %v3371_v23 = vld [vmem:[%s4331_s9 + $0xe0] sm:$0xff]   ;;  %v3381_v37 = vld [vmem:[%s4333_s11 + $0x30] sm:$0xff]   ;;  %v3382_v39 = vld [vmem:[%s4333_s11 + $0x38] sm:$0xff]  }
 0x320   : > { %3121 = vmatmul.mubr.msk.bf16.vlgmr.msra.gmra.mrb[16].mxu0 %vm658_vm3, %v1570_v28  ;;  %3145 = vmatmul.mubr.msk.bf16.vlgmr.msra.gmra.mrb[28].mxu1 %vm658_vm3, %v1721_v29  ;;  %v1891_v46 = vmul.f32 %v1890_v25, %v3737_v58  ;;  %v1892_v51 = vmul.f32 %v1889_v22, %v3739_v59  ;;  %v3357_v58 = vld [vmem:[%s4331_s9 + $0x48] sm:$0xff]   ;;  %v2059_v3 = vmul.f32 %v4026_v18, %v3783_v12  ;;  %v1973_v14 = vrot.slane %v4015_v5, 1  ;;  %v3377_v28 = vld [vmem:[%s4333_s11 + $0x10] sm:$0xff]   ;;  %v3378_v29 = vld [vmem:[%s4333_s11 + $0x18] sm:$0xff]  }
 0x321   : > { %3125 = vmatpush3.bf16.msra.mxu0 %v3347_v26  ;;  %3161 = vmatpush3.bf16.msra.mxu1 %v3348_v27  ;;  %v3358_v59 = vld [vmem:[%s4331_s9 + $0xc8] sm:$0xff]   ;;  %v2060_v4 = vmul.f32 %v4030_v47, %v3785_v13  ;;  %v1807_v9 = vpack.c.bf16 %v1806_v2, %v1805_v0  ;;  %v3369_v47 = vld [vmem:[%s4331_s9 + $0xb8] sm:$0xff]   ;;  %v2223_v45 = vmul.f32 %v1803_v61, %v3857_v43  ;;  %v3375_v26 = vld [vmem:[%s4333_s11] sm:$0xff]  }
 0x322   : > { %3126 = vmatprep.subr.bf16.mxu0 %v3447_v1  ;;  %3162 = vmatprep.subr.bf16.mxu1 %v3447_v1  ;;  %v1893_v53 = vpack.c.bf16 %v1892_v51, %v1891_v46  ;;  %v3365_v12 = vld [vmem:[%s4331_s9 + $0xa8] sm:$0xff]   ;;  %v1975_v17 = vsel %vm1064_vm6, %v1973_v14, %v1974_v11  ;;  %v1976_v18 = vsel %vm1064_vm6, %v1974_v11, %v1973_v14  ;;  %v3374_v43 = vld [vmem:[%s4331_s9 + $0xf8] sm:$0xff]  }
 0x323   : > { %3132 = vmatprep.mubr.msk.bf16.mxu0 %vm3448_vm0, %v3447_v1  ;;  %3168 = vmatprep.mubr.msk.bf16.mxu1 %vm3448_vm0, %v3447_v1  ;;  %v2061_v49 = vpack.c.bf16 %v2060_v4, %v2059_v3  ;;  %v3366_v13 = vld [vmem:[%s4331_s9 + $0x108] sm:$0xff]   ;;  %v1977_v19 = vmul.f32 %v1975_v17, %v3767_v7  ;;  %v1978_v20 = vmul.f32 %v1976_v18, %v3769_v8 }
 0x324   : > { %v2224_v21 = vmul.f32 %v1804_v60, %v3845_v34  ;;  %v3372_v8 = vld [vmem:[%s4331_s9 + $0xe8] sm:$0xff]   ;;  %v3373_v34 = vld [vmem:[%s4331_s9 + $0xf0] sm:$0xff]  }
 0x325   : > { %3127 = vmatpush3.bf16.msra.mxu0 %v3349_v35  ;;  %3163 = vmatpush3.bf16.msra.mxu1 %v3350_v36  ;;  %v1979_v24 = vpack.c.bf16 %v1978_v20, %v1977_v19  ;;  %v3376_v27 = vld [vmem:[%s4333_s11 + $0x8] sm:$0xff]   ;;  %v3379_v35 = vld [vmem:[%s4333_s11 + $0x20] sm:$0xff]  }
 0x326   : > { %3128 = vmatprep.subr.bf16.mxu0 %v3447_v1  ;;  %3164 = vmatprep.subr.bf16.mxu1 %v3447_v1  ;;  %v2225_v7 = vpack.c.bf16 %v2224_v21, %v2223_v45  ;;  %v3380_v36 = vld [vmem:[%s4333_s11 + $0x28] sm:$0xff]   ;;  %v2824_v21 = vld [vmem:[%s4332_s10] ss:$0 sm:$0xff] }
 0x329   : > { %3129 = vmatpush3.bf16.msra.mxu0 %v3351_v31  ;;  %3165 = vmatpush3.bf16.msra.mxu1 %v3352_v32 }
 0x32a   : > { %3130 = vmatprep.subr.bf16.mxu0 %v3447_v1  ;;  %3166 = vmatprep.subr.bf16.mxu1 %v3447_v1 }
 0x32d   : > { %3131 = vmatpush3.bf16.msra.mxu0 %v3353_v41  ;;  %3167 = vmatpush3.bf16.msra.mxu1 %v3354_v42 }
 0x32e   : > { %3148 = vmatprep.subr.bf16.mxu0 %v3447_v1  ;;  %3184 = vmatprep.subr.bf16.mxu1 %v3447_v1 }
 0x330   : > { %3133 = vmatmul.mubr.msk.bf16.vlgmr.msra.gmra.mrb[20].mxu0 %vm658_vm3, %v1554_v50  ;;  %3169 = vmatmul.mubr.msk.bf16.vlgmr.msra.gmra.mrb[32].mxu1 %vm658_vm3, %v1893_v53 }
 0x331   : > { %3149 = vmatpush3.bf16.msra.mxu0 %v3355_v52  ;;  %3185 = vmatpush3.bf16.msra.mxu1 %v3356_v40 }
 0x332   : > { %3150 = vmatprep.subr.bf16.mxu0 %v3447_v1  ;;  %3186 = vmatprep.subr.bf16.mxu1 %v3447_v1 }
 0x333   : > { %3156 = vmatprep.mubr.msk.bf16.mxu0 %vm3448_vm0, %v3447_v1  ;;  %3192 = vmatprep.mubr.msk.bf16.mxu1 %vm3448_vm0, %v3447_v1 }
 0x335   : > { %3151 = vmatpush3.bf16.msra.mxu0 %v3357_v58  ;;  %3187 = vmatpush3.bf16.msra.mxu1 %v3358_v59 }
 0x336   : > { %3152 = vmatprep.subr.bf16.mxu0 %v3447_v1  ;;  %3188 = vmatprep.subr.bf16.mxu1 %v3447_v1 }
 0x339   : > { %3153 = vmatpush3.bf16.msra.mxu0 %v3359_v57  ;;  %3189 = vmatpush3.bf16.msra.mxu1 %v3360_v55 }
 0x33a   : > { %3154 = vmatprep.subr.bf16.mxu0 %v3447_v1  ;;  %3190 = vmatprep.subr.bf16.mxu1 %v3447_v1 }
 0x33d   : > { %3155 = vmatpush3.bf16.msra.mxu0 %v3361_v62  ;;  %3191 = vmatpush3.bf16.msra.mxu1 %v3362_v63 }
 0x33e   : > { %3172 = vmatprep.subr.bf16.mxu0 %v3447_v1  ;;  %3208 = vmatprep.subr.bf16.mxu1 %v3447_v1 }
 0x340   : > { %3157 = vmatmul.mubr.msk.bf16.vlgmr.msra.gmra.mrb[24].mxu0 %vm658_vm3, %v1807_v9  ;;  %3193 = vmatmul.mubr.msk.bf16.vlgmr.msra.gmra.mrb[36].mxu1 %vm658_vm3, %v2061_v49 }
 0x341   : > { %3173 = vmatpush3.bf16.msra.mxu0 %v3363_v6  ;;  %3209 = vmatpush3.bf16.msra.mxu1 %v3364_v48 }
 0x342   : > { %3174 = vmatprep.subr.bf16.mxu0 %v3447_v1  ;;  %3210 = vmatprep.subr.bf16.mxu1 %v3447_v1 }
 0x343   : > { %3180 = vmatprep.mubr.msk.bf16.mxu0 %vm3448_vm0, %v3447_v1  ;;  %3216 = vmatprep.mubr.msk.bf16.mxu1 %vm3448_vm0, %v3447_v1 }
 0x345   : > { %3175 = vmatpush3.bf16.msra.mxu0 %v3365_v12  ;;  %3211 = vmatpush3.bf16.msra.mxu1 %v3366_v13 }
 0x346   : > { %3176 = vmatprep.subr.bf16.mxu0 %v3447_v1  ;;  %3212 = vmatprep.subr.bf16.mxu1 %v3447_v1 }
 0x349   : > { %3177 = vmatpush3.bf16.msra.mxu0 %v3367_v15  ;;  %3213 = vmatpush3.bf16.msra.mxu1 %v3368_v16 }
 0x34a   : > { %3178 = vmatprep.subr.bf16.mxu0 %v3447_v1  ;;  %3214 = vmatprep.subr.bf16.mxu1 %v3447_v1 }
 0x34d   : > { %3179 = vmatpush3.bf16.msra.mxu0 %v3369_v47  ;;  %3215 = vmatpush3.bf16.msra.mxu1 %v3370_v44 }
 0x34e   : > { %3196 = vmatprep.subr.bf16.mxu0 %v3447_v1 }
 0x350   : > { %3181 = vmatmul.mubr.msk.bf16.vlgmr.msra.gmra.mrb[28].mxu0 %vm658_vm3, %v1979_v24  ;;  %3217 = vmatmul.mubr.msk.bf16.vlgmr.msra.gmra.mrb[40].mxu1 %vm658_vm3, %v2225_v7 }
 0x351   : > { %3197 = vmatpush3.bf16.msra.mxu0 %v3371_v23  ;;  %3204 = vmatprep.mubr.msk.bf16.mxu0 %vm3448_vm0, %v3447_v1 }
 0x352   : > { %3198 = vmatprep.subr.bf16.mxu0 %v3447_v1 }
 0x355   : > { %3199 = vmatpush3.bf16.msra.mxu0 %v3372_v8 }
 0x356   : > { %3200 = vmatprep.subr.bf16.mxu0 %v3447_v1 }
 0x359   : > { %3201 = vmatpush3.bf16.msra.mxu0 %v3373_v34 }
 0x35a   : > { %3202 = vmatprep.subr.bf16.mxu0 %v3447_v1 }
 0x35d   : > { %3203 = vmatpush3.bf16.msra.mxu0 %v3374_v43 }
 0x35e   : > { %3220 = vmatprep.subr.bf16.mxu0 %v3447_v1 }
 0x360   : > { %3205 = vmatmul.mubr.msk.bf16.vlgmr.msra.gmra.mrb[32].mxu0 %vm658_vm3, %v2143_v38 }
 0x361   : > { %3236 = vmatprep.mubr.msk.bf16.mxu0 %vm3448_vm0, %v3447_v1  ;;  %3221 = vmatpush3.bf16.msra.mxu0 %v3375_v26 }
 0x362   : > { %3222 = vmatprep.subr.bf16.mxu0 %v3447_v1 }
 0x365   : > { %3223 = vmatpush3.bf16.msra.mxu0 %v3376_v27 }
 0x366   : > { %3224 = vmatprep.subr.bf16.mxu0 %v3447_v1 }
 0x369   : > { %3225 = vmatpush3.bf16.msra.mxu0 %v3377_v28 }
 0x36a   : > { %3226 = vmatprep.subr.bf16.mxu0 %v3447_v1 }
 0x36d   : > { %3227 = vmatpush3.bf16.msra.mxu0 %v3378_v29 }
 0x36e   : > { %3228 = vmatprep.subr.bf16.mxu0 %v3447_v1 }
 0x371   : > { %3229 = vmatpush3.bf16.msra.mxu0 %v3379_v35 }
 0x372   : > { %3230 = vmatprep.subr.bf16.mxu0 %v3447_v1 }
 0x375   : > { %3231 = vmatpush3.bf16.msra.mxu0 %v3380_v36  ;;  %v2835_v36 = vld [vmem:[%s4326_s4] ss:$0 sm:$0xff] }
 0x376   : > { %3232 = vmatprep.subr.bf16.mxu0 %v3447_v1 }
 0x379   : > { %3233 = vmatpush3.bf16.msra.mxu0 %v3381_v37 }
 0x37a   : > { %3234 = vmatprep.subr.bf16.mxu0 %v3447_v1 }
 0x37d   : > { %3235 = vmatpush3.bf16.msra.mxu0 %v3382_v39 }
 0x3f3   : > { %v1640_v30 = vpop.f32.mrb[16].mxu0  ;;  %v1792_v31 = vpop.f32.mrb[28].mxu1 }
 0x3f4   : > { %v3122_v32 = vpop.f32.mrb[17].mxu0  ;;  %v3146_v33 = vpop.f32.mrb[29].mxu1 }
 0x3f5   : > { %v1643_v38 = vpop.f32.mrb[18].mxu0  ;;  %v1795_v22 = vpop.f32.mrb[30].mxu1 }
 0x3f6   : > { %v3123_v25 = vpop.f32.mrb[19].mxu0  ;;  %v3147_v41 = vpop.f32.mrb[31].mxu1 }
 0x403   : > { %v1708_v42 = vpop.f32.mrb[20].mxu0  ;;  %v1964_v46 = vpop.f32.mrb[32].mxu1 }
 0x404   : > { %v1709_v51 = vadd.f32 %v1708_v42, %v1640_v30  ;;  %v3134_v52 = vpop.f32.mrb[21].mxu0  ;;  %v3170_v40 = vpop.f32.mrb[33].mxu1  ;;  %v2836_v30 = vld [vmem:[%s4327_s5] ss:$0 sm:$0xff] }
 0x405   : > { %v1711_v50 = vpop.f32.mrb[22].mxu0  ;;  %v1967_v53 = vpop.f32.mrb[34].mxu1 }
 0x406   : > { %v1712_v58 = vadd.f32 %v1711_v50, %v1643_v38  ;;  %v3135_v59 = vpop.f32.mrb[23].mxu0  ;;  %v3171_v54 = vpop.f32.mrb[35].mxu1  ;;  %v1799_v1 = vadd.f32 %v1792_v31, %v1709_v51 }
 0x408   : > { %v1800_v56 = vadd.f32 %v1795_v22, %v1712_v58 }
 0x413   : > { %v1878_v57 = vpop.f32.mrb[24].mxu0  ;;  %v2132_v55 = vpop.f32.mrb[36].mxu1 }
 0x414   : > { %v1885_v60 = vadd.f32 %v1878_v57, %v1799_v1  ;;  %v3158_v61 = vpop.f32.mrb[25].mxu0  ;;  %v3194_v62 = vpop.f32.mrb[37].mxu1 }
 0x415   : > { %v1881_v63 = vpop.f32.mrb[26].mxu0  ;;  %v2135_v0 = vpop.f32.mrb[38].mxu1 }
 0x416   : > { %v1886_v2 = vadd.f32 %v1881_v63, %v1800_v56  ;;  %v3159_v3 = vpop.f32.mrb[27].mxu0  ;;  %v3195_v4 = vpop.f32.mrb[39].mxu1  ;;  %v1971_v6 = vadd.f32 %v1964_v46, %v1885_v60 }
 0x418   : > { %v1972_v48 = vadd.f32 %v1967_v53, %v1886_v2 }
 0x423   : > { %v2050_v9 = vpop.f32.mrb[28].mxu0  ;;  %v2296_v49 = vpop.f32.mrb[40].mxu1 }
 0x424   : > { %v2057_v12 = vadd.f32 %v2050_v9, %v1971_v6  ;;  %v3182_v13 = vpop.f32.mrb[29].mxu0  ;;  %v3218_v11 = vpop.f32.mrb[41].mxu1 }
 0x425   : > { %v2053_v14 = vpop.f32.mrb[30].mxu0  ;;  %v2299_v15 = vpop.f32.mrb[42].mxu1 }
 0x426   : > { %v2058_v16 = vadd.f32 %v2053_v14, %v1972_v48  ;;  %v3183_v17 = vpop.f32.mrb[31].mxu0  ;;  %v3219_v18 = vpop.f32.mrb[43].mxu1  ;;  %v2139_v47 = vadd.f32 %v2132_v55, %v2057_v12 }
 0x428   : > { %v2140_v44 = vadd.f32 %v2135_v0, %v2058_v16 }
 0x433   : > { %v2214_v19 = vpop.f32.mrb[32].mxu0 }
 0x434   : > { %v2221_v20 = vadd.f32 %v2214_v19, %v2139_v47  ;;  %v3206_v45 = vpop.f32.mrb[33].mxu0 }
 0x435   : > { %v2217_v23 = vpop.f32.mrb[34].mxu0 }
 0x436   : > { %v2303_v24 = vadd.f32 %v2296_v49, %v2221_v20  ;;  %v2222_v7 = vadd.f32 %v2217_v23, %v2140_v44  ;;  %v3207_v8 = vpop.f32.mrb[35].mxu0 }
 0x438   : > { %v2312_v34 = vadd.f32 %v2824_v21, %v2303_v24  ;;  %v2304_v43 = vadd.f32 %v2299_v15, %v2222_v7 }
 0x43a   : > { %v2313_v26 = vadd.f32 %v2824_v21, %v2304_v43  ;;  %v2314_v27 = vmax.f32 %v2312_v34, 0.0 }
 0x43c   : > { %v2315_v28 = vmax.f32 %v2313_v26, 0.0 }
 0x43e   : > { %v2316_v29 = vpack.c.bf16 %v2315_v28, %v2314_v27 }
 0x440   : > { %3237 = vmatmul.mubr.bf16.vlgmr.msra.gmra.mrb[36].mxu0 %v2316_v29 }
 0x513   : > { %v2415_v35 = vpop.f32.mrb[36].mxu0 }
 0x514   : > { %v2422_v37 = vadd.f32 %v2415_v35, %v4015_v5  ;;  %v3238_v39 = vpop.f32.mrb[37].mxu0 }
 0x515   : > { %v2418_v31 = vpop.f32.mrb[38].mxu0 }
 0x516   : > { %v2844_v32 = vpack.c.bf16 %v2422_v37, %v2422_v37  ;;  %v2442_v33 = vmul.f32 %v2835_v36, %v2422_v37  ;;  %v2423_v38 = vadd.f32 %v2418_v31, %v4018_v10  ;;  %v3239_v22 = vpop.f32.mrb[39].mxu0 }
 0x518   : > { %2433 = vst.msk [vmem:[%s451_s14] sm:$0xf] %vm2432_vm7, %v2844_v32  ;;  %v2451_v5 = vadd.f32 %v2836_v30, %v2442_v33  ;;  %v2845_v25 = vpack.c.bf16 %v2423_v38, %v2423_v38  ;;  %v2443_v41 = vmul.f32 %v2835_v36, %v2423_v38 }
 0x51a   : > { %2453 = vst.msk [vmem:[%s441_s17] sm:$0xff] %vm658_vm3, %v2451_v5  ;;  %v2452_v10 = vadd.f32 %v2836_v30, %v2443_v41 }
 0x51b   : > { %2434 = vst.msk [vmem:[%s451_s14 + $0x4] sm:$0xf] %vm2432_vm7, %v2845_v25 }
 0x51c   : > { %2454 = vst.msk [vmem:[%s441_s17 + $0x8] sm:$0xff] %vm658_vm3, %v2452_v10 }
 0x51d   : > { %3396 = shalt.err (!%p3393_p3)
}
 0x51e   : > { %s3397_s16 = scalar_lea.hbm %s4274_s22, 256  ;;  %s3401_s17 = scalar_lea.hbm %s4335_s13, 512 }
 0x51f   : > { %p3398_p4 = scmp.ne.s32.totalorder %s4274_s22, %s3397_s16  ;;  %p3402_p9 = scmp.lt.u32.totalorder %s4274_s22, %s4335_s13 }
 0x520   : > { %p3403_p10 = scmp.lt.u32.totalorder %s3401_s17, %s3397_s16  ;;  %p3405_p12 = scmp.lt.u32.totalorder %s3397_s16, %s4274_s22 }
 0x521   : > { %p3399_p7 = pnand %p3398_p4, %p3561_p5 }
 0x522   : > { %p3404_p11 = por %p3403_p10, %p3402_p9 }
 0x523   : > { %p3400_p8 = pneg %p3399_p7 }
 0x524   : > { %p3406_p13 = por %p3405_p12, %p3404_p11 }
 0x526   : > { %p3407_p0 = pnand %p3406_p13, %p3400_p8 }
 0x528   : > { %3410 = shalt.err (!%p3407_p0)
}
 0x529   : > { %s3451_s21 = smov 128   ;;  %s3452_s27 = smov 8  }
 0x52a   : > { %3240 = dma.vmem_to_hbm [thread:$0]  (%p3561_p5), %s4276_s0, 256, %s4274_s22, %s4281_s29, %s3451_s21, %s3451_s21, %s3452_s27  }
 0x52b PF: > { %p3246_p1 = scmp.ge.s32.totalorder %s3445_s28, 2  ;;  %s2500_s30 = sand.u32 1, %s3433_s25  }
 0x52c   : > { %s2501_s15 = scalar_lea.sflag [#allocation3], %s2500_s30 }
 0x52d   : > { %p3243_p2 = pnand %p3246_p1, %p3565_p6 }
 0x52f   : > { %3428 = dma.done.wait (!%p3243_p2), %s2501_s15, 256  }
 0x530   : > { %3430 = vsyncadd (!%p3243_p2), %s2501_s15, 4294967040  ;;  %s4348_s28 = sld [smem:[#allocation6_spill]]  ;;  %s4349_s16 = sld [smem:[#allocation5_spill]] }
 0x531   : > { %s4350_s27 = sld [smem:[#allocation7_spill]]  ;;  %s4351_s25 = smov %s3437_s26 }
 0x536   : > { %p24_p3 = scmp.ge.s32.totalorder %s4348_s28, 4   ;;  %s4352_s26 = smov %s4349_s16 }
 0x538   :  { %26 = sbr.rel (!%p24_p3) target bundleno = 5 (0x5), region = 138 }
 0x53f   :  { %2506 = vsyncpa [#allocation3], 1 }
 0x540   :  { %2508 = vsyncpa [#allocation3 + $0x1], 1 }

// kernel: fasternet_forward.7
= control target key start
LH: loop header
LB: loop body
LE: loop exit
PB: predicated region body
PF: predicated region fallthrough
CT: control target
= control target key end

     0   :  { %s4440_s0 = inlined_call_operand.vmem [shape: bf16[2,4,256], index: 0, kind: input, shape index: {}]   ;;  %s4441_s1 = inlined_call_operand.vmem [shape: bf16[256,128], index: 1, kind: input, shape index: {}]   ;;  %s4442_s2 = inlined_call_operand.vmem [shape: f32[1,128], index: 2, kind: input, shape index: {}]   ;;  %s4443_s3 = inlined_call_operand.vmem [shape: f32[9,4,4], index: 3, kind: input, shape index: {}]   ;;  %s4444_s4 = inlined_call_operand.vmem [shape: f32[1,128], index: 4, kind: input, shape index: {}]   ;;  %s4445_s5 = inlined_call_operand.vmem [shape: f32[1,128], index: 5, kind: input, shape index: {}]   ;;  %s4446_s6 = inlined_call_operand.vmem [shape: bf16[9,128,256], index: 6, kind: input, shape index: {}]   ;;  %s4447_s7 = inlined_call_operand.vmem [shape: f32[1,256], index: 7, kind: input, shape index: {}]   ;;  %s4448_s8 = inlined_call_operand.vmem [shape: bf16[256,128], index: 8, kind: input, shape index: {}]   ;;  %s4449_s9 = inlined_call_operand.hbm [shape: bf16[2,4,128], index: 9, kind: output, shape index: {0}]   ;;  %s4450_s10 = inlined_call_operand.hbm [shape: f32[2,4,128], index: 10, kind: output, shape index: {1}]  }
   0x1   :  { %4452 = sst [smem:[#allocation10_spill]] %s4440_s0 }
   0x2   :  { %16 = vsyncpa [#allocation3], 0 }
   0x3   :  { %18 = vsyncpa [#allocation3 + $0x1], 0 }
   0x4   :  { %19 = vsyncpa [#allocation5], 0 }
   0x5   :  { %21 = vsyncpa [#allocation5 + $0x1], 0  ;;  %s3651_s13 = smov 0   ;;  %s3653_s14 = smov 0  }
   0x6   :  { %s3655_s15 = smov 0   ;;  %s3657_s16 = smov 0  }
   0x7 LB: > { %4453 = sst [smem:[#allocation8_spill]] %s3585_s15  ;;  %s3672_s17 = sadd.s32 4294967295, %s3589_s16   ;;  %s3589_s16 = sphi %s3657_s16, %s4462_s16   ;;  %s3585_s15 = sphi %s3655_s15, %s4459_s15   ;;  %s3581_s14 = sphi %s3653_s14, %s4461_s14   ;;  %s3577_s13 = sphi %s3651_s13, %s4460_s13  }
   0x8   : > { %s2754_s18 = sadd.s32 4294967294, %s3589_s16   ;;  %s3676_s19 = sadd.s32 1, %s3589_s16  }
   0x9   : > { %s228_s20 = sadd.s32 1, %s3585_s15  ;;  %s225_s21 = ssub.s32 %s3589_s16, %s3676_s19 }
   0xa   : > { %p238_p0 = scmp.ne.s32.totalorder %s3585_s15, %s3581_s14  ;;  %p226_p1 = scmp.eq.s32.totalorder %s225_s21, 0 }
   0xb   : > { %p239_p2 = scmp.eq.s32.totalorder %s3672_s17, 1  ;;  %p244_p3 = scmp.ne.s32.totalorder %s3581_s14, %s3577_s13 }
   0xc   : > { %p245_p4 = scmp.eq.s32.totalorder %s2754_s18, 1  ;;  %p2757_p7 = scmp.ge.s32.totalorder %s3589_s16, 1 }
   0xd   : > { %s3687_s22 = scalar_select %p226_p1, %s3585_s15, %s228_s20  }
   0xe   : > { %p3689_p5 = por %p239_p2, %p238_p0  ;;  %p3693_p6 = por %p245_p4, %p244_p3 }
   0xf   : > { %4454 = sst [smem:[#allocation9_spill]] %s3687_s22  ;;  %p321_p8 = scmp.lt.s32.totalorder %s3589_s16, 3 }
  0x11   : > { %p322_p9 = pnand %p2757_p7, %p321_p8 }
  0x12   : > { %v3247_v0 = vld [vmem:[%s4441_s1 + $0x40] sm:$0xff] (!%p322_p9)   ;;  %v3249_v2 = vld [vmem:[%s4441_s1 + $0x48] sm:$0xff] (!%p322_p9)   ;;  %p364_p10 = scmp.lt.s32.totalorder (!%p322_p9), %s3672_s17, 1  ;;  %v3251_v4 = vld [vmem:[%s4441_s1 + $0x50] sm:$0xff] (!%p322_p9)   ;;  %s4457_s0 = sld [smem:[#allocation10_spill]] (!%p322_p9)  ;;  %v3591_v34 = vmov (!%p322_p9), 0.0  }
  0x13   : > { %325 = sbr.rel (%p322_p9) target bundleno = 1857 (0x741), region = 56  ;;  %v3248_v1 = vld [vmem:[%s4441_s1] sm:$0xff] (!%p322_p9)   ;;  %3100 = vmatprep.subr.bf16.mxu0 (!%p322_p9), %v3247_v0  ;;  %v3250_v3 = vld [vmem:[%s4441_s1 + $0x8] sm:$0xff] (!%p322_p9)   ;;  %v3252_v5 = vld [vmem:[%s4441_s1 + $0x10] sm:$0xff] (!%p322_p9)   ;;  %3160 = vmatprep.subr.mxu1 (!%p322_p9), %v3591_v34  ;;  %vm3592_vm0 = vmmov (!%p322_p9), 0   ;;  %v3593_v35 = vmov (!%p322_p9), 0  }
  0x14   : > { %3101 = vmatpush3.bf16.msra.mxu0 (!%p322_p9), %v3248_v1  ;;  %v3253_v6 = vld [vmem:[%s4441_s1 + $0x58] sm:$0xff] (!%p322_p9)   ;;  %v3255_v8 = vld [vmem:[%s4441_s1 + $0x60] sm:$0xff] (!%p322_p9)   ;;  %v3257_v10 = vld [vmem:[%s4441_s1 + $0x68] sm:$0xff] (!%p322_p9)   ;;  %3162 = vmatprep.mubr.msk.f32.mxu1 (!%p322_p9), %vm3592_vm0, %v3591_v34  ;;  %vm594_vm1 = vcmask (!%p322_p9), 1043456   ;;  %vm590_vm2 = vcmask (!%p322_p9), 31744   ;;  %s4348_s27 = sand.u32 (!%p322_p9), 1, %s3581_s14  }
  0x15   : > { %3102 = vmatprep.subr.bf16.mxu0 (!%p322_p9), %v3249_v2  ;;  %v3254_v7 = vld [vmem:[%s4441_s1 + $0x18] sm:$0xff] (!%p322_p9)   ;;  %v3256_v9 = vld [vmem:[%s4441_s1 + $0x20] sm:$0xff] (!%p322_p9)   ;;  %v3258_v13 = vld [vmem:[%s4441_s1 + $0x28] sm:$0xff] (!%p322_p9)   ;;  %s2758_s28 = sshll.u32 (!%p322_p9), %s4348_s27, 1  ;;  %s2759_s30 = sshll.u32 (!%p322_p9), %s4348_s27, 2 }
  0x16   : > { %v3259_v14 = vld [vmem:[%s4441_s1 + $0x70] sm:$0xff] (!%p322_p9)   ;;  %v3261_v16 = vld [vmem:[%s4441_s1 + $0x78] sm:$0xff] (!%p322_p9)   ;;  %v3265_v18 = vld [vmem:[%s4446_s6 + $0x204] ss:$8 sps:$4 sm:$0xff] (!%p322_p9)   ;;  %s3095_s15 = sshll.u32 (!%p322_p9), %s3672_s17, 5  ;;  %s356_s11 = scalar_lea.vmem (!%p322_p9), [#allocation2], %s2758_s28 }
  0x17   : > { %v3260_v15 = vld [vmem:[%s4441_s1 + $0x30] sm:$0xff] (!%p322_p9)   ;;  %v3262_v17 = vld [vmem:[%s4441_s1 + $0x38] sm:$0xff] (!%p322_p9)   ;;  %v3263_v19 = vld [vmem:[%s4446_s6 + $0x200] ss:$8 sps:$4 sm:$0xff] (!%p322_p9)   ;;  %s2650_s12 = sshll.u32 (!%p322_p9), %s356_s11, 4  ;;  %s4361_s26 = scalar_lea.vmem (!%p322_p9), [#allocation4], %s2759_s30  ;;  %s4369_s12 = int_to_ptr.vmem [resolvable:$true] %s2650_s12 }
  0x18   : > { %3103 = vmatpush3.bf16.msra.mxu0 (!%p322_p9), %v3250_v3  ;;  %v3268_v20 = vld [vmem:[%s4446_s6 + $0x214] ss:$8 sps:$4 sm:$0xff] (!%p322_p9)   ;;  %v3266_v21 = vld [vmem:[%s4446_s6 + $0x210] ss:$8 sps:$4 sm:$0xff] (!%p322_p9)   ;;  %v3271_v22 = vld [vmem:[%s4446_s6 + $0x224] ss:$8 sps:$4 sm:$0xff] (!%p322_p9)  }
  0x19   : > { %3104 = vmatprep.subr.bf16.mxu0 (!%p322_p9), %v3251_v4  ;;  %v3269_v23 = vld [vmem:[%s4446_s6 + $0x220] ss:$8 sps:$4 sm:$0xff] (!%p322_p9)   ;;  %v3274_v24 = vld [vmem:[%s4446_s6 + $0x234] ss:$8 sps:$4 sm:$0xff] (!%p322_p9)   ;;  %v3272_v25 = vld [vmem:[%s4446_s6 + $0x230] ss:$8 sps:$4 sm:$0xff] (!%p322_p9)  }
  0x1a   : > { %s365_s21 = scalar_select %p364_p10, %s3672_s17, 1  ;;  %v3277_v26 = vld [vmem:[%s4446_s6 + $0x244] ss:$8 sps:$4 sm:$0xff]   ;;  %v3275_v27 = vld [vmem:[%s4446_s6 + $0x240] ss:$8 sps:$4 sm:$0xff]  }
  0x1b   : > { %v3280_v28 = vld [vmem:[%s4446_s6 + $0x254] ss:$8 sps:$4 sm:$0xff]   ;;  %v3278_v29 = vld [vmem:[%s4446_s6 + $0x250] ss:$8 sps:$4 sm:$0xff]   ;;  %v3283_v30 = vld [vmem:[%s4446_s6 + $0x264] ss:$8 sps:$4 sm:$0xff]  }
  0x1c   : > { %s3099_s29 = sshll.u32 %s365_s21, 2  ;;  %3105 = vmatpush3.bf16.msra.mxu0 %v3252_v5  ;;  %v3281_v31 = vld [vmem:[%s4446_s6 + $0x260] ss:$8 sps:$4 sm:$0xff]   ;;  %v3286_v32 = vld [vmem:[%s4446_s6 + $0x274] ss:$8 sps:$4 sm:$0xff]   ;;  %s2663_s21 = sshll.u32 %s4361_s26, 4  ;;  %s4376_s21 = int_to_ptr.vmem [resolvable:$true] %s2663_s21 }
  0x1d   : > { %3106 = vmatprep.subr.bf16.mxu0 %v3253_v6  ;;  %s368_s25 = scalar_lea.vmem %s4457_s0, %s3099_s29  ;;  %v3284_v33 = vld [vmem:[%s4446_s6 + $0x270] ss:$8 sps:$4 sm:$0xff]   ;;  %v2762_v37 = vld [vmem:[%s4442_s2] ss:$0 sm:$0xff]  ;;  %v3289_v42 = vld [vmem:[%s4446_s6 + $0x4] ss:$8 sps:$4 sm:$0xff]   ;;  %s4367_s0 = scalar_lea.hbm %s4449_s9, %s3095_s15 }
  0x1e   : > { %v2763_v11 = vld.sshfl [vmem:[%s368_s25] sm:$0x33 pattern:$0x76325410]  ;;  %v3292_v46 = vld [vmem:[%s4446_s6 + $0x14] ss:$8 sps:$4 sm:$0xff]  }
  0x1f   : > { %v418_v12 = vcombine.high %v2763_v11, %v2763_v11  ;;  %v557_v44 = vld [vmem:[%s4443_s3] sm:$0xf]  ;;  %v3290_v48 = vld [vmem:[%s4446_s6 + $0x10] ss:$8 sps:$4 sm:$0xff]   ;;  %v3295_v49 = vld [vmem:[%s4446_s6 + $0x24] ss:$8 sps:$4 sm:$0xff]  }
  0x20   : > { %3107 = vmatpush3.bf16.msra.mxu0 %v3254_v7  ;;  %v3287_v45 = vld [vmem:[%s4446_s6] ss:$8 sps:$4 sm:$0xff]   ;;  %v3298_v51 = vld [vmem:[%s4446_s6 + $0x34] ss:$8 sps:$4 sm:$0xff]   ;;  %v3296_v52 = vld [vmem:[%s4446_s6 + $0x30] ss:$8 sps:$4 sm:$0xff]  }
  0x21   : > { %3108 = vmatprep.subr.bf16.mxu0 %v3255_v8  ;;  %549 = vmatprep.mubr.bf16.mxu0 %v418_v12  ;;  %v3293_v50 = vld [vmem:[%s4446_s6 + $0x20] ss:$8 sps:$4 sm:$0xff]   ;;  %v3301_v53 = vld [vmem:[%s4446_s6 + $0x44] ss:$8 sps:$4 sm:$0xff]   ;;  %v3304_v55 = vld [vmem:[%s4446_s6 + $0x54] ss:$8 sps:$4 sm:$0xff]  }
  0x22   : > { %v3299_v54 = vld [vmem:[%s4446_s6 + $0x40] ss:$8 sps:$4 sm:$0xff]   ;;  %v3302_v56 = vld [vmem:[%s4446_s6 + $0x50] ss:$8 sps:$4 sm:$0xff]   ;;  %v3307_v57 = vld [vmem:[%s4446_s6 + $0x64] ss:$8 sps:$4 sm:$0xff]  }
  0x23   : > { %v3305_v58 = vld [vmem:[%s4446_s6 + $0x60] ss:$8 sps:$4 sm:$0xff]   ;;  %v3310_v59 = vld [vmem:[%s4446_s6 + $0x74] ss:$8 sps:$4 sm:$0xff]   ;;  %v3308_v60 = vld [vmem:[%s4446_s6 + $0x70] ss:$8 sps:$4 sm:$0xff]  }
  0x24   : > { %3109 = vmatpush3.bf16.msra.mxu0 %v3256_v9  ;;  %v3313_v1 = vld [vmem:[%s4446_s6 + $0x84] ss:$8 sps:$4 sm:$0xff]   ;;  %v3311_v6 = vld [vmem:[%s4446_s6 + $0x80] ss:$8 sps:$4 sm:$0xff]   ;;  %v3316_v7 = vld [vmem:[%s4446_s6 + $0x94] ss:$8 sps:$4 sm:$0xff]  }
  0x25   : > { %3110 = vmatprep.subr.bf16.mxu0 %v3257_v10  ;;  %v2780_v5 = vld [vmem:[%s4443_s3 + $0x4] sm:$0xf]  ;;  %v3314_v8 = vld [vmem:[%s4446_s6 + $0x90] ss:$8 sps:$4 sm:$0xff]   ;;  %v3317_v10 = vld [vmem:[%s4446_s6 + $0xa0] ss:$8 sps:$4 sm:$0xff]  }
  0x26   : > { %v3319_v9 = vld [vmem:[%s4446_s6 + $0xa4] ss:$8 sps:$4 sm:$0xff]   ;;  %v3320_v12 = vld [vmem:[%s4446_s6 + $0xb0] ss:$8 sps:$4 sm:$0xff]   ;;  %s3096_s25 = sshll.u32 %s3672_s17, 6  ;;  %s2632_s18 = scalar_lea.sflag [#allocation3], %s4348_s27 }
  0x27   : > { %s4374_s30 = scalar_lea.hbm %s4450_s10, %s3096_s25  ;;  %s3495_s20 = scalar_lea.vmem %s4369_s12, 32 }
  0x28   : > { %3111 = vmatpush3.bf16.msra.mxu0 %v3258_v13  ;;  %v3325_v13 = vld [vmem:[%s4446_s6 + $0xc4] ss:$8 sps:$4 sm:$0xff]   ;;  %p3496_p11 = scmp.ne.s32.totalorder %s4369_s12, %s3495_s20  ;;  %s3594_s15 = smov [#allocation2]  }
  0x29   : > { %3112 = vmatprep.subr.bf16.mxu0 %v3259_v14  ;;  %v3323_v14 = vld [vmem:[%s4446_s6 + $0xc0] ss:$8 sps:$4 sm:$0xff]   ;;  %s3499_s22 = sshll.u32 %s3594_s15, 4  ;;  %s3500_s22 = int_to_ptr.vmem [resolvable:$false] %s3499_s22 }
  0x2a   : > { %p3497_p12 = pnand %p3496_p11, %p3689_p5  ;;  %s3501_s29 = scalar_lea.vmem %s3500_s22, 64 }
  0x2b   : > { %p3502_p0 = scmp.lt.s32.totalorder %s4369_s12, %s3500_s22  ;;  %p3503_p1 = scmp.lt.s32.totalorder %s3501_s29, %s3495_s20 }
  0x2c   : > { %3113 = vmatpush3.bf16.msra.mxu0 %v3260_v15  ;;  %v3328_v15 = vld [vmem:[%s4446_s6 + $0xd4] ss:$8 sps:$4 sm:$0xff]   ;;  %p3498_p13 = pneg %p3497_p12 }
  0x2d   : > { %3114 = vmatprep.subr.bf16.mxu0 %v3261_v16  ;;  %v3326_v16 = vld [vmem:[%s4446_s6 + $0xd0] ss:$8 sps:$4 sm:$0xff]   ;;  %p3504_p2 = por %p3503_p1, %p3502_p0 }
  0x2f   : > { %p3505_p3 = pnand %p3504_p2, %p3498_p13 }
  0x30   : > { %3115 = vmatpush3.bf16.msra.mxu0 %v3262_v17  ;;  %v3331_v17 = vld [vmem:[%s4446_s6 + $0xe4] ss:$8 sps:$4 sm:$0xff]  }
  0x31   : > { %886 = vmatprep.subr.bf16.mxu0 %v3265_v18  ;;  %v3329_v18 = vld [vmem:[%s4446_s6 + $0xe0] ss:$8 sps:$4 sm:$0xff]  }
  0x33   : > { %550 = vmatmul.mubr.bf16.vlgmr.msra.gmra.mrb[0].mxu0 %v2763_v11  ;;  %v3322_v11 = vld [vmem:[%s4446_s6 + $0xb4] ss:$8 sps:$4 sm:$0xff]  }
  0x34   : > { %887 = vmatpush1.bf16.msra.mxu0 %v3263_v19  ;;  %918 = vmatprep.mubr.bf16.mxu0 %v3593_v35  ;;  %v3334_v19 = vld [vmem:[%s4446_s6 + $0xf4] ss:$8 sps:$4 sm:$0xff]  }
  0x35   : > { %888 = vmatprep.subr.bf16.mxu0 %v3268_v20  ;;  %v3332_v20 = vld [vmem:[%s4446_s6 + $0xf0] ss:$8 sps:$4 sm:$0xff]  }
  0x38   : > { %889 = vmatpush1.bf16.msra.mxu0 %v3266_v21  ;;  %v3335_v21 = vld [vmem:[%s4446_s6 + $0x100] ss:$8 sps:$4 sm:$0xff]  }
  0x39   : > { %890 = vmatprep.subr.bf16.mxu0 %v3271_v22  ;;  %v3337_v22 = vld [vmem:[%s4446_s6 + $0x104] ss:$8 sps:$4 sm:$0xff]  }
  0x3c   : > { %891 = vmatpush1.bf16.msra.mxu0 %v3269_v23  ;;  %v3343_v23 = vld [vmem:[%s4446_s6 + $0x114] ss:$8 sps:$4 sm:$0xff]  }
  0x3d   : > { %892 = vmatprep.subr.bf16.mxu0 %v3274_v24  ;;  %v3341_v24 = vld [vmem:[%s4446_s6 + $0x110] ss:$8 sps:$4 sm:$0xff]  }
  0x40   : > { %893 = vmatpush1.bf16.msra.mxu0 %v3272_v25  ;;  %v3349_v25 = vld [vmem:[%s4446_s6 + $0x124] ss:$8 sps:$4 sm:$0xff]  }
  0x41   : > { %894 = vmatprep.subr.bf16.mxu0 %v3277_v26  ;;  %v3347_v26 = vld [vmem:[%s4446_s6 + $0x120] ss:$8 sps:$4 sm:$0xff]  }
  0x44   : > { %895 = vmatpush1.bf16.msra.mxu0 %v3275_v27  ;;  %v3355_v27 = vld [vmem:[%s4446_s6 + $0x134] ss:$8 sps:$4 sm:$0xff]  }
  0x45   : > { %896 = vmatprep.subr.bf16.mxu0 %v3280_v28  ;;  %v3353_v28 = vld [vmem:[%s4446_s6 + $0x130] ss:$8 sps:$4 sm:$0xff]  }
  0x48   : > { %897 = vmatpush1.bf16.msra.mxu0 %v3278_v29  ;;  %v3361_v29 = vld [vmem:[%s4446_s6 + $0x144] ss:$8 sps:$4 sm:$0xff]  }
  0x49   : > { %898 = vmatprep.subr.bf16.mxu0 %v3283_v30  ;;  %v3359_v30 = vld [vmem:[%s4446_s6 + $0x140] ss:$8 sps:$4 sm:$0xff]  }
  0x4c   : > { %899 = vmatpush1.bf16.msra.mxu0 %v3281_v31  ;;  %v3367_v31 = vld [vmem:[%s4446_s6 + $0x154] ss:$8 sps:$4 sm:$0xff]  }
  0x4d   : > { %900 = vmatprep.subr.bf16.mxu0 %v3286_v32  ;;  %v3365_v32 = vld [vmem:[%s4446_s6 + $0x150] ss:$8 sps:$4 sm:$0xff]  }
  0x50   : > { %901 = vmatpush1.bf16.msra.mxu0 %v3284_v33 }
  0x51   : > { %1312 = vmatprep.subr.bf16.mxu0 %v3337_v22  ;;  %v2783_v22 = vld [vmem:[%s4443_s3 + $0x14] sm:$0xf] }
 0x106   : > { %v3116_v36 = vpop.f32.mrb[0].mxu0 }
 0x107   : > { %v3117_v38 = vpop.f32.mrb[1].mxu0 }
 0x108   : > { %v3118_v39 = vadd.f32 %v3117_v38, %v3116_v36  ;;  %v3119_v40 = vpop.f32.mrb[2].mxu0 }
 0x109   : > { %v3120_v41 = vpop.f32.mrb[3].mxu0 }
 0x10a   : > { %v3810_v43 = vadd.f32 %v3118_v39, %v2762_v37 }
 0x10c   : > { %3161 = vmatpush3.msk.msra.mxu1 %vm594_vm1, %v3810_v43  ;;  %v572_v47 = vpack.c.bf16 %v3810_v43, %v3810_v43 }
 0x10d   : > { %3163 = vmatmul.mubr.msk.f32.vlgmr.msra.gmra.mrb[0].mxu1 %vm590_vm2, %v557_v44  ;;  %765 = vmatprep.subr.bf16.mxu1 %v3289_v42 }
 0x10e   : > { %919 = vmatmul.mubr.bf16.vlgmr.msra.gmra.mrb[4].mxu0 %v572_v47  ;;  %766 = vmatpush1.bf16.msra.mxu1 %v3287_v45  ;;  %v2781_v45 = vld [vmem:[%s4443_s3 + $0x8] sm:$0xf]  ;;  %v2782_v47 = vld [vmem:[%s4443_s3 + $0xc] sm:$0xf] }
 0x10f   : > { %767 = vmatprep.subr.bf16.mxu1 %v3292_v46  ;;  %797 = vmatprep.mubr.bf16.mxu1 %v3593_v35  ;;  %v3340_v46 = vld [vmem:[%s4446_s6 + $0x184] ss:$8 sps:$4 sm:$0xff]  }
 0x110   : > { %1344 = vmatprep.mubr.bf16.mxu0 %v3593_v35  ;;  %1313 = vmatpush1.bf16.msra.mxu0 %v3335_v21  ;;  %v3400_v21 = vld [vmem:[%s4446_s6 + $0x2b4] ss:$8 sps:$4 sm:$0xff]  }
 0x111   : > { %1314 = vmatprep.subr.bf16.mxu0 %v3343_v23  ;;  %v3391_v23 = vld [vmem:[%s4446_s6 + $0x304] ss:$8 sps:$4 sm:$0xff]  }
 0x112   : > { %768 = vmatpush1.bf16.msra.mxu1 %v3290_v48  ;;  %v3338_v48 = vld [vmem:[%s4446_s6 + $0x180] ss:$8 sps:$4 sm:$0xff]  }
 0x113   : > { %769 = vmatprep.subr.bf16.mxu1 %v3295_v49  ;;  %v3346_v49 = vld [vmem:[%s4446_s6 + $0x194] ss:$8 sps:$4 sm:$0xff]  }
 0x114   : > { %1315 = vmatpush1.bf16.msra.mxu0 %v3341_v24  ;;  %v3398_v24 = vld [vmem:[%s4446_s6 + $0x2b0] ss:$8 sps:$4 sm:$0xff]  }
 0x115   : > { %1316 = vmatprep.subr.bf16.mxu0 %v3349_v25  ;;  %v3406_v25 = vld [vmem:[%s4446_s6 + $0x2c4] ss:$8 sps:$4 sm:$0xff]  }
 0x116   : > { %770 = vmatpush1.bf16.msra.mxu1 %v3293_v50  ;;  %v3344_v50 = vld [vmem:[%s4446_s6 + $0x190] ss:$8 sps:$4 sm:$0xff]  }
 0x117   : > { %771 = vmatprep.subr.bf16.mxu1 %v3298_v51  ;;  %v3352_v51 = vld [vmem:[%s4446_s6 + $0x1a4] ss:$8 sps:$4 sm:$0xff]  }
 0x118   : > { %1317 = vmatpush1.bf16.msra.mxu0 %v3347_v26  ;;  %v2784_v26 = vld [vmem:[%s4443_s3 + $0x18] sm:$0xf] }
 0x119   : > { %1318 = vmatprep.subr.bf16.mxu0 %v3355_v27  ;;  %v3389_v27 = vld [vmem:[%s4446_s6 + $0x300] ss:$8 sps:$4 sm:$0xff]  }
 0x11a   : > { %772 = vmatpush1.bf16.msra.mxu1 %v3296_v52  ;;  %v3350_v52 = vld [vmem:[%s4446_s6 + $0x1a0] ss:$8 sps:$4 sm:$0xff]  }
 0x11b   : > { %773 = vmatprep.subr.bf16.mxu1 %v3301_v53  ;;  %v3358_v53 = vld [vmem:[%s4446_s6 + $0x1b4] ss:$8 sps:$4 sm:$0xff]  }
 0x11c   : > { %1319 = vmatpush1.bf16.msra.mxu0 %v3353_v28  ;;  %v3397_v28 = vld [vmem:[%s4446_s6 + $0x314] ss:$8 sps:$4 sm:$0xff]  }
 0x11d   : > { %1320 = vmatprep.subr.bf16.mxu0 %v3361_v29  ;;  %v3404_v29 = vld [vmem:[%s4446_s6 + $0x2c0] ss:$8 sps:$4 sm:$0xff]  }
 0x11e   : > { %774 = vmatpush1.bf16.msra.mxu1 %v3299_v54  ;;  %v3356_v54 = vld [vmem:[%s4446_s6 + $0x1b0] ss:$8 sps:$4 sm:$0xff]  }
 0x11f   : > { %775 = vmatprep.subr.bf16.mxu1 %v3304_v55  ;;  %v3364_v55 = vld [vmem:[%s4446_s6 + $0x1c4] ss:$8 sps:$4 sm:$0xff]  }
 0x120   : > { %1321 = vmatpush1.bf16.msra.mxu0 %v3359_v30  ;;  %v3395_v30 = vld [vmem:[%s4446_s6 + $0x310] ss:$8 sps:$4 sm:$0xff]  }
 0x121   : > { %1322 = vmatprep.subr.bf16.mxu0 %v3367_v31  ;;  %v3403_v31 = vld [vmem:[%s4446_s6 + $0x324] ss:$8 sps:$4 sm:$0xff]  }
 0x122   : > { %776 = vmatpush1.bf16.msra.mxu1 %v3302_v56  ;;  %v3362_v56 = vld [vmem:[%s4446_s6 + $0x1c0] ss:$8 sps:$4 sm:$0xff]  }
 0x123   : > { %777 = vmatprep.subr.bf16.mxu1 %v3307_v57  ;;  %v3370_v57 = vld [vmem:[%s4446_s6 + $0x1d4] ss:$8 sps:$4 sm:$0xff]  }
 0x124   : > { %1323 = vmatpush1.bf16.msra.mxu0 %v3365_v32  ;;  %v3401_v32 = vld [vmem:[%s4446_s6 + $0x320] ss:$8 sps:$4 sm:$0xff]  }
 0x126   : > { %778 = vmatpush1.bf16.msra.mxu1 %v3305_v58  ;;  %v3368_v58 = vld [vmem:[%s4446_s6 + $0x1d0] ss:$8 sps:$4 sm:$0xff]  }
 0x127   : > { %779 = vmatprep.subr.bf16.mxu1 %v3310_v59  ;;  %v3373_v59 = vld [vmem:[%s4446_s6 + $0x164] ss:$8 sps:$4 sm:$0xff]  }
 0x128   : > { %1324 = vmatprep.subr.bf16.mxu0 %v3373_v59 }
 0x12a   : > { %780 = vmatpush1.bf16.msra.mxu1 %v3308_v60  ;;  %v3371_v60 = vld [vmem:[%s4446_s6 + $0x160] ss:$8 sps:$4 sm:$0xff]  }
 0x12b   : > { %3165 = vmatprep.subr.mxu1 %v3591_v34  ;;  %1325 = vmatpush1.bf16.msra.mxu0 %v3371_v60 }
 0x1e0   : > { %v664_v61 = vpop.f32.mrb[0].mxu1 }
 0x1e1   : > { %v668_v62 = vpack.c.bf16 %v664_v61, %v664_v61  ;;  %v3164_v63 = vpop.f32.mrb[1].mxu1  ;;  %v3868_v0 = vpop.f32.mrb[4].mxu0  ;;  %v3376_v61 = vld [vmem:[%s4446_s6 + $0x1e4] ss:$8 sps:$4 sm:$0xff]  }
 0x1e2   : > { %v3873_v2 = vpop.f32.mrb[5].mxu0  ;;  %v3379_v63 = vld [vmem:[%s4446_s6 + $0x174] ss:$8 sps:$4 sm:$0xff]  }
 0x1e3   : > { %798 = vmatmul.mubr.bf16.vlgmr.msra.gmra.mrb[4].mxu1 %v668_v62  ;;  %v924_v3 = vpop.f32.mrb[6].mxu0  ;;  %v3374_v62 = vld [vmem:[%s4446_s6 + $0x1e0] ss:$8 sps:$4 sm:$0xff]   ;;  %1326 = vmatprep.subr.bf16.mxu0 %v3379_v63 }
 0x1e4   : > { %3166 = vmatpush3.msk.msra.mxu1 %vm594_vm1, %v3810_v43  ;;  %v925_v4 = vpop.f32.mrb[7].mxu0  ;;  %3167 = vmatprep.mubr.msk.f32.mxu1 %vm3592_vm0, %v3591_v34  ;;  %v3385_v3 = vld [vmem:[%s4446_s6 + $0x284] ss:$8 sps:$4 sm:$0xff]  }
 0x1e5   : > { %1098 = vmatprep.subr.bf16.mxu1 %v3313_v1  ;;  %v3380_v1 = vld [vmem:[%s4446_s6 + $0x1f0] ss:$8 sps:$4 sm:$0xff]  }
 0x1eb   : > { %3168 = vmatmul.mubr.msk.f32.vlgmr.msra.gmra.mrb[2].mxu1 %vm590_vm2, %v2780_v5 }
 0x1ec   : > { %1099 = vmatpush1.bf16.msra.mxu1 %v3311_v6  ;;  %1130 = vmatprep.mubr.bf16.mxu1 %v3593_v35 }
 0x1ed   : > { %1100 = vmatprep.subr.bf16.mxu1 %v3316_v7 }
 0x1f0   : > { %1101 = vmatpush1.bf16.msra.mxu1 %v3314_v8 }
 0x1f1   : > { %1102 = vmatprep.subr.bf16.mxu1 %v3319_v9 }
 0x1f4   : > { %1103 = vmatpush1.bf16.msra.mxu1 %v3317_v10 }
 0x1f5   : > { %1104 = vmatprep.subr.bf16.mxu1 %v3322_v11  ;;  %v3383_v11 = vld [vmem:[%s4446_s6 + $0x280] ss:$8 sps:$4 sm:$0xff]  }
 0x1f8   : > { %1105 = vmatpush1.bf16.msra.mxu1 %v3320_v12 }
 0x1f9   : > { %1106 = vmatprep.subr.bf16.mxu1 %v3325_v13 }
 0x1fc   : > { %1107 = vmatpush1.bf16.msra.mxu1 %v3323_v14  ;;  %v3388_v14 = vld [vmem:[%s4446_s6 + $0x294] ss:$8 sps:$4 sm:$0xff]  }
 0x1fd   : > { %1108 = vmatprep.subr.bf16.mxu1 %v3328_v15 }
 0x200   : > { %1109 = vmatpush1.bf16.msra.mxu1 %v3326_v16 }
 0x201   : > { %1110 = vmatprep.subr.bf16.mxu1 %v3331_v17 }
 0x204   : > { %1111 = vmatpush1.bf16.msra.mxu1 %v3329_v18  ;;  %v3386_v18 = vld [vmem:[%s4446_s6 + $0x290] ss:$8 sps:$4 sm:$0xff]  }
 0x205   : > { %1112 = vmatprep.subr.bf16.mxu1 %v3334_v19  ;;  %v3394_v19 = vld [vmem:[%s4446_s6 + $0x2a4] ss:$8 sps:$4 sm:$0xff]  }
 0x208   : > { %1113 = vmatpush1.bf16.msra.mxu1 %v3332_v20  ;;  %v3392_v20 = vld [vmem:[%s4446_s6 + $0x2a0] ss:$8 sps:$4 sm:$0xff]  }
 0x209   : > { %3170 = vmatprep.subr.mxu1 %v3591_v34 }
 0x2b6   : > { %v799_v33 = vpop.f32.mrb[4].mxu1 }
 0x2b7   : > { %v3967_v36 = vadd.f32 %v3868_v0, %v799_v33  ;;  %v801_v37 = vpop.f32.mrb[5].mxu1  ;;  %v3377_v0 = vld [vmem:[%s4446_s6 + $0x170] ss:$8 sps:$4 sm:$0xff]   ;;  %v3409_v33 = vld [vmem:[%s4446_s6 + $0x334] ss:$8 sps:$4 sm:$0xff]  }
 0x2b8   : > { %v3970_v38 = vadd.f32 %v3873_v2, %v801_v37  ;;  %v803_v39 = vpop.f32.mrb[6].mxu1  ;;  %1327 = vmatpush1.bf16.msra.mxu0 %v3377_v0  ;;  %v3382_v2 = vld [vmem:[%s4446_s6 + $0x1f4] ss:$8 sps:$4 sm:$0xff]  }
 0x2b9   : > { %v804_v40 = vpop.f32.mrb[7].mxu1  ;;  %1740 = vmatprep.subr.bf16.mxu0 %v3385_v3  ;;  %v3412_v37 = vld [vmem:[%s4446_s6 + $0x2d4] ss:$8 sps:$4 sm:$0xff]   ;;  %v3410_v39 = vld [vmem:[%s4446_s6 + $0x2d0] ss:$8 sps:$4 sm:$0xff]  }
 0x2ba   : > { %v3413_v40 = vld [vmem:[%s4446_s6 + $0x340] ss:$8 sps:$4 sm:$0xff]   ;;  %v3433_v3 = vld [vmem:[%s4446_s6 + $0x384] ss:$8 sps:$4 sm:$0xff]  }
 0x2be   : > { %v996_v41 = vpop.f32.mrb[2].mxu1 }
 0x2bf   : > { %v1000_v42 = vpack.c.bf16 %v996_v41, %v996_v41  ;;  %v3169_v44 = vpop.f32.mrb[3].mxu1  ;;  %v3418_v41 = vld [vmem:[%s4446_s6 + $0x2e4] ss:$8 sps:$4 sm:$0xff]  }
 0x2c0   : > { %v3416_v44 = vld [vmem:[%s4446_s6 + $0x2e0] ss:$8 sps:$4 sm:$0xff]  }
 0x2c1   : > { %1131 = vmatmul.mubr.bf16.vlgmr.msra.gmra.mrb[8].mxu1 %v1000_v42  ;;  %v3421_v42 = vld [vmem:[%s4446_s6 + $0x354] ss:$8 sps:$4 sm:$0xff]  }
 0x2c2   : > { %3171 = vmatpush3.msk.msra.mxu1 %vm594_vm1, %v3810_v43  ;;  %3172 = vmatprep.mubr.msk.f32.mxu1 %vm3592_vm0, %v3591_v34 }
 0x2c3   : > { %3175 = vmatprep.subr.mxu1 %v3591_v34 }
 0x2c9   : > { %3173 = vmatmul.mubr.msk.f32.vlgmr.msra.gmra.mrb[12].mxu1 %vm590_vm2, %v2781_v45  ;;  %v3419_v45 = vld [vmem:[%s4446_s6 + $0x350] ss:$8 sps:$4 sm:$0xff]  }
 0x2ca   : > { %3176 = vmatpush3.msk.msra.mxu1 %vm594_vm1, %v3810_v43  ;;  %3177 = vmatprep.mubr.msk.f32.mxu1 %vm3592_vm0, %v3591_v34 }
 0x2cb   : > { %1526 = vmatprep.subr.bf16.mxu1 %v3340_v46  ;;  %v3424_v46 = vld [vmem:[%s4446_s6 + $0x2f4] ss:$8 sps:$4 sm:$0xff]  }
 0x2cd   : > { %3178 = vmatmul.mubr.msk.f32.vlgmr.msra.gmra.mrb[14].mxu1 %vm590_vm2, %v2782_v47  ;;  %v3422_v47 = vld [vmem:[%s4446_s6 + $0x2f0] ss:$8 sps:$4 sm:$0xff]  }
 0x2ce   : > { %1527 = vmatpush1.bf16.msra.mxu1 %v3338_v48  ;;  %1558 = vmatprep.mubr.bf16.mxu1 %v3593_v35  ;;  %v3425_v48 = vld [vmem:[%s4446_s6 + $0x360] ss:$8 sps:$4 sm:$0xff]  }
 0x2cf   : > { %1528 = vmatprep.subr.bf16.mxu1 %v3346_v49  ;;  %v3427_v49 = vld [vmem:[%s4446_s6 + $0x364] ss:$8 sps:$4 sm:$0xff]  }
 0x2d2   : > { %1529 = vmatpush1.bf16.msra.mxu1 %v3344_v50  ;;  %v3428_v50 = vld [vmem:[%s4446_s6 + $0x370] ss:$8 sps:$4 sm:$0xff]  }
 0x2d3   : > { %1530 = vmatprep.subr.bf16.mxu1 %v3352_v51  ;;  %v3430_v51 = vld [vmem:[%s4446_s6 + $0x374] ss:$8 sps:$4 sm:$0xff]  }
 0x2d6   : > { %1531 = vmatpush1.bf16.msra.mxu1 %v3350_v52 }
 0x2d7   : > { %1532 = vmatprep.subr.bf16.mxu1 %v3358_v53 }
 0x2da   : > { %1533 = vmatpush1.bf16.msra.mxu1 %v3356_v54 }
 0x2db   : > { %1534 = vmatprep.subr.bf16.mxu1 %v3364_v55 }
 0x2de   : > { %1535 = vmatpush1.bf16.msra.mxu1 %v3362_v56 }
 0x2df   : > { %1536 = vmatprep.subr.bf16.mxu1 %v3370_v57 }
 0x2e2   : > { %1537 = vmatpush1.bf16.msra.mxu1 %v3368_v58 }
 0x2e3   : > { %1538 = vmatprep.subr.bf16.mxu1 %v3376_v61 }
 0x2e6   : > { %1539 = vmatpush1.bf16.msra.mxu1 %v3374_v62 }
 0x2e7   : > { %1540 = vmatprep.subr.bf16.mxu1 %v3382_v2 }
 0x2ea   : > { %1541 = vmatpush1.bf16.msra.mxu1 %v3380_v1 }
 0x2eb   : > { %3180 = vmatprep.subr.mxu1 %v3591_v34 }
 0x394   : > { %v1132_v4 = vpop.f32.mrb[8].mxu1 }
 0x395   : > { %v4055_v5 = vadd.f32 %v1132_v4, %v3967_v36  ;;  %v1134_v6 = vpop.f32.mrb[9].mxu1  ;;  %v3407_v36 = vld [vmem:[%s4446_s6 + $0x330] ss:$8 sps:$4 sm:$0xff]  }
 0x396   : > { %v4058_v7 = vadd.f32 %v1134_v6, %v3970_v38  ;;  %v1136_v8 = vpop.f32.mrb[10].mxu1  ;;  %v3415_v38 = vld [vmem:[%s4446_s6 + $0x344] ss:$8 sps:$4 sm:$0xff]  }
 0x397   : > { %v1137_v9 = vpop.f32.mrb[11].mxu1  ;;  %v2785_v8 = vld [vmem:[%s4443_s3 + $0x1c] sm:$0xf] }
 0x398   : > { %v3431_v9 = vld [vmem:[%s4446_s6 + $0x380] ss:$8 sps:$4 sm:$0xff]  }
 0x39c   : > { %v1210_v10 = vpop.f32.mrb[12].mxu1 }
 0x39d   : > { %v1214_v12 = vpack.c.bf16 %v1210_v10, %v1210_v10  ;;  %v3174_v13 = vpop.f32.mrb[13].mxu1  ;;  %v3436_v10 = vld [vmem:[%s4446_s6 + $0x394] ss:$8 sps:$4 sm:$0xff]  }
 0x39e   : > { %v3442_v13 = vld [vmem:[%s4446_s6 + $0x3a4] ss:$8 sps:$4 sm:$0xff]  }
 0x39f   : > { %1345 = vmatmul.mubr.bf16.vlgmr.msra.gmra.mrb[8].mxu0 %v1214_v12  ;;  %v3437_v12 = vld [vmem:[%s4446_s6 + $0x400] ss:$8 sps:$4 sm:$0xff]  }
 0x3a0   : > { %v1424_v15 = vpop.f32.mrb[14].mxu1  ;;  %1741 = vmatpush1.bf16.msra.mxu0 %v3383_v11  ;;  %1772 = vmatprep.mubr.bf16.mxu0 %v3593_v35  ;;  %v2786_v11 = vld [vmem:[%s4443_s3 + $0x20] sm:$0xf] }
 0x3a1   : > { %v1428_v16 = vpack.c.bf16 %v1424_v15, %v1424_v15  ;;  %v3179_v17 = vpop.f32.mrb[15].mxu1  ;;  %1742 = vmatprep.subr.bf16.mxu0 %v3388_v14  ;;  %v3445_v14 = vld [vmem:[%s4446_s6 + $0x414] ss:$8 sps:$4 sm:$0xff]   ;;  %v3440_v15 = vld [vmem:[%s4446_s6 + $0x3a0] ss:$8 sps:$4 sm:$0xff]  }
 0x3a2   : > { %v3448_v17 = vld [vmem:[%s4446_s6 + $0x3b4] ss:$8 sps:$4 sm:$0xff]  }
 0x3a3   : > { %1559 = vmatmul.mubr.bf16.vlgmr.msra.gmra.mrb[16].mxu1 %v1428_v16  ;;  %v3443_v16 = vld [vmem:[%s4446_s6 + $0x410] ss:$8 sps:$4 sm:$0xff]  }
 0x3a4   : > { %3181 = vmatpush3.msk.msra.mxu1 %vm594_vm1, %v3810_v43  ;;  %3182 = vmatprep.mubr.msk.f32.mxu1 %vm3592_vm0, %v3591_v34 }
 0x3a5   : > { %3185 = vmatprep.subr.mxu1 %v3591_v34  ;;  %1743 = vmatpush1.bf16.msra.mxu0 %v3386_v18  ;;  %v3451_v18 = vld [vmem:[%s4446_s6 + $0x424] ss:$8 sps:$4 sm:$0xff]  }
 0x3a6   : > { %1744 = vmatprep.subr.bf16.mxu0 %v3394_v19  ;;  %v3446_v19 = vld [vmem:[%s4446_s6 + $0x3b0] ss:$8 sps:$4 sm:$0xff]  }
 0x3a9   : > { %1745 = vmatpush1.bf16.msra.mxu0 %v3392_v20  ;;  %v3449_v20 = vld [vmem:[%s4446_s6 + $0x420] ss:$8 sps:$4 sm:$0xff]  }
 0x3aa   : > { %1746 = vmatprep.subr.bf16.mxu0 %v3400_v21  ;;  %v3454_v21 = vld [vmem:[%s4446_s6 + $0x3c4] ss:$8 sps:$4 sm:$0xff]  }
 0x3ab   : > { %3183 = vmatmul.mubr.msk.f32.vlgmr.msra.gmra.mrb[20].mxu1 %vm590_vm2, %v2783_v22  ;;  %v3452_v22 = vld [vmem:[%s4446_s6 + $0x3c0] ss:$8 sps:$4 sm:$0xff]  }
 0x3ac   : > { %3186 = vmatpush3.msk.msra.mxu1 %vm594_vm1, %v3810_v43  ;;  %3187 = vmatprep.mubr.msk.f32.mxu1 %vm3592_vm0, %v3591_v34 }
 0x3ad   : > { %1954 = vmatprep.subr.bf16.mxu1 %v3391_v23  ;;  %1747 = vmatpush1.bf16.msra.mxu0 %v3398_v24  ;;  %v3455_v23 = vld [vmem:[%s4446_s6 + $0x430] ss:$8 sps:$4 sm:$0xff]   ;;  %v3460_v24 = vld [vmem:[%s4446_s6 + $0x3d4] ss:$8 sps:$4 sm:$0xff]  }
 0x3ae   : > { %1748 = vmatprep.subr.bf16.mxu0 %v3406_v25  ;;  %v3463_v25 = vld [vmem:[%s4446_s6 + $0x444] ss:$8 sps:$4 sm:$0xff]  }
 0x3af   : > { %3188 = vmatmul.mubr.msk.f32.vlgmr.msra.gmra.mrb[22].mxu1 %vm590_vm2, %v2784_v26  ;;  %v3458_v26 = vld [vmem:[%s4446_s6 + $0x3d0] ss:$8 sps:$4 sm:$0xff]  }
 0x3b0   : > { %1955 = vmatpush1.bf16.msra.mxu1 %v3389_v27  ;;  %1986 = vmatprep.mubr.bf16.mxu1 %v3593_v35  ;;  %v3461_v27 = vld [vmem:[%s4446_s6 + $0x440] ss:$8 sps:$4 sm:$0xff]  }
 0x3b1   : > { %1956 = vmatprep.subr.bf16.mxu1 %v3397_v28  ;;  %1749 = vmatpush1.bf16.msra.mxu0 %v3404_v29  ;;  %v3466_v28 = vld [vmem:[%s4446_s6 + $0x3e4] ss:$8 sps:$4 sm:$0xff]   ;;  %v3469_v29 = vld [vmem:[%s4446_s6 + $0x454] ss:$8 sps:$4 sm:$0xff]  }
 0x3b2   : > { %1750 = vmatprep.subr.bf16.mxu0 %v3412_v37  ;;  %v3473_v37 = vld [vmem:[%s4446_s6 + $0x460] ss:$8 sps:$4 sm:$0xff]  }
 0x3b4   : > { %1957 = vmatpush1.bf16.msra.mxu1 %v3395_v30  ;;  %v3464_v30 = vld [vmem:[%s4446_s6 + $0x3e0] ss:$8 sps:$4 sm:$0xff]  }
 0x3b5   : > { %1958 = vmatprep.subr.bf16.mxu1 %v3403_v31  ;;  %1751 = vmatpush1.bf16.msra.mxu0 %v3410_v39  ;;  %v3467_v31 = vld [vmem:[%s4446_s6 + $0x450] ss:$8 sps:$4 sm:$0xff]  }
 0x3b6   : > { %1752 = vmatprep.subr.bf16.mxu0 %v3418_v41  ;;  %v3476_v39 = vld [vmem:[%s4446_s6 + $0x470] ss:$8 sps:$4 sm:$0xff]  }
 0x3b8   : > { %1959 = vmatpush1.bf16.msra.mxu1 %v3401_v32  ;;  %v3472_v32 = vld [vmem:[%s4446_s6 + $0x3f4] ss:$8 sps:$4 sm:$0xff]  }
 0x3b9   : > { %1960 = vmatprep.subr.bf16.mxu1 %v3409_v33  ;;  %1753 = vmatpush1.bf16.msra.mxu0 %v3416_v44  ;;  %v3475_v33 = vld [vmem:[%s4446_s6 + $0x464] ss:$8 sps:$4 sm:$0xff]  }
 0x3ba   : > { %1754 = vmatprep.subr.bf16.mxu0 %v3424_v46 }
 0x3bc   : > { %1961 = vmatpush1.bf16.msra.mxu1 %v3407_v36  ;;  %v3470_v36 = vld [vmem:[%s4446_s6 + $0x3f0] ss:$8 sps:$4 sm:$0xff]  }
 0x3bd   : > { %1962 = vmatprep.subr.bf16.mxu1 %v3415_v38  ;;  %1755 = vmatpush1.bf16.msra.mxu0 %v3422_v47  ;;  %v3478_v38 = vld [vmem:[%s4446_s6 + $0x474] ss:$8 sps:$4 sm:$0xff]  }
 0x3be   : > { %3190 = vmatprep.subr.mxu0 %v3591_v34 }
 0x3c0   : > { %1963 = vmatpush1.bf16.msra.mxu1 %v3413_v40  ;;  %v3479_v40 = vld [vmem:[%s4448_s8 + $0x40] sm:$0xff]  }
 0x3c1   : > { %1964 = vmatprep.subr.bf16.mxu1 %v3421_v42 }
 0x3c4   : > { %1965 = vmatpush1.bf16.msra.mxu1 %v3419_v45 }
 0x3c5   : > { %1966 = vmatprep.subr.bf16.mxu1 %v3427_v49 }
 0x3c8   : > { %1967 = vmatpush1.bf16.msra.mxu1 %v3425_v48 }
 0x3c9   : > { %1968 = vmatprep.subr.bf16.mxu1 %v3430_v51 }
 0x3cc   : > { %1969 = vmatpush1.bf16.msra.mxu1 %v3428_v50 }
 0x3cd   : > { %3195 = vmatprep.subr.mxu1 %v3591_v34 }
 0x472   : > { %v1346_v52 = vpop.f32.mrb[8].mxu0 }
 0x473   : > { %v1353_v53 = vadd.f32 %v1346_v52, %v4055_v5  ;;  %v1348_v54 = vpop.f32.mrb[9].mxu0 }
 0x474   : > { %v1354_v55 = vadd.f32 %v1348_v54, %v4058_v7  ;;  %v1350_v56 = vpop.f32.mrb[10].mxu0  ;;  %v3439_v7 = vld [vmem:[%s4446_s6 + $0x404] ss:$8 sps:$4 sm:$0xff]  }
 0x475   : > { %v1351_v57 = vpop.f32.mrb[11].mxu0 }
 0x476   : > { %v1560_v58 = vpop.f32.mrb[16].mxu1 }
 0x477   : > { %v4176_v59 = vadd.f32 %v1560_v58, %v1353_v53  ;;  %v1562_v60 = vpop.f32.mrb[17].mxu1  ;;  %v3481_v58 = vld [vmem:[%s4448_s8 + $0x48] sm:$0xff]  }
 0x478   : > { %v4178_v61 = vadd.f32 %v1562_v60, %v1354_v55  ;;  %v1564_v62 = vpop.f32.mrb[18].mxu1  ;;  %v3480_v55 = vld [vmem:[%s4448_s8] sm:$0xff]   ;;  %v3482_v60 = vld [vmem:[%s4448_s8 + $0x8] sm:$0xff]  }
 0x479   : > { %v1565_v63 = vpop.f32.mrb[19].mxu1 }
 0x47a   : > { %v3483_v63 = vld [vmem:[%s4448_s8 + $0x50] sm:$0xff]  }
 0x47e   : > { %v1638_v0 = vpop.f32.mrb[20].mxu1 }
 0x47f   : > { %v1642_v1 = vpack.c.bf16 %v1638_v0, %v1638_v0  ;;  %v3184_v2 = vpop.f32.mrb[21].mxu1  ;;  %v3484_v0 = vld [vmem:[%s4448_s8 + $0x10] sm:$0xff]  }
 0x480   : > { %v3486_v2 = vld [vmem:[%s4448_s8 + $0x18] sm:$0xff]  }
 0x481   : > { %1773 = vmatmul.mubr.bf16.vlgmr.msra.gmra.mrb[12].mxu0 %v1642_v1  ;;  %v3485_v1 = vld [vmem:[%s4448_s8 + $0x58] sm:$0xff]  }
 0x482   : > { %3191 = vmatpush3.msk.msra.mxu0 %vm594_vm1, %v3810_v43  ;;  %v1852_v4 = vpop.f32.mrb[22].mxu1  ;;  %3192 = vmatprep.mubr.msk.f32.mxu0 %vm3592_vm0, %v3591_v34 }
 0x483   : > { %v1856_v5 = vpack.c.bf16 %v1852_v4, %v1852_v4  ;;  %v3189_v6 = vpop.f32.mrb[23].mxu1  ;;  %2168 = vmatprep.subr.bf16.mxu0 %v3433_v3  ;;  %v3487_v3 = vld [vmem:[%s4448_s8 + $0x60] sm:$0xff]  }
 0x484   : > { %v3488_v4 = vld [vmem:[%s4448_s8 + $0x20] sm:$0xff]   ;;  %v3490_v6 = vld [vmem:[%s4448_s8 + $0x28] sm:$0xff]  }
 0x485   : > { %1987 = vmatmul.mubr.bf16.vlgmr.msra.gmra.mrb[24].mxu1 %v1856_v5  ;;  %v3489_v5 = vld [vmem:[%s4448_s8 + $0x68] sm:$0xff]  }
 0x486   : > { %3196 = vmatpush3.msk.msra.mxu1 %vm594_vm1, %v3810_v43  ;;  %3197 = vmatprep.mubr.msk.f32.mxu1 %vm3592_vm0, %v3591_v34  ;;  %v3434_v34 = vld [vmem:[%s4446_s6 + $0x390] ss:$8 sps:$4 sm:$0xff]  }
 0x487   : > { %2382 = vmatprep.subr.bf16.mxu1 %v3439_v7  ;;  %v3491_v7 = vld [vmem:[%s4448_s8 + $0x70] sm:$0xff]  }
 0x489   : > { %3193 = vmatmul.mubr.msk.f32.vlgmr.msra.gmra.mrb[16].mxu0 %vm590_vm2, %v2785_v8  ;;  %v3492_v8 = vld [vmem:[%s4448_s8 + $0x30] sm:$0xff]  }
 0x48a   : > { %2169 = vmatpush1.bf16.msra.mxu0 %v3431_v9  ;;  %2200 = vmatprep.mubr.bf16.mxu0 %v3593_v35  ;;  %v3493_v9 = vld [vmem:[%s4448_s8 + $0x78] sm:$0xff]  }
 0x48b   : > { %2170 = vmatprep.subr.bf16.mxu0 %v3436_v10  ;;  %v3494_v10 = vld [vmem:[%s4448_s8 + $0x38] sm:$0xff]  }
 0x48d   : > { %3198 = vmatmul.mubr.msk.f32.vlgmr.msra.gmra.mrb[28].mxu1 %vm590_vm2, %v2786_v11  ;;  %v2427_v11 = vlaneseq }
 0x48e   : > { %2171 = vmatpush1.bf16.msra.mxu0 %v3434_v34  ;;  %2383 = vmatpush1.bf16.msra.mxu1 %v3437_v12 }
 0x48f   : > { %2172 = vmatprep.subr.bf16.mxu0 %v3442_v13  ;;  %2384 = vmatprep.subr.bf16.mxu1 %v3445_v14  ;;  %v2428_v34 = vshrl.u32 %v2427_v11, 7  ;;  %v2425_v14 = vld [vmem:[%s4447_s7] sm:$0x3] }
 0x490   : > { %2414 = vmatprep.mubr.bf16.mxu1 %v3593_v35  ;;  %v3457_v35 = vld [vmem:[%s4446_s6 + $0x434] ss:$8 sps:$4 sm:$0xff]  }
 0x491   : > { %v2429_v12 = vsub.s32 0, %v2428_v34 }
 0x492   : > { %2173 = vmatpush1.bf16.msra.mxu0 %v3440_v15  ;;  %2385 = vmatpush1.bf16.msra.mxu1 %v3443_v16  ;;  %v2433_v15 = vsub.s32 1, %v2428_v34 }
 0x493   : > { %2174 = vmatprep.subr.bf16.mxu0 %v3448_v17  ;;  %2386 = vmatprep.subr.bf16.mxu1 %v3451_v18 }
 0x496   : > { %2175 = vmatpush1.bf16.msra.mxu0 %v3446_v19  ;;  %2387 = vmatpush1.bf16.msra.mxu1 %v3449_v20 }
 0x497   : > { %2176 = vmatprep.subr.bf16.mxu0 %v3454_v21  ;;  %2388 = vmatprep.subr.bf16.mxu1 %v3457_v35  ;;  %v2430_v21 = vrot.slane %v2425_v14, %v2429_v12 }
 0x49a   : > { %2177 = vmatpush1.bf16.msra.mxu0 %v3452_v22  ;;  %2389 = vmatpush1.bf16.msra.mxu1 %v3455_v23  ;;  %v2434_v22 = vrot.slane %v2425_v14, %v2433_v15 }
 0x49b   : > { %2178 = vmatprep.subr.bf16.mxu0 %v3460_v24  ;;  %2390 = vmatprep.subr.bf16.mxu1 %v3463_v25 }
 0x49e   : > { %2179 = vmatpush1.bf16.msra.mxu0 %v3458_v26  ;;  %2391 = vmatpush1.bf16.msra.mxu1 %v3461_v27 }
 0x49f   : > { %2180 = vmatprep.subr.bf16.mxu0 %v3466_v28  ;;  %2392 = vmatprep.subr.bf16.mxu1 %v3469_v29 }
 0x4a2   : > { %2181 = vmatpush1.bf16.msra.mxu0 %v3464_v30  ;;  %2393 = vmatpush1.bf16.msra.mxu1 %v3467_v31 }
 0x4a3   : > { %2182 = vmatprep.subr.bf16.mxu0 %v3472_v32  ;;  %2394 = vmatprep.subr.bf16.mxu1 %v3475_v33 }
 0x4a6   : > { %2183 = vmatpush1.bf16.msra.mxu0 %v3470_v36  ;;  %2395 = vmatpush1.bf16.msra.mxu1 %v3473_v37 }
 0x4a7   : > { %2396 = vmatprep.subr.bf16.mxu1 %v3478_v38  ;;  %3138 = vmatprep.subr.bf16.mxu0 %v3479_v40  ;;  %v3091_v40 = vld [vmem:[%s4444_s4] ss:$0 sm:$0xff] }
 0x4aa   : > { %2397 = vmatpush1.bf16.msra.mxu1 %v3476_v39 }
 0x554   : > { %v1774_v41 = vpop.f32.mrb[12].mxu0 }
 0x555   : > { %v1781_v42 = vadd.f32 %v1774_v41, %v4176_v59  ;;  %v1776_v44 = vpop.f32.mrb[13].mxu0 }
 0x556   : > { %v1782_v45 = vadd.f32 %v1776_v44, %v4178_v61  ;;  %v1778_v46 = vpop.f32.mrb[14].mxu0  ;;  %v3092_v44 = vld [vmem:[%s4445_s5] ss:$0 sm:$0xff] }
 0x557   : > { %v1779_v47 = vpop.f32.mrb[15].mxu0 }
 0x558   : > { %v1988_v48 = vpop.f32.mrb[24].mxu1 }
 0x559   : > { %v1995_v49 = vadd.f32 %v1988_v48, %v1781_v42  ;;  %v1990_v50 = vpop.f32.mrb[25].mxu1 }
 0x55a   : > { %v1996_v51 = vadd.f32 %v1990_v50, %v1782_v45  ;;  %v1992_v52 = vpop.f32.mrb[26].mxu1 }
 0x55b   : > { %v1993_v53 = vpop.f32.mrb[27].mxu1 }
 0x55c   : > { %v2066_v54 = vpop.f32.mrb[16].mxu0 }
 0x55d   : > { %v2070_v56 = vpack.c.bf16 %v2066_v54, %v2066_v54  ;;  %v3194_v57 = vpop.f32.mrb[17].mxu0 }
 0x55f   : > { %2201 = vmatmul.mubr.bf16.vlgmr.msra.gmra.mrb[20].mxu0 %v2070_v56 }
 0x560   : > { %v2280_v59 = vpop.f32.mrb[28].mxu1  ;;  %3139 = vmatpush3.bf16.msra.mxu0 %v3480_v55 }
 0x561   : > { %v2284_v61 = vpack.c.bf16 %v2280_v59, %v2280_v59  ;;  %v3199_v62 = vpop.f32.mrb[29].mxu1  ;;  %3140 = vmatprep.subr.bf16.mxu0 %v3481_v58 }
 0x563   : > { %2415 = vmatmul.mubr.bf16.vlgmr.msra.gmra.mrb[32].mxu1 %v2284_v61 }
 0x564   : > { %3141 = vmatpush3.bf16.msra.mxu0 %v3482_v60 }
 0x565   : > { %3142 = vmatprep.subr.bf16.mxu0 %v3483_v63 }
 0x568   : > { %3143 = vmatpush3.bf16.msra.mxu0 %v3484_v0 }
 0x569   : > { %3144 = vmatprep.subr.bf16.mxu0 %v3485_v1 }
 0x56c   : > { %3145 = vmatpush3.bf16.msra.mxu0 %v3486_v2 }
 0x56d   : > { %3146 = vmatprep.subr.bf16.mxu0 %v3487_v3 }
 0x570   : > { %3147 = vmatpush3.bf16.msra.mxu0 %v3488_v4 }
 0x571   : > { %3148 = vmatprep.subr.bf16.mxu0 %v3489_v5 }
 0x574   : > { %3149 = vmatpush3.bf16.msra.mxu0 %v3490_v6 }
 0x575   : > { %3150 = vmatprep.subr.bf16.mxu0 %v3491_v7 }
 0x578   : > { %3151 = vmatpush3.bf16.msra.mxu0 %v3492_v8 }
 0x579   : > { %3152 = vmatprep.subr.bf16.mxu0 %v3493_v9 }
 0x57c   : > { %3153 = vmatpush3.bf16.msra.mxu0 %v3494_v10 }
 0x632   : > { %v2202_v13 = vpop.f32.mrb[20].mxu0 }
 0x633   : > { %v2209_v16 = vadd.f32 %v2202_v13, %v1995_v49  ;;  %v2204_v17 = vpop.f32.mrb[21].mxu0 }
 0x634   : > { %v2210_v18 = vadd.f32 %v2204_v17, %v1996_v51  ;;  %v2206_v19 = vpop.f32.mrb[22].mxu0 }
 0x635   : > { %v2207_v20 = vpop.f32.mrb[23].mxu0 }
 0x636   : > { %v2416_v35 = vpop.f32.mrb[32].mxu1 }
 0x637   : > { %v2423_v23 = vadd.f32 %v2416_v35, %v2209_v16  ;;  %v2418_v24 = vpop.f32.mrb[33].mxu1 }
 0x638   : > { %v2424_v25 = vadd.f32 %v2418_v24, %v2210_v18  ;;  %v2420_v26 = vpop.f32.mrb[34].mxu1 }
 0x639   : > { %v2437_v27 = vadd.f32 %v2430_v21, %v2423_v23  ;;  %v2421_v28 = vpop.f32.mrb[35].mxu1 }
 0x63a   : > { %v2438_v29 = vadd.f32 %v2434_v22, %v2424_v25 }
 0x63b   : > { %v2439_v30 = vmax.f32 %v2437_v27, 0.0 }
 0x63c   : > { %v2440_v31 = vmax.f32 %v2438_v29, 0.0 }
 0x63d   : > { %v2441_v33 = vpack.c.bf16 %v2439_v30, %v2439_v30 }
 0x63e   : > { %v2442_v32 = vpack.c.bf16 %v2440_v31, %v2440_v31 }
 0x640   : > { %2603 = vmatprep.mubr.bf16.mxu0 %v2442_v32 }
 0x641   : > { %2604 = vmatmul.mubr.bf16.vlgmr.msra.gmra.mrb[24].mxu0 %v2441_v33 }
 0x714   : > { %v3154_v36 = vpop.f32.mrb[24].mxu0 }
 0x715   : > { %v3155_v37 = vpop.f32.mrb[25].mxu0 }
 0x716   : > { %v3156_v38 = vadd.f32 %v3155_v37, %v3154_v36  ;;  %v3157_v39 = vpop.f32.mrb[26].mxu0 }
 0x717   : > { %v3158_v41 = vpop.f32.mrb[27].mxu0 }
 0x718   : > { %v2611_v42 = vadd.f32 %v3156_v38, %v3810_v43 }
 0x71a   : > { %v2612_v45 = vpack.c.bf16 %v2611_v42, %v2611_v42  ;;  %v2621_v46 = vmul.f32 %v3091_v40, %v2611_v42 }
 0x71c   : > { %2613 = vst [vmem:[%s356_s11] sm:$0x3] %v2612_v45  ;;  %v2629_v43 = vadd.f32 %v3092_v44, %v2621_v46 }
 0x71d   : > { %3508 = shalt.err (!%p3505_p3)
}
 0x71e   : > { %s3509_s11 = scalar_lea.hbm %s4367_s0, 32  ;;  %s3513_s17 = scalar_lea.hbm %s4449_s9, 64 }
 0x71f   : > { %p3510_p4 = scmp.ne.s32.totalorder %s4367_s0, %s3509_s11  ;;  %p3514_p9 = scmp.lt.u32.totalorder %s4367_s0, %s4449_s9 }
 0x720   : > { %p3515_p10 = scmp.lt.u32.totalorder %s3513_s17, %s3509_s11  ;;  %p3517_p12 = scmp.lt.u32.totalorder %s3509_s11, %s4367_s0 }
 0x721   : > { %p3511_p7 = pnand %p3510_p4, %p3689_p5 }
 0x722   : > { %p3516_p11 = por %p3515_p10, %p3514_p9 }
 0x723   : > { %p3512_p8 = pneg %p3511_p7 }
 0x724   : > { %p3518_p13 = por %p3517_p12, %p3516_p11 }
 0x726   : > { %p3519_p0 = pnand %p3518_p13, %p3512_p8 }
 0x728   : > { %3522 = shalt.err (!%p3519_p0)
}
 0x729   : > { %3200 = dma.vmem_to_hbm [thread:$0]  (%p3689_p5), %s4369_s12, 32, %s4367_s0, %s2632_s18   ;;  %2630 = vst [vmem:[%s4361_s26] sm:$0xf] %v2629_v43 }
 0x72a   : > { %s2637_s20 = scalar_lea.sflag [#allocation5], %s4348_s27  ;;  %s3523_s29 = scalar_lea.vmem %s4376_s21, 64 }
 0x72b   : > { %p3524_p1 = scmp.ne.s32.totalorder %s4376_s21, %s3523_s29  ;;  %s3595_s11 = smov [#allocation4]  }
 0x72c   : > { %s3527_s25 = sshll.u32 %s3595_s11, 4  ;;  %s3528_s25 = int_to_ptr.vmem [resolvable:$false] %s3527_s25 }
 0x72d   : > { %p3525_p2 = pnand %p3524_p1, %p3689_p5  ;;  %s3529_s28 = scalar_lea.vmem %s3528_s25, 128 }
 0x72e   : > { %p3530_p4 = scmp.lt.s32.totalorder %s4376_s21, %s3528_s25  ;;  %p3531_p7 = scmp.lt.s32.totalorder %s3529_s28, %s3523_s29 }
 0x72f   : > { %p3526_p3 = pneg %p3525_p2 }
 0x730   : > { %p3532_p8 = por %p3531_p7, %p3530_p4 }
 0x732   : > { %p3533_p9 = pnand %p3532_p8, %p3526_p3 }
 0x734   : > { %3536 = shalt.err (!%p3533_p9)
}
 0x735   : > { %s3537_s0 = scalar_lea.hbm %s4374_s30, 64  ;;  %s3541_s26 = scalar_lea.hbm %s4450_s10, 128 }
 0x736   : > { %p3538_p10 = scmp.ne.s32.totalorder %s4374_s30, %s3537_s0  ;;  %p3542_p13 = scmp.lt.u32.totalorder %s4374_s30, %s4450_s10 }
 0x737   : > { %p3543_p0 = scmp.lt.u32.totalorder %s3541_s26, %s3537_s0  ;;  %p3545_p2 = scmp.lt.u32.totalorder %s3537_s0, %s4374_s30 }
 0x738   : > { %p3539_p11 = pnand %p3538_p10, %p3689_p5 }
 0x739   : > { %p3544_p1 = por %p3543_p0, %p3542_p13 }
 0x73a   : > { %p3540_p12 = pneg %p3539_p11 }
 0x73b   : > { %p3546_p3 = por %p3545_p2, %p3544_p1 }
 0x73d   : > { %p3547_p4 = pnand %p3546_p3, %p3540_p12 }
 0x73f   : > { %3550 = shalt.err (!%p3547_p4)
}
 0x740   : > { %3201 = dma.vmem_to_hbm [thread:$0]  (%p3689_p5), %s4376_s21, 64, %s4374_s30, %s2637_s20  }
 0x741 PF: > { %p3211_p7 = scmp.ge.s32.totalorder %s3589_s16, 2  ;;  %s2675_s15 = sand.u32 1, %s3577_s13  }
 0x742   : > { %s2676_s22 = scalar_lea.sflag [#allocation3], %s2675_s15 }
 0x743   : > { %p3205_p8 = pnand %p3211_p7, %p3693_p6 }
 0x745   : > { %3568 = dma.done.wait (!%p3205_p8), %s2676_s22, 32  }
 0x746   : > { %3570 = vsyncadd (!%p3205_p8), %s2676_s22, 4294967264  ;;  %s2685_s29 = scalar_lea.sflag [#allocation5], %s2675_s15 }
 0x747   : > { %3572 = dma.done.wait (!%p3205_p8), %s2685_s29, 64  }
 0x748   : > { %3574 = vsyncadd (!%p3205_p8), %s2685_s29, 4294967232  ;;  %s4458_s23 = sld [smem:[#allocation8_spill]]  ;;  %s4459_s15 = sld [smem:[#allocation9_spill]] }
 0x749   : > { %p24_p5 = scmp.ge.s32.totalorder %s3676_s19, 4   ;;  %s4460_s13 = smov %s3581_s14 }
 0x74a   : > { %s4462_s16 = smov %s3676_s19 }
 0x74b   :  { %26 = sbr.rel (!%p24_p5) target bundleno = 7 (0x7), region = 123 }
 0x74e   : > { %s4461_s14 = smov %s4458_s23 }
 0x752   :  { %2690 = vsyncpa [#allocation3], 1 }
 0x753   :  { %2692 = vsyncpa [#allocation3 + $0x1], 1 }
 0x754   :  { %2693 = vsyncpa [#allocation5], 1 }
 0x755   :  { %2695 = vsyncpa [#allocation5 + $0x1], 1 }

</bundles_post_ra>
